<compile_context>
chip_gen: v7x
topology: tpu7x:2x2x1
jax: 0.10.0
libtpu: 0.0.40
codegen_flags: <defaults>
</compile_context>

<pallas_src>
import functools

import numpy as np
import jax
import jax.numpy as jnp
from jax import lax
from jax.experimental import pallas as pl
from jax.experimental.pallas import tpu as pltpu


PADM = 2  # max replication pad in the block (the two 5x5 layers)
# (kernel_size, relu) for the six conv layers of _ConvBlock3 (dropout=False).
_LAYERS = ((5, True), (3, True), (3, True), (3, True), (3, False), (5, False))


def _round_up(x, m):
    return (x + m - 1) // m * m


def _ring_categories(hc, wc):
    """Per-lane code for the width-2 replication ring of the (hc, wc) canvas.

    0 = interior (valid conv output), 1..4 = left/right column fills (valid
    rows only), 5..8 = top/bottom row fills (whole rows). Row categories take
    precedence; they are applied after the column fills inside the kernel.
    """
    canvas = hc * wc
    flat = np.arange(canvas)
    row = flat // wc
    col = flat % wc
    cat = np.zeros(canvas, np.int32)
    inner = (row >= PADM) & (row < hc - PADM)
    cat[inner & (col == 0)] = 1
    cat[inner & (col == 1)] = 2
    cat[inner & (col == wc - 2)] = 3
    cat[inner & (col == wc - 1)] = 4
    cat[row == 0] = 5
    cat[row == 1] = 6
    cat[row == hc - 2] = 7
    cat[row == hc - 1] = 8
    return cat.reshape(1, canvas)


def _convblock3_kernel(x_ref, cat_ref,
                       w1, b1, w2, b2, w3, b3, w4, b4, w5, b5, w6, b6,
                       o_ref, *, wc, canvas, margin, out_c):
    """Fused forward of all six conv layers for one batch element.

    x_ref : (1, Cin_p, extw) f32  edge-padded canvas (flattened, zero margins)
    cat_ref: (1, canvas) int32    ring-fill category per canvas lane
    w*    : (Cout_p, K*K*Cin_p)   im2col-flattened weights (zero padded)
    b*    : (Cout_p, 1)           biases (zero padded)
    o_ref : (1, out_c, canvas)    final layer output in canvas layout
    """
    cat = cat_ref[...]  # (1, canvas) int32

    # (category, roll shift): value at lane i is replaced by value at i - shift.
    fill = ((1, -2), (2, -1), (3, 1), (4, 2),
            (5, -2 * wc), (6, -wc), (7, wc), (8, 2 * wc))

    def ring_fill(a):
        # Edge-replicate the width-2 ring from the valid center (ReplicationPad2d).
        for k, shift in fill:
            a = jnp.where(cat == k, jnp.roll(a, shift, axis=1), a)
        return a

    def extend(a):
        # Add zero margins so every conv tap is a uniform static lane slice.
        z = jnp.zeros((a.shape[0], margin), a.dtype)
        return jnp.concatenate([z, a, z], axis=1)

    def conv_layer(ext, w_ref, b_ref, ksize, relu):
        # ext: (Cin_p, extw); edge-padded canvas lives at [:, margin:margin+canvas].
        p = (ksize - 1) // 2
        taps = []
        for kh in range(ksize):
            for kw in range(ksize):
                d = (kh - p) * wc + (kw - p)
                taps.append(ext[:, margin + d: margin + d + canvas])
        pmat = jnp.concatenate(taps, axis=0)            # (K*K*Cin_p, canvas)
        acc = jnp.dot(w_ref[...], pmat,
                      preferred_element_type=jnp.float32)  # (Cout_p, canvas)
        acc = acc + b_ref[...]                           # (Cout_p, 1) broadcast
        if relu:
            acc = jnp.maximum(acc, 0.0)
        return acc

    wb = ((w1, b1), (w2, b2), (w3, b3), (w4, b4), (w5, b5), (w6, b6))
    a = x_ref[0]                                         # (Cin_p, extw)
    acc = None
    n_layers = len(_LAYERS)
    for li, (ksize, relu) in enumerate(_LAYERS):
        acc = conv_layer(a, wb[li][0], wb[li][1], ksize, relu)
        if li + 1 < n_layers:
            a = extend(ring_fill(acc))                   # stays in VMEM/vregs
    o_ref[...] = acc[:out_c][None].astype(o_ref.dtype)


def conv_params_to_flat(params):
    """HWIO weights -> (Cout_p, K*K*Cin_p) with (kh, kw, ci)-major columns."""
    flat = []
    for (wh, b, _pad, _relu) in params:
        kh, kw, ci, co = wh.shape
        cip, cop = _round_up(ci, 8), _round_up(co, 8)
        wp = jnp.zeros((kh, kw, cip, cop), wh.dtype).at[:, :, :ci, :co].set(wh)
        wf = jnp.transpose(wp, (3, 0, 1, 2)).reshape(cop, kh * kw * cip)
        bf = jnp.zeros((cop, 1), b.dtype).at[:co, 0].set(b)
        flat.append((wf, bf))
    return flat


def convblock3_forward_nchw(x_nchw, params):
    """Forward pass matching the PyTorch module (NCHW in, NCHW out)."""
    assert len(params) == len(_LAYERS)
    n, in_c, h, w = x_nchw.shape
    hc, wc = h + 2 * PADM, w + 2 * PADM
    canvas = hc * wc
    margin = PADM * (wc + 1)          # >= max tap offset, so slices stay in-bounds
    extw = canvas + 2 * margin

    in_cp = _round_up(in_c, 8)
    out_c = params[-1][0].shape[-1]

    # One-time input prep (tiny): zero-pad channels to a multiple of 8,
    # edge-replicate pad the spatial dims by PADM, flatten spatial into the
    # lane-dense canvas, and add zero margins.
    xcp = jnp.pad(x_nchw, ((0, 0), (0, in_cp - in_c), (0, 0), (0, 0)))
    xep = jnp.pad(xcp, ((0, 0), (0, 0), (PADM, PADM), (PADM, PADM)), mode="edge")
    xe = jnp.pad(xep.reshape(n, in_cp, canvas), ((0, 0), (0, 0), (margin, margin)))

    cat = jnp.asarray(_ring_categories(hc, wc))
    flat_wb = conv_params_to_flat(params)

    operands = [xe, cat]
    in_specs = [
        pl.BlockSpec((1, in_cp, extw), lambda i: (i, 0, 0)),
        pl.BlockSpec((1, canvas), lambda i: (0, 0)),
    ]
    for wf, bf in flat_wb:
        operands += [wf, bf]
        in_specs += [pl.BlockSpec(wf.shape, lambda i: (0, 0)),
                     pl.BlockSpec(bf.shape, lambda i: (0, 0))]

    kernel = functools.partial(_convblock3_kernel, wc=wc, canvas=canvas,
                               margin=margin, out_c=out_c)

    out_canvas = pl.pallas_call(
        kernel,
        out_shape=jax.ShapeDtypeStruct((n, out_c, canvas), x_nchw.dtype),
        grid_spec=pltpu.PrefetchScalarGridSpec(
            num_scalar_prefetch=0,
            grid=(n,),
            in_specs=in_specs,
            out_specs=pl.BlockSpec((1, out_c, canvas), lambda i: (i, 0, 0)),
        ),
        compiler_params=pltpu.CompilerParams(
            dimension_semantics=("parallel",)),
    )(*operands)

    # Extract the valid 16x16 center of the canvas; already NCHW.
    out = out_canvas.reshape(n, out_c, hc, wc)[:, :, PADM:PADM + h, PADM:PADM + w]
    return out


# ----------------------------- parameter init -----------------------------
def init_conv_params(key, kh, kw, cin, cout, dtype=jnp.float32):
    """Deterministic init mimicking PyTorch Conv2d default (uniform, fan_in)."""
    kw_key, kb_key = jax.random.split(key)
    fan_in = cin * kh * kw
    bound = 1.0 / jnp.sqrt(float(fan_in))
    w = jax.random.uniform(kw_key, (kh, kw, cin, cout), dtype,
                           minval=-bound, maxval=bound)
    b = jax.random.uniform(kb_key, (cout,), dtype, minval=-bound, maxval=bound)
    return w, b


def make_convblock3_params(key, in_c, mid1, mid2, mid3, out_c):
    """Layer configs of _ConvBlock3 (dropout=False): (w, b, pad, relu)."""
    cfg = [
        (5, 2, in_c, mid1, True),
        (3, 1, mid1, mid2, True),
        (3, 1, mid2, mid3, True),
        (3, 1, mid3, mid2, True),
        (3, 1, mid2, mid1, False),
        (5, 2, mid1, out_c, False),
    ]
    params = []
    keys = jax.random.split(key, len(cfg))
    for k, (ksize, pad, cin, cout, relu) in zip(keys, cfg):
        w, b = init_conv_params(k, ksize, ksize, cin, cout)
        params.append((w, b, pad, relu))
    return params


# ----------------------- pure-JAX reference for checking -----------------------
def _ref_forward_nchw(x_nchw, params):
    y = jnp.transpose(x_nchw, (0, 2, 3, 1))
    for (w, b, pad, relu) in params:
        yp = jnp.pad(y, ((0, 0), (pad, pad), (pad, pad), (0, 0)), mode="edge")
        y = lax.conv_general_dilated(
            yp, w, window_strides=(1, 1), padding="VALID",
            dimension_numbers=("NHWC", "HWIO", "NHWC"))
        y = y + b
        if relu:
            y = jnp.maximum(y, 0.0)
    return jnp.transpose(y, (0, 3, 1, 2))


if __name__ == "__main__":
    # Small shapes consistent with the module: batch=2, in_channels=4,
    # mid1=8, mid2=16, mid3=32, out_channels=4, spatial 16x16 (NCHW).
    key = jax.random.PRNGKey(0)
    k_x, k_p = jax.random.split(key)

    in_c, mid1, mid2, mid3, out_c = 4, 8, 16, 32, 4
    x = jax.random.normal(k_x, (2, in_c, 16, 16), jnp.float32)

    params = make_convblock3_params(k_p, in_c, mid1, mid2, mid3, out_c)

    out = jax.block_until_ready(convblock3_forward_nchw(x, params))
    ref = jax.block_until_ready(_ref_forward_nchw(x, params))

    assert out.shape == (2, out_c, 16, 16)
    assert jnp.allclose(out, ref, rtol=1e-4, atol=1e-4), (
        float(jnp.max(jnp.abs(out - ref))))

    print("KERNEL_OK")
</pallas_src>

<mosaic_0001>
module attributes {stable_mosaic.version = 11 : i64} {
  func.func @_convblock3_kernel(%arg0: i32, %arg1: memref<1x8x484xf32, #tpu.memory_space<vmem>>, %arg2: memref<1x400xi32, #tpu.memory_space<vmem>>, %arg3: memref<8x200xf32, #tpu.memory_space<vmem>>, %arg4: memref<8x1xf32, #tpu.memory_space<vmem>>, %arg5: memref<16x72xf32, #tpu.memory_space<vmem>>, %arg6: memref<16x1xf32, #tpu.memory_space<vmem>>, %arg7: memref<32x144xf32, #tpu.memory_space<vmem>>, %arg8: memref<32x1xf32, #tpu.memory_space<vmem>>, %arg9: memref<16x288xf32, #tpu.memory_space<vmem>>, %arg10: memref<16x1xf32, #tpu.memory_space<vmem>>, %arg11: memref<8x144xf32, #tpu.memory_space<vmem>>, %arg12: memref<8x1xf32, #tpu.memory_space<vmem>>, %arg13: memref<8x200xf32, #tpu.memory_space<vmem>>, %arg14: memref<8x1xf32, #tpu.memory_space<vmem>>, %arg15: memref<1x4x400xf32, #tpu.memory_space<vmem>>) attributes {dimension_semantics = [#tpu.dimension_semantics<parallel>], iteration_bounds = array<i64: 2>, scalar_prefetch = 0 : i64, scratch_operands = 0 : i64, tpu.core_type = #tpu.core_type<tc>, window_params = [{transform_indices = @transform_0, window_bounds = array<i64: 1, 8, 484>}, {pipeline_mode = #tpu.pipeline_mode<synchronous>, transform_indices = @transform_1, window_bounds = array<i64: 1, 400>}, {pipeline_mode = #tpu.pipeline_mode<synchronous>, transform_indices = @transform_2, window_bounds = array<i64: 8, 200>}, {pipeline_mode = #tpu.pipeline_mode<synchronous>, transform_indices = @transform_3, window_bounds = array<i64: 8, 1>}, {pipeline_mode = #tpu.pipeline_mode<synchronous>, transform_indices = @transform_4, window_bounds = array<i64: 16, 72>}, {pipeline_mode = #tpu.pipeline_mode<synchronous>, transform_indices = @transform_5, window_bounds = array<i64: 16, 1>}, {pipeline_mode = #tpu.pipeline_mode<synchronous>, transform_indices = @transform_6, window_bounds = array<i64: 32, 144>}, {pipeline_mode = #tpu.pipeline_mode<synchronous>, transform_indices = @transform_7, window_bounds = array<i64: 32, 1>}, {pipeline_mode = #tpu.pipeline_mode<synchronous>, transform_indices = @transform_8, window_bounds = array<i64: 16, 288>}, {pipeline_mode = #tpu.pipeline_mode<synchronous>, transform_indices = @transform_9, window_bounds = array<i64: 16, 1>}, {pipeline_mode = #tpu.pipeline_mode<synchronous>, transform_indices = @transform_10, window_bounds = array<i64: 8, 144>}, {pipeline_mode = #tpu.pipeline_mode<synchronous>, transform_indices = @transform_11, window_bounds = array<i64: 8, 1>}, {pipeline_mode = #tpu.pipeline_mode<synchronous>, transform_indices = @transform_12, window_bounds = array<i64: 8, 200>}, {pipeline_mode = #tpu.pipeline_mode<synchronous>, transform_indices = @transform_13, window_bounds = array<i64: 8, 1>}, {transform_indices = @transform_14, window_bounds = array<i64: 1, 4, 400>}]} {
    %c0 = arith.constant 0 : index
    %c0_0 = arith.constant 0 : index
    %0 = vector.load %arg2[%c0, %c0_0] : memref<1x400xi32, #tpu.memory_space<vmem>>, vector<1x400xi32>
    %c0_1 = arith.constant 0 : index
    %c0_2 = arith.constant 0 : index
    %c0_3 = arith.constant 0 : index
    %1 = vector.load %arg1[%c0_1, %c0_2, %c0_3] : memref<1x8x484xf32, #tpu.memory_space<vmem>>, vector<1x8x484xf32>
    %2 = vector.shape_cast %1 : vector<1x8x484xf32> to vector<8x484xf32>
    %3 = vector.extract_strided_slice %2 {offsets = [0, 0], sizes = [8, 400], strides = [1, 1]} : vector<8x484xf32> to vector<8x400xf32>
    %4 = vector.extract_strided_slice %2 {offsets = [0, 1], sizes = [8, 400], strides = [1, 1]} : vector<8x484xf32> to vector<8x400xf32>
    %5 = vector.extract_strided_slice %2 {offsets = [0, 2], sizes = [8, 400], strides = [1, 1]} : vector<8x484xf32> to vector<8x400xf32>
    %6 = vector.extract_strided_slice %2 {offsets = [0, 3], sizes = [8, 400], strides = [1, 1]} : vector<8x484xf32> to vector<8x400xf32>
    %7 = vector.extract_strided_slice %2 {offsets = [0, 4], sizes = [8, 400], strides = [1, 1]} : vector<8x484xf32> to vector<8x400xf32>
    %8 = vector.extract_strided_slice %2 {offsets = [0, 20], sizes = [8, 400], strides = [1, 1]} : vector<8x484xf32> to vector<8x400xf32>
    %9 = vector.extract_strided_slice %2 {offsets = [0, 21], sizes = [8, 400], strides = [1, 1]} : vector<8x484xf32> to vector<8x400xf32>
    %10 = vector.extract_strided_slice %2 {offsets = [0, 22], sizes = [8, 400], strides = [1, 1]} : vector<8x484xf32> to vector<8x400xf32>
    %11 = vector.extract_strided_slice %2 {offsets = [0, 23], sizes = [8, 400], strides = [1, 1]} : vector<8x484xf32> to vector<8x400xf32>
    %12 = vector.extract_strided_slice %2 {offsets = [0, 24], sizes = [8, 400], strides = [1, 1]} : vector<8x484xf32> to vector<8x400xf32>
    %13 = vector.extract_strided_slice %2 {offsets = [0, 40], sizes = [8, 400], strides = [1, 1]} : vector<8x484xf32> to vector<8x400xf32>
    %14 = vector.extract_strided_slice %2 {offsets = [0, 41], sizes = [8, 400], strides = [1, 1]} : vector<8x484xf32> to vector<8x400xf32>
    %15 = vector.extract_strided_slice %2 {offsets = [0, 42], sizes = [8, 400], strides = [1, 1]} : vector<8x484xf32> to vector<8x400xf32>
    %16 = vector.extract_strided_slice %2 {offsets = [0, 43], sizes = [8, 400], strides = [1, 1]} : vector<8x484xf32> to vector<8x400xf32>
    %17 = vector.extract_strided_slice %2 {offsets = [0, 44], sizes = [8, 400], strides = [1, 1]} : vector<8x484xf32> to vector<8x400xf32>
    %18 = vector.extract_strided_slice %2 {offsets = [0, 60], sizes = [8, 400], strides = [1, 1]} : vector<8x484xf32> to vector<8x400xf32>
    %19 = vector.extract_strided_slice %2 {offsets = [0, 61], sizes = [8, 400], strides = [1, 1]} : vector<8x484xf32> to vector<8x400xf32>
    %20 = vector.extract_strided_slice %2 {offsets = [0, 62], sizes = [8, 400], strides = [1, 1]} : vector<8x484xf32> to vector<8x400xf32>
    %21 = vector.extract_strided_slice %2 {offsets = [0, 63], sizes = [8, 400], strides = [1, 1]} : vector<8x484xf32> to vector<8x400xf32>
    %22 = vector.extract_strided_slice %2 {offsets = [0, 64], sizes = [8, 400], strides = [1, 1]} : vector<8x484xf32> to vector<8x400xf32>
    %23 = vector.extract_strided_slice %2 {offsets = [0, 80], sizes = [8, 400], strides = [1, 1]} : vector<8x484xf32> to vector<8x400xf32>
    %24 = vector.extract_strided_slice %2 {offsets = [0, 81], sizes = [8, 400], strides = [1, 1]} : vector<8x484xf32> to vector<8x400xf32>
    %25 = vector.extract_strided_slice %2 {offsets = [0, 82], sizes = [8, 400], strides = [1, 1]} : vector<8x484xf32> to vector<8x400xf32>
    %26 = vector.extract_strided_slice %2 {offsets = [0, 83], sizes = [8, 400], strides = [1, 1]} : vector<8x484xf32> to vector<8x400xf32>
    %27 = vector.extract_strided_slice %2 {offsets = [0, 84], sizes = [8, 400], strides = [1, 1]} : vector<8x484xf32> to vector<8x400xf32>
    %28 = tpu.concatenate %3, %4, %5, %6, %7, %8, %9, %10, %11, %12, %13, %14, %15, %16, %17, %18 in 0 : vector<8x400xf32>, vector<8x400xf32>, vector<8x400xf32>, vector<8x400xf32>, vector<8x400xf32>, vector<8x400xf32>, vector<8x400xf32>, vector<8x400xf32>, vector<8x400xf32>, vector<8x400xf32>, vector<8x400xf32>, vector<8x400xf32>, vector<8x400xf32>, vector<8x400xf32>, vector<8x400xf32>, vector<8x400xf32> -> vector<128x400xf32>
    %29 = tpu.concatenate %19, %20, %21, %22, %23, %24, %25, %26, %27 in 0 : vector<8x400xf32>, vector<8x400xf32>, vector<8x400xf32>, vector<8x400xf32>, vector<8x400xf32>, vector<8x400xf32>, vector<8x400xf32>, vector<8x400xf32>, vector<8x400xf32> -> vector<72x400xf32>
    %30 = tpu.concatenate %28, %29 in 0 : vector<128x400xf32>, vector<72x400xf32> -> vector<200x400xf32>
    %c0_4 = arith.constant 0 : index
    %c0_5 = arith.constant 0 : index
    %31 = vector.load %arg3[%c0_4, %c0_5] : memref<8x200xf32, #tpu.memory_space<vmem>>, vector<8x200xf32>
    %cst = arith.constant dense<0.000000e+00> : vector<8x400xf32>
    %32 = tpu.matmul %31, %30, %cst {dimension_numbers = #tpu.dot_dimension_numbers<[1], [0], [0], [1], [0, 0, 1, 1], [], []>} : vector<8x200xf32>, vector<200x400xf32>, vector<8x400xf32> -> vector<8x400xf32>
    %c0_6 = arith.constant 0 : index
    %c0_7 = arith.constant 0 : index
    %33 = vector.load %arg4[%c0_6, %c0_7] : memref<8x1xf32, #tpu.memory_space<vmem>>, vector<8x1xf32>
    %34 = vector.broadcast %33 : vector<8x1xf32> to vector<8x400xf32>
    %35 = arith.addf %32, %34 : vector<8x400xf32>
    %cst_8 = arith.constant 0.000000e+00 : f32
    %36 = vector.broadcast %cst_8 : f32 to vector<8x400xf32>
    %37 = arith.maximumf %35, %36 : vector<8x400xf32>
    %c1_i32 = arith.constant 1 : i32
    %38 = vector.broadcast %c1_i32 : i32 to vector<1x400xi32>
    %39 = arith.cmpi eq, %0, %38 : vector<1x400xi32>
    %40 = vector.extract_strided_slice %37 {offsets = [0, 2], sizes = [8, 398], strides = [1, 1]} : vector<8x400xf32> to vector<8x398xf32>
    %41 = vector.extract_strided_slice %37 {offsets = [0, 0], sizes = [8, 2], strides = [1, 1]} : vector<8x400xf32> to vector<8x2xf32>
    %42 = tpu.concatenate %40, %41 in 1 : vector<8x398xf32>, vector<8x2xf32> -> vector<8x400xf32>
    %43 = vector.shape_cast %39 : vector<1x400xi1> to vector<1x400xi1>
    %44 = vector.broadcast %43 : vector<1x400xi1> to vector<8x400xi1>
    %45 = arith.select %44, %42, %37 : vector<8x400xi1>, vector<8x400xf32>
    %c2_i32 = arith.constant 2 : i32
    %46 = vector.broadcast %c2_i32 : i32 to vector<1x400xi32>
    %47 = arith.cmpi eq, %0, %46 : vector<1x400xi32>
    %48 = vector.extract_strided_slice %45 {offsets = [0, 1], sizes = [8, 399], strides = [1, 1]} : vector<8x400xf32> to vector<8x399xf32>
    %49 = vector.extract_strided_slice %45 {offsets = [0, 0], sizes = [8, 1], strides = [1, 1]} : vector<8x400xf32> to vector<8x1xf32>
    %50 = tpu.concatenate %48, %49 in 1 : vector<8x399xf32>, vector<8x1xf32> -> vector<8x400xf32>
    %51 = vector.shape_cast %47 : vector<1x400xi1> to vector<1x400xi1>
    %52 = vector.broadcast %51 : vector<1x400xi1> to vector<8x400xi1>
    %53 = arith.select %52, %50, %45 : vector<8x400xi1>, vector<8x400xf32>
    %c3_i32 = arith.constant 3 : i32
    %54 = vector.broadcast %c3_i32 : i32 to vector<1x400xi32>
    %55 = arith.cmpi eq, %0, %54 : vector<1x400xi32>
    %56 = vector.extract_strided_slice %53 {offsets = [0, 399], sizes = [8, 1], strides = [1, 1]} : vector<8x400xf32> to vector<8x1xf32>
    %57 = vector.extract_strided_slice %53 {offsets = [0, 0], sizes = [8, 399], strides = [1, 1]} : vector<8x400xf32> to vector<8x399xf32>
    %58 = tpu.concatenate %56, %57 in 1 : vector<8x1xf32>, vector<8x399xf32> -> vector<8x400xf32>
    %59 = vector.shape_cast %55 : vector<1x400xi1> to vector<1x400xi1>
    %60 = vector.broadcast %59 : vector<1x400xi1> to vector<8x400xi1>
    %61 = arith.select %60, %58, %53 : vector<8x400xi1>, vector<8x400xf32>
    %c4_i32 = arith.constant 4 : i32
    %62 = vector.broadcast %c4_i32 : i32 to vector<1x400xi32>
    %63 = arith.cmpi eq, %0, %62 : vector<1x400xi32>
    %64 = vector.extract_strided_slice %61 {offsets = [0, 398], sizes = [8, 2], strides = [1, 1]} : vector<8x400xf32> to vector<8x2xf32>
    %65 = vector.extract_strided_slice %61 {offsets = [0, 0], sizes = [8, 398], strides = [1, 1]} : vector<8x400xf32> to vector<8x398xf32>
    %66 = tpu.concatenate %64, %65 in 1 : vector<8x2xf32>, vector<8x398xf32> -> vector<8x400xf32>
    %67 = vector.shape_cast %63 : vector<1x400xi1> to vector<1x400xi1>
    %68 = vector.broadcast %67 : vector<1x400xi1> to vector<8x400xi1>
    %69 = arith.select %68, %66, %61 : vector<8x400xi1>, vector<8x400xf32>
    %c5_i32 = arith.constant 5 : i32
    %70 = vector.broadcast %c5_i32 : i32 to vector<1x400xi32>
    %71 = arith.cmpi eq, %0, %70 : vector<1x400xi32>
    %72 = vector.extract_strided_slice %69 {offsets = [0, 40], sizes = [8, 360], strides = [1, 1]} : vector<8x400xf32> to vector<8x360xf32>
    %73 = vector.extract_strided_slice %69 {offsets = [0, 0], sizes = [8, 40], strides = [1, 1]} : vector<8x400xf32> to vector<8x40xf32>
    %74 = tpu.concatenate %72, %73 in 1 : vector<8x360xf32>, vector<8x40xf32> -> vector<8x400xf32>
    %75 = vector.shape_cast %71 : vector<1x400xi1> to vector<1x400xi1>
    %76 = vector.broadcast %75 : vector<1x400xi1> to vector<8x400xi1>
    %77 = arith.select %76, %74, %69 : vector<8x400xi1>, vector<8x400xf32>
    %c6_i32 = arith.constant 6 : i32
    %78 = vector.broadcast %c6_i32 : i32 to vector<1x400xi32>
    %79 = arith.cmpi eq, %0, %78 : vector<1x400xi32>
    %80 = vector.extract_strided_slice %77 {offsets = [0, 20], sizes = [8, 380], strides = [1, 1]} : vector<8x400xf32> to vector<8x380xf32>
    %81 = vector.extract_strided_slice %77 {offsets = [0, 0], sizes = [8, 20], strides = [1, 1]} : vector<8x400xf32> to vector<8x20xf32>
    %82 = tpu.concatenate %80, %81 in 1 : vector<8x380xf32>, vector<8x20xf32> -> vector<8x400xf32>
    %83 = vector.shape_cast %79 : vector<1x400xi1> to vector<1x400xi1>
    %84 = vector.broadcast %83 : vector<1x400xi1> to vector<8x400xi1>
    %85 = arith.select %84, %82, %77 : vector<8x400xi1>, vector<8x400xf32>
    %c7_i32 = arith.constant 7 : i32
    %86 = vector.broadcast %c7_i32 : i32 to vector<1x400xi32>
    %87 = arith.cmpi eq, %0, %86 : vector<1x400xi32>
    %88 = vector.extract_strided_slice %85 {offsets = [0, 380], sizes = [8, 20], strides = [1, 1]} : vector<8x400xf32> to vector<8x20xf32>
    %89 = vector.extract_strided_slice %85 {offsets = [0, 0], sizes = [8, 380], strides = [1, 1]} : vector<8x400xf32> to vector<8x380xf32>
    %90 = tpu.concatenate %88, %89 in 1 : vector<8x20xf32>, vector<8x380xf32> -> vector<8x400xf32>
    %91 = vector.shape_cast %87 : vector<1x400xi1> to vector<1x400xi1>
    %92 = vector.broadcast %91 : vector<1x400xi1> to vector<8x400xi1>
    %93 = arith.select %92, %90, %85 : vector<8x400xi1>, vector<8x400xf32>
    %c8_i32 = arith.constant 8 : i32
    %94 = vector.broadcast %c8_i32 : i32 to vector<1x400xi32>
    %95 = arith.cmpi eq, %0, %94 : vector<1x400xi32>
    %96 = vector.extract_strided_slice %93 {offsets = [0, 360], sizes = [8, 40], strides = [1, 1]} : vector<8x400xf32> to vector<8x40xf32>
    %97 = vector.extract_strided_slice %93 {offsets = [0, 0], sizes = [8, 360], strides = [1, 1]} : vector<8x400xf32> to vector<8x360xf32>
    %98 = tpu.concatenate %96, %97 in 1 : vector<8x40xf32>, vector<8x360xf32> -> vector<8x400xf32>
    %99 = vector.shape_cast %95 : vector<1x400xi1> to vector<1x400xi1>
    %100 = vector.broadcast %99 : vector<1x400xi1> to vector<8x400xi1>
    %101 = arith.select %100, %98, %93 : vector<8x400xi1>, vector<8x400xf32>
    %cst_9 = arith.constant 0.000000e+00 : f32
    %102 = vector.broadcast %cst_9 : f32 to vector<8x42xf32>
    %103 = tpu.concatenate %102, %101, %102 in 1 : vector<8x42xf32>, vector<8x400xf32>, vector<8x42xf32> -> vector<8x484xf32>
    %104 = vector.extract_strided_slice %103 {offsets = [0, 21], sizes = [8, 400], strides = [1, 1]} : vector<8x484xf32> to vector<8x400xf32>
    %105 = vector.extract_strided_slice %103 {offsets = [0, 22], sizes = [8, 400], strides = [1, 1]} : vector<8x484xf32> to vector<8x400xf32>
    %106 = vector.extract_strided_slice %103 {offsets = [0, 23], sizes = [8, 400], strides = [1, 1]} : vector<8x484xf32> to vector<8x400xf32>
    %107 = vector.extract_strided_slice %103 {offsets = [0, 41], sizes = [8, 400], strides = [1, 1]} : vector<8x484xf32> to vector<8x400xf32>
    %108 = vector.extract_strided_slice %103 {offsets = [0, 42], sizes = [8, 400], strides = [1, 1]} : vector<8x484xf32> to vector<8x400xf32>
    %109 = vector.extract_strided_slice %103 {offsets = [0, 43], sizes = [8, 400], strides = [1, 1]} : vector<8x484xf32> to vector<8x400xf32>
    %110 = vector.extract_strided_slice %103 {offsets = [0, 61], sizes = [8, 400], strides = [1, 1]} : vector<8x484xf32> to vector<8x400xf32>
    %111 = vector.extract_strided_slice %103 {offsets = [0, 62], sizes = [8, 400], strides = [1, 1]} : vector<8x484xf32> to vector<8x400xf32>
    %112 = vector.extract_strided_slice %103 {offsets = [0, 63], sizes = [8, 400], strides = [1, 1]} : vector<8x484xf32> to vector<8x400xf32>
    %113 = tpu.concatenate %104, %105, %106, %107, %108, %109, %110, %111, %112 in 0 : vector<8x400xf32>, vector<8x400xf32>, vector<8x400xf32>, vector<8x400xf32>, vector<8x400xf32>, vector<8x400xf32>, vector<8x400xf32>, vector<8x400xf32>, vector<8x400xf32> -> vector<72x400xf32>
    %c0_10 = arith.constant 0 : index
    %c0_11 = arith.constant 0 : index
    %114 = vector.load %arg5[%c0_10, %c0_11] : memref<16x72xf32, #tpu.memory_space<vmem>>, vector<16x72xf32>
    %cst_12 = arith.constant dense<0.000000e+00> : vector<16x400xf32>
    %115 = tpu.matmul %114, %113, %cst_12 {dimension_numbers = #tpu.dot_dimension_numbers<[1], [0], [0], [1], [0, 0, 1, 1], [], []>} : vector<16x72xf32>, vector<72x400xf32>, vector<16x400xf32> -> vector<16x400xf32>
    %c0_13 = arith.constant 0 : index
    %c0_14 = arith.constant 0 : index
    %116 = vector.load %arg6[%c0_13, %c0_14] : memref<16x1xf32, #tpu.memory_space<vmem>>, vector<16x1xf32>
    %117 = vector.broadcast %116 : vector<16x1xf32> to vector<16x400xf32>
    %118 = arith.addf %115, %117 : vector<16x400xf32>
    %cst_15 = arith.constant 0.000000e+00 : f32
    %119 = vector.broadcast %cst_15 : f32 to vector<16x400xf32>
    %120 = arith.maximumf %118, %119 : vector<16x400xf32>
    %c1_i32_16 = arith.constant 1 : i32
    %121 = vector.broadcast %c1_i32_16 : i32 to vector<1x400xi32>
    %122 = arith.cmpi eq, %0, %121 : vector<1x400xi32>
    %123 = vector.extract_strided_slice %120 {offsets = [0, 2], sizes = [16, 398], strides = [1, 1]} : vector<16x400xf32> to vector<16x398xf32>
    %124 = vector.extract_strided_slice %120 {offsets = [0, 0], sizes = [16, 2], strides = [1, 1]} : vector<16x400xf32> to vector<16x2xf32>
    %125 = tpu.concatenate %123, %124 in 1 : vector<16x398xf32>, vector<16x2xf32> -> vector<16x400xf32>
    %126 = vector.shape_cast %122 : vector<1x400xi1> to vector<1x400xi1>
    %127 = vector.broadcast %126 : vector<1x400xi1> to vector<16x400xi1>
    %128 = arith.select %127, %125, %120 : vector<16x400xi1>, vector<16x400xf32>
    %c2_i32_17 = arith.constant 2 : i32
    %129 = vector.broadcast %c2_i32_17 : i32 to vector<1x400xi32>
    %130 = arith.cmpi eq, %0, %129 : vector<1x400xi32>
    %131 = vector.extract_strided_slice %128 {offsets = [0, 1], sizes = [16, 399], strides = [1, 1]} : vector<16x400xf32> to vector<16x399xf32>
    %132 = vector.extract_strided_slice %128 {offsets = [0, 0], sizes = [16, 1], strides = [1, 1]} : vector<16x400xf32> to vector<16x1xf32>
    %133 = tpu.concatenate %131, %132 in 1 : vector<16x399xf32>, vector<16x1xf32> -> vector<16x400xf32>
    %134 = vector.shape_cast %130 : vector<1x400xi1> to vector<1x400xi1>
    %135 = vector.broadcast %134 : vector<1x400xi1> to vector<16x400xi1>
    %136 = arith.select %135, %133, %128 : vector<16x400xi1>, vector<16x400xf32>
    %c3_i32_18 = arith.constant 3 : i32
    %137 = vector.broadcast %c3_i32_18 : i32 to vector<1x400xi32>
    %138 = arith.cmpi eq, %0, %137 : vector<1x400xi32>
    %139 = vector.extract_strided_slice %136 {offsets = [0, 399], sizes = [16, 1], strides = [1, 1]} : vector<16x400xf32> to vector<16x1xf32>
    %140 = vector.extract_strided_slice %136 {offsets = [0, 0], sizes = [16, 399], strides = [1, 1]} : vector<16x400xf32> to vector<16x399xf32>
    %141 = tpu.concatenate %139, %140 in 1 : vector<16x1xf32>, vector<16x399xf32> -> vector<16x400xf32>
    %142 = vector.shape_cast %138 : vector<1x400xi1> to vector<1x400xi1>
    %143 = vector.broadcast %142 : vector<1x400xi1> to vector<16x400xi1>
    %144 = arith.select %143, %141, %136 : vector<16x400xi1>, vector<16x400xf32>
    %c4_i32_19 = arith.constant 4 : i32
    %145 = vector.broadcast %c4_i32_19 : i32 to vector<1x400xi32>
    %146 = arith.cmpi eq, %0, %145 : vector<1x400xi32>
    %147 = vector.extract_strided_slice %144 {offsets = [0, 398], sizes = [16, 2], strides = [1, 1]} : vector<16x400xf32> to vector<16x2xf32>
    %148 = vector.extract_strided_slice %144 {offsets = [0, 0], sizes = [16, 398], strides = [1, 1]} : vector<16x400xf32> to vector<16x398xf32>
    %149 = tpu.concatenate %147, %148 in 1 : vector<16x2xf32>, vector<16x398xf32> -> vector<16x400xf32>
    %150 = vector.shape_cast %146 : vector<1x400xi1> to vector<1x400xi1>
    %151 = vector.broadcast %150 : vector<1x400xi1> to vector<16x400xi1>
    %152 = arith.select %151, %149, %144 : vector<16x400xi1>, vector<16x400xf32>
    %c5_i32_20 = arith.constant 5 : i32
    %153 = vector.broadcast %c5_i32_20 : i32 to vector<1x400xi32>
    %154 = arith.cmpi eq, %0, %153 : vector<1x400xi32>
    %155 = vector.extract_strided_slice %152 {offsets = [0, 40], sizes = [16, 360], strides = [1, 1]} : vector<16x400xf32> to vector<16x360xf32>
    %156 = vector.extract_strided_slice %152 {offsets = [0, 0], sizes = [16, 40], strides = [1, 1]} : vector<16x400xf32> to vector<16x40xf32>
    %157 = tpu.concatenate %155, %156 in 1 : vector<16x360xf32>, vector<16x40xf32> -> vector<16x400xf32>
    %158 = vector.shape_cast %154 : vector<1x400xi1> to vector<1x400xi1>
    %159 = vector.broadcast %158 : vector<1x400xi1> to vector<16x400xi1>
    %160 = arith.select %159, %157, %152 : vector<16x400xi1>, vector<16x400xf32>
    %c6_i32_21 = arith.constant 6 : i32
    %161 = vector.broadcast %c6_i32_21 : i32 to vector<1x400xi32>
    %162 = arith.cmpi eq, %0, %161 : vector<1x400xi32>
    %163 = vector.extract_strided_slice %160 {offsets = [0, 20], sizes = [16, 380], strides = [1, 1]} : vector<16x400xf32> to vector<16x380xf32>
    %164 = vector.extract_strided_slice %160 {offsets = [0, 0], sizes = [16, 20], strides = [1, 1]} : vector<16x400xf32> to vector<16x20xf32>
    %165 = tpu.concatenate %163, %164 in 1 : vector<16x380xf32>, vector<16x20xf32> -> vector<16x400xf32>
    %166 = vector.shape_cast %162 : vector<1x400xi1> to vector<1x400xi1>
    %167 = vector.broadcast %166 : vector<1x400xi1> to vector<16x400xi1>
    %168 = arith.select %167, %165, %160 : vector<16x400xi1>, vector<16x400xf32>
    %c7_i32_22 = arith.constant 7 : i32
    %169 = vector.broadcast %c7_i32_22 : i32 to vector<1x400xi32>
    %170 = arith.cmpi eq, %0, %169 : vector<1x400xi32>
    %171 = vector.extract_strided_slice %168 {offsets = [0, 380], sizes = [16, 20], strides = [1, 1]} : vector<16x400xf32> to vector<16x20xf32>
    %172 = vector.extract_strided_slice %168 {offsets = [0, 0], sizes = [16, 380], strides = [1, 1]} : vector<16x400xf32> to vector<16x380xf32>
    %173 = tpu.concatenate %171, %172 in 1 : vector<16x20xf32>, vector<16x380xf32> -> vector<16x400xf32>
    %174 = vector.shape_cast %170 : vector<1x400xi1> to vector<1x400xi1>
    %175 = vector.broadcast %174 : vector<1x400xi1> to vector<16x400xi1>
    %176 = arith.select %175, %173, %168 : vector<16x400xi1>, vector<16x400xf32>
    %c8_i32_23 = arith.constant 8 : i32
    %177 = vector.broadcast %c8_i32_23 : i32 to vector<1x400xi32>
    %178 = arith.cmpi eq, %0, %177 : vector<1x400xi32>
    %179 = vector.extract_strided_slice %176 {offsets = [0, 360], sizes = [16, 40], strides = [1, 1]} : vector<16x400xf32> to vector<16x40xf32>
    %180 = vector.extract_strided_slice %176 {offsets = [0, 0], sizes = [16, 360], strides = [1, 1]} : vector<16x400xf32> to vector<16x360xf32>
    %181 = tpu.concatenate %179, %180 in 1 : vector<16x40xf32>, vector<16x360xf32> -> vector<16x400xf32>
    %182 = vector.shape_cast %178 : vector<1x400xi1> to vector<1x400xi1>
    %183 = vector.broadcast %182 : vector<1x400xi1> to vector<16x400xi1>
    %184 = arith.select %183, %181, %176 : vector<16x400xi1>, vector<16x400xf32>
    %cst_24 = arith.constant 0.000000e+00 : f32
    %185 = vector.broadcast %cst_24 : f32 to vector<16x42xf32>
    %186 = tpu.concatenate %185, %184, %185 in 1 : vector<16x42xf32>, vector<16x400xf32>, vector<16x42xf32> -> vector<16x484xf32>
    %187 = vector.extract_strided_slice %186 {offsets = [0, 21], sizes = [16, 400], strides = [1, 1]} : vector<16x484xf32> to vector<16x400xf32>
    %188 = vector.extract_strided_slice %186 {offsets = [0, 22], sizes = [16, 400], strides = [1, 1]} : vector<16x484xf32> to vector<16x400xf32>
    %189 = vector.extract_strided_slice %186 {offsets = [0, 23], sizes = [16, 400], strides = [1, 1]} : vector<16x484xf32> to vector<16x400xf32>
    %190 = vector.extract_strided_slice %186 {offsets = [0, 41], sizes = [16, 400], strides = [1, 1]} : vector<16x484xf32> to vector<16x400xf32>
    %191 = vector.extract_strided_slice %186 {offsets = [0, 42], sizes = [16, 400], strides = [1, 1]} : vector<16x484xf32> to vector<16x400xf32>
    %192 = vector.extract_strided_slice %186 {offsets = [0, 43], sizes = [16, 400], strides = [1, 1]} : vector<16x484xf32> to vector<16x400xf32>
    %193 = vector.extract_strided_slice %186 {offsets = [0, 61], sizes = [16, 400], strides = [1, 1]} : vector<16x484xf32> to vector<16x400xf32>
    %194 = vector.extract_strided_slice %186 {offsets = [0, 62], sizes = [16, 400], strides = [1, 1]} : vector<16x484xf32> to vector<16x400xf32>
    %195 = vector.extract_strided_slice %186 {offsets = [0, 63], sizes = [16, 400], strides = [1, 1]} : vector<16x484xf32> to vector<16x400xf32>
    %196 = tpu.concatenate %187, %188, %189, %190, %191, %192, %193, %194, %195 in 0 : vector<16x400xf32>, vector<16x400xf32>, vector<16x400xf32>, vector<16x400xf32>, vector<16x400xf32>, vector<16x400xf32>, vector<16x400xf32>, vector<16x400xf32>, vector<16x400xf32> -> vector<144x400xf32>
    %c0_25 = arith.constant 0 : index
    %c0_26 = arith.constant 0 : index
    %197 = vector.load %arg7[%c0_25, %c0_26] : memref<32x144xf32, #tpu.memory_space<vmem>>, vector<32x144xf32>
    %cst_27 = arith.constant dense<0.000000e+00> : vector<32x400xf32>
    %198 = tpu.matmul %197, %196, %cst_27 {dimension_numbers = #tpu.dot_dimension_numbers<[1], [0], [0], [1], [0, 0, 1, 1], [], []>} : vector<32x144xf32>, vector<144x400xf32>, vector<32x400xf32> -> vector<32x400xf32>
    %c0_28 = arith.constant 0 : index
    %c0_29 = arith.constant 0 : index
    %199 = vector.load %arg8[%c0_28, %c0_29] : memref<32x1xf32, #tpu.memory_space<vmem>>, vector<32x1xf32>
    %200 = vector.broadcast %199 : vector<32x1xf32> to vector<32x400xf32>
    %201 = arith.addf %198, %200 : vector<32x400xf32>
    %cst_30 = arith.constant 0.000000e+00 : f32
    %202 = vector.broadcast %cst_30 : f32 to vector<32x400xf32>
    %203 = arith.maximumf %201, %202 : vector<32x400xf32>
    %c1_i32_31 = arith.constant 1 : i32
    %204 = vector.broadcast %c1_i32_31 : i32 to vector<1x400xi32>
    %205 = arith.cmpi eq, %0, %204 : vector<1x400xi32>
    %206 = vector.extract_strided_slice %203 {offsets = [0, 2], sizes = [32, 398], strides = [1, 1]} : vector<32x400xf32> to vector<32x398xf32>
    %207 = vector.extract_strided_slice %203 {offsets = [0, 0], sizes = [32, 2], strides = [1, 1]} : vector<32x400xf32> to vector<32x2xf32>
    %208 = tpu.concatenate %206, %207 in 1 : vector<32x398xf32>, vector<32x2xf32> -> vector<32x400xf32>
    %209 = vector.shape_cast %205 : vector<1x400xi1> to vector<1x400xi1>
    %210 = vector.broadcast %209 : vector<1x400xi1> to vector<32x400xi1>
    %211 = arith.select %210, %208, %203 : vector<32x400xi1>, vector<32x400xf32>
    %c2_i32_32 = arith.constant 2 : i32
    %212 = vector.broadcast %c2_i32_32 : i32 to vector<1x400xi32>
    %213 = arith.cmpi eq, %0, %212 : vector<1x400xi32>
    %214 = vector.extract_strided_slice %211 {offsets = [0, 1], sizes = [32, 399], strides = [1, 1]} : vector<32x400xf32> to vector<32x399xf32>
    %215 = vector.extract_strided_slice %211 {offsets = [0, 0], sizes = [32, 1], strides = [1, 1]} : vector<32x400xf32> to vector<32x1xf32>
    %216 = tpu.concatenate %214, %215 in 1 : vector<32x399xf32>, vector<32x1xf32> -> vector<32x400xf32>
    %217 = vector.shape_cast %213 : vector<1x400xi1> to vector<1x400xi1>
    %218 = vector.broadcast %217 : vector<1x400xi1> to vector<32x400xi1>
    %219 = arith.select %218, %216, %211 : vector<32x400xi1>, vector<32x400xf32>
    %c3_i32_33 = arith.constant 3 : i32
    %220 = vector.broadcast %c3_i32_33 : i32 to vector<1x400xi32>
    %221 = arith.cmpi eq, %0, %220 : vector<1x400xi32>
    %222 = vector.extract_strided_slice %219 {offsets = [0, 399], sizes = [32, 1], strides = [1, 1]} : vector<32x400xf32> to vector<32x1xf32>
    %223 = vector.extract_strided_slice %219 {offsets = [0, 0], sizes = [32, 399], strides = [1, 1]} : vector<32x400xf32> to vector<32x399xf32>
    %224 = tpu.concatenate %222, %223 in 1 : vector<32x1xf32>, vector<32x399xf32> -> vector<32x400xf32>
    %225 = vector.shape_cast %221 : vector<1x400xi1> to vector<1x400xi1>
    %226 = vector.broadcast %225 : vector<1x400xi1> to vector<32x400xi1>
    %227 = arith.select %226, %224, %219 : vector<32x400xi1>, vector<32x400xf32>
    %c4_i32_34 = arith.constant 4 : i32
    %228 = vector.broadcast %c4_i32_34 : i32 to vector<1x400xi32>
    %229 = arith.cmpi eq, %0, %228 : vector<1x400xi32>
    %230 = vector.extract_strided_slice %227 {offsets = [0, 398], sizes = [32, 2], strides = [1, 1]} : vector<32x400xf32> to vector<32x2xf32>
    %231 = vector.extract_strided_slice %227 {offsets = [0, 0], sizes = [32, 398], strides = [1, 1]} : vector<32x400xf32> to vector<32x398xf32>
    %232 = tpu.concatenate %230, %231 in 1 : vector<32x2xf32>, vector<32x398xf32> -> vector<32x400xf32>
    %233 = vector.shape_cast %229 : vector<1x400xi1> to vector<1x400xi1>
    %234 = vector.broadcast %233 : vector<1x400xi1> to vector<32x400xi1>
    %235 = arith.select %234, %232, %227 : vector<32x400xi1>, vector<32x400xf32>
    %c5_i32_35 = arith.constant 5 : i32
    %236 = vector.broadcast %c5_i32_35 : i32 to vector<1x400xi32>
    %237 = arith.cmpi eq, %0, %236 : vector<1x400xi32>
    %238 = vector.extract_strided_slice %235 {offsets = [0, 40], sizes = [32, 360], strides = [1, 1]} : vector<32x400xf32> to vector<32x360xf32>
    %239 = vector.extract_strided_slice %235 {offsets = [0, 0], sizes = [32, 40], strides = [1, 1]} : vector<32x400xf32> to vector<32x40xf32>
    %240 = tpu.concatenate %238, %239 in 1 : vector<32x360xf32>, vector<32x40xf32> -> vector<32x400xf32>
    %241 = vector.shape_cast %237 : vector<1x400xi1> to vector<1x400xi1>
    %242 = vector.broadcast %241 : vector<1x400xi1> to vector<32x400xi1>
    %243 = arith.select %242, %240, %235 : vector<32x400xi1>, vector<32x400xf32>
    %c6_i32_36 = arith.constant 6 : i32
    %244 = vector.broadcast %c6_i32_36 : i32 to vector<1x400xi32>
    %245 = arith.cmpi eq, %0, %244 : vector<1x400xi32>
    %246 = vector.extract_strided_slice %243 {offsets = [0, 20], sizes = [32, 380], strides = [1, 1]} : vector<32x400xf32> to vector<32x380xf32>
    %247 = vector.extract_strided_slice %243 {offsets = [0, 0], sizes = [32, 20], strides = [1, 1]} : vector<32x400xf32> to vector<32x20xf32>
    %248 = tpu.concatenate %246, %247 in 1 : vector<32x380xf32>, vector<32x20xf32> -> vector<32x400xf32>
    %249 = vector.shape_cast %245 : vector<1x400xi1> to vector<1x400xi1>
    %250 = vector.broadcast %249 : vector<1x400xi1> to vector<32x400xi1>
    %251 = arith.select %250, %248, %243 : vector<32x400xi1>, vector<32x400xf32>
    %c7_i32_37 = arith.constant 7 : i32
    %252 = vector.broadcast %c7_i32_37 : i32 to vector<1x400xi32>
    %253 = arith.cmpi eq, %0, %252 : vector<1x400xi32>
    %254 = vector.extract_strided_slice %251 {offsets = [0, 380], sizes = [32, 20], strides = [1, 1]} : vector<32x400xf32> to vector<32x20xf32>
    %255 = vector.extract_strided_slice %251 {offsets = [0, 0], sizes = [32, 380], strides = [1, 1]} : vector<32x400xf32> to vector<32x380xf32>
    %256 = tpu.concatenate %254, %255 in 1 : vector<32x20xf32>, vector<32x380xf32> -> vector<32x400xf32>
    %257 = vector.shape_cast %253 : vector<1x400xi1> to vector<1x400xi1>
    %258 = vector.broadcast %257 : vector<1x400xi1> to vector<32x400xi1>
    %259 = arith.select %258, %256, %251 : vector<32x400xi1>, vector<32x400xf32>
    %c8_i32_38 = arith.constant 8 : i32
    %260 = vector.broadcast %c8_i32_38 : i32 to vector<1x400xi32>
    %261 = arith.cmpi eq, %0, %260 : vector<1x400xi32>
    %262 = vector.extract_strided_slice %259 {offsets = [0, 360], sizes = [32, 40], strides = [1, 1]} : vector<32x400xf32> to vector<32x40xf32>
    %263 = vector.extract_strided_slice %259 {offsets = [0, 0], sizes = [32, 360], strides = [1, 1]} : vector<32x400xf32> to vector<32x360xf32>
    %264 = tpu.concatenate %262, %263 in 1 : vector<32x40xf32>, vector<32x360xf32> -> vector<32x400xf32>
    %265 = vector.shape_cast %261 : vector<1x400xi1> to vector<1x400xi1>
    %266 = vector.broadcast %265 : vector<1x400xi1> to vector<32x400xi1>
    %267 = arith.select %266, %264, %259 : vector<32x400xi1>, vector<32x400xf32>
    %cst_39 = arith.constant 0.000000e+00 : f32
    %268 = vector.broadcast %cst_39 : f32 to vector<32x42xf32>
    %269 = tpu.concatenate %268, %267, %268 in 1 : vector<32x42xf32>, vector<32x400xf32>, vector<32x42xf32> -> vector<32x484xf32>
    %270 = vector.extract_strided_slice %269 {offsets = [0, 21], sizes = [32, 400], strides = [1, 1]} : vector<32x484xf32> to vector<32x400xf32>
    %271 = vector.extract_strided_slice %269 {offsets = [0, 22], sizes = [32, 400], strides = [1, 1]} : vector<32x484xf32> to vector<32x400xf32>
    %272 = vector.extract_strided_slice %269 {offsets = [0, 23], sizes = [32, 400], strides = [1, 1]} : vector<32x484xf32> to vector<32x400xf32>
    %273 = vector.extract_strided_slice %269 {offsets = [0, 41], sizes = [32, 400], strides = [1, 1]} : vector<32x484xf32> to vector<32x400xf32>
    %274 = vector.extract_strided_slice %269 {offsets = [0, 42], sizes = [32, 400], strides = [1, 1]} : vector<32x484xf32> to vector<32x400xf32>
    %275 = vector.extract_strided_slice %269 {offsets = [0, 43], sizes = [32, 400], strides = [1, 1]} : vector<32x484xf32> to vector<32x400xf32>
    %276 = vector.extract_strided_slice %269 {offsets = [0, 61], sizes = [32, 400], strides = [1, 1]} : vector<32x484xf32> to vector<32x400xf32>
    %277 = vector.extract_strided_slice %269 {offsets = [0, 62], sizes = [32, 400], strides = [1, 1]} : vector<32x484xf32> to vector<32x400xf32>
    %278 = vector.extract_strided_slice %269 {offsets = [0, 63], sizes = [32, 400], strides = [1, 1]} : vector<32x484xf32> to vector<32x400xf32>
    %279 = tpu.concatenate %270, %271, %272, %273, %274, %275, %276, %277, %278 in 0 : vector<32x400xf32>, vector<32x400xf32>, vector<32x400xf32>, vector<32x400xf32>, vector<32x400xf32>, vector<32x400xf32>, vector<32x400xf32>, vector<32x400xf32>, vector<32x400xf32> -> vector<288x400xf32>
    %c0_40 = arith.constant 0 : index
    %c0_41 = arith.constant 0 : index
    %280 = vector.load %arg9[%c0_40, %c0_41] : memref<16x288xf32, #tpu.memory_space<vmem>>, vector<16x288xf32>
    %cst_42 = arith.constant dense<0.000000e+00> : vector<16x400xf32>
    %281 = tpu.matmul %280, %279, %cst_42 {dimension_numbers = #tpu.dot_dimension_numbers<[1], [0], [0], [1], [0, 0, 1, 1], [], []>} : vector<16x288xf32>, vector<288x400xf32>, vector<16x400xf32> -> vector<16x400xf32>
    %c0_43 = arith.constant 0 : index
    %c0_44 = arith.constant 0 : index
    %282 = vector.load %arg10[%c0_43, %c0_44] : memref<16x1xf32, #tpu.memory_space<vmem>>, vector<16x1xf32>
    %283 = vector.broadcast %282 : vector<16x1xf32> to vector<16x400xf32>
    %284 = arith.addf %281, %283 : vector<16x400xf32>
    %cst_45 = arith.constant 0.000000e+00 : f32
    %285 = vector.broadcast %cst_45 : f32 to vector<16x400xf32>
    %286 = arith.maximumf %284, %285 : vector<16x400xf32>
    %c1_i32_46 = arith.constant 1 : i32
    %287 = vector.broadcast %c1_i32_46 : i32 to vector<1x400xi32>
    %288 = arith.cmpi eq, %0, %287 : vector<1x400xi32>
    %289 = vector.extract_strided_slice %286 {offsets = [0, 2], sizes = [16, 398], strides = [1, 1]} : vector<16x400xf32> to vector<16x398xf32>
    %290 = vector.extract_strided_slice %286 {offsets = [0, 0], sizes = [16, 2], strides = [1, 1]} : vector<16x400xf32> to vector<16x2xf32>
    %291 = tpu.concatenate %289, %290 in 1 : vector<16x398xf32>, vector<16x2xf32> -> vector<16x400xf32>
    %292 = vector.shape_cast %288 : vector<1x400xi1> to vector<1x400xi1>
    %293 = vector.broadcast %292 : vector<1x400xi1> to vector<16x400xi1>
    %294 = arith.select %293, %291, %286 : vector<16x400xi1>, vector<16x400xf32>
    %c2_i32_47 = arith.constant 2 : i32
    %295 = vector.broadcast %c2_i32_47 : i32 to vector<1x400xi32>
    %296 = arith.cmpi eq, %0, %295 : vector<1x400xi32>
    %297 = vector.extract_strided_slice %294 {offsets = [0, 1], sizes = [16, 399], strides = [1, 1]} : vector<16x400xf32> to vector<16x399xf32>
    %298 = vector.extract_strided_slice %294 {offsets = [0, 0], sizes = [16, 1], strides = [1, 1]} : vector<16x400xf32> to vector<16x1xf32>
    %299 = tpu.concatenate %297, %298 in 1 : vector<16x399xf32>, vector<16x1xf32> -> vector<16x400xf32>
    %300 = vector.shape_cast %296 : vector<1x400xi1> to vector<1x400xi1>
    %301 = vector.broadcast %300 : vector<1x400xi1> to vector<16x400xi1>
    %302 = arith.select %301, %299, %294 : vector<16x400xi1>, vector<16x400xf32>
    %c3_i32_48 = arith.constant 3 : i32
    %303 = vector.broadcast %c3_i32_48 : i32 to vector<1x400xi32>
    %304 = arith.cmpi eq, %0, %303 : vector<1x400xi32>
    %305 = vector.extract_strided_slice %302 {offsets = [0, 399], sizes = [16, 1], strides = [1, 1]} : vector<16x400xf32> to vector<16x1xf32>
    %306 = vector.extract_strided_slice %302 {offsets = [0, 0], sizes = [16, 399], strides = [1, 1]} : vector<16x400xf32> to vector<16x399xf32>
    %307 = tpu.concatenate %305, %306 in 1 : vector<16x1xf32>, vector<16x399xf32> -> vector<16x400xf32>
    %308 = vector.shape_cast %304 : vector<1x400xi1> to vector<1x400xi1>
    %309 = vector.broadcast %308 : vector<1x400xi1> to vector<16x400xi1>
    %310 = arith.select %309, %307, %302 : vector<16x400xi1>, vector<16x400xf32>
    %c4_i32_49 = arith.constant 4 : i32
    %311 = vector.broadcast %c4_i32_49 : i32 to vector<1x400xi32>
    %312 = arith.cmpi eq, %0, %311 : vector<1x400xi32>
    %313 = vector.extract_strided_slice %310 {offsets = [0, 398], sizes = [16, 2], strides = [1, 1]} : vector<16x400xf32> to vector<16x2xf32>
    %314 = vector.extract_strided_slice %310 {offsets = [0, 0], sizes = [16, 398], strides = [1, 1]} : vector<16x400xf32> to vector<16x398xf32>
    %315 = tpu.concatenate %313, %314 in 1 : vector<16x2xf32>, vector<16x398xf32> -> vector<16x400xf32>
    %316 = vector.shape_cast %312 : vector<1x400xi1> to vector<1x400xi1>
    %317 = vector.broadcast %316 : vector<1x400xi1> to vector<16x400xi1>
    %318 = arith.select %317, %315, %310 : vector<16x400xi1>, vector<16x400xf32>
    %c5_i32_50 = arith.constant 5 : i32
    %319 = vector.broadcast %c5_i32_50 : i32 to vector<1x400xi32>
    %320 = arith.cmpi eq, %0, %319 : vector<1x400xi32>
    %321 = vector.extract_strided_slice %318 {offsets = [0, 40], sizes = [16, 360], strides = [1, 1]} : vector<16x400xf32> to vector<16x360xf32>
    %322 = vector.extract_strided_slice %318 {offsets = [0, 0], sizes = [16, 40], strides = [1, 1]} : vector<16x400xf32> to vector<16x40xf32>
    %323 = tpu.concatenate %321, %322 in 1 : vector<16x360xf32>, vector<16x40xf32> -> vector<16x400xf32>
    %324 = vector.shape_cast %320 : vector<1x400xi1> to vector<1x400xi1>
    %325 = vector.broadcast %324 : vector<1x400xi1> to vector<16x400xi1>
    %326 = arith.select %325, %323, %318 : vector<16x400xi1>, vector<16x400xf32>
    %c6_i32_51 = arith.constant 6 : i32
    %327 = vector.broadcast %c6_i32_51 : i32 to vector<1x400xi32>
    %328 = arith.cmpi eq, %0, %327 : vector<1x400xi32>
    %329 = vector.extract_strided_slice %326 {offsets = [0, 20], sizes = [16, 380], strides = [1, 1]} : vector<16x400xf32> to vector<16x380xf32>
    %330 = vector.extract_strided_slice %326 {offsets = [0, 0], sizes = [16, 20], strides = [1, 1]} : vector<16x400xf32> to vector<16x20xf32>
    %331 = tpu.concatenate %329, %330 in 1 : vector<16x380xf32>, vector<16x20xf32> -> vector<16x400xf32>
    %332 = vector.shape_cast %328 : vector<1x400xi1> to vector<1x400xi1>
    %333 = vector.broadcast %332 : vector<1x400xi1> to vector<16x400xi1>
    %334 = arith.select %333, %331, %326 : vector<16x400xi1>, vector<16x400xf32>
    %c7_i32_52 = arith.constant 7 : i32
    %335 = vector.broadcast %c7_i32_52 : i32 to vector<1x400xi32>
    %336 = arith.cmpi eq, %0, %335 : vector<1x400xi32>
    %337 = vector.extract_strided_slice %334 {offsets = [0, 380], sizes = [16, 20], strides = [1, 1]} : vector<16x400xf32> to vector<16x20xf32>
    %338 = vector.extract_strided_slice %334 {offsets = [0, 0], sizes = [16, 380], strides = [1, 1]} : vector<16x400xf32> to vector<16x380xf32>
    %339 = tpu.concatenate %337, %338 in 1 : vector<16x20xf32>, vector<16x380xf32> -> vector<16x400xf32>
    %340 = vector.shape_cast %336 : vector<1x400xi1> to vector<1x400xi1>
    %341 = vector.broadcast %340 : vector<1x400xi1> to vector<16x400xi1>
    %342 = arith.select %341, %339, %334 : vector<16x400xi1>, vector<16x400xf32>
    %c8_i32_53 = arith.constant 8 : i32
    %343 = vector.broadcast %c8_i32_53 : i32 to vector<1x400xi32>
    %344 = arith.cmpi eq, %0, %343 : vector<1x400xi32>
    %345 = vector.extract_strided_slice %342 {offsets = [0, 360], sizes = [16, 40], strides = [1, 1]} : vector<16x400xf32> to vector<16x40xf32>
    %346 = vector.extract_strided_slice %342 {offsets = [0, 0], sizes = [16, 360], strides = [1, 1]} : vector<16x400xf32> to vector<16x360xf32>
    %347 = tpu.concatenate %345, %346 in 1 : vector<16x40xf32>, vector<16x360xf32> -> vector<16x400xf32>
    %348 = vector.shape_cast %344 : vector<1x400xi1> to vector<1x400xi1>
    %349 = vector.broadcast %348 : vector<1x400xi1> to vector<16x400xi1>
    %350 = arith.select %349, %347, %342 : vector<16x400xi1>, vector<16x400xf32>
    %cst_54 = arith.constant 0.000000e+00 : f32
    %351 = vector.broadcast %cst_54 : f32 to vector<16x42xf32>
    %352 = tpu.concatenate %351, %350, %351 in 1 : vector<16x42xf32>, vector<16x400xf32>, vector<16x42xf32> -> vector<16x484xf32>
    %353 = vector.extract_strided_slice %352 {offsets = [0, 21], sizes = [16, 400], strides = [1, 1]} : vector<16x484xf32> to vector<16x400xf32>
    %354 = vector.extract_strided_slice %352 {offsets = [0, 22], sizes = [16, 400], strides = [1, 1]} : vector<16x484xf32> to vector<16x400xf32>
    %355 = vector.extract_strided_slice %352 {offsets = [0, 23], sizes = [16, 400], strides = [1, 1]} : vector<16x484xf32> to vector<16x400xf32>
    %356 = vector.extract_strided_slice %352 {offsets = [0, 41], sizes = [16, 400], strides = [1, 1]} : vector<16x484xf32> to vector<16x400xf32>
    %357 = vector.extract_strided_slice %352 {offsets = [0, 42], sizes = [16, 400], strides = [1, 1]} : vector<16x484xf32> to vector<16x400xf32>
    %358 = vector.extract_strided_slice %352 {offsets = [0, 43], sizes = [16, 400], strides = [1, 1]} : vector<16x484xf32> to vector<16x400xf32>
    %359 = vector.extract_strided_slice %352 {offsets = [0, 61], sizes = [16, 400], strides = [1, 1]} : vector<16x484xf32> to vector<16x400xf32>
    %360 = vector.extract_strided_slice %352 {offsets = [0, 62], sizes = [16, 400], strides = [1, 1]} : vector<16x484xf32> to vector<16x400xf32>
    %361 = vector.extract_strided_slice %352 {offsets = [0, 63], sizes = [16, 400], strides = [1, 1]} : vector<16x484xf32> to vector<16x400xf32>
    %362 = tpu.concatenate %353, %354, %355, %356, %357, %358, %359, %360, %361 in 0 : vector<16x400xf32>, vector<16x400xf32>, vector<16x400xf32>, vector<16x400xf32>, vector<16x400xf32>, vector<16x400xf32>, vector<16x400xf32>, vector<16x400xf32>, vector<16x400xf32> -> vector<144x400xf32>
    %c0_55 = arith.constant 0 : index
    %c0_56 = arith.constant 0 : index
    %363 = vector.load %arg11[%c0_55, %c0_56] : memref<8x144xf32, #tpu.memory_space<vmem>>, vector<8x144xf32>
    %cst_57 = arith.constant dense<0.000000e+00> : vector<8x400xf32>
    %364 = tpu.matmul %363, %362, %cst_57 {dimension_numbers = #tpu.dot_dimension_numbers<[1], [0], [0], [1], [0, 0, 1, 1], [], []>} : vector<8x144xf32>, vector<144x400xf32>, vector<8x400xf32> -> vector<8x400xf32>
    %c0_58 = arith.constant 0 : index
    %c0_59 = arith.constant 0 : index
    %365 = vector.load %arg12[%c0_58, %c0_59] : memref<8x1xf32, #tpu.memory_space<vmem>>, vector<8x1xf32>
    %366 = vector.broadcast %365 : vector<8x1xf32> to vector<8x400xf32>
    %367 = arith.addf %364, %366 : vector<8x400xf32>
    %c1_i32_60 = arith.constant 1 : i32
    %368 = vector.broadcast %c1_i32_60 : i32 to vector<1x400xi32>
    %369 = arith.cmpi eq, %0, %368 : vector<1x400xi32>
    %370 = vector.extract_strided_slice %367 {offsets = [0, 2], sizes = [8, 398], strides = [1, 1]} : vector<8x400xf32> to vector<8x398xf32>
    %371 = vector.extract_strided_slice %367 {offsets = [0, 0], sizes = [8, 2], strides = [1, 1]} : vector<8x400xf32> to vector<8x2xf32>
    %372 = tpu.concatenate %370, %371 in 1 : vector<8x398xf32>, vector<8x2xf32> -> vector<8x400xf32>
    %373 = vector.shape_cast %369 : vector<1x400xi1> to vector<1x400xi1>
    %374 = vector.broadcast %373 : vector<1x400xi1> to vector<8x400xi1>
    %375 = arith.select %374, %372, %367 : vector<8x400xi1>, vector<8x400xf32>
    %c2_i32_61 = arith.constant 2 : i32
    %376 = vector.broadcast %c2_i32_61 : i32 to vector<1x400xi32>
    %377 = arith.cmpi eq, %0, %376 : vector<1x400xi32>
    %378 = vector.extract_strided_slice %375 {offsets = [0, 1], sizes = [8, 399], strides = [1, 1]} : vector<8x400xf32> to vector<8x399xf32>
    %379 = vector.extract_strided_slice %375 {offsets = [0, 0], sizes = [8, 1], strides = [1, 1]} : vector<8x400xf32> to vector<8x1xf32>
    %380 = tpu.concatenate %378, %379 in 1 : vector<8x399xf32>, vector<8x1xf32> -> vector<8x400xf32>
    %381 = vector.shape_cast %377 : vector<1x400xi1> to vector<1x400xi1>
    %382 = vector.broadcast %381 : vector<1x400xi1> to vector<8x400xi1>
    %383 = arith.select %382, %380, %375 : vector<8x400xi1>, vector<8x400xf32>
    %c3_i32_62 = arith.constant 3 : i32
    %384 = vector.broadcast %c3_i32_62 : i32 to vector<1x400xi32>
    %385 = arith.cmpi eq, %0, %384 : vector<1x400xi32>
    %386 = vector.extract_strided_slice %383 {offsets = [0, 399], sizes = [8, 1], strides = [1, 1]} : vector<8x400xf32> to vector<8x1xf32>
    %387 = vector.extract_strided_slice %383 {offsets = [0, 0], sizes = [8, 399], strides = [1, 1]} : vector<8x400xf32> to vector<8x399xf32>
    %388 = tpu.concatenate %386, %387 in 1 : vector<8x1xf32>, vector<8x399xf32> -> vector<8x400xf32>
    %389 = vector.shape_cast %385 : vector<1x400xi1> to vector<1x400xi1>
    %390 = vector.broadcast %389 : vector<1x400xi1> to vector<8x400xi1>
    %391 = arith.select %390, %388, %383 : vector<8x400xi1>, vector<8x400xf32>
    %c4_i32_63 = arith.constant 4 : i32
    %392 = vector.broadcast %c4_i32_63 : i32 to vector<1x400xi32>
    %393 = arith.cmpi eq, %0, %392 : vector<1x400xi32>
    %394 = vector.extract_strided_slice %391 {offsets = [0, 398], sizes = [8, 2], strides = [1, 1]} : vector<8x400xf32> to vector<8x2xf32>
    %395 = vector.extract_strided_slice %391 {offsets = [0, 0], sizes = [8, 398], strides = [1, 1]} : vector<8x400xf32> to vector<8x398xf32>
    %396 = tpu.concatenate %394, %395 in 1 : vector<8x2xf32>, vector<8x398xf32> -> vector<8x400xf32>
    %397 = vector.shape_cast %393 : vector<1x400xi1> to vector<1x400xi1>
    %398 = vector.broadcast %397 : vector<1x400xi1> to vector<8x400xi1>
    %399 = arith.select %398, %396, %391 : vector<8x400xi1>, vector<8x400xf32>
    %c5_i32_64 = arith.constant 5 : i32
    %400 = vector.broadcast %c5_i32_64 : i32 to vector<1x400xi32>
    %401 = arith.cmpi eq, %0, %400 : vector<1x400xi32>
    %402 = vector.extract_strided_slice %399 {offsets = [0, 40], sizes = [8, 360], strides = [1, 1]} : vector<8x400xf32> to vector<8x360xf32>
    %403 = vector.extract_strided_slice %399 {offsets = [0, 0], sizes = [8, 40], strides = [1, 1]} : vector<8x400xf32> to vector<8x40xf32>
    %404 = tpu.concatenate %402, %403 in 1 : vector<8x360xf32>, vector<8x40xf32> -> vector<8x400xf32>
    %405 = vector.shape_cast %401 : vector<1x400xi1> to vector<1x400xi1>
    %406 = vector.broadcast %405 : vector<1x400xi1> to vector<8x400xi1>
    %407 = arith.select %406, %404, %399 : vector<8x400xi1>, vector<8x400xf32>
    %c6_i32_65 = arith.constant 6 : i32
    %408 = vector.broadcast %c6_i32_65 : i32 to vector<1x400xi32>
    %409 = arith.cmpi eq, %0, %408 : vector<1x400xi32>
    %410 = vector.extract_strided_slice %407 {offsets = [0, 20], sizes = [8, 380], strides = [1, 1]} : vector<8x400xf32> to vector<8x380xf32>
    %411 = vector.extract_strided_slice %407 {offsets = [0, 0], sizes = [8, 20], strides = [1, 1]} : vector<8x400xf32> to vector<8x20xf32>
    %412 = tpu.concatenate %410, %411 in 1 : vector<8x380xf32>, vector<8x20xf32> -> vector<8x400xf32>
    %413 = vector.shape_cast %409 : vector<1x400xi1> to vector<1x400xi1>
    %414 = vector.broadcast %413 : vector<1x400xi1> to vector<8x400xi1>
    %415 = arith.select %414, %412, %407 : vector<8x400xi1>, vector<8x400xf32>
    %c7_i32_66 = arith.constant 7 : i32
    %416 = vector.broadcast %c7_i32_66 : i32 to vector<1x400xi32>
    %417 = arith.cmpi eq, %0, %416 : vector<1x400xi32>
    %418 = vector.extract_strided_slice %415 {offsets = [0, 380], sizes = [8, 20], strides = [1, 1]} : vector<8x400xf32> to vector<8x20xf32>
    %419 = vector.extract_strided_slice %415 {offsets = [0, 0], sizes = [8, 380], strides = [1, 1]} : vector<8x400xf32> to vector<8x380xf32>
    %420 = tpu.concatenate %418, %419 in 1 : vector<8x20xf32>, vector<8x380xf32> -> vector<8x400xf32>
    %421 = vector.shape_cast %417 : vector<1x400xi1> to vector<1x400xi1>
    %422 = vector.broadcast %421 : vector<1x400xi1> to vector<8x400xi1>
    %423 = arith.select %422, %420, %415 : vector<8x400xi1>, vector<8x400xf32>
    %c8_i32_67 = arith.constant 8 : i32
    %424 = vector.broadcast %c8_i32_67 : i32 to vector<1x400xi32>
    %425 = arith.cmpi eq, %0, %424 : vector<1x400xi32>
    %426 = vector.extract_strided_slice %423 {offsets = [0, 360], sizes = [8, 40], strides = [1, 1]} : vector<8x400xf32> to vector<8x40xf32>
    %427 = vector.extract_strided_slice %423 {offsets = [0, 0], sizes = [8, 360], strides = [1, 1]} : vector<8x400xf32> to vector<8x360xf32>
    %428 = tpu.concatenate %426, %427 in 1 : vector<8x40xf32>, vector<8x360xf32> -> vector<8x400xf32>
    %429 = vector.shape_cast %425 : vector<1x400xi1> to vector<1x400xi1>
    %430 = vector.broadcast %429 : vector<1x400xi1> to vector<8x400xi1>
    %431 = arith.select %430, %428, %423 : vector<8x400xi1>, vector<8x400xf32>
    %cst_68 = arith.constant 0.000000e+00 : f32
    %432 = vector.broadcast %cst_68 : f32 to vector<8x42xf32>
    %433 = tpu.concatenate %432, %431, %432 in 1 : vector<8x42xf32>, vector<8x400xf32>, vector<8x42xf32> -> vector<8x484xf32>
    %434 = vector.extract_strided_slice %433 {offsets = [0, 0], sizes = [8, 400], strides = [1, 1]} : vector<8x484xf32> to vector<8x400xf32>
    %435 = vector.extract_strided_slice %433 {offsets = [0, 1], sizes = [8, 400], strides = [1, 1]} : vector<8x484xf32> to vector<8x400xf32>
    %436 = vector.extract_strided_slice %433 {offsets = [0, 2], sizes = [8, 400], strides = [1, 1]} : vector<8x484xf32> to vector<8x400xf32>
    %437 = vector.extract_strided_slice %433 {offsets = [0, 3], sizes = [8, 400], strides = [1, 1]} : vector<8x484xf32> to vector<8x400xf32>
    %438 = vector.extract_strided_slice %433 {offsets = [0, 4], sizes = [8, 400], strides = [1, 1]} : vector<8x484xf32> to vector<8x400xf32>
    %439 = vector.extract_strided_slice %433 {offsets = [0, 20], sizes = [8, 400], strides = [1, 1]} : vector<8x484xf32> to vector<8x400xf32>
    %440 = vector.extract_strided_slice %433 {offsets = [0, 21], sizes = [8, 400], strides = [1, 1]} : vector<8x484xf32> to vector<8x400xf32>
    %441 = vector.extract_strided_slice %433 {offsets = [0, 22], sizes = [8, 400], strides = [1, 1]} : vector<8x484xf32> to vector<8x400xf32>
    %442 = vector.extract_strided_slice %433 {offsets = [0, 23], sizes = [8, 400], strides = [1, 1]} : vector<8x484xf32> to vector<8x400xf32>
    %443 = vector.extract_strided_slice %433 {offsets = [0, 24], sizes = [8, 400], strides = [1, 1]} : vector<8x484xf32> to vector<8x400xf32>
    %444 = vector.extract_strided_slice %433 {offsets = [0, 40], sizes = [8, 400], strides = [1, 1]} : vector<8x484xf32> to vector<8x400xf32>
    %445 = vector.extract_strided_slice %433 {offsets = [0, 41], sizes = [8, 400], strides = [1, 1]} : vector<8x484xf32> to vector<8x400xf32>
    %446 = vector.extract_strided_slice %433 {offsets = [0, 42], sizes = [8, 400], strides = [1, 1]} : vector<8x484xf32> to vector<8x400xf32>
    %447 = vector.extract_strided_slice %433 {offsets = [0, 43], sizes = [8, 400], strides = [1, 1]} : vector<8x484xf32> to vector<8x400xf32>
    %448 = vector.extract_strided_slice %433 {offsets = [0, 44], sizes = [8, 400], strides = [1, 1]} : vector<8x484xf32> to vector<8x400xf32>
    %449 = vector.extract_strided_slice %433 {offsets = [0, 60], sizes = [8, 400], strides = [1, 1]} : vector<8x484xf32> to vector<8x400xf32>
    %450 = vector.extract_strided_slice %433 {offsets = [0, 61], sizes = [8, 400], strides = [1, 1]} : vector<8x484xf32> to vector<8x400xf32>
    %451 = vector.extract_strided_slice %433 {offsets = [0, 62], sizes = [8, 400], strides = [1, 1]} : vector<8x484xf32> to vector<8x400xf32>
    %452 = vector.extract_strided_slice %433 {offsets = [0, 63], sizes = [8, 400], strides = [1, 1]} : vector<8x484xf32> to vector<8x400xf32>
    %453 = vector.extract_strided_slice %433 {offsets = [0, 64], sizes = [8, 400], strides = [1, 1]} : vector<8x484xf32> to vector<8x400xf32>
    %454 = vector.extract_strided_slice %433 {offsets = [0, 80], sizes = [8, 400], strides = [1, 1]} : vector<8x484xf32> to vector<8x400xf32>
    %455 = vector.extract_strided_slice %433 {offsets = [0, 81], sizes = [8, 400], strides = [1, 1]} : vector<8x484xf32> to vector<8x400xf32>
    %456 = vector.extract_strided_slice %433 {offsets = [0, 82], sizes = [8, 400], strides = [1, 1]} : vector<8x484xf32> to vector<8x400xf32>
    %457 = vector.extract_strided_slice %433 {offsets = [0, 83], sizes = [8, 400], strides = [1, 1]} : vector<8x484xf32> to vector<8x400xf32>
    %458 = vector.extract_strided_slice %433 {offsets = [0, 84], sizes = [8, 400], strides = [1, 1]} : vector<8x484xf32> to vector<8x400xf32>
    %459 = tpu.concatenate %434, %435, %436, %437, %438, %439, %440, %441, %442, %443, %444, %445, %446, %447, %448, %449 in 0 : vector<8x400xf32>, vector<8x400xf32>, vector<8x400xf32>, vector<8x400xf32>, vector<8x400xf32>, vector<8x400xf32>, vector<8x400xf32>, vector<8x400xf32>, vector<8x400xf32>, vector<8x400xf32>, vector<8x400xf32>, vector<8x400xf32>, vector<8x400xf32>, vector<8x400xf32>, vector<8x400xf32>, vector<8x400xf32> -> vector<128x400xf32>
    %460 = tpu.concatenate %450, %451, %452, %453, %454, %455, %456, %457, %458 in 0 : vector<8x400xf32>, vector<8x400xf32>, vector<8x400xf32>, vector<8x400xf32>, vector<8x400xf32>, vector<8x400xf32>, vector<8x400xf32>, vector<8x400xf32>, vector<8x400xf32> -> vector<72x400xf32>
    %461 = tpu.concatenate %459, %460 in 0 : vector<128x400xf32>, vector<72x400xf32> -> vector<200x400xf32>
    %c0_69 = arith.constant 0 : index
    %c0_70 = arith.constant 0 : index
    %462 = vector.load %arg13[%c0_69, %c0_70] : memref<8x200xf32, #tpu.memory_space<vmem>>, vector<8x200xf32>
    %cst_71 = arith.constant dense<0.000000e+00> : vector<8x400xf32>
    %463 = tpu.matmul %462, %461, %cst_71 {dimension_numbers = #tpu.dot_dimension_numbers<[1], [0], [0], [1], [0, 0, 1, 1], [], []>} : vector<8x200xf32>, vector<200x400xf32>, vector<8x400xf32> -> vector<8x400xf32>
    %c0_72 = arith.constant 0 : index
    %c0_73 = arith.constant 0 : index
    %464 = vector.load %arg14[%c0_72, %c0_73] : memref<8x1xf32, #tpu.memory_space<vmem>>, vector<8x1xf32>
    %465 = vector.broadcast %464 : vector<8x1xf32> to vector<8x400xf32>
    %466 = arith.addf %463, %465 : vector<8x400xf32>
    %467 = vector.extract_strided_slice %466 {offsets = [0, 0], sizes = [4, 400], strides = [1, 1]} : vector<8x400xf32> to vector<4x400xf32>
    %468 = vector.shape_cast %467 : vector<4x400xf32> to vector<1x4x400xf32>
    %c0_74 = arith.constant 0 : index
    %c0_75 = arith.constant 0 : index
    %c0_76 = arith.constant 0 : index
    %469 = vector.load %arg15[%c0_74, %c0_75, %c0_76] : memref<1x4x400xf32, #tpu.memory_space<vmem>>, vector<1x4x400xf32>
    tpu.vector_store %arg15[%c0_74, %c0_75, %c0_76], %468 {strides = array<i32>} : memref<1x4x400xf32, #tpu.memory_space<vmem>>, vector<1x4x400xf32>,
    return
  }
  func.func @transform_0(%arg0: i32) -> (i32, i32, i32) {
    %c0_i32 = arith.constant 0 : i32
    %c0_i32_0 = arith.constant 0 : i32
    %c0_i32_1 = arith.constant 0 : i32
    return %arg0, %c0_i32, %c0_i32_0 : i32, i32, i32
  }
  func.func @transform_1(%arg0: i32) -> (i32, i32) {
    %c0_i32 = arith.constant 0 : i32
    %c0_i32_0 = arith.constant 0 : i32
    %c0_i32_1 = arith.constant 0 : i32
    return %c0_i32, %c0_i32_0 : i32, i32
  }
  func.func @transform_2(%arg0: i32) -> (i32, i32) {
    %c0_i32 = arith.constant 0 : i32
    %c0_i32_0 = arith.constant 0 : i32
    %c0_i32_1 = arith.constant 0 : i32
    return %c0_i32, %c0_i32_0 : i32, i32
  }
  func.func @transform_3(%arg0: i32) -> (i32, i32) {
    %c0_i32 = arith.constant 0 : i32
    %c0_i32_0 = arith.constant 0 : i32
    %c0_i32_1 = arith.constant 0 : i32
    return %c0_i32, %c0_i32_0 : i32, i32
  }
  func.func @transform_4(%arg0: i32) -> (i32, i32) {
    %c0_i32 = arith.constant 0 : i32
    %c0_i32_0 = arith.constant 0 : i32
    %c0_i32_1 = arith.constant 0 : i32
    return %c0_i32, %c0_i32_0 : i32, i32
  }
  func.func @transform_5(%arg0: i32) -> (i32, i32) {
    %c0_i32 = arith.constant 0 : i32
    %c0_i32_0 = arith.constant 0 : i32
    %c0_i32_1 = arith.constant 0 : i32
    return %c0_i32, %c0_i32_0 : i32, i32
  }
  func.func @transform_6(%arg0: i32) -> (i32, i32) {
    %c0_i32 = arith.constant 0 : i32
    %c0_i32_0 = arith.constant 0 : i32
    %c0_i32_1 = arith.constant 0 : i32
    return %c0_i32, %c0_i32_0 : i32, i32
  }
  func.func @transform_7(%arg0: i32) -> (i32, i32) {
    %c0_i32 = arith.constant 0 : i32
    %c0_i32_0 = arith.constant 0 : i32
    %c0_i32_1 = arith.constant 0 : i32
    return %c0_i32, %c0_i32_0 : i32, i32
  }
  func.func @transform_8(%arg0: i32) -> (i32, i32) {
    %c0_i32 = arith.constant 0 : i32
    %c0_i32_0 = arith.constant 0 : i32
    %c0_i32_1 = arith.constant 0 : i32
    return %c0_i32, %c0_i32_0 : i32, i32
  }
  func.func @transform_9(%arg0: i32) -> (i32, i32) {
    %c0_i32 = arith.constant 0 : i32
    %c0_i32_0 = arith.constant 0 : i32
    %c0_i32_1 = arith.constant 0 : i32
    return %c0_i32, %c0_i32_0 : i32, i32
  }
  func.func @transform_10(%arg0: i32) -> (i32, i32) {
    %c0_i32 = arith.constant 0 : i32
    %c0_i32_0 = arith.constant 0 : i32
    %c0_i32_1 = arith.constant 0 : i32
    return %c0_i32, %c0_i32_0 : i32, i32
  }
  func.func @transform_11(%arg0: i32) -> (i32, i32) {
    %c0_i32 = arith.constant 0 : i32
    %c0_i32_0 = arith.constant 0 : i32
    %c0_i32_1 = arith.constant 0 : i32
    return %c0_i32, %c0_i32_0 : i32, i32
  }
  func.func @transform_12(%arg0: i32) -> (i32, i32) {
    %c0_i32 = arith.constant 0 : i32
    %c0_i32_0 = arith.constant 0 : i32
    %c0_i32_1 = arith.constant 0 : i32
    return %c0_i32, %c0_i32_0 : i32, i32
  }
  func.func @transform_13(%arg0: i32) -> (i32, i32) {
    %c0_i32 = arith.constant 0 : i32
    %c0_i32_0 = arith.constant 0 : i32
    %c0_i32_1 = arith.constant 0 : i32
    return %c0_i32, %c0_i32_0 : i32, i32
  }
  func.func @transform_14(%arg0: i32) -> (i32, i32, i32) {
    %c0_i32 = arith.constant 0 : i32
    %c0_i32_0 = arith.constant 0 : i32
    %c0_i32_1 = arith.constant 0 : i32
    return %arg0, %c0_i32, %c0_i32_0 : i32, i32, i32
  }
}

</mosaic_0001>

<bundles_post_ra>
// kernel: tpu_custom_call.1
= control target key start
LH: loop header
LB: loop body
LE: loop exit
PB: predicated region body
PF: predicated region fallthrough
CT: control target
= control target key end

     0   :  { %s15209_s0 = inlined_call_operand.vmem [shape: f32[2,8,484], index: 0, kind: input, shape index: {}]   ;;  %s15210_s1 = inlined_call_operand.hbm [shape: s32[1,400], index: 1, kind: input, shape index: {}]   ;;  %s15211_s2 = inlined_call_operand.hbm [shape: f32[8,200], index: 2, kind: input, shape index: {}]   ;;  %s15212_s3 = inlined_call_operand.vmem [shape: f32[8,1], index: 3, kind: input, shape index: {}]   ;;  %s15213_s4 = inlined_call_operand.hbm [shape: f32[16,72], index: 4, kind: input, shape index: {}]   ;;  %s15214_s5 = inlined_call_operand.vmem [shape: f32[16,1], index: 5, kind: input, shape index: {}]   ;;  %s15215_s6 = inlined_call_operand.hbm [shape: f32[32,144], index: 6, kind: input, shape index: {}]   ;;  %s15216_s7 = inlined_call_operand.vmem [shape: f32[32,1], index: 7, kind: input, shape index: {}]   ;;  %s15217_s8 = inlined_call_operand.vmem [shape: f32[16,288], index: 8, kind: input, shape index: {}]   ;;  %s15218_s9 = inlined_call_operand.vmem [shape: f32[16,1], index: 9, kind: input, shape index: {}]   ;;  %s15219_s10 = inlined_call_operand.vmem [shape: f32[8,144], index: 10, kind: input, shape index: {}]   ;;  %s15220_s11 = inlined_call_operand.vmem [shape: f32[8,1], index: 11, kind: input, shape index: {}]   ;;  %s15221_s12 = inlined_call_operand.hbm [shape: f32[8,200], index: 12, kind: input, shape index: {}]   ;;  %s15222_s13 = inlined_call_operand.vmem [shape: f32[8,1], index: 13, kind: input, shape index: {}]   ;;  %s15223_s14 = inlined_call_operand.hbm [shape: f32[2,4,400], index: 14, kind: output, shape index: {}]  }
   0x1   :  { %15523 = sst [smem:[#allocation58_spill]] %s15209_s0 }
   0x2   :  { %15524 = sst [smem:[#allocation59_spill]] %s15210_s1 }
   0x3   :  { %15525 = sst [smem:[#allocation60_spill]] %s15211_s2 }
   0x4   :  { %15526 = sst [smem:[#allocation61_spill]] %s15212_s3 }
   0x5   :  { %15527 = sst [smem:[#allocation62_spill]] %s15213_s4 }
   0x6   :  { %15528 = sst [smem:[#allocation63_spill]] %s15214_s5 }
   0x7   :  { %15529 = sst [smem:[#allocation64_spill]] %s15215_s6 }
   0x8   :  { %15530 = sst [smem:[#allocation65_spill]] %s15216_s7 }
   0x9   :  { %15531 = sst [smem:[#allocation66_spill]] %s15223_s14 }
   0xa   :  { %19 = vsyncpa [#allocation3], 0 }
   0xb   :  { %20 = vsyncpa [#allocation6], 0 }
   0xc   :  { %21 = vsyncpa [#allocation9], 0 }
   0xd   :  { %22 = vsyncpa [#allocation4], 0 }
   0xe   :  { %24 = vsyncpa [#allocation4 + $0x1], 0  ;;  %s10908_s29 = smov 0   ;;  %s10910_s30 = smov 0  }
   0xf   :  { %s10912_s15 = smov 0   ;;  %s10914_s16 = smov 0  }
  0x10 LB: > { %15532 = sst [smem:[#allocation16_spill]] %s10778_s29  ;;  %s10929_s17 = sadd.s32 4294967295, %s10790_s16   ;;  %s10790_s16 = sphi %s10914_s16, %s16632_s16   ;;  %s10786_s15 = sphi %s10912_s15, %s16634_s15   ;;  %s10782_s30 = sphi %s10910_s30, %s16636_s30   ;;  %s10778_s29 = sphi %s10908_s29, %s16635_s29  }
  0x11   : > { %15533 = sst [smem:[#allocation17_spill]] %s10786_s15  ;;  %s7110_s18 = sadd.s32 4294967294, %s10790_s16  }
  0x12   : > { %15534 = sst [smem:[#allocation18_spill]] %s10790_s16  ;;  %s10933_s19 = sadd.s32 1, %s10790_s16  }
  0x13   : > { %15535 = sst [smem:[#allocation19_spill]] %s10933_s19  ;;  %s336_s20 = sadd.s32 1, %s10786_s15 }
  0x14   : > { %s333_s21 = ssub.s32 %s10790_s16, %s10933_s19  ;;  %p346_p0 = scmp.ne.s32.totalorder %s10786_s15, %s10782_s30 }
  0x15   : > { %p334_p1 = scmp.eq.s32.totalorder %s333_s21, 0  ;;  %p347_p2 = scmp.eq.s32.totalorder %s10929_s17, 1 }
  0x16   : > { %p352_p3 = scmp.ne.s32.totalorder %s10782_s30, %s10778_s29  ;;  %p353_p4 = scmp.eq.s32.totalorder %s7110_s18, 1 }
  0x17   : > { %s10944_s22 = scalar_select %p334_p1, %s10786_s15, %s336_s20  }
  0x18   : > { %p10946_p5 = por %p347_p2, %p346_p0  ;;  %p10950_p6 = por %p353_p4, %p352_p3 }
  0x19   : > { %15536 = sst [smem:[#allocation20_spill]] %s10944_s22  ;;  %p7111_p7 = scmp.ge.s32.totalorder %s10790_s16, 1 }
  0x1a   : > { %s15537_s23 = scalar_select %p10946_p5, 1, 0 }
  0x1b   : > { %s15539_s24 = scalar_select %p10950_p6, 1, 0 }
  0x1c   : > { %15538 = sst [smem:[#allocation21_spill]] %s15537_s23  ;;  %p360_p8 = scmp.lt.s32.totalorder %s10790_s16, 3 }
  0x1d   : > { %15540 = sst [smem:[#allocation22_spill]] %s15539_s24  ;;  %p15230_p9 = scmp.eq.s32.totalorder %s10929_s17, 0 }
  0x1e   : > { %p10957_p10 = pnand %p7111_p7, %p360_p8  ;;  %s10792_s26 = smov [#allocation5]  }
  0x1f   : > { %s384_s27 = sshll.u32 %s10792_s26, 4  ;;  %s10793_s28 = smov [#allocation8]   ;;  %s385_s27 = int_to_ptr.vmem [resolvable:$true] %s384_s27 }
  0x20   : > { %s15541_s25 = scalar_select %p10957_p10, 1, 0 }
  0x21   : > { %p7711_p11 = pneg %p10957_p10  ;;  %s413_s18 = sshll.u32 %s10793_s28, 4  ;;  %s10969_s18 = int_to_ptr.vmem [resolvable:$true] %s413_s18 }
  0x22   : > { %s10794_s21 = smov [#allocation2]   ;;  %s15543_s2 = sld [smem:[#allocation60_spill]] }
  0x23   : > { %p10965_p12 = pnand %p15230_p9, %p7711_p11  ;;  %s10971_s22 = sshll.u32 %s10794_s21, 4  ;;  %s374_s22 = int_to_ptr.vmem [resolvable:$true] %s10971_s22 }
  0x25   : > { %p10981_p0 = pneg %p10965_p12 }
  0x28   : > { %s10576_s26 = scalar_lea.hbm %s15543_s2, 256 }
  0x29   : > { %p10577_p13 = scmp.ne.s32.totalorder %s15543_s2, %s10576_s26  ;;  %p10583_p3 = scmp.lt.u32.totalorder %s10576_s26, %s15543_s2 }
  0x2b   : > { %p10579_p1 = pnand %p10981_p0, %p10577_p13 }
  0x2d   : > { %p10580_p2 = pneg %p10579_p1 }
  0x2f   : > { %p10585_p4 = pnand %p10583_p3, %p10580_p2 }
  0x31   : > { %10588 = shalt.err (!%p10585_p4)
}
  0x32   : > { %s10589_s15 = scalar_lea.vmem %s385_s27, 256  ;;  %p10597_p9 = scmp.lt.s32.totalorder %s385_s27, %s385_s27 }
  0x33   : > { %p10590_p7 = scmp.ne.s32.totalorder %s385_s27, %s10589_s15  ;;  %p10598_p6 = scmp.lt.s32.totalorder %s10589_s15, %s10589_s15 }
  0x35   : > { %p10592_p8 = pnand %p10590_p7, %p10981_p0  ;;  %p10599_p5 = por %p10598_p6, %p10597_p9 }
  0x37   : > { %p10593_p11 = pneg %p10592_p8 }
  0x39   : > { %p10600_p10 = pnand %p10599_p5, %p10593_p11 }
  0x3b   : > { %10603 = shalt.err (!%p10600_p10)
}
  0x3c   : > { %7717 = dma.hbm_to_vmem [thread:$0]  (!%p10965_p12), %s15543_s2, 256, %s385_s27, [#allocation6]  }
  0x3d   : > { %s15545_s6 = sld [smem:[#allocation64_spill]] }
  0x43   : > { %s10604_s26 = scalar_lea.hbm %s15545_s6, 1024 }
  0x44   : > { %p10605_p13 = scmp.ne.s32.totalorder %s15545_s6, %s10604_s26  ;;  %p10611_p5 = scmp.lt.u32.totalorder %s10604_s26, %s15545_s6 }
  0x46   : > { %p10607_p1 = pnand %p10605_p13, %p10981_p0 }
  0x48   : > { %p10608_p6 = pneg %p10607_p1 }
  0x4a   : > { %p10613_p9 = pnand %p10611_p5, %p10608_p6 }
  0x4c   : > { %10616 = shalt.err (!%p10613_p9)
}
  0x4d   : > { %s10617_s27 = scalar_lea.vmem %s10969_s18, 1024  ;;  %p10625_p4 = scmp.lt.s32.totalorder %s10969_s18, %s10969_s18 }
  0x4e   : > { %p10618_p10 = scmp.ne.s32.totalorder %s10969_s18, %s10617_s27  ;;  %p10626_p7 = scmp.lt.s32.totalorder %s10617_s27, %s10617_s27 }
  0x50   : > { %p10620_p2 = pnand %p10618_p10, %p10981_p0  ;;  %p10627_p8 = por %p10626_p7, %p10625_p4 }
  0x52   : > { %p10621_p3 = pneg %p10620_p2 }
  0x54   : > { %p10628_p11 = pnand %p10627_p8, %p10621_p3 }
  0x56   : > { %10631 = shalt.err (!%p10628_p11)
}
  0x57   : > { %s10795_s14 = smov 256   ;;  %s10796_s23 = smov 16  }
  0x58   : > { %7723 = dma.hbm_to_vmem [thread:$0]  (!%p10965_p12), %s15545_s6, 1024, %s10969_s18, [#allocation9], %s10795_s14, %s10795_s14, %s10796_s23  }
  0x59   : > { %s15546_s1 = sld [smem:[#allocation59_spill]] }
  0x5f   : > { %s10632_s26 = scalar_lea.hbm %s15546_s1, 64 }
  0x60   : > { %p10633_p13 = scmp.ne.s32.totalorder %s15546_s1, %s10632_s26  ;;  %p10639_p5 = scmp.lt.u32.totalorder %s10632_s26, %s15546_s1 }
  0x62   : > { %p10635_p1 = pnand %p10633_p13, %p10981_p0 }
  0x64   : > { %p10636_p6 = pneg %p10635_p1 }
  0x66   : > { %p10641_p9 = pnand %p10639_p5, %p10636_p6 }
  0x68   : > { %10644 = shalt.err (!%p10641_p9)
}
  0x69   : > { %s10645_s29 = scalar_lea.vmem %s374_s22, 64  ;;  %p10653_p4 = scmp.lt.s32.totalorder %s374_s22, %s374_s22 }
  0x6a   : > { %p10646_p10 = scmp.ne.s32.totalorder %s374_s22, %s10645_s29  ;;  %p10654_p7 = scmp.lt.s32.totalorder %s10645_s29, %s10645_s29 }
  0x6c   : > { %p10648_p2 = pnand %p10646_p10, %p10981_p0  ;;  %p10655_p8 = por %p10654_p7, %p10653_p4 }
  0x6e   : > { %p10649_p3 = pneg %p10648_p2 }
  0x70   : > { %p10656_p11 = pnand %p10655_p8, %p10649_p3 }
  0x72   : > { %10659 = shalt.err (!%p10656_p11)
}
  0x73   : > { %7714 = dma.hbm_to_vmem [thread:$0]  (!%p10965_p12), %s15546_s1, 64, %s374_s22, [#allocation3]  }
  0x74   : > { %s10797_s2 = smov [#allocation7]   ;;  %s15547_s4 = sld [smem:[#allocation62_spill]] }
  0x75   : > { %s397_s23 = sshll.u32 %s10797_s2, 4  ;;  %s398_s23 = int_to_ptr.vmem [resolvable:$true] %s397_s23 }
  0x7a   : > { %s10660_s24 = scalar_lea.hbm %s15547_s4, 256 }
  0x7b   : > { %p10661_p13 = scmp.ne.s32.totalorder %s15547_s4, %s10660_s24  ;;  %p10667_p5 = scmp.lt.u32.totalorder %s10660_s24, %s15547_s4 }
  0x7d   : > { %p10663_p1 = pnand %p10661_p13, %p10981_p0 }
  0x7f   : > { %p10664_p6 = pneg %p10663_p1 }
  0x81   : > { %p10669_p9 = pnand %p10667_p5, %p10664_p6 }
  0x83   : > { %10672 = shalt.err (!%p10669_p9)
}
  0x84   : > { %s10673_s22 = scalar_lea.vmem %s398_s23, 256  ;;  %p10681_p4 = scmp.lt.s32.totalorder %s398_s23, %s398_s23 }
  0x85   : > { %p10674_p10 = scmp.ne.s32.totalorder %s398_s23, %s10673_s22  ;;  %p10682_p7 = scmp.lt.s32.totalorder %s10673_s22, %s10673_s22 }
  0x87   : > { %p10676_p2 = pnand %p10674_p10, %p10981_p0  ;;  %p10683_p8 = por %p10682_p7, %p10681_p4 }
  0x89   : > { %p10677_p3 = pneg %p10676_p2 }
  0x8b   : > { %p10684_p11 = pnand %p10683_p8, %p10677_p3 }
  0x8d   : > { %10687 = shalt.err (!%p10684_p11)
}
  0x8e   : > { %s10798_s29 = smov 128   ;;  %s10799_s18 = smov 8  }
  0x8f   : > { %7720 = dma.hbm_to_vmem [thread:$0]  (!%p10965_p12), %s15547_s4, 256, %s398_s23, [#allocation6], %s10798_s29, %s10798_s29, %s10799_s18  }
  0x90   : > { %s10800_s19 = smov [#allocation10]   ;;  %s10688_s21 = scalar_lea.hbm %s15221_s12, 256 }
  0x91   : > { %s442_s16 = sshll.u32 %s10800_s19, 4  ;;  %p10689_p13 = scmp.ne.s32.totalorder %s15221_s12, %s10688_s21  ;;  %s443_s16 = int_to_ptr.vmem [resolvable:$true] %s442_s16 }
  0x92   : > { %p10695_p5 = scmp.lt.u32.totalorder %s10688_s21, %s15221_s12 }
  0x93   : > { %p10691_p1 = pnand %p10689_p13, %p10981_p0 }
  0x95   : > { %p10692_p6 = pneg %p10691_p1 }
  0x97   : > { %p10697_p9 = pnand %p10695_p5, %p10692_p6 }
  0x99   : > { %10700 = shalt.err (!%p10697_p9)
}
  0x9a   : > { %s10701_s23 = scalar_lea.vmem %s443_s16, 256  ;;  %p10709_p4 = scmp.lt.s32.totalorder %s443_s16, %s443_s16 }
  0x9b   : > { %p10702_p10 = scmp.ne.s32.totalorder %s443_s16, %s10701_s23  ;;  %p10710_p7 = scmp.lt.s32.totalorder %s10701_s23, %s10701_s23 }
  0x9d   : > { %p10704_p2 = pnand %p10702_p10, %p10981_p0  ;;  %p10711_p8 = por %p10710_p7, %p10709_p4 }
  0x9f   : > { %p10705_p3 = pneg %p10704_p2 }
  0xa1   : > { %p10712_p11 = pnand %p10711_p8, %p10705_p3 }
  0xa3   : > { %10715 = shalt.err (!%p10712_p11)
}
  0xa4   : > { %7726 = dma.hbm_to_vmem [thread:$0]  (!%p10965_p12), %s15221_s12, 256, %s443_s16, [#allocation9]  }
  0xa5   : > { %p15548_p13 = scmp.ne.s32.totalorder %s15541_s25, 0 }
  0xa7   : > { %466 = sbr.rel (%p15548_p13) target bundleno = 8986 (0x231a), region = 76 }
  0xae   : > { %p15549_p1 = scmp.eq.s32.totalorder %s10929_s17, 0 }
  0xb0   : > { %10761 = dma.done.wait (%p15549_p1), [#allocation3], 64   ;;  %p15550_p0 = pmov %p15549_p1 }
  0xb2   : > { %10763 = vsyncadd (%p15550_p0), [#allocation3], 4294967232  ;;  %p15551_p6 = pmov %p15550_p0 }
  0xb3   : > { %p15552_p5 = pmov %p15550_p0 }
  0xb4   : > { %10765 = dma.done.wait (%p15551_p6), [#allocation6], 512  }
  0xb5   : > { %10767 = vsyncadd (%p15552_p5), [#allocation6], 4294966784  ;;  %p15553_p9 = pmov %p15550_p0 }
  0xb6   : > { %p15554_p12 = pmov %p15550_p0 }
  0xb7   : > { %10769 = dma.done.wait (%p15553_p9), [#allocation9], 1280  }
  0xb8   : > { %10771 = vsyncadd (%p15554_p12), [#allocation9], 4294966016  ;;  %p528_p10 = scmp.lt.s32.totalorder %s10929_s17, 1  ;;  %s15555_s0 = sld [smem:[#allocation58_spill]]  ;;  %vm15258_vm0 = vcmask 1039360   ;;  %vm15257_vm1 = vcmask 1031168  }
  0xb9   : > { %s15423_s2 = smov 126   ;;  %s15438_s19 = smov 127   ;;  %vm15246_vm2 = vcmask 1022976   ;;  %vm15245_vm3 = vcmask 891904   ;;  %vm15265_vm4 = vcmask 883712   ;;  %vm15256_vm5 = vcmask 875520  }
  0xba   : > { %s529_s1 = scalar_select %p528_p10, %s10929_s17, 1  ;;  %vm15253_vm6 = vcmask 867328   ;;  %vm15240_vm7 = vcmask 859136   ;;  %vm15248_vm8 = vcmask 588800   ;;  %vm15264_vm9 = vcmask 1014784  }
  0xbb   : > { %s15286_s16 = smov 125   ;;  %s15381_s24 = smov 108   ;;  %vm15267_vm10 = vcmask 850944   ;;  %vm15268_vm11 = vcmask 719872   ;;  %vm15252_vm12 = vcmask 711680   ;;  %vm15249_vm13 = vcmask 703488  }
  0xbc   : > { %s7157_s25 = sshll.u32 %s529_s1, 5  ;;  %s15262_s26 = smov 109   ;;  %vm15241_vm14 = vcmask 695296   ;;  %vm15244_vm15 = vcmask 687104  }
  0xbd   : > { %s15413_s21 = smov 107   ;;  %s15334_s15 = smov 106  }
  0xbe   : > { %s532_s14 = scalar_lea.vmem %s15555_s0, %s7157_s25  ;;  %s15259_s27 = smov 105  }
  0xbf   : > { %v11094_v0 = vld [vmem:[%s532_s14 + $0x8] sm:$0xff]  ;;  %v11096_v1 = vld [vmem:[%s532_s14 + $0x10] sm:$0xff]  ;;  %v11098_v2 = vld [vmem:[%s532_s14] sm:$0xff]  ;;  %s15292_s22 = smov 124   ;;  %s15365_s23 = smov 104  }
  0xc0   : > { %v7824_v3 = vpack.i.bf16 %v11096_v1, %v11094_v0  ;;  %v11102_v4 = vld [vmem:[%s532_s14 + $0x18] sm:$0xff]  ;;  %s15383_s29 = smov 88   ;;  %s15332_s18 = smov 87  }
  0xc1   : > { %v7829_v5 = vpack.i.bf16 %v11098_v2, %v11102_v4  ;;  %v7889_v6 = vpack.i.bf16 %v11102_v4, %v11098_v2  ;;  %s15330_s1 = smov 86   ;;  %s15254_s25 = smov 85  }
  0xc2   : > { %7825 = vrot.lane.b32.xlu1 %v7824_v3, %s15423_s2  ;;  %7815 = vrot.lane.b32.xlu0 %v7824_v3, %s15438_s19  ;;  %s15236_s20 = smov 84   ;;  %s15238_s28 = smov 68  }
  0xc3   : > { %s15250_s14 = smov 67   ;;  %s15556_s3 = sld [smem:[#allocation61_spill]] }
  0xc4   : > { %s15684_s5 = sld [smem:[#allocation63_spill]]  ;;  %s15845_s7 = sld [smem:[#allocation65_spill]] }
  0xc5   : > { %s16054_s0 = smov 126   ;;  %s16265_s6 = smov 127  }
  0xc6   : > { %7830 = vrot.lane.b32.xlu1 %v7829_v5, %s15423_s2  ;;  %7820 = vrot.lane.b32.xlu0 %v7829_v5, %s15438_s19  ;;  %s16271_s4 = smov 15  }
  0xca   : > { %7840 = vrot.lane.b32.xlu1 %v7829_v5, %s15286_s16  ;;  %7835 = vrot.lane.b32.xlu0 %v7824_v3, %s15286_s16  ;;  %s15302_s16 = smov 20  }
  0xce   : > { %7850 = vrot.lane.b32.xlu1 %v7829_v5, %s15381_s24  ;;  %7845 = vrot.lane.b32.xlu0 %v7824_v3, %s15381_s24 }
  0xd2   : > { %7860 = vrot.lane.b32.xlu1 %v7829_v5, %s15262_s26  ;;  %7855 = vrot.lane.b32.xlu0 %v7824_v3, %s15262_s26  ;;  %s15367_s26 = smov 114  }
  0xd6   : > { %7870 = vrot.lane.b32.xlu1 %v7829_v5, %s15413_s21  ;;  %7865 = vrot.lane.b32.xlu0 %v7824_v3, %s15413_s21 }
  0xda   : > { %7880 = vrot.lane.b32.xlu1 %v7829_v5, %s15334_s15  ;;  %7875 = vrot.lane.b32.xlu0 %v7824_v3, %s15334_s15 }
  0xde   : > { %658 = vrot.lane.b32.xlu1 %v11096_v1, %s15259_s27  ;;  %656 = vrot.lane.b32.xlu0 %v11094_v0, %s15259_s27 }
  0xe2   : > { %654 = vrot.lane.b32.xlu1 %v11098_v2, %s15259_s27  ;;  %660 = vrot.lane.b32.xlu0 %v11102_v4, %s15259_s27  ;;  %s15369_s27 = smov 2  }
  0xe6   : > { %7890 = vrot.lane.b32.xlu1 %v7889_v6, %s15292_s22  ;;  %7885 = vrot.lane.b32.xlu0 %v7824_v3, %s15292_s22 }
  0xea   : > { %7900 = vrot.lane.b32.xlu1 %v7889_v6, %s15365_s23  ;;  %7895 = vrot.lane.b32.xlu0 %v7824_v3, %s15365_s23 }
  0xee   : > { %7905 = vrot.lane.b32.xlu0 %v7824_v3, %s15383_s29  ;;  %7910 = vrot.lane.b32.xlu1 %v7824_v3, %s15332_s18 }
  0xf2   : > { %7915 = vrot.lane.b32.xlu0 %v7889_v6, %s15383_s29  ;;  %7920 = vrot.lane.b32.xlu1 %v7889_v6, %s15332_s18 }
  0xf6   : > { %7925 = vrot.lane.b32.xlu0 %v7824_v3, %s15330_s1  ;;  %7930 = vrot.lane.b32.xlu1 %v7824_v3, %s15254_s25 }
  0xfa   : > { %7935 = vrot.lane.b32.xlu0 %v7889_v6, %s15330_s1  ;;  %7940 = vrot.lane.b32.xlu1 %v7889_v6, %s15254_s25  ;;  %s15385_s25 = smov 113  }
  0xfe   : > { %7945 = vrot.lane.b32.xlu0 %v7824_v3, %s15236_s20  ;;  %7950 = vrot.lane.b32.xlu1 %v7824_v3, %s15238_s28 }
 0x102   : > { %7955 = vrot.lane.b32.xlu0 %v7889_v6, %s15236_s20  ;;  %7960 = vrot.lane.b32.xlu1 %v7889_v6, %s15238_s28  ;;  %s15409_s20 = smov 14   ;;  %s15401_s28 = smov 15  }
 0x106   : > { %7965 = vrot.lane.b32.xlu0 %v7824_v3, %s15250_s14 }
 0x10a   : > { %7970 = vrot.lane.b32.xlu0 %v7889_v6, %s15250_s14 }
 0x134   : > { %v7826_v7 = vpop.permute.xlu1 %7825  ;;  %v7816_v8 = vpop.permute.xlu0 %7815 }
 0x135   : > { %v7828_v9 = vunpack.i.h.bf16 %v7826_v7  ;;  %v7827_v10 = vunpack.i.l.bf16 %v7826_v7  ;;  %v7818_v11 = vunpack.i.h.bf16 %v7816_v8  ;;  %v7817_v12 = vunpack.i.l.bf16 %v7816_v8 }
 0x137   : > { %v552_v13 = vsel %vm15258_vm0, %v7817_v12, %v7818_v11  ;;  %v568_v20 = vsel %vm15257_vm1, %v7827_v10, %v7828_v9 }
 0x138   : > { %v7831_v14 = vpop.permute.xlu1 %7830  ;;  %v7821_v15 = vpop.permute.xlu0 %7820  ;;  %v7159_v16 = vpack.c.bf16 %v552_v13, %v11094_v0 }
 0x139   : > { %v7832_v17 = vunpack.i.l.bf16 %v7831_v14  ;;  %v7823_v18 = vunpack.i.h.bf16 %v7821_v15  ;;  %v7822_v19 = vunpack.i.l.bf16 %v7821_v15  ;;  %v7833_v21 = vunpack.i.h.bf16 %v7831_v14 }
 0x13a   : > { %7160 = vmatprep.subr.bf16.mxu0 %v7159_v16 }
 0x13b   : > { %v553_v22 = vsel %vm15258_vm0, %v7818_v11, %v7822_v19  ;;  %v7207_v23 = vpack.c.bf16 %v7822_v19, %v11102_v4  ;;  %v569_v24 = vsel %vm15257_vm1, %v7828_v9, %v7832_v17  ;;  %v551_v25 = vsel %vm15258_vm0, %v7823_v18, %v7817_v12 }
 0x13c   : > { %v7974_v26 = vpack.i.bf16 %v553_v22, %v552_v13  ;;  %v7841_v27 = vpop.permute.xlu1 %7840  ;;  %v7836_v28 = vpop.permute.xlu0 %7835  ;;  %v7984_v29 = vpack.i.bf16 %v569_v24, %v568_v20  ;;  %v7161_v30 = vpack.c.bf16 %v551_v25, %v11098_v2  ;;  %v7209_v35 = vpack.c.bf16 %v553_v22, %v11096_v1 }
 0x13d   : > { %v7843_v31 = vunpack.i.h.bf16 %v7841_v27  ;;  %v7842_v32 = vunpack.i.l.bf16 %v7841_v27  ;;  %v7838_v33 = vunpack.i.h.bf16 %v7836_v28  ;;  %v7837_v34 = vunpack.i.l.bf16 %v7836_v28  ;;  %7208 = vmatprep.subr.bf16.mxu1 %v7207_v23 }
 0x13e   : > { %7985 = vrot.lane.b32.xlu0 %v7984_v29, %s15250_s14  ;;  %7162 = vmatpush1.bf16.msra.mxu0 %v7161_v30  ;;  %v567_v36 = vsel %vm15257_vm1, %v7833_v21, %v7827_v10  ;;  %v7979_v46 = vpack.i.bf16 %v7822_v19, %v551_v25 }
 0x13f   : > { %7975 = vrot.lane.b32.xlu1 %v7974_v26, %s15250_s14  ;;  %v7211_v37 = vpack.c.bf16 %v7842_v32, %v7832_v17  ;;  %v584_v38 = vsel %vm15246_vm2, %v7837_v34, %v7838_v33  ;;  %v585_v39 = vsel %vm15246_vm2, %v7838_v33, %v7842_v32  ;;  %7210 = vmatpush1.bf16.msra.mxu1 %v7209_v35 }
 0x140   : > { %v7851_v40 = vpop.permute.xlu1 %7850  ;;  %v7846_v41 = vpop.permute.xlu0 %7845  ;;  %v7994_v42 = vpack.i.bf16 %v7832_v17, %v567_v36  ;;  %v7163_v43 = vpack.c.bf16 %v584_v38, %v568_v20  ;;  %v7213_v44 = vpack.c.bf16 %v585_v39, %v569_v24  ;;  %v583_v45 = vsel %vm15246_vm2, %v7843_v31, %v7837_v34 }
 0x141   : > { %7212 = vmatprep.subr.bf16.mxu1 %v7211_v37  ;;  %v7165_v47 = vpack.c.bf16 %v583_v45, %v567_v36  ;;  %v7989_v48 = vpack.i.bf16 %v585_v39, %v584_v38  ;;  %v11165_v55 = vunpack.i.l.bf16 %v7851_v40  ;;  %v7848_v56 = vunpack.i.h.bf16 %v7846_v41 }
 0x142   : > { %7995 = vrot.lane.b32.xlu0 %v7994_v42, %s15250_s14  ;;  %7164 = vmatprep.subr.bf16.mxu0 %v7163_v43  ;;  %v7847_v57 = vunpack.i.l.bf16 %v7846_v41  ;;  %v7853_v61 = vunpack.i.h.bf16 %v7851_v40  ;;  %v7999_v4 = vpack.i.bf16 %v7842_v32, %v583_v45  ;;  %v931_v32 = vld [vmem:[#allocation5 + $0x8] sm:$0xff]  ;;  %v10818_v40 = vmov 0  }
 0x143   : > { %7980 = vrot.lane.b32.xlu1 %v7979_v46, %s15250_s14  ;;  %7214 = vmatpush1.bf16.msra.mxu1 %v7213_v44  ;;  %v11179_v7 = vsel %vm15265_vm4, %v7848_v56, %v11165_v55 }
 0x144   : > { %7166 = vmatpush1.bf16.msra.mxu0 %v7165_v47  ;;  %v7861_v49 = vpop.permute.xlu1 %7860  ;;  %v7856_v50 = vpop.permute.xlu0 %7855  ;;  %v11175_v6 = vsel %vm15265_vm4, %v7847_v57, %v7848_v56  ;;  %v11192_v14 = vsel %vm15265_vm4, %v7853_v61, %v7847_v57  ;;  %7127 = vmatprep.mubr.msk.f32.mxu0 %vm15248_vm8, %v931_v32 }
 0x145   : > { %v7863_v51 = vunpack.i.h.bf16 %v7861_v49  ;;  %v7862_v52 = vunpack.i.l.bf16 %v7861_v49  ;;  %v7858_v53 = vunpack.i.h.bf16 %v7856_v50  ;;  %v7857_v54 = vunpack.i.l.bf16 %v7856_v50  ;;  %7128 = vmatprep.mubr.msk.f32.mxu1 %vm15248_vm8, %v931_v32  ;;  %8044 = vset.pattern.permute.xlu0 %v10818_v40 }
 0x146   : > { %v8009_v13 = vpack.i.bf16 %v11179_v7, %v11175_v6  ;;  %v8019_v21 = vpack.i.bf16 %v11165_v55, %v11192_v14  ;;  %8185 = vset.pattern.permute.xlu1 %v10818_v40 }
 0x147   : > { %7990 = vrot.lane.b32.xlu1 %v7989_v48, %s15250_s14  ;;  %v792_v58 = vsel %vm15245_vm3, %v7857_v54, %v7858_v53  ;;  %v793_v59 = vsel %vm15245_vm3, %v7858_v53, %v7862_v52  ;;  %v791_v60 = vsel %vm15245_vm3, %v7863_v51, %v7857_v54 }
 0x148   : > { %v7871_v62 = vpop.permute.xlu1 %7870  ;;  %v7866_v63 = vpop.permute.xlu0 %7865  ;;  %v8004_v0 = vpack.i.bf16 %v793_v59, %v792_v58  ;;  %v8014_v5 = vpack.i.bf16 %v7862_v52, %v791_v60  ;;  %v932_v58 = vld [vmem:[%s15556_s3] sm:$0xff]  ;;  %s16055_s3 = smov 107  }
 0x149   : > { %v11171_v1 = vunpack.i.l.bf16 %v7871_v62  ;;  %v7868_v2 = vunpack.i.h.bf16 %v7866_v63  ;;  %v7867_v3 = vunpack.i.l.bf16 %v7866_v63  ;;  %v7873_v12 = vunpack.i.h.bf16 %v7871_v62 }
 0x14a   : > { %8005 = vrot.lane.b32.xlu0 %v8004_v0, %s15250_s14 }
 0x14b   : > { %8000 = vrot.lane.b32.xlu1 %v7999_v4, %s15250_s14  ;;  %v11183_v8 = vsel %vm15256_vm5, %v7867_v3, %v7868_v2  ;;  %v11187_v9 = vsel %vm15256_vm5, %v7868_v2, %v11171_v1  ;;  %v11203_v22 = vsel %vm15256_vm5, %v7873_v12, %v7867_v3 }
 0x14c   : > { %v7881_v10 = vpop.permute.xlu1 %7880  ;;  %v7876_v11 = vpop.permute.xlu0 %7875  ;;  %v8024_v18 = vpack.i.bf16 %v11187_v9, %v11183_v8  ;;  %v8034_v29 = vpack.i.bf16 %v11171_v1, %v11203_v22 }
 0x14d   : > { %v11194_v15 = vunpack.i.l.bf16 %v7881_v10  ;;  %v7878_v16 = vunpack.i.h.bf16 %v7876_v11  ;;  %v7877_v17 = vunpack.i.l.bf16 %v7876_v11  ;;  %v7883_v25 = vunpack.i.h.bf16 %v7881_v10 }
 0x14e   : > { %8015 = vrot.lane.b32.xlu0 %v8014_v5, %s15250_s14 }
 0x14f   : > { %8010 = vrot.lane.b32.xlu1 %v8009_v13, %s15250_s14  ;;  %v11207_v23 = vsel %vm15253_vm6, %v7877_v17, %v7878_v16  ;;  %v11211_v24 = vsel %vm15253_vm6, %v7878_v16, %v11194_v15  ;;  %v11226_v31 = vsel %vm15253_vm6, %v7883_v25, %v7877_v17 }
 0x150   : > { %v659_v19 = vpop.permute.xlu1 %658  ;;  %v657_v20 = vpop.permute.xlu0 %656  ;;  %v8029_v26 = vpack.i.bf16 %v11211_v24, %v11207_v23  ;;  %v8039_v35 = vpack.i.bf16 %v11194_v15, %v11226_v31  ;;  %v7171_v57 = vpack.c.bf16 %v11207_v23, %v11183_v8  ;;  %v7221_v59 = vpack.c.bf16 %v11211_v24, %v11187_v9 }
 0x151   : > { %v11223_v30 = vsel %vm15240_vm7, %v657_v20, %v659_v19  ;;  %v7173_v4 = vpack.c.bf16 %v11226_v31, %v11203_v22 }
 0x152   : > { %8025 = vrot.lane.b32.xlu0 %v8024_v18, %s15250_s14 }
 0x153   : > { %8020 = vrot.lane.b32.xlu1 %v8019_v21, %s15250_s14 }
 0x154   : > { %v655_v27 = vpop.permute.xlu1 %654  ;;  %v11216_v28 = vpop.permute.xlu0 %660 }
 0x155   : > { %v11237_v41 = vsel %vm15240_vm7, %v655_v27, %v657_v20  ;;  %v665_v50 = vsel %vm15240_vm7, %v659_v19, %v11216_v28  ;;  %vm15243_vm7 = vcmask 556032  }
 0x156   : > { %8035 = vrot.lane.b32.xlu0 %v8034_v29, %s15250_s14 }
 0x157   : > { %8030 = vrot.lane.b32.xlu1 %v8029_v26, %s15250_s14 }
 0x158   : > { %v7891_v33 = vpop.permute.xlu1 %7890  ;;  %v7886_v34 = vpop.permute.xlu0 %7885 }
 0x159   : > { %v7893_v36 = vunpack.i.h.bf16 %v7891_v33  ;;  %v7892_v37 = vunpack.i.l.bf16 %v7891_v33  ;;  %v7888_v38 = vunpack.i.h.bf16 %v7886_v34  ;;  %v7887_v39 = vunpack.i.l.bf16 %v7886_v34 }
 0x15a   : > { %860 = vrot.lane.b32.xlu0 %v11223_v30, %s15250_s14 }
 0x15b   : > { %8040 = vrot.lane.b32.xlu1 %v8039_v35, %s15250_s14  ;;  %v7215_v42 = vpack.c.bf16 %v11165_v55, %v7893_v36  ;;  %v600_v43 = vsel %vm15264_vm9, %v7887_v39, %v7888_v38  ;;  %v601_v44 = vsel %vm15264_vm9, %v7888_v38, %v7893_v36  ;;  %v599_v45 = vsel %vm15264_vm9, %v7892_v37, %v7887_v39 }
 0x15c   : > { %v7901_v46 = vpop.permute.xlu1 %7900  ;;  %v7896_v47 = vpop.permute.xlu0 %7895  ;;  %v7167_v48 = vpack.c.bf16 %v11175_v6, %v600_v43  ;;  %v7217_v49 = vpack.c.bf16 %v11179_v7, %v601_v44  ;;  %v7169_v51 = vpack.c.bf16 %v11192_v14, %v599_v45  ;;  %v7219_v55 = vpack.c.bf16 %v11194_v15, %v11171_v1 }
 0x15d   : > { %v7903_v52 = vunpack.i.h.bf16 %v7901_v46  ;;  %v7898_v53 = vunpack.i.h.bf16 %v7896_v47  ;;  %v7897_v54 = vunpack.i.l.bf16 %v7896_v47  ;;  %7216 = vmatprep.subr.bf16.mxu1 %v7215_v42  ;;  %v7902_v56 = vunpack.i.l.bf16 %v7901_v46 }
 0x15e   : > { %858 = vrot.lane.b32.xlu0 %v11237_v41, %s15250_s14  ;;  %7168 = vmatprep.subr.bf16.mxu0 %v7167_v48 }
 0x15f   : > { %7218 = vmatpush1.bf16.msra.mxu1 %v7217_v49  ;;  %862 = vrot.lane.b32.xlu1 %v665_v50, %s15250_s14  ;;  %v7223_v60 = vpack.c.bf16 %v7903_v52, %v11216_v28  ;;  %v680_v61 = vsel %vm15267_vm10, %v7897_v54, %v7898_v53  ;;  %v681_v0 = vsel %vm15267_vm10, %v7898_v53, %v7903_v52 }
 0x160   : > { %7170 = vmatpush1.bf16.msra.mxu0 %v7169_v51  ;;  %7220 = vmatprep.subr.bf16.mxu1 %v7219_v55  ;;  %v7906_v62 = vpop.permute.xlu0 %7905  ;;  %v7911_v63 = vpop.permute.xlu1 %7910  ;;  %v679_v6 = vsel %vm15267_vm10, %v7902_v56, %v7897_v54  ;;  %v7175_v7 = vpack.c.bf16 %v680_v61, %v11223_v30  ;;  %v7225_v9 = vpack.c.bf16 %v681_v0, %v665_v50 }
 0x161   : > { %7172 = vmatprep.subr.bf16.mxu0 %v7171_v57  ;;  %v7908_v1 = vunpack.i.h.bf16 %v7906_v62  ;;  %v7907_v2 = vunpack.i.l.bf16 %v7906_v62  ;;  %v7913_v3 = vunpack.i.h.bf16 %v7911_v63  ;;  %v7912_v5 = vunpack.i.l.bf16 %v7911_v63 }
 0x162   : > { %935 = vperm.xlu0 %8044, %v932_v58   ;;  %v7177_v17 = vpack.c.bf16 %v679_v6, %v11237_v41 }
 0x163   : > { %7222 = vmatpush1.bf16.msra.mxu1 %v7221_v59  ;;  %864 = vrot.lane.b32.xlu1 %v11216_v28, %s15250_s14  ;;  %v696_v8 = vsel %vm15268_vm11, %v7907_v2, %v7908_v1  ;;  %v712_v12 = vsel %vm15252_vm12, %v7912_v5, %v7913_v3  ;;  %s15387_s14 = smov 1  }
 0x164   : > { %7174 = vmatpush1.bf16.msra.mxu0 %v7173_v4  ;;  %7224 = vmatprep.subr.bf16.mxu1 %v7223_v60  ;;  %v7916_v10 = vpop.permute.xlu0 %7915  ;;  %v7921_v11 = vpop.permute.xlu1 %7920  ;;  %v7179_v18 = vpack.c.bf16 %v712_v12, %v696_v8 }
 0x165   : > { %7176 = vmatprep.subr.bf16.mxu0 %v7175_v7  ;;  %v7918_v13 = vunpack.i.h.bf16 %v7916_v10  ;;  %v7917_v14 = vunpack.i.l.bf16 %v7916_v10  ;;  %v7923_v15 = vunpack.i.h.bf16 %v7921_v11  ;;  %v7922_v16 = vunpack.i.l.bf16 %v7921_v11 }
 0x167   : > { %7226 = vmatpush1.bf16.msra.mxu1 %v7225_v9  ;;  %v7227_v19 = vpack.c.bf16 %v7923_v15, %v7918_v13  ;;  %v695_v20 = vsel %vm15268_vm11, %v7917_v14, %v7907_v2  ;;  %v711_v21 = vsel %vm15252_vm12, %v7922_v16, %v7912_v5  ;;  %v697_v22 = vsel %vm15268_vm11, %v7908_v1, %v7918_v13 }
 0x168   : > { %7178 = vmatpush1.bf16.msra.mxu0 %v7177_v17  ;;  %v7926_v23 = vpop.permute.xlu0 %7925  ;;  %v7931_v24 = vpop.permute.xlu1 %7930  ;;  %v7181_v25 = vpack.c.bf16 %v711_v21, %v695_v20  ;;  %v713_v26 = vsel %vm15252_vm12, %v7913_v3, %v7923_v15  ;;  %vm15261_vm12 = vcmask 121856  }
 0x169   : > { %v7928_v27 = vunpack.i.h.bf16 %v7926_v23  ;;  %v7927_v28 = vunpack.i.l.bf16 %v7926_v23  ;;  %v7933_v29 = vunpack.i.h.bf16 %v7931_v24  ;;  %v7932_v30 = vunpack.i.l.bf16 %v7931_v24  ;;  %7180 = vmatprep.subr.bf16.mxu0 %v7179_v18  ;;  %7228 = vmatprep.subr.bf16.mxu1 %v7227_v19 }
 0x16a   : > { %v7229_v31 = vpack.c.bf16 %v713_v26, %v697_v22 }
 0x16b   : > { %v728_v32 = vsel %vm15249_vm13, %v7927_v28, %v7928_v27  ;;  %v744_v33 = vsel %vm15241_vm14, %v7932_v30, %v7933_v29 }
 0x16c   : > { %v7936_v34 = vpop.permute.xlu0 %7935  ;;  %7182 = vmatpush1.bf16.msra.mxu0 %v7181_v25  ;;  %7230 = vmatpush1.bf16.msra.mxu1 %v7229_v31  ;;  %v7941_v35 = vpop.permute.xlu1 %7940  ;;  %v7183_v36 = vpack.c.bf16 %v744_v33, %v728_v32 }
 0x16d   : > { %v7938_v37 = vunpack.i.h.bf16 %v7936_v34  ;;  %v7937_v38 = vunpack.i.l.bf16 %v7936_v34  ;;  %v7943_v39 = vunpack.i.h.bf16 %v7941_v35  ;;  %v7942_v41 = vunpack.i.l.bf16 %v7941_v35 }
 0x16e   : > { %7184 = vmatprep.subr.bf16.mxu0 %v7183_v36 }
 0x16f   : > { %v7231_v42 = vpack.c.bf16 %v7943_v39, %v7938_v37  ;;  %v727_v43 = vsel %vm15249_vm13, %v7937_v38, %v7927_v28  ;;  %v743_v44 = vsel %vm15241_vm14, %v7942_v41, %v7932_v30  ;;  %v729_v45 = vsel %vm15249_vm13, %v7928_v27, %v7938_v37 }
 0x170   : > { %v7946_v46 = vpop.permute.xlu0 %7945  ;;  %v7951_v47 = vpop.permute.xlu1 %7950  ;;  %v7185_v48 = vpack.c.bf16 %v743_v44, %v727_v43  ;;  %v745_v49 = vsel %vm15241_vm14, %v7933_v29, %v7943_v39  ;;  %vm15242_vm14 = vcmask 547840  }
 0x171   : > { %v7948_v50 = vunpack.i.h.bf16 %v7946_v46  ;;  %v7947_v51 = vunpack.i.l.bf16 %v7946_v46  ;;  %v7953_v52 = vunpack.i.h.bf16 %v7951_v47  ;;  %v7952_v53 = vunpack.i.l.bf16 %v7951_v47  ;;  %7232 = vmatprep.subr.bf16.mxu1 %v7231_v42 }
 0x172   : > { %7186 = vmatpush1.bf16.msra.mxu0 %v7185_v48  ;;  %v7233_v54 = vpack.c.bf16 %v745_v49, %v729_v45 }
 0x173   : > { %v760_v55 = vsel %vm15244_vm15, %v7947_v51, %v7948_v50  ;;  %v776_v56 = vsel %vm15243_vm7, %v7952_v53, %v7953_v52 }
 0x174   : > { %v7956_v57 = vpop.permute.xlu0 %7955  ;;  %7234 = vmatpush1.bf16.msra.mxu1 %v7233_v54  ;;  %v7961_v58 = vpop.permute.xlu1 %7960  ;;  %v7187_v59 = vpack.c.bf16 %v776_v56, %v760_v55 }
 0x175   : > { %v7958_v60 = vunpack.i.h.bf16 %v7956_v57  ;;  %v7957_v61 = vunpack.i.l.bf16 %v7956_v57  ;;  %v7963_v62 = vunpack.i.h.bf16 %v7961_v58  ;;  %v7962_v63 = vunpack.i.l.bf16 %v7961_v58 }
 0x176   : > { %7188 = vmatprep.subr.bf16.mxu0 %v7187_v59 }
 0x177   : > { %v7235_v0 = vpack.c.bf16 %v7963_v62, %v7958_v60  ;;  %v759_v1 = vsel %vm15244_vm15, %v7957_v61, %v7947_v51  ;;  %v775_v2 = vsel %vm15243_vm7, %v7962_v63, %v7952_v53  ;;  %v761_v3 = vsel %vm15244_vm15, %v7948_v50, %v7958_v60 }
 0x178   : > { %v7189_v4 = vpack.c.bf16 %v775_v2, %v759_v1  ;;  %v777_v5 = vsel %vm15243_vm7, %v7953_v52, %v7963_v62  ;;  %v7966_v7 = vpop.permute.xlu0 %7965 }
 0x179   : > { %7236 = vmatprep.subr.bf16.mxu1 %v7235_v0  ;;  %v7237_v6 = vpack.c.bf16 %v777_v5, %v761_v3  ;;  %v7968_v9 = vunpack.i.h.bf16 %v7966_v7  ;;  %v7967_v10 = vunpack.i.l.bf16 %v7966_v7 }
 0x17a   : > { %7190 = vmatpush1.bf16.msra.mxu0 %v7189_v4 }
 0x17b   : > { %7238 = vmatpush1.bf16.msra.mxu1 %v7237_v6  ;;  %v868_v15 = vsel %vm15242_vm14, %v7967_v10, %v7968_v9 }
 0x17c   : > { %v7971_v8 = vpop.permute.xlu0 %7970 }
 0x17d   : > { %v7973_v16 = vunpack.i.h.bf16 %v7971_v8  ;;  %v7972_v17 = vunpack.i.l.bf16 %v7971_v8 }
 0x17f   : > { %v867_v24 = vsel %vm15242_vm14, %v7972_v17, %v7967_v10  ;;  %v869_v25 = vsel %vm15242_vm14, %v7968_v9, %v7973_v16 }
 0x1b0   : > { %v7986_v12 = vpop.permute.xlu0 %7985 }
 0x1b1   : > { %v7976_v11 = vpop.permute.xlu1 %7975  ;;  %v7988_v23 = vunpack.i.h.bf16 %v7986_v12  ;;  %v7987_v26 = vunpack.i.l.bf16 %v7986_v12 }
 0x1b2   : > { %v7978_v13 = vunpack.i.h.bf16 %v7976_v11  ;;  %v7977_v14 = vunpack.i.l.bf16 %v7976_v11 }
 0x1b3   : > { %v874_v39 = vsel %vm15242_vm14, %v7987_v26, %v7988_v23 }
 0x1b4   : > { %v871_v18 = vsel %vm15242_vm14, %v7977_v14, %v7978_v13  ;;  %v7996_v27 = vpop.permute.xlu0 %7995 }
 0x1b5   : > { %v7981_v19 = vpop.permute.xlu1 %7980  ;;  %v7191_v20 = vpack.c.bf16 %v871_v18, %v868_v15  ;;  %v7997_v36 = vunpack.i.l.bf16 %v7996_v27  ;;  %v7998_v37 = vunpack.i.h.bf16 %v7996_v27 }
 0x1b6   : > { %v7983_v21 = vunpack.i.h.bf16 %v7981_v19  ;;  %v7982_v22 = vunpack.i.l.bf16 %v7981_v19 }
 0x1b7   : > { %7192 = vmatprep.subr.bf16.mxu0 %v7191_v20  ;;  %v873_v48 = vsel %vm15242_vm14, %v7997_v36, %v7987_v26  ;;  %v875_v52 = vsel %vm15242_vm14, %v7988_v23, %v7998_v37 }
 0x1b8   : > { %v7239_v28 = vpack.c.bf16 %v7983_v21, %v7973_v16  ;;  %v870_v29 = vsel %vm15242_vm14, %v7982_v22, %v7977_v14  ;;  %v872_v30 = vsel %vm15242_vm14, %v7978_v13, %v7983_v21 }
 0x1b9   : > { %v7991_v31 = vpop.permute.xlu1 %7990  ;;  %v7193_v32 = vpack.c.bf16 %v870_v29, %v867_v24  ;;  %v7241_v33 = vpack.c.bf16 %v872_v30, %v869_v25 }
 0x1ba   : > { %v7993_v34 = vunpack.i.h.bf16 %v7991_v31  ;;  %v7992_v35 = vunpack.i.l.bf16 %v7991_v31  ;;  %7240 = vmatprep.subr.bf16.mxu1 %v7239_v28 }
 0x1bb   : > { %7194 = vmatpush1.bf16.msra.mxu0 %v7193_v32  ;;  %7242 = vmatpush1.bf16.msra.mxu1 %v7241_v33 }
 0x1bc   : > { %v8006_v38 = vpop.permute.xlu0 %8005  ;;  %v877_v41 = vsel %vm15242_vm14, %v7992_v35, %v7993_v34 }
 0x1bd   : > { %v8001_v42 = vpop.permute.xlu1 %8000  ;;  %v7195_v43 = vpack.c.bf16 %v877_v41, %v874_v39  ;;  %v8008_v44 = vunpack.i.h.bf16 %v8006_v38  ;;  %v8007_v45 = vunpack.i.l.bf16 %v8006_v38 }
 0x1be   : > { %v8003_v46 = vunpack.i.h.bf16 %v8001_v42  ;;  %v8002_v47 = vunpack.i.l.bf16 %v8001_v42 }
 0x1bf   : > { %7196 = vmatprep.subr.bf16.mxu0 %v7195_v43  ;;  %v880_v59 = vsel %vm15242_vm14, %v8007_v45, %v8008_v44 }
 0x1c0   : > { %v8016_v49 = vpop.permute.xlu0 %8015  ;;  %v7243_v50 = vpack.c.bf16 %v8003_v46, %v7998_v37  ;;  %v876_v51 = vsel %vm15242_vm14, %v8002_v47, %v7992_v35  ;;  %v878_v53 = vsel %vm15242_vm14, %v7993_v34, %v8003_v46  ;;  %v930_v37 = vld [vmem:[#allocation5] sm:$0xff] }
 0x1c1   : > { %v8011_v54 = vpop.permute.xlu1 %8010  ;;  %v7197_v55 = vpack.c.bf16 %v876_v51, %v873_v48  ;;  %v7245_v56 = vpack.c.bf16 %v878_v53, %v875_v52  ;;  %v8018_v60 = vunpack.i.h.bf16 %v8016_v49  ;;  %v8017_v61 = vunpack.i.l.bf16 %v8016_v49 }
 0x1c2   : > { %v8013_v57 = vunpack.i.h.bf16 %v8011_v54  ;;  %v8012_v58 = vunpack.i.l.bf16 %v8011_v54  ;;  %7244 = vmatprep.subr.bf16.mxu1 %v7243_v50  ;;  %v1114_v54 = vlaneseq }
 0x1c3   : > { %7198 = vmatpush1.bf16.msra.mxu0 %v7197_v55  ;;  %7246 = vmatpush1.bf16.msra.mxu1 %v7245_v56  ;;  %v879_v5 = vsel %vm15242_vm14, %v8017_v61, %v8007_v45  ;;  %v881_v6 = vsel %vm15242_vm14, %v8008_v44, %v8018_v60  ;;  %v11321_v55 = vld [vmem:[#allocation2] sm:$0xf] }
 0x1c4   : > { %v8026_v62 = vpop.permute.xlu0 %8025  ;;  %v883_v63 = vsel %vm15242_vm14, %v8012_v58, %v8013_v57  ;;  %v1115_v56 = vshrl.u32 %v1114_v54, 7  ;;  %vm1188_vm5 = vcmp.eq.s32.totalorder %v11321_v55, 3  ;;  %vm1238_vm4 = vcmp.eq.s32.totalorder %v11321_v55, 4 }
 0x1c5   : > { %v8021_v0 = vpop.permute.xlu1 %8020  ;;  %v7199_v1 = vpack.c.bf16 %v883_v63, %v880_v59  ;;  %v8028_v4 = vunpack.i.h.bf16 %v8026_v62  ;;  %v8027_v7 = vunpack.i.l.bf16 %v8026_v62 }
 0x1c6   : > { %v8023_v2 = vunpack.i.h.bf16 %v8021_v0  ;;  %v8022_v3 = vunpack.i.l.bf16 %v8021_v0  ;;  %v11330_v61 = vsub.s32 3, %v1115_v56  ;;  %v15557_v0 = vmov 0 }
 0x1c7   : > { %7200 = vmatprep.subr.bf16.mxu0 %v7199_v1  ;;  %v886_v19 = vsel %vm15242_vm14, %v8027_v7, %v8028_v4 }
 0x1c8   : > { %v8036_v8 = vpop.permute.xlu0 %8035  ;;  %v7247_v9 = vpack.c.bf16 %v8023_v2, %v8018_v60  ;;  %v882_v10 = vsel %vm15242_vm14, %v8022_v3, %v8012_v58  ;;  %v884_v11 = vsel %vm15242_vm14, %v8013_v57, %v8023_v2  ;;  %v11324_v57 = vsub.s32 1, %v1115_v56 }
 0x1c9   : > { %v8031_v12 = vpop.permute.xlu1 %8030  ;;  %v7201_v13 = vpack.c.bf16 %v882_v10, %v879_v5  ;;  %v7249_v14 = vpack.c.bf16 %v884_v11, %v881_v6  ;;  %v8037_v17 = vunpack.i.l.bf16 %v8036_v8  ;;  %v8038_v18 = vunpack.i.h.bf16 %v8036_v8 }
 0x1ca   : > { %v8033_v15 = vunpack.i.h.bf16 %v8031_v12  ;;  %v8032_v16 = vunpack.i.l.bf16 %v8031_v12  ;;  %7248 = vmatprep.subr.bf16.mxu1 %v7247_v9  ;;  %v11328_v60 = vsub.s32 2, %v1115_v56  ;;  %v11338_v3 = vsub.s32 0, %v1115_v56 }
 0x1cb   : > { %7202 = vmatpush1.bf16.msra.mxu0 %v7201_v13  ;;  %7250 = vmatpush1.bf16.msra.mxu1 %v7249_v14  ;;  %v885_v26 = vsel %vm15242_vm14, %v8037_v17, %v8027_v7  ;;  %v887_v29 = vsel %vm15242_vm14, %v8028_v4, %v8038_v18  ;;  %v15560_v7 = vmov 0  ;;  %v15563_v8 = vmov 0 }
 0x1cc   : > { %v889_v20 = vsel %vm15242_vm14, %v8032_v16, %v8033_v15  ;;  %v861_v21 = vpop.permute.xlu0 %860  ;;  %v15566_v17 = vmov 0  ;;  %v15587_v56 = vmov 0 }
 0x1cd   : > { %v8041_v22 = vpop.permute.xlu1 %8040  ;;  %v7203_v23 = vpack.c.bf16 %v889_v20, %v886_v19 }
 0x1ce   : > { %v8043_v24 = vunpack.i.h.bf16 %v8041_v22  ;;  %v8042_v25 = vunpack.i.l.bf16 %v8041_v22 }
 0x1cf   : > { %7204 = vmatprep.subr.bf16.mxu0 %v7203_v23  ;;  %v15569_v23 = vmov 0 }
 0x1d0   : > { %v7251_v27 = vpack.c.bf16 %v8043_v24, %v8038_v18  ;;  %v888_v28 = vsel %vm15242_vm14, %v8042_v25, %v8032_v16  ;;  %v890_v30 = vsel %vm15242_vm14, %v8033_v15, %v8043_v24  ;;  %v859_v35 = vpop.permute.xlu0 %858  ;;  %v15572_v24 = vmov 0 }
 0x1d1   : > { %v863_v31 = vpop.permute.xlu1 %862  ;;  %v7205_v32 = vpack.c.bf16 %v888_v28, %v885_v26  ;;  %v7253_v33 = vpack.c.bf16 %v890_v30, %v887_v29  ;;  %v891_v38 = vsel %vm15242_vm14, %v859_v35, %v861_v21 }
 0x1d2   : > { %7252 = vmatprep.subr.bf16.mxu1 %v7251_v27  ;;  %v892_v34 = vsel %vm15242_vm14, %v861_v21, %v863_v31 }
 0x1d3   : > { %7206 = vmatpush1.bf16.msra.mxu0 %v7205_v32  ;;  %7254 = vmatpush1.bf16.msra.mxu1 %v7253_v33  ;;  %v15575_v32 = vmov 0 }
 0x1d4   : > { %990 = vmatprep.subr.mxu0 %v892_v34 }
 0x1d5   : > { %v865_v36 = vpop.permute.xlu1 %864 }
 0x1d6   : > { %1061 = vmatprep.subr.mxu1 %v865_v36  ;;  %v893_v39 = vsel %vm15242_vm14, %v863_v31, %v865_v36  ;;  %vm1088_vm14 = vcmp.eq.s32.totalorder %v11321_v55, 1 }
 0x1d7   : > { %991 = vmatpush1.msra.mxu0 %v891_v38  ;;  %1062 = vmatpush1.msra.mxu1 %v893_v39  ;;  %v1113_v58 = vsel %vm1088_vm14, 1, %v10818_v40  ;;  %vm15247_vm14 = vcmask 113664  }
 0x1d8   : > { %1007 = vmatmul.mubr.f32.vlgmr.msra.gmra.mrb[0].mxu0 %v930_v37  ;;  %1078 = vmatmul.mubr.f32.vlgmr.msra.gmra.mrb[0].mxu1 %v930_v37  ;;  %v1121_v59 = vrot.slane %v1113_v58, %v11324_v57  ;;  %v1125_v1 = vrot.slane %v1113_v58, %v11328_v60  ;;  %v1129_v2 = vrot.slane %v1113_v58, %v11330_v61  ;;  %v15578_v37 = vmov 0 }
 0x1d9   : > { %v1117_v9 = vrot.slane %v1113_v58, %v11338_v3 }
 0x1da   : > { %vm11332_vm7 = vcmp.eq.s32.totalorder %v1121_v59, 1  ;;  %vm11344_vm15 = vcmp.eq.s32.totalorder %v1125_v1, 1  ;;  %vm11348_vm3 = vcmp.eq.s32.totalorder %v1129_v2, 1 }
 0x1db   : > { %v15558_v0 = vsel %vm11332_vm7, 4294967295, %v15557_v0  ;;  %v15561_v7 = vsel %vm11344_vm15, 4294967295, %v15560_v7  ;;  %v15564_v8 = vsel %vm11348_vm3, 4294967295, %v15563_v8  ;;  %vm11362_vm2 = vcmp.eq.s32.totalorder %v1117_v9, 1 }
 0x1dc   : > { %15559 = vst [vmem:[#allocation23_spill] sm:$0xff] %v15558_v0  ;;  %15562 = vst [vmem:[#allocation24_spill] sm:$0xff] %v15561_v7  ;;  %v15567_v17 = vsel %vm11362_vm2, 4294967295, %v15566_v17 }
 0x1dd   : > { %15565 = vst [vmem:[#allocation25_spill] sm:$0xff] %v15564_v8  ;;  %15568 = vst [vmem:[#allocation26_spill] sm:$0xff] %v15567_v17 }
 0x1e1   : > { %v936_v41 = vpop.permute.xlu0 %935 }
 0x2ab   : > { %v1008_v42 = vpop.f32.mrb[0].mxu0  ;;  %v1079_v43 = vpop.f32.mrb[0].mxu1 }
 0x2ac   : > { %v1009_v44 = vadd.f32 %v1008_v42, %v936_v41  ;;  %v1080_v45 = vadd.f32 %v1079_v43, %v936_v41  ;;  %v1010_v46 = vpop.f32.mrb[1].mxu0  ;;  %v1081_v47 = vpop.f32.mrb[1].mxu1  ;;  %v1213_v42 = vsel %vm1188_vm5, 1, %v10818_v40 }
 0x2ad   : > { %v1011_v50 = vadd.f32 %v1010_v46, %v936_v41  ;;  %v1082_v52 = vadd.f32 %v1081_v47, %v936_v41  ;;  %v1225_v43 = vrot.slane %v1213_v42, %v11328_v60  ;;  %v1217_v58 = vrot.slane %v1213_v42, %v11338_v3 }
 0x2ae   : > { %v1084_v48 = vmax.f32 %v1009_v44, 0.0  ;;  %v1086_v49 = vmax.f32 %v1080_v45, 0.0  ;;  %v15581_v44 = vmov 0  ;;  %v1221_v45 = vrot.slane %v1213_v42, %v11324_v57 }
 0x2af   : > { %v1085_v51 = vmax.f32 %v1011_v50, 0.0  ;;  %v1087_v53 = vmax.f32 %v1082_v52, 0.0  ;;  %v15584_v50 = vmov 0  ;;  %vm11441_vm9 = vcmp.eq.s32.totalorder %v1217_v58, 1 }
 0x2b0   : > { %1097 = vrot.lane.b32.xlu0 %v1086_v49, %s15423_s2  ;;  %1093 = vrot.lane.b32.xlu1 %v1084_v48, %s15423_s2  ;;  %vm11421_vm5 = vcmp.eq.s32.totalorder %v1221_v45, 1 }
 0x2b1   : > { %v15585_v50 = vsel %vm11421_vm5, 4294967295, %v15584_v50 }
 0x2b2   : > { %15586 = vst [vmem:[#allocation32_spill] sm:$0xff] %v15585_v50 }
 0x2b4   : > { %1108 = vrot.lane.b32.xlu0 %v1084_v48, %s15409_s20  ;;  %1095 = vrot.lane.b32.xlu1 %v1085_v51, %s15423_s2 }
 0x2b8   : > { %1099 = vrot.lane.b32.xlu1 %v1087_v53, %s15423_s2 }
 0x322   : > { %v1094_v62 = vpop.permute.xlu1 %1093  ;;  %v1098_v63 = vpop.permute.xlu0 %1097 }
 0x326   : > { %v1096_v4 = vpop.permute.xlu1 %1095  ;;  %v1109_v10 = vpop.permute.xlu0 %1108 }
 0x327   : > { %v1102_v5 = vsel %vm15257_vm1, %v1096_v4, %v1098_v63  ;;  %v1101_v16 = vsel %vm15257_vm1, %v1094_v62, %v1096_v4  ;;  %v15590_v4 = vmov 0 }
 0x328   : > { %v1135_v6 = vsel %vm11332_vm7, %v1102_v5, %v1085_v51  ;;  %v1134_v18 = vsel %vm11362_vm2, %v1101_v16, %v1084_v48  ;;  %v1229_v51 = vrot.slane %v1213_v42, %v11330_v61  ;;  %v15591_v4 = vsel %vm11441_vm9, 4294967295, %v15590_v4 }
 0x329   : > { %1145 = vrot.lane.b32.xlu0 %v1135_v6, %s15438_s19  ;;  %15592 = vst [vmem:[#allocation34_spill] sm:$0xff] %v15591_v4  ;;  %v15596_v16 = vmov 0 }
 0x32a   : > { %v1100_v11 = vpop.permute.xlu1 %1099 }
 0x32b   : > { %v1103_v12 = vsel %vm15257_vm1, %v1098_v63, %v1100_v11  ;;  %v1112_v13 = vsel %vm15247_vm14, %v1100_v11, %v1109_v10  ;;  %vm1138_vm14 = vcmp.eq.s32.totalorder %v11321_v55, 2  ;;  %vm15266_vm1 = vcmask 7168  }
 0x32c   : > { %v1136_v14 = vsel %vm11344_vm15, %v1103_v12, %v1086_v49  ;;  %v1137_v15 = vsel %vm11348_vm3, %v1112_v13, %v1087_v53  ;;  %v1163_v19 = vsel %vm1138_vm14, 1, %v10818_v40  ;;  %v15593_v10 = vmov 0 }
 0x32d   : > { %1147 = vrot.lane.b32.xlu1 %v1136_v14, %s15438_s19  ;;  %1149 = vrot.lane.b32.xlu0 %v1137_v15, %s15438_s19  ;;  %v1175_v20 = vrot.slane %v1163_v19, %v11328_v60  ;;  %v1171_v21 = vrot.slane %v1163_v19, %v11324_v57  ;;  %v1167_v25 = vrot.slane %v1163_v19, %v11338_v3 }
 0x32e   : > { %v1179_v33 = vrot.slane %v1163_v19, %v11330_v61 }
 0x32f   : > { %vm11374_vm8 = vcmp.eq.s32.totalorder %v1175_v20, 1  ;;  %vm11378_vm13 = vcmp.eq.s32.totalorder %v1171_v21, 1  ;;  %vm11391_vm14 = vcmp.eq.s32.totalorder %v1167_v25, 1 }
 0x330   : > { %v15570_v23 = vsel %vm11374_vm8, 4294967295, %v15569_v23  ;;  %v15573_v24 = vsel %vm11378_vm13, 4294967295, %v15572_v24  ;;  %v15576_v32 = vsel %vm11391_vm14, 4294967295, %v15575_v32  ;;  %vm11400_vm6 = vcmp.eq.s32.totalorder %v1179_v33, 1 }
 0x331   : > { %1143 = vrot.lane.b32.xlu1 %v1134_v18, %s15438_s19  ;;  %15571 = vst [vmem:[#allocation27_spill] sm:$0xff] %v15570_v23  ;;  %15574 = vst [vmem:[#allocation28_spill] sm:$0xff] %v15573_v24  ;;  %v15579_v37 = vsel %vm11400_vm6, 4294967295, %v15578_v37 }
 0x332   : > { %15577 = vst [vmem:[#allocation29_spill] sm:$0xff] %v15576_v32  ;;  %15580 = vst [vmem:[#allocation30_spill] sm:$0xff] %v15579_v37 }
 0x335   : > { %1158 = vrot.lane.b32.xlu1 %v1134_v18, %s15401_s28 }
 0x39b   : > { %v1146_v22 = vpop.permute.xlu0 %1145 }
 0x39f   : > { %v1148_v26 = vpop.permute.xlu1 %1147  ;;  %v1150_v27 = vpop.permute.xlu0 %1149 }
 0x3a0   : > { %v1152_v28 = vsel %vm15258_vm0, %v1146_v22, %v1148_v26  ;;  %v1153_v29 = vsel %vm15258_vm0, %v1148_v26, %v1150_v27 }
 0x3a1   : > { %v1186_v30 = vsel %vm11374_vm8, %v1153_v29, %v1136_v14  ;;  %v1185_v31 = vsel %vm11378_vm13, %v1152_v28, %v1135_v6  ;;  %v1263_v6 = vsel %vm1238_vm4, 1, %v10818_v40 }
 0x3a2   : > { %1200 = vrot.lane.b32.xlu0 %v1186_v30, %s15387_s14  ;;  %1198 = vrot.lane.b32.xlu1 %v1185_v31, %s15387_s14  ;;  %v1275_v9 = vrot.slane %v1263_v6, %v11328_v60  ;;  %v1279_v11 = vrot.slane %v1263_v6, %v11330_v61  ;;  %v1271_v25 = vrot.slane %v1263_v6, %v11324_v57 }
 0x3a3   : > { %v1144_v34 = vpop.permute.xlu1 %1143 }
 0x3a4   : > { %v1151_v35 = vsel %vm15258_vm0, %v1144_v34, %v1146_v22  ;;  %vm11412_vm0 = vcmp.eq.s32.totalorder %v1225_v43, 1  ;;  %vm11451_vm10 = vcmp.eq.s32.totalorder %v1275_v9, 1  ;;  %vm11460_vm11 = vcmp.eq.s32.totalorder %v1279_v11, 1 }
 0x3a5   : > { %v1184_v36 = vsel %vm11391_vm14, %v1151_v35, %v1134_v18  ;;  %v15582_v44 = vsel %vm11412_vm0, 4294967295, %v15581_v44  ;;  %v15594_v10 = vsel %vm11451_vm10, 4294967295, %v15593_v10  ;;  %v15597_v16 = vsel %vm11460_vm11, 4294967295, %v15596_v16 }
 0x3a6   : > { %1196 = vrot.lane.b32.xlu0 %v1184_v36, %s15387_s14  ;;  %15583 = vst [vmem:[#allocation31_spill] sm:$0xff] %v15582_v44  ;;  %15595 = vst [vmem:[#allocation35_spill] sm:$0xff] %v15594_v10  ;;  %v1267_v18 = vrot.slane %v1263_v6, %v11338_v3  ;;  %v15599_v22 = vmov 0  ;;  %v15621_v9 = vmov 0 }
 0x3a7   : > { %v1159_v38 = vpop.permute.xlu1 %1158  ;;  %15598 = vst [vmem:[#allocation36_spill] sm:$0xff] %v15597_v16 }
 0x3a8   : > { %v1162_v39 = vsel %vm15261_vm12, %v1150_v27, %v1159_v38  ;;  %vm11430_vm12 = vcmp.eq.s32.totalorder %v1229_v51, 1  ;;  %vm11469_vm4 = vcmp.eq.s32.totalorder %v1267_v18, 1 }
 0x3a9   : > { %v1187_v41 = vsel %vm11400_vm6, %v1162_v39, %v1137_v15  ;;  %v15588_v56 = vsel %vm11430_vm12, 4294967295, %v15587_v56  ;;  %v15600_v22 = vsel %vm11469_vm4, 4294967295, %v15599_v22  ;;  %v15605_v39 = vmov 0 }
 0x3aa   : > { %1190 = vrot.lane.b32.xlu0 %v1187_v41, %s15385_s25  ;;  %1202 = vrot.lane.b32.xlu1 %v1187_v41, %s15387_s14  ;;  %15589 = vst [vmem:[#allocation33_spill] sm:$0xff] %v15588_v56  ;;  %15601 = vst [vmem:[#allocation37_spill] sm:$0xff] %v15600_v22 }
 0x414   : > { %v1201_v46 = vpop.permute.xlu0 %1200  ;;  %v1199_v47 = vpop.permute.xlu1 %1198 }
 0x415   : > { %v1206_v48 = vsel %vm15266_vm1, %v1199_v47, %v1201_v46 }
 0x416   : > { %v1236_v49 = vsel %vm11412_vm0, %v1206_v48, %v1186_v30 }
 0x417   : > { %1250 = vrot.lane.b32.xlu0 %v1236_v49, %s15369_s27 }
 0x418   : > { %v1197_v52 = vpop.permute.xlu0 %1196 }
 0x419   : > { %v1205_v53 = vsel %vm15266_vm1, %v1197_v52, %v1199_v47  ;;  %v15611_v47 = vmov 0 }
 0x41a   : > { %v1235_v54 = vsel %vm11421_vm5, %v1205_v53, %v1185_v31  ;;  %v15602_v31 = vmov 0 }
 0x41b   : > { %1248 = vrot.lane.b32.xlu1 %v1235_v54, %s15369_s27 }
 0x41c   : > { %v1191_v59 = vpop.permute.xlu0 %1190  ;;  %v1203_v62 = vpop.permute.xlu1 %1202 }
 0x41d   : > { %v1207_v63 = vsel %vm15266_vm1, %v1201_v46, %v1203_v62  ;;  %v1212_v2 = vsel %vm15266_vm1, %v1191_v59, %v1197_v52  ;;  %vm15273_vm1 = vcmask 15360   ;;  %v15608_v46 = vmov 0 }
 0x41e   : > { %v1237_v1 = vsel %vm11430_vm12, %v1207_v63, %v1187_v41  ;;  %v1234_v5 = vsel %vm11441_vm9, %v1212_v2, %v1184_v36  ;;  %v15618_v63 = vmov 0 }
 0x41f   : > { %1240 = vrot.lane.b32.xlu0 %v1237_v1, %s15367_s26  ;;  %1252 = vrot.lane.b32.xlu1 %v1237_v1, %s15369_s27 }
 0x423   : > { %1246 = vrot.lane.b32.xlu1 %v1234_v5, %s15369_s27 }
 0x489   : > { %v1251_v12 = vpop.permute.xlu0 %1250 }
 0x48d   : > { %v1249_v13 = vpop.permute.xlu1 %1248 }
 0x48e   : > { %v1256_v14 = vsel %vm15273_vm1, %v1249_v13, %v1251_v12 }
 0x48f   : > { %v1286_v15 = vsel %vm11451_vm10, %v1256_v14, %v1236_v49  ;;  %vm1288_vm10 = vcmp.eq.s32.totalorder %v11321_v55, 5 }
 0x490   : > { %1297 = vrot.lane.b32.xlu0 %v1286_v15, %s15383_s29  ;;  %v1311_v34 = vsel %vm1288_vm10, 1, %v10818_v40 }
 0x491   : > { %v1253_v19 = vpop.permute.xlu1 %1252  ;;  %v1241_v26 = vpop.permute.xlu0 %1240  ;;  %v1327_v35 = vrot.slane %v1311_v34, %v11330_v61  ;;  %v1319_v41 = vrot.slane %v1311_v34, %v11324_v57  ;;  %v1315_v42 = vrot.slane %v1311_v34, %v11338_v3  ;;  %v1323_v48 = vrot.slane %v1311_v34, %v11328_v60 }
 0x492   : > { %v1257_v20 = vsel %vm15273_vm1, %v1251_v12, %v1253_v19  ;;  %v15633_v34 = vmov 0 }
 0x493   : > { %v1287_v21 = vsel %vm11460_vm11, %v1257_v20, %v1237_v1  ;;  %vm11480_vm11 = vcmp.eq.s32.totalorder %v1271_v25, 1  ;;  %vm11503_vm10 = vcmp.eq.s32.totalorder %v1315_v42, 1  ;;  %vm11518_vm0 = vcmp.eq.s32.totalorder %v1323_v48, 1 }
 0x494   : > { %1299 = vrot.lane.b32.xlu1 %v1287_v21, %s15383_s29  ;;  %v15603_v31 = vsel %vm11480_vm11, 4294967295, %v15602_v31  ;;  %v15612_v47 = vsel %vm11503_vm10, 4294967295, %v15611_v47  ;;  %v15619_v63 = vsel %vm11518_vm0, 4294967295, %v15618_v63  ;;  %v15625_v20 = vmov 0 }
 0x495   : > { %v1247_v27 = vpop.permute.xlu1 %1246  ;;  %15604 = vst [vmem:[#allocation38_spill] sm:$0xff] %v15603_v31  ;;  %15613 = vst [vmem:[#allocation41_spill] sm:$0xff] %v15612_v47  ;;  %v15628_v25 = vmov 0  ;;  %v15636_v48 = vmov 0 }
 0x496   : > { %v1262_v28 = vsel %vm15273_vm1, %v1241_v26, %v1247_v27  ;;  %v1255_v30 = vsel %vm15273_vm1, %v1247_v27, %v1249_v13  ;;  %vm11490_vm1 = vcmp.eq.s32.totalorder %v1327_v35, 1  ;;  %15620 = vst [vmem:[#allocation42_spill] sm:$0xff] %v15619_v63 }
 0x497   : > { %v1284_v29 = vsel %vm11469_vm4, %v1262_v28, %v1234_v5  ;;  %v1285_v33 = vsel %vm11480_vm11, %v1255_v30, %v1235_v54  ;;  %v15606_v39 = vsel %vm11490_vm1, 4294967295, %v15605_v39  ;;  %vm11499_vm11 = vcmp.eq.s32.totalorder %v1319_v41, 1 }
 0x498   : > { %1293 = vrot.lane.b32.xlu1 %v1284_v29, %s15383_s29  ;;  %1307 = vrot.lane.b32.xlu0 %v1284_v29, %s15365_s23  ;;  %15607 = vst [vmem:[#allocation39_spill] sm:$0xff] %v15606_v39  ;;  %v15609_v46 = vsel %vm11499_vm11, 4294967295, %v15608_v46  ;;  %vm15614_vm4 = vcmask 719872  }
 0x499   : > { %15610 = vst [vmem:[#allocation40_spill] sm:$0xff] %v15609_v46  ;;  %vm15615_vm9 = vmmov %vm15614_vm4 }
 0x49a   : > { %vm15616_vm12 = vmmov %vm15614_vm4 }
 0x49c   : > { %1295 = vrot.lane.b32.xlu0 %v1285_v33, %s15383_s29 }
 0x502   : > { %v1298_v36 = vpop.permute.xlu0 %1297 }
 0x506   : > { %v1300_v38 = vpop.permute.xlu1 %1299 }
 0x507   : > { %v1303_v54 = vsel %vm15616_vm12, %v1298_v36, %v1300_v38  ;;  %vm15624_vm12 = vcmask 883712  }
 0x50a   : > { %v1308_v43 = vpop.permute.xlu0 %1307  ;;  %v1294_v49 = vpop.permute.xlu1 %1293 }
 0x50b   : > { %v1335_v45 = vsel %vm11490_vm1, %v1308_v43, %v1287_v21  ;;  %vm15617_vm1 = vcmask 850944  }
 0x50c   : > { %1347 = vrot.lane.b32.xlu0 %v1335_v45, %s15381_s24  ;;  %v1310_v62 = vsel %vm15617_vm1, %v1303_v54, %v1308_v43 }
 0x50d   : > { %v1334_v1 = vsel %vm11518_vm0, %v1310_v62, %v1286_v15 }
 0x50e   : > { %v1296_v51 = vpop.permute.xlu0 %1295 }
 0x50f   : > { %v1301_v52 = vsel %vm15614_vm4, %v1294_v49, %v1296_v51  ;;  %v1302_v53 = vsel %vm15615_vm9, %v1296_v51, %v1298_v36  ;;  %vm1336_vm9 = vcmp.eq.s32.totalorder %v11321_v55, 6  ;;  %v15639_v49 = vmov 0 }
 0x510   : > { %v1333_v58 = vsel %vm11499_vm11, %v1302_v53, %v1285_v33  ;;  %v1332_v59 = vsel %vm11503_vm10, %v1301_v52, %v1284_v29  ;;  %v1359_v2 = vsel %vm1336_vm9, 1, %v10818_v40  ;;  %vm15632_vm11 = vmmov %vm15624_vm12 }
 0x511   : > { %1343 = vrot.lane.b32.xlu0 %v1333_v58, %s15381_s24  ;;  %1341 = vrot.lane.b32.xlu1 %v1332_v59, %s15381_s24  ;;  %v1363_v6 = vrot.slane %v1359_v2, %v11338_v3  ;;  %v1375_v15 = vrot.slane %v1359_v2, %v11330_v61  ;;  %v1371_v18 = vrot.slane %v1359_v2, %v11328_v60 }
 0x512   : > { %v1367_v21 = vrot.slane %v1359_v2, %v11324_v57 }
 0x513   : > { %vm11529_vm1 = vcmp.eq.s32.totalorder %v1363_v6, 1  ;;  %vm11539_vm4 = vcmp.eq.s32.totalorder %v1375_v15, 1  ;;  %vm11544_vm9 = vcmp.eq.s32.totalorder %v1371_v18, 1 }
 0x514   : > { %v15622_v9 = vsel %vm11529_vm1, 4294967295, %v15621_v9  ;;  %v15626_v20 = vsel %vm11539_vm4, 4294967295, %v15625_v20  ;;  %v15629_v25 = vsel %vm11544_vm9, 4294967295, %v15628_v25  ;;  %vm11556_vm10 = vcmp.eq.s32.totalorder %v1367_v21, 1 }
 0x515   : > { %1345 = vrot.lane.b32.xlu1 %v1334_v1, %s15381_s24  ;;  %15623 = vst [vmem:[#allocation43_spill] sm:$0xff] %v15622_v9  ;;  %15627 = vst [vmem:[#allocation44_spill] sm:$0xff] %v15626_v20  ;;  %v15634_v34 = vsel %vm11556_vm10, 4294967295, %v15633_v34 }
 0x516   : > { %15630 = vst [vmem:[#allocation45_spill] sm:$0xff] %v15629_v25  ;;  %15635 = vst [vmem:[#allocation46_spill] sm:$0xff] %v15634_v34 }
 0x519   : > { %1355 = vrot.lane.b32.xlu1 %v1332_v59, %s15292_s22  ;;  %s15300_s22 = smov 4  }
 0x57e   : > { %v1348_v5 = vpop.permute.xlu0 %1347 }
 0x583   : > { %v1344_v11 = vpop.permute.xlu0 %1343  ;;  %v1342_v12 = vpop.permute.xlu1 %1341 }
 0x584   : > { %v1349_v13 = vsel %vm15624_vm12, %v1342_v12, %v1344_v11  ;;  %v15645_v12 = vmov 0 }
 0x585   : > { %v1380_v14 = vsel %vm11529_vm1, %v1349_v13, %v1332_v59  ;;  %vm15631_vm1 = vcmask 1014784  }
 0x586   : > { %1396 = vrot.lane.b32.xlu0 %v1380_v14, %s15302_s16 }
 0x587   : > { %v1346_v19 = vpop.permute.xlu1 %1345 }
 0x588   : > { %v1351_v26 = vsel %vm15624_vm12, %v1346_v19, %v1348_v5  ;;  %v1350_v30 = vsel %vm15632_vm11, %v1344_v11, %v1346_v19  ;;  %vm1384_vm11 = vcmp.eq.s32.totalorder %v11321_v55, 7 }
 0x589   : > { %v1381_v35 = vsel %vm11556_vm10, %v1350_v30, %v1333_v58  ;;  %v1410_v38 = vsel %vm1384_vm11, 1, %v10818_v40 }
 0x58a   : > { %v1418_v41 = vrot.slane %v1410_v38, %v11324_v57  ;;  %v1426_v42 = vrot.slane %v1410_v38, %v11330_v61  ;;  %v1422_v51 = vrot.slane %v1410_v38, %v11328_v60  ;;  %v1414_v2 = vrot.slane %v1410_v38, %v11338_v3 }
 0x58b   : > { %v1356_v27 = vpop.permute.xlu1 %1355 }
 0x58c   : > { %v1358_v28 = vsel %vm15631_vm1, %v1351_v26, %v1356_v27  ;;  %v1383_v29 = vsel %vm11539_vm4, %v1356_v27, %v1335_v45  ;;  %vm11569_vm1 = vcmp.eq.s32.totalorder %v1418_v41, 1  ;;  %vm11573_vm12 = vcmp.eq.s32.totalorder %v1426_v42, 1 }
 0x58d   : > { %1389 = vrot.lane.b32.xlu1 %v1383_v29, %s15300_s22  ;;  %v1382_v33 = vsel %vm11544_vm9, %v1358_v28, %v1334_v1  ;;  %v15637_v48 = vsel %vm11569_vm1, 4294967295, %v15636_v48  ;;  %v15640_v49 = vsel %vm11573_vm12, 4294967295, %v15639_v49  ;;  %vm15307_vm9 = vcmask 162816  }
 0x58e   : > { %1387 = vrot.lane.b32.xlu0 %v1382_v33, %s15300_s22  ;;  %15638 = vst [vmem:[#allocation47_spill] sm:$0xff] %v15637_v48  ;;  %15641 = vst [vmem:[#allocation48_spill] sm:$0xff] %v15640_v49  ;;  %vm15306_vm4 = vcmask 31744   ;;  %s15312_s22 = smov 40   ;;  %vm11586_vm11 = vcmp.eq.s32.totalorder %v1422_v51, 1  ;;  %v15642_v1 = vmov 0 }
 0x58f   : > { %v15643_v1 = vsel %vm11586_vm11, 4294967295, %v15642_v1  ;;  %v15648_v27 = vmov 0  ;;  %v15651_v28 = vmov 0 }
 0x590   : > { %15644 = vst [vmem:[#allocation49_spill] sm:$0xff] %v15643_v1 }
 0x591   : > { %1398 = vrot.lane.b32.xlu1 %v1381_v35, %s15302_s16 }
 0x592   : > { %1400 = vrot.lane.b32.xlu0 %v1382_v33, %s15302_s16  ;;  %s15360_s16 = smov 24  }
 0x5f8   : > { %v1397_v36 = vpop.permute.xlu0 %1396 }
 0x5ff   : > { %v1390_v43 = vpop.permute.xlu1 %1389 }
 0x600   : > { %v1388_v45 = vpop.permute.xlu0 %1387 }
 0x601   : > { %v1392_v5 = vsel %vm15306_vm4, %v1388_v45, %v1390_v43  ;;  %vm1435_vm4 = vcmp.eq.s32.totalorder %v11321_v55, 8 }
 0x602   : > { %v1409_v11 = vsel %vm15307_vm9, %v1392_v5, %v1397_v36  ;;  %v1461_v15 = vsel %vm1435_vm4, 1, %v10818_v40  ;;  %vm15324_vm4 = vcmask 195584  }
 0x603   : > { %v1399_v52 = vpop.permute.xlu1 %1398  ;;  %v1477_v18 = vrot.slane %v1461_v15, %v11330_v61  ;;  %v1473_v19 = vrot.slane %v1461_v15, %v11328_v60  ;;  %v1469_v55 = vrot.slane %v1461_v15, %v11324_v57  ;;  %v15657_v57 = vmov 0 }
 0x604   : > { %v1403_v53 = vsel %vm15307_vm9, %v1397_v36, %v1399_v52  ;;  %v1401_v54 = vpop.permute.xlu0 %1400 }
 0x605   : > { %v1432_v58 = vsel %vm11569_vm1, %v1403_v53, %v1381_v35  ;;  %v1434_v59 = vsel %vm11573_vm12, %v1401_v54, %v1383_v29  ;;  %v1404_v62 = vsel %vm15307_vm9, %v1399_v52, %v1401_v54  ;;  %vm11597_vm1 = vcmp.eq.s32.totalorder %v1414_v2, 1 }
 0x606   : > { %1449 = vrot.lane.b32.xlu1 %v1432_v58, %s15312_s22  ;;  %1440 = vrot.lane.b32.xlu0 %v1434_v59, %s15360_s16  ;;  %v1433_v6 = vsel %vm11586_vm11, %v1404_v62, %v1382_v33  ;;  %v15646_v12 = vsel %vm11597_vm1, 4294967295, %v15645_v12  ;;  %v1431_v13 = vsel %vm11597_vm1, %v1409_v11, %v1380_v14  ;;  %vm15325_vm9 = vcmask 326656  }
 0x607   : > { %15647 = vst [vmem:[#allocation50_spill] sm:$0xff] %v15646_v12  ;;  %vm11608_vm11 = vcmp.eq.s32.totalorder %v1477_v18, 1  ;;  %vm11612_vm12 = vcmp.eq.s32.totalorder %v1473_v19, 1  ;;  %v1465_v14 = vrot.slane %v1461_v15, %v11338_v3  ;;  %v15654_v3 = vmov 0 }
 0x608   : > { %v15649_v27 = vsel %vm11608_vm11, 4294967295, %v15648_v27  ;;  %v15652_v28 = vsel %vm11612_vm12, 4294967295, %v15651_v28  ;;  %vm11629_vm10 = vcmp.eq.s32.totalorder %v1469_v55, 1 }
 0x609   : > { %15650 = vst [vmem:[#allocation51_spill] sm:$0xff] %v15649_v27  ;;  %15653 = vst [vmem:[#allocation52_spill] sm:$0xff] %v15652_v28  ;;  %vm11625_vm1 = vcmp.eq.s32.totalorder %v1465_v14, 1  ;;  %v15658_v57 = vsel %vm11629_vm10, 4294967295, %v15657_v57 }
 0x60a   : > { %1451 = vrot.lane.b32.xlu0 %v1433_v6, %s15312_s22  ;;  %1438 = vrot.lane.b32.xlu1 %v1433_v6, %s15360_s16  ;;  %v15655_v3 = vsel %vm11625_vm1, 4294967295, %v15654_v3  ;;  %15659 = vst [vmem:[#allocation54_spill] sm:$0xff] %v15658_v57 }
 0x60b   : > { %15656 = vst [vmem:[#allocation53_spill] sm:$0xff] %v15655_v3 }
 0x60e   : > { %1447 = vrot.lane.b32.xlu1 %v1431_v13, %s15312_s22  ;;  %s15336_s22 = smov 42  }
 0x678   : > { %v1450_v21 = vpop.permute.xlu1 %1449  ;;  %v1441_v26 = vpop.permute.xlu0 %1440 }
 0x67c   : > { %v1452_v40 = vpop.permute.xlu0 %1451  ;;  %v1439_v29 = vpop.permute.xlu1 %1438 }
 0x67d   : > { %v1455_v61 = vsel %vm15325_vm9, %v1450_v21, %v1452_v40  ;;  %v1485_v60 = vsel %vm11608_vm11, %v1452_v40, %v1434_v59  ;;  %v1443_v33 = vsel %vm15324_vm4, %v1439_v29, %v1441_v26  ;;  %vm15322_vm11 = vcmask 474112  }
 0x67e   : > { %1496 = vrot.lane.b32.xlu1 %v1485_v60, %s15336_s22  ;;  %v1484_v30 = vsel %vm11612_vm12, %v1455_v61, %v1433_v6  ;;  %vm15323_vm12 = vcmask 343040  }
 0x67f   : > { %1494 = vrot.lane.b32.xlu0 %v1484_v30, %s15336_s22 }
 0x680   : > { %v1448_v35 = vpop.permute.xlu1 %1447 }
 0x681   : > { %v1454_v36 = vsel %vm15325_vm9, %v1448_v35, %v1450_v21  ;;  %v1460_v38 = vsel %vm15325_vm9, %v1443_v33, %v1448_v35  ;;  %vm15663_vm9 = vcmask 1031168  }
 0x682   : > { %v1482_v41 = vsel %vm11625_vm1, %v1460_v38, %v1431_v13  ;;  %v1483_v42 = vsel %vm11629_vm10, %v1454_v36, %v1432_v58  ;;  %vm15664_vm10 = vmmov %vm15663_vm9 }
 0x683   : > { %1490 = vrot.lane.b32.xlu0 %v1482_v41, %s15336_s22  ;;  %1492 = vrot.lane.b32.xlu1 %v1483_v42, %s15336_s22  ;;  %s15766_s22 = smov 20  }
 0x6f0   : > { %v1497_v43 = vpop.permute.xlu1 %1496 }
 0x6f1   : > { %v1495_v45 = vpop.permute.xlu0 %1494 }
 0x6f2   : > { %v1501_v51 = vsel %vm15323_vm12, %v1495_v45, %v1497_v43 }
 0x6f3   : > { %v1506_v54 = vsel %vm15322_vm11, %v1501_v51, 0.0  ;;  %vm15660_vm11 = vcmask 1039360  }
 0x6f4   : > { %vm15662_vm4 = vmmov %vm15660_vm11 }
 0x6f5   : > { %v1491_v52 = vpop.permute.xlu0 %1490  ;;  %v1493_v53 = vpop.permute.xlu1 %1492 }
 0x6f6   : > { %v1504_v59 = vsel %vm15323_vm12, 0.0, %v1491_v52  ;;  %v1499_v62 = vsel %vm15323_vm12, %v1491_v52, %v1493_v53  ;;  %v1500_v58 = vsel %vm15323_vm12, %v1493_v53, %v1495_v45  ;;  %vm15661_vm12 = vmmov %vm15660_vm11 }
 0x6f7   : > { %v8050_v2 = vpack.i.bf16 %v1504_v59, %v1506_v54  ;;  %v8045_v5 = vpack.i.bf16 %v1500_v58, %v1499_v62 }
 0x6f9   : > { %8051 = vrot.lane.b32.xlu1 %v8050_v2, %s15438_s19  ;;  %8046 = vrot.lane.b32.xlu0 %v8045_v5, %s15438_s19 }
 0x6fd   : > { %8061 = vrot.lane.b32.xlu1 %v8050_v2, %s15423_s2  ;;  %8056 = vrot.lane.b32.xlu0 %v8045_v5, %s15423_s2 }
 0x701   : > { %8071 = vrot.lane.b32.xlu1 %v8050_v2, %s15381_s24  ;;  %8066 = vrot.lane.b32.xlu0 %v8045_v5, %s15381_s24 }
 0x705   : > { %8081 = vrot.lane.b32.xlu1 %v8050_v2, %s15413_s21  ;;  %8076 = vrot.lane.b32.xlu0 %v8045_v5, %s15413_s21 }
 0x709   : > { %8091 = vrot.lane.b32.xlu1 %v8050_v2, %s15334_s15  ;;  %8086 = vrot.lane.b32.xlu0 %v8045_v5, %s15334_s15  ;;  %s15757_s15 = smov 124  }
 0x70d   : > { %8101 = vrot.lane.b32.xlu1 %v8050_v2, %s15383_s29  ;;  %8096 = vrot.lane.b32.xlu0 %v8045_v5, %s15383_s29 }
 0x711   : > { %8111 = vrot.lane.b32.xlu1 %v8050_v2, %s15332_s18  ;;  %8106 = vrot.lane.b32.xlu0 %v8045_v5, %s15332_s18  ;;  %s15769_s18 = smov 4  }
 0x715   : > { %1590 = vrot.lane.b32.xlu1 %v1500_v58, %s15330_s1  ;;  %1588 = vrot.lane.b32.xlu0 %v1499_v62, %s15330_s1 }
 0x719   : > { %1586 = vrot.lane.b32.xlu1 %v1504_v59, %s15330_s1  ;;  %1592 = vrot.lane.b32.xlu0 %v1506_v54, %s15330_s1  ;;  %s15782_s1 = smov 40  }
 0x76b   : > { %v8047_v6 = vpop.permute.xlu0 %8046  ;;  %v8052_v11 = vpop.permute.xlu1 %8051 }
 0x76c   : > { %v8049_v13 = vunpack.i.h.bf16 %v8047_v6  ;;  %v8048_v15 = vunpack.i.l.bf16 %v8047_v6  ;;  %v8054_v18 = vunpack.i.h.bf16 %v8052_v11  ;;  %v8053_v19 = vunpack.i.l.bf16 %v8052_v11 }
 0x76e   : > { %v1518_v21 = vsel %vm15660_vm11, %v8048_v15, %v8049_v13  ;;  %v1517_v26 = vsel %vm15661_vm12, %v8054_v18, %v8048_v15  ;;  %v1519_v14 = vsel %vm15662_vm4, %v8049_v13, %v8053_v19  ;;  %vm15665_vm11 = vmmov %vm15663_vm9  ;;  %vm15666_vm12 = vcmask 883712  }
 0x76f   : > { %v8120_v55 = vpack.i.bf16 %v8053_v19, %v1517_v26  ;;  %v8057_v40 = vpop.permute.xlu0 %8056  ;;  %v8062_v29 = vpop.permute.xlu1 %8061  ;;  %v8115_v61 = vpack.i.bf16 %v1519_v14, %v1518_v21  ;;  %vm15667_vm4 = vmmov %vm15666_vm12 }
 0x770   : > { %v8059_v60 = vunpack.i.h.bf16 %v8057_v40  ;;  %v8058_v30 = vunpack.i.l.bf16 %v8057_v40  ;;  %v8064_v33 = vunpack.i.h.bf16 %v8062_v29  ;;  %v8063_v35 = vunpack.i.l.bf16 %v8062_v29  ;;  %vm15668_vm1 = vmmov %vm15667_vm4 }
 0x771   : > { %8116 = vrot.lane.b32.xlu0 %v8115_v61, %s15413_s21  ;;  %8121 = vrot.lane.b32.xlu1 %v8120_v55, %s15413_s21 }
 0x772   : > { %v1529_v36 = vsel %vm15663_vm9, %v8058_v30, %v8059_v60  ;;  %v1530_v38 = vsel %vm15664_vm10, %v8059_v60, %v8063_v35  ;;  %v1528_v41 = vsel %vm15665_vm11, %v8064_v33, %v8058_v30  ;;  %vm15669_vm10 = vcmask 875520  }
 0x773   : > { %v8067_v42 = vpop.permute.xlu0 %8066  ;;  %v8072_v43 = vpop.permute.xlu1 %8071  ;;  %v8125_v45 = vpack.i.bf16 %v1530_v38, %v1529_v36  ;;  %v8135_v58 = vpack.i.bf16 %v8063_v35, %v1528_v41  ;;  %vm15670_vm9 = vmmov %vm15669_vm10  ;;  %vm15672_vm11 = vcmask 867328  }
 0x774   : > { %v8069_v51 = vunpack.i.h.bf16 %v8067_v42  ;;  %v8068_v52 = vunpack.i.l.bf16 %v8067_v42  ;;  %v8074_v53 = vunpack.i.h.bf16 %v8072_v43  ;;  %v8073_v54 = vunpack.i.l.bf16 %v8072_v43 }
 0x775   : > { %8126 = vrot.lane.b32.xlu0 %v8125_v45, %s15413_s21 }
 0x776   : > { %v1540_v59 = vsel %vm15666_vm12, %v8068_v52, %v8069_v51  ;;  %v1541_v62 = vsel %vm15667_vm4, %v8069_v51, %v8073_v54  ;;  %v1539_v2 = vsel %vm15668_vm1, %v8074_v53, %v8068_v52  ;;  %vm15671_vm1 = vmmov %vm15670_vm9 }
 0x777   : > { %v8077_v5 = vpop.permute.xlu0 %8076  ;;  %v8082_v6 = vpop.permute.xlu1 %8081  ;;  %v8130_v11 = vpack.i.bf16 %v1541_v62, %v1540_v59  ;;  %v8140_v14 = vpack.i.bf16 %v8073_v54, %v1539_v2  ;;  %vm15673_vm12 = vmmov %vm15672_vm11 }
 0x778   : > { %v8079_v13 = vunpack.i.h.bf16 %v8077_v5  ;;  %v8078_v15 = vunpack.i.l.bf16 %v8077_v5  ;;  %v8084_v18 = vunpack.i.h.bf16 %v8082_v6  ;;  %v11677_v19 = vunpack.i.l.bf16 %v8082_v6  ;;  %vm15674_vm4 = vmmov %vm15672_vm11 }
 0x779   : > { %8136 = vrot.lane.b32.xlu0 %v8135_v58, %s15413_s21  ;;  %8131 = vrot.lane.b32.xlu1 %v8130_v11, %s15413_s21 }
 0x77a   : > { %v11682_v21 = vsel %vm15669_vm10, %v8078_v15, %v8079_v13  ;;  %v11686_v26 = vsel %vm15670_vm9, %v8079_v13, %v11677_v19  ;;  %v11689_v55 = vsel %vm15671_vm1, %v8084_v18, %v8078_v15  ;;  %vm15675_vm10 = vcmask 719872  }
 0x77b   : > { %v8087_v40 = vpop.permute.xlu0 %8086  ;;  %v8092_v29 = vpop.permute.xlu1 %8091  ;;  %v8145_v61 = vpack.i.bf16 %v11686_v26, %v11682_v21  ;;  %v8155_v45 = vpack.i.bf16 %v11677_v19, %v11689_v55  ;;  %vm15676_vm9 = vmmov %vm15675_vm10 }
 0x77c   : > { %v8089_v60 = vunpack.i.h.bf16 %v8087_v40  ;;  %v8088_v30 = vunpack.i.l.bf16 %v8087_v40  ;;  %v8094_v33 = vunpack.i.h.bf16 %v8092_v29  ;;  %v8093_v35 = vunpack.i.l.bf16 %v8092_v29  ;;  %vm15677_vm1 = vmmov %vm15676_vm9 }
 0x77d   : > { %8146 = vrot.lane.b32.xlu0 %v8145_v61, %s15413_s21  ;;  %8141 = vrot.lane.b32.xlu1 %v8140_v14, %s15413_s21 }
 0x77e   : > { %v1562_v36 = vsel %vm15672_vm11, %v8088_v30, %v8089_v60  ;;  %v1563_v38 = vsel %vm15673_vm12, %v8089_v60, %v8093_v35  ;;  %v1561_v41 = vsel %vm15674_vm4, %v8094_v33, %v8088_v30  ;;  %vm15678_vm11 = vcmask 711680  }
 0x77f   : > { %v8097_v42 = vpop.permute.xlu0 %8096  ;;  %v8102_v43 = vpop.permute.xlu1 %8101  ;;  %v8150_v51 = vpack.i.bf16 %v1563_v38, %v1562_v36  ;;  %v8160_v2 = vpack.i.bf16 %v8093_v35, %v1561_v41  ;;  %vm15679_vm12 = vmmov %vm15678_vm11  ;;  %v15371_v38 = vmov 0.0  }
 0x780   : > { %v8099_v52 = vunpack.i.h.bf16 %v8097_v42  ;;  %v8098_v53 = vunpack.i.l.bf16 %v8097_v42  ;;  %v8104_v54 = vunpack.i.h.bf16 %v8102_v43  ;;  %v8103_v59 = vunpack.i.l.bf16 %v8102_v43  ;;  %vm15680_vm4 = vmmov %vm15678_vm11  ;;  %1805 = vmatprep.mubr.f32.mxu0 %v15371_v38  ;;  %1882 = vmatprep.mubr.f32.mxu1 %v15371_v38 }
 0x781   : > { %8156 = vrot.lane.b32.xlu0 %v8155_v45, %s15413_s21  ;;  %8151 = vrot.lane.b32.xlu1 %v8150_v51, %s15413_s21 }
 0x782   : > { %v1573_v62 = vsel %vm15675_vm10, %v8098_v53, %v8099_v52  ;;  %v1574_v58 = vsel %vm15676_vm9, %v8099_v52, %v8103_v59  ;;  %v1572_v5 = vsel %vm15677_vm1, %v8104_v54, %v8098_v53  ;;  %vm15681_vm10 = vcmask 703488   ;;  %v1599_v53 = vld [vmem:[%s15684_s5] sm:$0xff]  ;;  %v1600_v54 = vld [vmem:[%s15684_s5 + $0x8] sm:$0xff]  ;;  %s16257_s5 = smov 14  }
 0x783   : > { %v8107_v6 = vpop.permute.xlu0 %8106  ;;  %v8112_v11 = vpop.permute.xlu1 %8111  ;;  %v8165_v13 = vpack.i.bf16 %v1574_v58, %v1573_v62  ;;  %v8175_v60 = vpack.i.bf16 %v8103_v59, %v1572_v5  ;;  %vm15682_vm9 = vmmov %vm15681_vm10 }
 0x784   : > { %v8109_v15 = vunpack.i.h.bf16 %v8107_v6  ;;  %v8108_v18 = vunpack.i.l.bf16 %v8107_v6  ;;  %v8114_v14 = vunpack.i.h.bf16 %v8112_v11  ;;  %v8113_v40 = vunpack.i.l.bf16 %v8112_v11  ;;  %vm15683_vm1 = vmmov %vm15682_vm9 }
 0x785   : > { %8166 = vrot.lane.b32.xlu0 %v8165_v13, %s15413_s21  ;;  %8161 = vrot.lane.b32.xlu1 %v8160_v2, %s15413_s21 }
 0x786   : > { %v1584_v29 = vsel %vm15678_vm11, %v8108_v18, %v8109_v15  ;;  %v1585_v61 = vsel %vm15679_vm12, %v8109_v15, %v8113_v40  ;;  %v1583_v36 = vsel %vm15680_vm4, %v8114_v14, %v8108_v18  ;;  %vm15685_vm11 = vcmask 875520  }
 0x787   : > { %v1589_v30 = vpop.permute.xlu0 %1588  ;;  %v1591_v33 = vpop.permute.xlu1 %1590  ;;  %v8170_v35 = vpack.i.bf16 %v1585_v61, %v1584_v29  ;;  %v8180_v41 = vpack.i.bf16 %v8113_v40, %v1583_v36  ;;  %vm15686_vm12 = vmmov %vm15685_vm11 }
 0x788   : > { %v1595_v42 = vsel %vm15681_vm10, %v1589_v30, %v1591_v33  ;;  %vm15687_vm4 = vmmov %vm15685_vm11 }
 0x789   : > { %8176 = vrot.lane.b32.xlu0 %v8175_v60, %s15413_s21  ;;  %8171 = vrot.lane.b32.xlu1 %v8170_v35, %s15413_s21  ;;  %vm15688_vm10 = vmmov %vm15687_vm4 }
 0x78b   : > { %v1593_v43 = vpop.permute.xlu0 %1592  ;;  %v1587_v45 = vpop.permute.xlu1 %1586 }
 0x78c   : > { %v1594_v51 = vsel %vm15682_vm9, %v1587_v45, %v1589_v30  ;;  %v1596_v52 = vsel %vm15683_vm1, %v1591_v33, %v1593_v43  ;;  %vm15689_vm9 = vmmov %vm15687_vm4 }
 0x78d   : > { %1669 = vrot.lane.b32.xlu0 %v1595_v42, %s15413_s21  ;;  %8181 = vrot.lane.b32.xlu1 %v8180_v41, %s15413_s21  ;;  %vm15690_vm1 = vmmov %vm15687_vm4 }
 0x791   : > { %1667 = vrot.lane.b32.xlu0 %v1594_v51, %s15413_s21  ;;  %1671 = vrot.lane.b32.xlu1 %v1596_v52, %s15413_s21 }
 0x795   : > { %1603 = vperm.xlu0 %8044, %v1599_v53   ;;  %1673 = vrot.lane.b32.xlu1 %v1593_v43, %s15413_s21 }
 0x799   : > { %1608 = vperm.xlu1 %8185, %v1600_v54  }
 0x7e3   : > { %v8117_v59 = vpop.permute.xlu0 %8116  ;;  %v8122_v62 = vpop.permute.xlu1 %8121 }
 0x7e4   : > { %v8119_v58 = vunpack.i.h.bf16 %v8117_v59  ;;  %v8118_v2 = vunpack.i.l.bf16 %v8117_v59  ;;  %v8124_v5 = vunpack.i.h.bf16 %v8122_v62  ;;  %v8123_v6 = vunpack.i.l.bf16 %v8122_v62 }
 0x7e6   : > { %v1677_v11 = vsel %vm15685_vm11, %v8119_v58, %v8124_v5  ;;  %v1675_v13 = vsel %vm15686_vm12, %v8123_v6, %v8118_v2  ;;  %v7271_v15 = vpack.c.bf16 %v8124_v5, %v11677_v19  ;;  %v1676_v18 = vsel %vm15687_vm4, %v8118_v2, %v8119_v58  ;;  %vm15691_vm11 = vmmov %vm15690_vm1 }
 0x7e7   : > { %v8127_v14 = vpop.permute.xlu0 %8126  ;;  %v7255_v40 = vpack.c.bf16 %v1676_v18, %v11682_v21  ;;  %v7273_v29 = vpack.c.bf16 %v1677_v11, %v11686_v26  ;;  %v7257_v61 = vpack.c.bf16 %v1675_v13, %v11689_v55  ;;  %vm15692_vm12 = vmmov %vm15690_vm1 }
 0x7e8   : > { %7272 = vmatprep.subr.bf16.mxu1 %v7271_v15  ;;  %v8129_v60 = vunpack.i.h.bf16 %v8127_v14  ;;  %v8128_v30 = vunpack.i.l.bf16 %v8127_v14  ;;  %vm15693_vm4 = vmmov %vm15690_vm1 }
 0x7e9   : > { %7256 = vmatprep.subr.bf16.mxu0 %v7255_v40  ;;  %7274 = vmatpush1.bf16.msra.mxu1 %v7273_v29 }
 0x7ea   : > { %7258 = vmatpush1.bf16.msra.mxu0 %v7257_v61  ;;  %v1679_v43 = vsel %vm15688_vm10, %v8128_v30, %v8129_v60  ;;  %vm15694_vm10 = vmmov %vm15690_vm1 }
 0x7eb   : > { %v8137_v33 = vpop.permute.xlu0 %8136  ;;  %v8132_v35 = vpop.permute.xlu1 %8131 }
 0x7ec   : > { %v8134_v36 = vunpack.i.h.bf16 %v8132_v35  ;;  %v8133_v41 = vunpack.i.l.bf16 %v8132_v35  ;;  %v8139_v19 = vunpack.i.h.bf16 %v8137_v33  ;;  %v8138_v42 = vunpack.i.l.bf16 %v8137_v33 }
 0x7ee   : > { %v1682_v21 = vsel %vm15689_vm9, %v8133_v41, %v8134_v36  ;;  %v1678_v53 = vsel %vm15690_vm1, %v8138_v42, %v8128_v30  ;;  %v1680_v54 = vsel %vm15691_vm11, %v8129_v60, %v8139_v19  ;;  %vm15695_vm9 = vmmov %vm15690_vm1 }
 0x7ef   : > { %v8147_v45 = vpop.permute.xlu0 %8146  ;;  %v8142_v26 = vpop.permute.xlu1 %8141  ;;  %v7259_v51 = vpack.c.bf16 %v1682_v21, %v1679_v43  ;;  %vm15696_vm11 = vmmov %vm15690_vm1 }
 0x7f0   : > { %v8144_v55 = vunpack.i.h.bf16 %v8142_v26  ;;  %v8143_v52 = vunpack.i.l.bf16 %v8142_v26  ;;  %v8149_v59 = vunpack.i.h.bf16 %v8147_v45  ;;  %v8148_v62 = vunpack.i.l.bf16 %v8147_v45 }
 0x7f1   : > { %7260 = vmatprep.subr.bf16.mxu0 %v7259_v51 }
 0x7f2   : > { %v1681_v58 = vsel %vm15692_vm12, %v8143_v52, %v8133_v41  ;;  %v1683_v2 = vsel %vm15693_vm4, %v8134_v36, %v8144_v55  ;;  %v7275_v5 = vpack.c.bf16 %v8144_v55, %v8139_v19  ;;  %v1685_v61 = vsel %vm15694_vm10, %v8148_v62, %v8149_v59  ;;  %vm15697_vm12 = vmmov %vm15690_vm1 }
 0x7f3   : > { %v8157_v6 = vpop.permute.xlu0 %8156  ;;  %v8152_v11 = vpop.permute.xlu1 %8151  ;;  %v7261_v13 = vpack.c.bf16 %v1681_v58, %v1678_v53  ;;  %v7277_v15 = vpack.c.bf16 %v1683_v2, %v1680_v54  ;;  %vm15698_vm4 = vmmov %vm15690_vm1 }
 0x7f4   : > { %v8154_v18 = vunpack.i.h.bf16 %v8152_v11  ;;  %v8153_v14 = vunpack.i.l.bf16 %v8152_v11  ;;  %7276 = vmatprep.subr.bf16.mxu1 %v7275_v5  ;;  %v8159_v40 = vunpack.i.h.bf16 %v8157_v6  ;;  %v8158_v29 = vunpack.i.l.bf16 %v8157_v6  ;;  %vm15699_vm10 = vmmov %vm15690_vm1 }
 0x7f5   : > { %7262 = vmatpush1.bf16.msra.mxu0 %v7261_v13  ;;  %7278 = vmatpush1.bf16.msra.mxu1 %v7277_v15 }
 0x7f6   : > { %v1688_v60 = vsel %vm15695_vm9, %v8153_v14, %v8154_v18  ;;  %v1684_v19 = vsel %vm15690_vm1, %v8158_v29, %v8148_v62  ;;  %v1686_v42 = vsel %vm15696_vm11, %v8149_v59, %v8159_v40  ;;  %vm15700_vm9 = vmmov %vm15690_vm1 }
 0x7f7   : > { %v8167_v30 = vpop.permute.xlu0 %8166  ;;  %v8162_v33 = vpop.permute.xlu1 %8161  ;;  %v7263_v35 = vpack.c.bf16 %v1688_v60, %v1685_v61  ;;  %vm15701_vm11 = vmmov %vm15690_vm1 }
 0x7f8   : > { %v8164_v36 = vunpack.i.h.bf16 %v8162_v33  ;;  %v8163_v41 = vunpack.i.l.bf16 %v8162_v33  ;;  %v8169_v43 = vunpack.i.h.bf16 %v8167_v30  ;;  %v8168_v21 = vunpack.i.l.bf16 %v8167_v30 }
 0x7f9   : > { %7264 = vmatprep.subr.bf16.mxu0 %v7263_v35 }
 0x7fa   : > { %v1687_v45 = vsel %vm15697_vm12, %v8163_v41, %v8153_v14  ;;  %v1689_v26 = vsel %vm15698_vm4, %v8154_v18, %v8164_v36  ;;  %v7279_v51 = vpack.c.bf16 %v8164_v36, %v8159_v40  ;;  %v1691_v59 = vsel %vm15699_vm10, %v8168_v21, %v8169_v43  ;;  %vm15702_vm12 = vmmov %vm15690_vm1 }
 0x7fb   : > { %v8177_v55 = vpop.permute.xlu0 %8176  ;;  %v8172_v52 = vpop.permute.xlu1 %8171  ;;  %v7265_v53 = vpack.c.bf16 %v1687_v45, %v1684_v19  ;;  %v7281_v54 = vpack.c.bf16 %v1689_v26, %v1686_v42  ;;  %vm15703_vm4 = vmmov %vm15690_vm1  ;;  %v1598_v26 = vld [vmem:[#allocation7 + $0x8] sm:$0xff] }
 0x7fc   : > { %v8174_v58 = vunpack.i.h.bf16 %v8172_v52  ;;  %v8173_v2 = vunpack.i.l.bf16 %v8172_v52  ;;  %7280 = vmatprep.subr.bf16.mxu1 %v7279_v51  ;;  %v8178_v5 = vunpack.i.l.bf16 %v8177_v55  ;;  %v8179_v62 = vunpack.i.h.bf16 %v8177_v55  ;;  %vm15704_vm10 = vmmov %vm15690_vm1 }
 0x7fd   : > { %7266 = vmatpush1.bf16.msra.mxu0 %v7265_v53  ;;  %7282 = vmatpush1.bf16.msra.mxu1 %v7281_v54 }
 0x7fe   : > { %v1694_v6 = vsel %vm15700_vm9, %v8173_v2, %v8174_v58  ;;  %v1690_v40 = vsel %vm15690_vm1, %v8178_v5, %v8168_v21  ;;  %v1692_v29 = vsel %vm15701_vm11, %v8169_v43, %v8179_v62  ;;  %v1597_v21 = vld [vmem:[#allocation7] sm:$0xff]  ;;  %vm15705_vm9 = vmmov %vm15690_vm1  ;;  %vm15706_vm11 = vcmask 588800  }
 0x7ff   : > { %v1670_v11 = vpop.permute.xlu0 %1669  ;;  %v8182_v13 = vpop.permute.xlu1 %8181  ;;  %v7267_v15 = vpack.c.bf16 %v1694_v6, %v1691_v59 }
 0x800   : > { %v8184_v18 = vunpack.i.h.bf16 %v8182_v13  ;;  %v8183_v14 = vunpack.i.l.bf16 %v8182_v13 }
 0x801   : > { %7268 = vmatprep.subr.bf16.mxu0 %v7267_v15 }
 0x802   : > { %v1693_v61 = vsel %vm15702_vm12, %v8183_v14, %v8173_v2  ;;  %v1695_v60 = vsel %vm15703_vm4, %v8174_v58, %v8184_v18  ;;  %v7283_v30 = vpack.c.bf16 %v8184_v18, %v8179_v62  ;;  %vm15707_vm12 = vmmov %vm15706_vm11 }
 0x803   : > { %v1672_v33 = vpop.permute.xlu1 %1671  ;;  %v7269_v35 = vpack.c.bf16 %v1693_v61, %v1690_v40  ;;  %v7285_v36 = vpack.c.bf16 %v1695_v60, %v1692_v29  ;;  %v1668_v19 = vpop.permute.xlu0 %1667  ;;  %vm15708_vm4 = vmmov %vm15706_vm11 }
 0x804   : > { %7284 = vmatprep.subr.bf16.mxu1 %v7283_v30  ;;  %v1697_v41 = vsel %vm15704_vm10, %v1670_v11, %v1672_v33  ;;  %v1696_v45 = vsel %vm15705_vm9, %v1668_v19, %v1670_v11  ;;  %vm15709_vm10 = vmmov %vm15708_vm4  ;;  %vm15710_vm9 = vcmask 1031168  }
 0x805   : > { %7270 = vmatpush1.bf16.msra.mxu0 %v7269_v35  ;;  %7286 = vmatpush1.bf16.msra.mxu1 %v7285_v36 }
 0x806   : > { %1757 = vmatprep.subr.mxu0 %v1697_v41 }
 0x807   : > { %v1674_v42 = vpop.permute.xlu1 %1673 }
 0x808   : > { %1834 = vmatprep.subr.mxu1 %v1674_v42  ;;  %v1698_v43 = vsel %vm15690_vm1, %v1672_v33, %v1674_v42  ;;  %vm15711_vm1 = vmmov %vm15710_vm9 }
 0x809   : > { %1758 = vmatpush1.msra.mxu0 %v1696_v45  ;;  %1835 = vmatpush1.msra.mxu1 %v1698_v43 }
 0x80a   : > { %7129 = vmatmul.mubr.msk.f32.vlgmr.msra.gmra.mrb[2].mxu0 %vm15706_vm11, %v1597_v21  ;;  %7131 = vmatmul.mubr.msk.f32.vlgmr.msra.gmra.mrb[2].mxu1 %vm15707_vm12, %v1597_v21  ;;  %vm15712_vm11 = vmmov %vm15711_vm1 }
 0x80b   : > { %1811 = vmatprep.mubr.f32.mxu0 %v15371_v38  ;;  %1888 = vmatprep.mubr.f32.mxu1 %v15371_v38  ;;  %vm15713_vm12 = vmmov %vm15711_vm1 }
 0x80e   : > { %7130 = vmatmul.mubr.msk.f32.gmra.mrb[4].mxu0 %vm15708_vm4, %v1598_v26  ;;  %7132 = vmatmul.mubr.msk.f32.gmra.mrb[4].mxu1 %vm15709_vm10, %v1598_v26  ;;  %vm15714_vm4 = vmmov %vm15711_vm1  ;;  %vm15715_vm10 = vcmask 113664  }
 0x814   : > { %v1604_v51 = vpop.permute.xlu0 %1603 }
 0x818   : > { %v1609_v59 = vpop.permute.xlu1 %1608 }
 0x8dd   : > { %v1807_v55 = vpop.f32.mrb[2].mxu0  ;;  %v1884_v52 = vpop.f32.mrb[2].mxu1 }
 0x8de   : > { %v1808_v53 = vadd.f32 %v1807_v55, %v1604_v51  ;;  %v11762_v54 = vadd.f32 %v1884_v52, %v1604_v51  ;;  %v1809_v58 = vpop.f32.mrb[3].mxu0  ;;  %v1886_v2 = vpop.f32.mrb[3].mxu1 }
 0x8df   : > { %v1810_v5 = vadd.f32 %v1809_v58, %v1604_v51  ;;  %v1887_v62 = vadd.f32 %v1886_v2, %v1604_v51 }
 0x8e0   : > { %v1895_v6 = vmax.f32 %v1808_v53, 0.0  ;;  %v1897_v11 = vmax.f32 %v11762_v54, 0.0 }
 0x8e1   : > { %v1896_v13 = vmax.f32 %v1810_v5, 0.0  ;;  %v1898_v15 = vmax.f32 %v1887_v62, 0.0  ;;  %v1813_v18 = vpop.f32.mrb[4].mxu0  ;;  %v1890_v14 = vpop.f32.mrb[4].mxu1 }
 0x8e2   : > { %v1814_v40 = vadd.f32 %v1813_v18, %v1609_v59  ;;  %v1891_v29 = vadd.f32 %v1890_v14, %v1609_v59  ;;  %v1815_v61 = vpop.f32.mrb[5].mxu0  ;;  %v1892_v60 = vpop.f32.mrb[5].mxu1 }
 0x8e3   : > { %v8191_v30 = vpack.i.bf16 %v1896_v13, %v1895_v6  ;;  %v8186_v33 = vpack.i.bf16 %v1898_v15, %v1897_v11  ;;  %v1816_v35 = vadd.f32 %v1815_v61, %v1609_v59  ;;  %v1893_v36 = vadd.f32 %v1892_v60, %v1609_v59 }
 0x8e4   : > { %v1899_v41 = vmax.f32 %v1814_v40, 0.0  ;;  %v1901_v19 = vmax.f32 %v1891_v29, 0.0 }
 0x8e5   : > { %v1900_v42 = vmax.f32 %v1816_v35, 0.0  ;;  %v1902_v21 = vmax.f32 %v1893_v36, 0.0  ;;  %8187 = vrot.lane.b32.xlu1 %v8186_v33, %s15423_s2  ;;  %8192 = vrot.lane.b32.xlu0 %v8191_v30, %s15423_s2 }
 0x8e6   : > { %v8206_v26 = vpack.i.bf16 %v1899_v41, %v1895_v6 }
 0x8e7   : > { %v8201_v45 = vpack.i.bf16 %v1900_v42, %v1899_v41  ;;  %v8196_v43 = vpack.i.bf16 %v1902_v21, %v1901_v19 }
 0x8e9   : > { %8197 = vrot.lane.b32.xlu1 %v8196_v43, %s15423_s2  ;;  %8202 = vrot.lane.b32.xlu0 %v8201_v45, %s15423_s2 }
 0x8ed   : > { %8207 = vrot.lane.b32.xlu0 %v8206_v26, %s15409_s20 }
 0x957   : > { %v8188_v51 = vpop.permute.xlu1 %8187  ;;  %v8193_v55 = vpop.permute.xlu0 %8192 }
 0x958   : > { %v8189_v52 = vunpack.i.l.bf16 %v8188_v51  ;;  %v8195_v53 = vunpack.i.h.bf16 %v8193_v55  ;;  %v8194_v54 = vunpack.i.l.bf16 %v8193_v55  ;;  %v8190_v5 = vunpack.i.h.bf16 %v8188_v51 }
 0x95a   : > { %v1928_v58 = vsel %vm15710_vm9, %v8195_v53, %v8189_v52  ;;  %v1927_v2 = vsel %vm15711_vm1, %v8194_v54, %v8195_v53  ;;  %v1929_v35 = vsel %vm15714_vm4, %v8189_v52, %v8190_v5  ;;  %vm15716_vm9 = vmmov %vm15715_vm10 }
 0x95b   : > { %v8198_v62 = vpop.permute.xlu1 %8197  ;;  %v8203_v59 = vpop.permute.xlu0 %8202  ;;  %v1949_v18 = vsel %vm11362_vm2, %v1927_v2, %v1895_v6  ;;  %v1950_v14 = vsel %vm11332_vm7, %v1928_v58, %v1896_v13  ;;  %v1951_v52 = vsel %vm11344_vm15, %v1929_v35, %v1897_v11 }
 0x95c   : > { %v8199_v40 = vunpack.i.l.bf16 %v8198_v62  ;;  %v8205_v29 = vunpack.i.h.bf16 %v8203_v59  ;;  %v8204_v61 = vunpack.i.l.bf16 %v8203_v59  ;;  %v8216_v60 = vpack.i.bf16 %v1950_v14, %v1949_v18 }
 0x95d   : > { %v8200_v13 = vunpack.i.h.bf16 %v8198_v62 }
 0x95e   : > { %v1931_v30 = vsel %vm15712_vm11, %v8205_v29, %v8199_v40  ;;  %v1930_v33 = vsel %vm15713_vm12, %v8204_v61, %v8205_v29  ;;  %8217 = vrot.lane.b32.xlu1 %v8216_v60, %s15438_s19  ;;  %vm15717_vm11 = vcmask 1039360  }
 0x95f   : > { %v8208_v36 = vpop.permute.xlu0 %8207  ;;  %v1953_v45 = vsel %vm11362_vm2, %v1930_v33, %v1899_v41  ;;  %v1954_v6 = vsel %vm11332_vm7, %v1931_v30, %v1900_v42  ;;  %v1932_v41 = vsel %vm15711_vm1, %v8199_v40, %v8200_v13  ;;  %vm15718_vm12 = vmmov %vm15717_vm11 }
 0x960   : > { %v8210_v43 = vunpack.i.h.bf16 %v8208_v36  ;;  %v8209_v26 = vunpack.i.l.bf16 %v8208_v36  ;;  %v8226_v51 = vpack.i.bf16 %v1954_v6, %v1953_v45  ;;  %v8231_v42 = vpack.i.bf16 %v1953_v45, %v1949_v18  ;;  %vm15719_vm4 = vmmov %vm15717_vm11 }
 0x961   : > { %vm15722_vm1 = vmmov %vm15719_vm4 }
 0x962   : > { %v1948_v55 = vsel %vm15715_vm10, %v8200_v13, %v8210_v43  ;;  %v1947_v53 = vsel %vm15716_vm9, %v8190_v5, %v8209_v26  ;;  %8227 = vrot.lane.b32.xlu1 %v8226_v51, %s15438_s19  ;;  %v1955_v5 = vsel %vm11344_vm15, %v1932_v41, %v1901_v19  ;;  %vm15720_vm10 = vmmov %vm15719_vm4  ;;  %vm15721_vm9 = vcmask 121856  }
 0x963   : > { %v1952_v54 = vsel %vm11348_vm3, %v1947_v53, %v1898_v15  ;;  %v1956_v2 = vsel %vm11348_vm3, %v1948_v55, %v1902_v21 }
 0x964   : > { %v8211_v58 = vpack.i.bf16 %v1952_v54, %v1951_v52  ;;  %v8221_v62 = vpack.i.bf16 %v1956_v2, %v1955_v5 }
 0x966   : > { %8212 = vrot.lane.b32.xlu0 %v8211_v58, %s15438_s19  ;;  %8232 = vrot.lane.b32.xlu1 %v8231_v42, %s15401_s28 }
 0x96a   : > { %8222 = vrot.lane.b32.xlu0 %v8221_v62, %s15438_s19 }
 0x9d0   : > { %v8218_v11 = vpop.permute.xlu1 %8217 }
 0x9d1   : > { %v8220_v59 = vunpack.i.h.bf16 %v8218_v11  ;;  %v8219_v15 = vunpack.i.l.bf16 %v8218_v11 }
 0x9d3   : > { %v1981_v60 = vsel %vm15717_vm11, %v8219_v15, %v8220_v59  ;;  %vm15723_vm11 = vmmov %vm15722_vm1 }
 0x9d4   : > { %v8228_v29 = vpop.permute.xlu1 %8227  ;;  %v2003_v26 = vsel %vm11391_vm14, %v1981_v60, %v1949_v18 }
 0x9d5   : > { %v8230_v40 = vunpack.i.h.bf16 %v8228_v29  ;;  %v8229_v61 = vunpack.i.l.bf16 %v8228_v29 }
 0x9d7   : > { %v1984_v13 = vsel %vm15718_vm12, %v8229_v61, %v8230_v40  ;;  %vm15724_vm12 = vmmov %vm15721_vm9 }
 0x9d8   : > { %v8213_v30 = vpop.permute.xlu0 %8212  ;;  %v8233_v35 = vpop.permute.xlu1 %8232 }
 0x9d9   : > { %v8215_v21 = vunpack.i.h.bf16 %v8213_v30  ;;  %v8214_v33 = vunpack.i.l.bf16 %v8213_v30  ;;  %v8234_v36 = vunpack.i.l.bf16 %v8233_v35  ;;  %v8235_v51 = vunpack.i.h.bf16 %v8233_v35 }
 0x9db   : > { %v1982_v19 = vsel %vm15719_vm4, %v8220_v59, %v8214_v33  ;;  %v1983_v43 = vsel %vm15720_vm10, %v8214_v33, %v8215_v21  ;;  %v2001_v55 = vsel %vm15721_vm9, %v8215_v21, %v8234_v36  ;;  %vm15725_vm4 = vcmask 7168  }
 0x9dc   : > { %v8223_v53 = vpop.permute.xlu0 %8222  ;;  %v2005_v41 = vsel %vm11374_vm8, %v1983_v43, %v1951_v52  ;;  %v2004_v58 = vsel %vm11378_vm13, %v1982_v19, %v1950_v14  ;;  %v2006_v11 = vsel %vm11400_vm6, %v2001_v55, %v1952_v54  ;;  %v2007_v54 = vsel %vm11391_vm14, %v1984_v13, %v1953_v45  ;;  %vm15726_vm10 = vmmov %vm15725_vm4 }
 0x9dd   : > { %v8225_v42 = vunpack.i.h.bf16 %v8223_v53  ;;  %v8224_v62 = vunpack.i.l.bf16 %v8223_v53  ;;  %v8236_v59 = vpack.i.bf16 %v2004_v58, %v2003_v26  ;;  %v8241_v15 = vpack.i.bf16 %v2006_v11, %v2005_v41  ;;  %vm15727_vm9 = vmmov %vm15725_vm4 }
 0x9df   : > { %v1985_v29 = vsel %vm15722_vm1, %v8230_v40, %v8224_v62  ;;  %v1986_v18 = vsel %vm15723_vm11, %v8224_v62, %v8225_v42  ;;  %v2002_v61 = vsel %vm15724_vm12, %v8225_v42, %v8235_v51  ;;  %8237 = vrot.lane.b32.xlu0 %v8236_v59, %s15387_s14  ;;  %8242 = vrot.lane.b32.xlu1 %v8241_v15, %s15387_s14  ;;  %vm15729_vm11 = vmmov %vm15725_vm4 }
 0x9e0   : > { %v2009_v14 = vsel %vm11374_vm8, %v1986_v18, %v1955_v5  ;;  %v2010_v52 = vsel %vm11400_vm6, %v2002_v61, %v1956_v2  ;;  %v2008_v40 = vsel %vm11378_vm13, %v1985_v29, %v1954_v6  ;;  %vm15728_vm1 = vnez %v15582_v44  ;;  %vm15730_vm12 = vmmov %vm15725_vm4 }
 0x9e1   : > { %v8251_v60 = vpack.i.bf16 %v2010_v52, %v2009_v14  ;;  %v8246_v30 = vpack.i.bf16 %v2008_v40, %v2007_v54  ;;  %v8256_v21 = vpack.i.bf16 %v2010_v52, %v2006_v11 }
 0x9e3   : > { %8247 = vrot.lane.b32.xlu0 %v8246_v30, %s15387_s14  ;;  %8252 = vrot.lane.b32.xlu1 %v8251_v60, %s15387_s14  ;;  %s15947_s14 = smov 114  }
 0x9e7   : > { %8257 = vrot.lane.b32.xlu0 %v8256_v21, %s15385_s25  ;;  %s15945_s25 = smov 2  }
 0xa51   : > { %v8238_v33 = vpop.permute.xlu0 %8237  ;;  %v8243_v5 = vpop.permute.xlu1 %8242 }
 0xa52   : > { %v8240_v35 = vunpack.i.h.bf16 %v8238_v33  ;;  %v8239_v36 = vunpack.i.l.bf16 %v8238_v33  ;;  %v8245_v2 = vunpack.i.h.bf16 %v8243_v5  ;;  %v8244_v19 = vunpack.i.l.bf16 %v8243_v5 }
 0xa54   : > { %v2041_v45 = vsel %vm15725_vm4, %v8239_v36, %v8240_v35  ;;  %v2042_v13 = vsel %vm15726_vm10, %v8240_v35, %v8244_v19  ;;  %v2043_v51 = vsel %vm15727_vm9, %v8244_v19, %v8245_v2  ;;  %vm15731_vm10 = vnez %v15588_v56  ;;  %vm15732_vm9 = vmmov %vm15725_vm4 }
 0xa55   : > { %v8248_v6 = vpop.permute.xlu0 %8247  ;;  %v11832_v43 = vsel %vm11421_vm5, %v2041_v45, %v2004_v58  ;;  %v8253_v55 = vpop.permute.xlu1 %8252  ;;  %v2059_v62 = vsel %vm15728_vm1, %v2042_v13, %v2005_v41  ;;  %v2060_v30 = vsel %vm15731_vm10, %v2043_v51, %v2006_v11 }
 0xa56   : > { %v8250_v53 = vunpack.i.h.bf16 %v8248_v6  ;;  %v8249_v42 = vunpack.i.l.bf16 %v8248_v6  ;;  %v8255_v59 = vunpack.i.h.bf16 %v8253_v55  ;;  %v8254_v15 = vunpack.i.l.bf16 %v8253_v55 }
 0xa57   : > { %v8261_v29 = vpack.i.bf16 %v2059_v62, %v11832_v43 }
 0xa58   : > { %v2044_v18 = vsel %vm15729_vm11, %v8249_v42, %v8250_v53  ;;  %v2046_v61 = vsel %vm15730_vm12, %v8254_v15, %v8255_v59  ;;  %v2045_v60 = vsel %vm15725_vm4, %v8250_v53, %v8254_v15  ;;  %vm15733_vm11 = vmmov %vm15725_vm4  ;;  %vm15734_vm12 = vnez %v15591_v4 }
 0xa59   : > { %8262 = vrot.lane.b32.xlu1 %v8261_v29, %s15369_s27  ;;  %v8258_v58 = vpop.permute.xlu0 %8257  ;;  %v2062_v21 = vsel %vm11421_vm5, %v2044_v18, %v2008_v40  ;;  %v2063_v35 = vsel %vm15728_vm1, %v2045_v60, %v2009_v14  ;;  %v2064_v2 = vsel %vm15731_vm10, %v2046_v61, %v2010_v52  ;;  %vm15735_vm4 = vcmask 15360  }
 0xa5a   : > { %v8260_v41 = vunpack.i.h.bf16 %v8258_v58  ;;  %v8259_v33 = vunpack.i.l.bf16 %v8258_v58  ;;  %v8266_v5 = vpack.i.bf16 %v2062_v21, %v2060_v30  ;;  %v8271_v13 = vpack.i.bf16 %v2064_v2, %v2063_v35  ;;  %vm15739_vm1 = vmmov %vm15735_vm4 }
 0xa5b   : > { %v8276_v6 = vpack.i.bf16 %v2064_v2, %v2060_v30  ;;  %vm15740_vm10 = vmmov %vm15739_vm1 }
 0xa5c   : > { %v2055_v19 = vsel %vm15732_vm9, %v8259_v33, %v8239_v36  ;;  %v2056_v45 = vsel %vm15733_vm11, %v8260_v41, %v8249_v42  ;;  %8267 = vrot.lane.b32.xlu0 %v8266_v5, %s15369_s27  ;;  %vm15736_vm9 = vmmov %vm15735_vm4  ;;  %vm15737_vm11 = vnez %v15594_v10 }
 0xa5d   : > { %v2057_v11 = vsel %vm15734_vm12, %v2055_v19, %v2003_v26  ;;  %v2061_v40 = vsel %vm15734_vm12, %v2056_v45, %v2007_v54  ;;  %8272 = vrot.lane.b32.xlu1 %v8271_v13, %s15369_s27  ;;  %vm15738_vm12 = vnez %v15597_v16 }
 0xa5e   : > { %v8281_v14 = vpack.i.bf16 %v2061_v40, %v2057_v11 }
 0xa60   : > { %8277 = vrot.lane.b32.xlu0 %v8276_v6, %s15367_s26  ;;  %s15803_s26 = smov 87  }
 0xa61   : > { %8282 = vrot.lane.b32.xlu1 %v8281_v14, %s15369_s27  ;;  %s15805_s27 = smov 86  }
 0xacb   : > { %v8263_v52 = vpop.permute.xlu1 %8262 }
 0xacc   : > { %v8265_v36 = vunpack.i.h.bf16 %v8263_v52  ;;  %v8264_v51 = vunpack.i.l.bf16 %v8263_v52 }
 0xace   : > { %v8268_v55 = vpop.permute.xlu0 %8267  ;;  %v2096_v53 = vsel %vm15735_vm4, %v8264_v51, %v8265_v36  ;;  %vm15741_vm4 = vmmov %vm15739_vm1 }
 0xacf   : > { %v8270_v42 = vunpack.i.h.bf16 %v8268_v55  ;;  %v8269_v59 = vunpack.i.l.bf16 %v8268_v55  ;;  %v8273_v26 = vpop.permute.xlu1 %8272  ;;  %v11864_v61 = vsel %vm15737_vm11, %v2096_v53, %v2059_v62 }
 0xad0   : > { %v8275_v54 = vunpack.i.h.bf16 %v8273_v26  ;;  %v8274_v29 = vunpack.i.l.bf16 %v8273_v26 }
 0xad1   : > { %v2097_v15 = vsel %vm15736_vm9, %v8265_v36, %v8269_v59  ;;  %vm15743_vm9 = vmmov %vm15739_vm1 }
 0xad2   : > { %v8278_v18 = vpop.permute.xlu0 %8277  ;;  %v2114_v60 = vsel %vm15738_vm12, %v2097_v15, %v2060_v30  ;;  %v2099_v58 = vsel %vm15739_vm1, %v8270_v42, %v8274_v29  ;;  %v2100_v41 = vsel %vm15740_vm10, %v8274_v29, %v8275_v54  ;;  %vm15742_vm10 = vmmov %vm15739_vm1 }
 0xad3   : > { %v8280_v33 = vunpack.i.h.bf16 %v8278_v18  ;;  %v8279_v5 = vunpack.i.l.bf16 %v8278_v18  ;;  %v8283_v19 = vpop.permute.xlu1 %8282  ;;  %v2117_v45 = vsel %vm15737_vm11, %v2099_v58, %v2063_v35  ;;  %v2118_v13 = vsel %vm15738_vm12, %v2100_v41, %v2064_v2 }
 0xad4   : > { %v8286_v6 = vpack.i.bf16 %v2114_v60, %v11864_v61  ;;  %v8285_v62 = vunpack.i.h.bf16 %v8283_v19  ;;  %v8284_v14 = vunpack.i.l.bf16 %v8283_v19  ;;  %v8291_v52 = vpack.i.bf16 %v2118_v13, %v2117_v45 }
 0xad5   : > { %vm15744_vm11 = vnez %v15600_v22  ;;  %vm15745_vm12 = vnez %v15603_v31 }
 0xad6   : > { %8287 = vrot.lane.b32.xlu0 %v8286_v6, %s15383_s29  ;;  %v2098_v30 = vsel %vm15741_vm4, %v8285_v62, %v8270_v42  ;;  %v2110_v36 = vsel %vm15739_vm1, %v8280_v33, %v8285_v62  ;;  %v2095_v55 = vsel %vm15742_vm10, %v8284_v14, %v8264_v51  ;;  %v2109_v53 = vsel %vm15743_vm9, %v8279_v5, %v8284_v14 }
 0xad7   : > { %8292 = vrot.lane.b32.xlu1 %v8291_v52, %s15383_s29  ;;  %v2111_v35 = vsel %vm15744_vm11, %v2109_v53, %v2057_v11  ;;  %v2115_v2 = vsel %vm15744_vm11, %v2110_v36, %v2061_v40  ;;  %v2112_v59 = vsel %vm15745_vm12, %v2095_v55, %v11832_v43  ;;  %v2116_v15 = vsel %vm15745_vm12, %v2098_v30, %v2062_v21 }
 0xad8   : > { %v8301_v26 = vpack.i.bf16 %v2115_v2, %v2111_v35  ;;  %v8296_v42 = vpack.i.bf16 %v2112_v59, %v2111_v35  ;;  %v8306_v51 = vpack.i.bf16 %v2116_v15, %v2115_v2  ;;  %vm15746_vm4 = vcmask 719872  }
 0xad9   : > { %vm15747_vm1 = vmmov %vm15746_vm4  ;;  %vm15748_vm10 = vcmask 850944   ;;  %vm15749_vm9 = vnez %v15606_v39 }
 0xada   : > { %8302 = vrot.lane.b32.xlu0 %v8301_v26, %s15365_s23  ;;  %vm15750_vm12 = vmmov %vm15748_vm10  ;;  %s15802_s23 = smov 106  }
 0xadb   : > { %8297 = vrot.lane.b32.xlu1 %v8296_v42, %s15383_s29  ;;  %vm15751_vm11 = vmmov %vm15747_vm1 }
 0xadc   : > { %vm15752_vm5 = vmmov %vm15747_vm1 }
 0xade   : > { %8307 = vrot.lane.b32.xlu0 %v8306_v51, %s15383_s29 }
 0xb48   : > { %v8288_v11 = vpop.permute.xlu0 %8287 }
 0xb49   : > { %v8293_v54 = vpop.permute.xlu1 %8292  ;;  %v8290_v18 = vunpack.i.h.bf16 %v8288_v11  ;;  %v8289_v58 = vunpack.i.l.bf16 %v8288_v11 }
 0xb4a   : > { %v8295_v29 = vunpack.i.h.bf16 %v8293_v54  ;;  %v8294_v40 = vunpack.i.l.bf16 %v8293_v54 }
 0xb4b   : > { %v2145_v62 = vsel %vm15747_vm1, %v8289_v58, %v8290_v18  ;;  %vm15754_vm1 = vnez %v15609_v46 }
 0xb4c   : > { %v8303_v41 = vpop.permute.xlu0 %8302  ;;  %v2148_v21 = vsel %vm15746_vm4, %v8294_v40, %v8295_v29  ;;  %vm15753_vm4 = vnez %v15612_v47 }
 0xb4d   : > { %v8298_v43 = vpop.permute.xlu1 %8297  ;;  %v8305_v33 = vunpack.i.h.bf16 %v8303_v41  ;;  %v8304_v5 = vunpack.i.l.bf16 %v8303_v41 }
 0xb4e   : > { %v8300_v19 = vunpack.i.h.bf16 %v8298_v43  ;;  %v8299_v6 = vunpack.i.l.bf16 %v8298_v43 }
 0xb4f   : > { %v2162_v14 = vsel %vm15748_vm10, %v2148_v21, %v8305_v33  ;;  %v2170_v52 = vsel %vm15749_vm9, %v8305_v33, %v2118_v13  ;;  %v2161_v30 = vsel %vm15750_vm12, %v2145_v62, %v8304_v5  ;;  %vm15755_vm10 = vmmov %vm15752_vm5  ;;  %v2166_v41 = vsel %vm15749_vm9, %v8304_v5, %v2114_v60 }
 0xb50   : > { %v2144_v36 = vsel %vm15751_vm11, %v8300_v19, %v8289_v58  ;;  %v2143_v55 = vsel %vm15752_vm5, %v8299_v6, %v8300_v19  ;;  %v8308_v53 = vpop.permute.xlu0 %8307  ;;  %v2169_v26 = vsel %vm11518_vm0, %v2162_v14, %v2117_v45  ;;  %vm15756_vm12 = vmmov %vm15752_vm5  ;;  %vm15758_vm5 = vcmask 883712  }
 0xb51   : > { %v8310_v42 = vunpack.i.h.bf16 %v8308_v53  ;;  %v8309_v51 = vunpack.i.l.bf16 %v8308_v53  ;;  %v8321_v11 = vpack.i.bf16 %v2170_v52, %v2169_v26  ;;  %v2163_v54 = vsel %vm15753_vm4, %v2143_v55, %v2111_v35  ;;  %vm15759_vm11 = vmmov %vm15758_vm5 }
 0xb52   : > { %v2164_v29 = vsel %vm15754_vm1, %v2144_v36, %v2112_v59  ;;  %v2165_v35 = vsel %vm11518_vm0, %v2161_v30, %v11864_v61  ;;  %vm15762_vm0 = vmmov %vm15758_vm5  ;;  %vm15763_vm9 = vcmask 1014784  }
 0xb53   : > { %v2147_v13 = vsel %vm15755_vm10, %v8310_v42, %v8294_v40  ;;  %v2146_v18 = vsel %vm15756_vm12, %v8309_v51, %v8310_v42  ;;  %8322 = vrot.lane.b32.xlu0 %v8321_v11, %s15381_s24  ;;  %v8311_v58 = vpack.i.bf16 %v2164_v29, %v2163_v54  ;;  %v8316_v40 = vpack.i.bf16 %v2166_v41, %v2165_v35 }
 0xb54   : > { %v2167_v45 = vsel %vm15753_vm4, %v2146_v18, %v2115_v2  ;;  %v2168_v43 = vsel %vm15754_vm1, %v2147_v13, %v2116_v15  ;;  %vm15760_vm10 = vnez %v15622_v9  ;;  %vm15761_vm12 = vnez %v15634_v34  ;;  %vm15765_vm1 = vmmov %vm15763_vm9 }
 0xb55   : > { %8312 = vrot.lane.b32.xlu1 %v8311_v58, %s15381_s24  ;;  %v8326_v59 = vpack.i.bf16 %v2168_v43, %v2167_v45  ;;  %v8331_v33 = vpack.i.bf16 %v2167_v45, %v2163_v54  ;;  %vm15767_vm4 = vnez %v15629_v25 }
 0xb57   : > { %8327 = vrot.lane.b32.xlu0 %v8326_v59, %s15381_s24 }
 0xb59   : > { %8317 = vrot.lane.b32.xlu1 %v8316_v40, %s15381_s24 }
 0xb5d   : > { %8332 = vrot.lane.b32.xlu1 %v8331_v33, %s15757_s15 }
 0xbc5   : > { %v8323_v60 = vpop.permute.xlu0 %8322 }
 0xbc6   : > { %v8325_v62 = vunpack.i.h.bf16 %v8323_v60  ;;  %v8324_v14 = vunpack.i.l.bf16 %v8323_v60 }
 0xbc7   : > { %v8313_v2 = vpop.permute.xlu1 %8312 }
 0xbc8   : > { %v8315_v5 = vunpack.i.h.bf16 %v8313_v2  ;;  %v8314_v19 = vunpack.i.l.bf16 %v8313_v2  ;;  %v2200_v59 = vsel %vm15758_vm5, %v8324_v14, %v8325_v62 }
 0xbc9   : > { %v8328_v21 = vpop.permute.xlu0 %8327 }
 0xbca   : > { %v2195_v6 = vsel %vm15758_vm5, %v8314_v19, %v8315_v5  ;;  %v8330_v55 = vunpack.i.h.bf16 %v8328_v21  ;;  %v8329_v11 = vunpack.i.l.bf16 %v8328_v21  ;;  %vm15768_vm5 = vmmov %vm15762_vm0 }
 0xbcb   : > { %v8318_v15 = vpop.permute.xlu1 %8317  ;;  %v11927_v42 = vsel %vm15760_vm10, %v2195_v6, %v2163_v54 }
 0xbcc   : > { %v8319_v61 = vunpack.i.l.bf16 %v8318_v15  ;;  %v8320_v30 = vunpack.i.h.bf16 %v8318_v15  ;;  %v2198_v19 = vsel %vm15768_vm5, %v8329_v11, %v8330_v55  ;;  %v2199_v15 = vsel %vm15762_vm0, %v8330_v55, %v8324_v14 }
 0xbce   : > { %v2196_v36 = vsel %vm15759_vm11, %v8315_v5, %v8319_v61  ;;  %v2197_v40 = vsel %vm15762_vm0, %v8319_v61, %v8320_v30  ;;  %vm15764_vm11 = vnez %v15626_v20 }
 0xbcf   : > { %v8333_v53 = vpop.permute.xlu1 %8332  ;;  %v2216_v51 = vsel %vm15761_vm12, %v2196_v36, %v2164_v29 }
 0xbd0   : > { %v8335_v13 = vunpack.i.h.bf16 %v8333_v53  ;;  %v8334_v18 = vunpack.i.l.bf16 %v8333_v53  ;;  %v8336_v58 = vpack.i.bf16 %v2216_v51, %v11927_v42 }
 0xbd2   : > { %v2214_v33 = vsel %vm15763_vm9, %v2200_v59, %v8335_v13  ;;  %v2222_v60 = vsel %vm15764_vm11, %v8335_v13, %v2170_v52  ;;  %v2213_v54 = vsel %vm15765_vm1, %v2197_v40, %v8334_v18  ;;  %v2218_v2 = vsel %vm15764_vm11, %v8334_v18, %v2166_v41  ;;  %8337 = vrot.lane.b32.xlu0 %v8336_v58, %s15766_s22 }
 0xbd3   : > { %v2221_v29 = vsel %vm15767_vm4, %v2214_v33, %v2169_v26  ;;  %v2217_v5 = vsel %vm15767_vm4, %v2213_v54, %v2165_v35  ;;  %v2219_v52 = vsel %vm15760_vm10, %v2198_v19, %v2167_v45  ;;  %v2220_v41 = vsel %vm15761_vm12, %v2199_v15, %v2168_v43 }
 0xbd4   : > { %v8346_v6 = vpack.i.bf16 %v2222_v60, %v2221_v29  ;;  %v8341_v21 = vpack.i.bf16 %v2218_v2, %v2217_v5  ;;  %v8351_v26 = vpack.i.bf16 %v2219_v52, %v2217_v5  ;;  %v8356_v61 = vpack.i.bf16 %v2221_v29, %v2220_v41 }
 0xbd5   : > { %vm15770_vm9 = vcmask 162816   ;;  %vm15771_vm1 = vnez %v15640_v49  ;;  %vm15774_vm4 = vnez %v15643_v1 }
 0xbd6   : > { %8347 = vrot.lane.b32.xlu1 %v8346_v6, %s15769_s18  ;;  %8342 = vrot.lane.b32.xlu0 %v8341_v21, %s15769_s18  ;;  %vm15772_vm5 = vmmov %vm15770_vm9 }
 0xbd7   : > { %vm15773_vm0 = vmmov %vm15772_vm5 }
 0xbd8   : > { %vm15775_vm11 = vmmov %vm15773_vm0 }
 0xbd9   : > { %vm15778_vm10 = vmmov %vm15773_vm0 }
 0xbda   : > { %8352 = vrot.lane.b32.xlu1 %v8351_v26, %s15766_s22  ;;  %8357 = vrot.lane.b32.xlu0 %v8356_v61, %s15766_s22 }
 0xc44   : > { %v8338_v35 = vpop.permute.xlu0 %8337 }
 0xc45   : > { %v8340_v30 = vunpack.i.h.bf16 %v8338_v35  ;;  %v8339_v36 = vunpack.i.l.bf16 %v8338_v35 }
 0xc47   : > { %v2255_v26 = vsel %vm15775_vm11, %v8339_v36, %v8340_v30  ;;  %vm15780_vm11 = vmmov %vm15773_vm0 }
 0xc48   : > { %v8348_v62 = vpop.permute.xlu1 %8347  ;;  %v8343_v14 = vpop.permute.xlu0 %8342 }
 0xc49   : > { %v8350_v58 = vunpack.i.h.bf16 %v8348_v62  ;;  %v8349_v59 = vunpack.i.l.bf16 %v8348_v62  ;;  %v8345_v43 = vunpack.i.h.bf16 %v8343_v14  ;;  %v8344_v40 = vunpack.i.l.bf16 %v8343_v14 }
 0xc4c   : > { %v8353_v55 = vpop.permute.xlu1 %8352  ;;  %v8358_v53 = vpop.permute.xlu0 %8357 }
 0xc4d   : > { %v8355_v11 = vunpack.i.h.bf16 %v8353_v55  ;;  %v8354_v13 = vunpack.i.l.bf16 %v8353_v55  ;;  %v8360_v18 = vunpack.i.h.bf16 %v8358_v53  ;;  %v8359_v45 = vunpack.i.l.bf16 %v8358_v53 }
 0xc4f   : > { %v2256_v33 = vsel %vm15770_vm9, %v8340_v30, %v8354_v13  ;;  %v2272_v54 = vsel %vm15771_vm1, %v8354_v13, %v2218_v2  ;;  %v2276_v19 = vsel %vm15771_vm1, %v8360_v18, %v2222_v60  ;;  %v2257_v15 = vsel %vm15772_vm5, %v8355_v11, %v8359_v45 }
 0xc50   : > { %v2258_v6 = vsel %vm15773_vm0, %v8359_v45, %v8360_v18  ;;  %v2271_v21 = vsel %vm15774_vm4, %v2256_v33, %v2217_v5  ;;  %vm15776_vm9 = vcmask 31744   ;;  %vm15779_vm5 = vnez %v15637_v48 }
 0xc51   : > { %v2275_v61 = vsel %vm15774_vm4, %v2258_v6, %v2221_v29  ;;  %v8361_v35 = vpack.i.bf16 %v2272_v54, %v2271_v21  ;;  %v2236_v62 = vsel %vm15776_vm9, %v8349_v59, %v8350_v58  ;;  %vm15777_vm12 = vmmov %vm15776_vm9  ;;  %v2274_v55 = vsel %vm15779_vm5, %v2257_v15, %v2220_v41 }
 0xc52   : > { %v2235_v2 = vsel %vm15777_vm12, %v8344_v40, %v8345_v43  ;;  %v8371_v14 = vpack.i.bf16 %v2276_v19, %v2275_v61  ;;  %v2268_v60 = vsel %vm15778_vm10, %v2236_v62, %v8355_v11  ;;  %v2270_v5 = vsel %vm15779_vm5, %v2255_v26, %v2216_v51 }
 0xc53   : > { %8362 = vrot.lane.b32.xlu1 %v8361_v35, %s15360_s16  ;;  %v2267_v29 = vsel %vm15780_vm11, %v2235_v2, %v8339_v36  ;;  %v8366_v30 = vpack.i.bf16 %v2271_v21, %v2270_v5  ;;  %v8376_v53 = vpack.i.bf16 %v2275_v61, %v2274_v55  ;;  %vm15781_vm0 = vnez %v15646_v12 }
 0xc54   : > { %8372 = vrot.lane.b32.xlu0 %v8371_v14, %s15360_s16  ;;  %v2273_v13 = vsel %vm15781_vm0, %v2268_v60, %v2219_v52  ;;  %v2269_v41 = vsel %vm15781_vm0, %v2267_v29, %v11927_v42  ;;  %vm15783_vm10 = vnez %v15649_v27  ;;  %vm15784_vm12 = vcmask 326656   ;;  %s15792_s16 = smov 42  }
 0xc55   : > { %v8381_v11 = vpack.i.bf16 %v2273_v13, %v2269_v41  ;;  %vm15785_vm9 = vmmov %vm15784_vm12  ;;  %vm15786_vm11 = vnez %v15652_v28  ;;  %vm15787_vm0 = vcmask 195584  }
 0xc56   : > { %vm15788_vm5 = vmmov %vm15787_vm0 }
 0xc57   : > { %8367 = vrot.lane.b32.xlu1 %v8366_v30, %s15782_s1  ;;  %vm15791_vm4 = vmmov %vm15785_vm9 }
 0xc58   : > { %8377 = vrot.lane.b32.xlu0 %v8376_v53, %s15782_s1 }
 0xc5b   : > { %8382 = vrot.lane.b32.xlu1 %v8381_v11, %s15782_s1 }
 0xcc5   : > { %v8363_v18 = vpop.permute.xlu1 %8362 }
 0xcc6   : > { %v8373_v51 = vpop.permute.xlu0 %8372  ;;  %v8365_v36 = vunpack.i.h.bf16 %v8363_v18  ;;  %v8364_v58 = vunpack.i.l.bf16 %v8363_v18 }
 0xcc7   : > { %v8375_v52 = vunpack.i.h.bf16 %v8373_v51  ;;  %v8374_v33 = vunpack.i.l.bf16 %v8373_v51 }
 0xcc9   : > { %v8368_v45 = vpop.permute.xlu1 %8367  ;;  %v2290_v11 = vsel %vm15787_vm0, %v8374_v33, %v8375_v52  ;;  %vm15794_vm0 = vnez %v15658_v57 }
 0xcca   : > { %v8378_v59 = vpop.permute.xlu0 %8377  ;;  %v8370_v43 = vunpack.i.h.bf16 %v8368_v45  ;;  %v8369_v40 = vunpack.i.l.bf16 %v8368_v45 }
 0xccb   : > { %v8380_v15 = vunpack.i.h.bf16 %v8378_v59  ;;  %v8379_v6 = vunpack.i.l.bf16 %v8378_v59 }
 0xccc   : > { %v2326_v26 = vsel %vm15783_vm10, %v8370_v43, %v2272_v54  ;;  %v2310_v42 = vsel %vm15784_vm12, %v8369_v40, %v8370_v43  ;;  %v2289_v54 = vsel %vm15788_vm5, %v8364_v58, %v8365_v36  ;;  %vm15789_vm12 = vmmov %vm15785_vm9 }
 0xccd   : > { %v2330_v35 = vsel %vm15783_vm10, %v8380_v15, %v2276_v19  ;;  %v2312_v62 = vsel %vm15785_vm9, %v8379_v6, %v8380_v15  ;;  %v8383_v2 = vpop.permute.xlu1 %8382  ;;  %v2325_v14 = vsel %vm15786_vm11, %v2310_v42, %v2271_v21  ;;  %vm15790_vm10 = vmmov %vm15785_vm9 }
 0xcce   : > { %v8385_v60 = vunpack.i.h.bf16 %v8383_v2  ;;  %v8384_v29 = vunpack.i.l.bf16 %v8383_v2  ;;  %v2329_v30 = vsel %vm15786_vm11, %v2312_v62, %v2275_v61  ;;  %v8386_v53 = vpack.i.bf16 %v2326_v26, %v2325_v14 }
 0xccf   : > { %v8396_v18 = vpack.i.bf16 %v2330_v35, %v2329_v30  ;;  %vm15793_vm11 = vnez %v15655_v3 }
 0xcd0   : > { %v2311_v51 = vsel %vm15789_vm12, %v8385_v60, %v8379_v6  ;;  %v2322_v19 = vsel %vm15790_vm10, %v2290_v11, %v8385_v60  ;;  %v2309_v45 = vsel %vm15785_vm9, %v8384_v29, %v8369_v40  ;;  %v2321_v59 = vsel %vm15791_vm4, %v2289_v54, %v8384_v29  ;;  %8387 = vrot.lane.b32.xlu0 %v8386_v53, %s15792_s16 }
 0xcd1   : > { %8397 = vrot.lane.b32.xlu1 %v8396_v18, %s15792_s16  ;;  %v2327_v21 = vsel %vm15793_vm11, %v2322_v19, %v2273_v13  ;;  %v2328_v61 = vsel %vm15794_vm0, %v2311_v51, %v2274_v55  ;;  %v2323_v36 = vsel %vm15793_vm11, %v2321_v59, %v2269_v41  ;;  %v2324_v58 = vsel %vm15794_vm0, %v2309_v45, %v2270_v5 }
 0xcd2   : > { %v8401_v43 = vpack.i.bf16 %v2328_v61, %v2327_v21  ;;  %v8391_v40 = vpack.i.bf16 %v2324_v58, %v2323_v36  ;;  %vm15795_vm4 = vcmask 343040   ;;  %vm15798_vm12 = vcmask 474112  }
 0xcd3   : > { %vm15796_vm5 = vmmov %vm15795_vm4 }
 0xcd4   : > { %8392 = vrot.lane.b32.xlu0 %v8391_v40, %s15792_s16  ;;  %vm15797_vm10 = vmmov %vm15795_vm4 }
 0xcd5   : > { %8402 = vrot.lane.b32.xlu1 %v8401_v43, %s15792_s16  ;;  %vm15799_vm9 = vmmov %vm15795_vm4 }
 0xcd6   : > { %vm15800_vm0 = vmmov %vm15795_vm4 }
 0xcd7   : > { %vm15801_vm11 = vmmov %vm15800_vm0 }
 0xd42   : > { %v8388_v52 = vpop.permute.xlu0 %8387 }
 0xd43   : > { %v8398_v33 = vpop.permute.xlu1 %8397  ;;  %v8390_v15 = vunpack.i.h.bf16 %v8388_v52  ;;  %v8389_v6 = vunpack.i.l.bf16 %v8388_v52 }
 0xd44   : > { %v8400_v18 = vunpack.i.h.bf16 %v8398_v33  ;;  %v8399_v51 = vunpack.i.l.bf16 %v8398_v33 }
 0xd45   : > { %v2357_v26 = vsel %vm15795_vm4, %v8389_v6, %v8390_v15  ;;  %vm15806_vm4 = vmmov %vm15798_vm12 }
 0xd46   : > { %v8393_v13 = vpop.permute.xlu0 %8392  ;;  %v2367_v14 = vsel %vm15798_vm12, %v2357_v26, 0.0 }
 0xd47   : > { %v8403_v55 = vpop.permute.xlu1 %8402  ;;  %v8395_v42 = vunpack.i.h.bf16 %v8393_v13  ;;  %v8394_v35 = vunpack.i.l.bf16 %v8393_v13 }
 0xd48   : > { %v8405_v41 = vunpack.i.h.bf16 %v8403_v55  ;;  %v8404_v62 = vunpack.i.l.bf16 %v8403_v55 }
 0xd49   : > { %v2356_v5 = vsel %vm15796_vm5, %v8395_v42, %v8389_v6  ;;  %v2355_v2 = vsel %vm15797_vm10, %v8394_v35, %v8395_v42  ;;  %v2365_v11 = vsel %vm15801_vm11, 0.0, %v8394_v35  ;;  %vm15804_vm11 = vmmov %vm15800_vm0  ;;  %vm15807_vm5 = vcmask 1039360  }
 0xd4a   : > { %v2358_v60 = vsel %vm15799_vm9, %v8404_v62, %v8405_v41  ;;  %v8406_v29 = vpack.i.bf16 %v2356_v5, %v2355_v2  ;;  %v2366_v53 = vsel %vm15800_vm0, 0.0, %v8404_v62  ;;  %v2360_v19 = vsel %vm15804_vm11, %v8399_v51, %v8400_v18  ;;  %vm15808_vm10 = vmmov %vm15807_vm5 }
 0xd4b   : > { %v8446_v30 = vpack.i.bf16 %v2358_v60, %v2367_v14  ;;  %v8456_v54 = vpack.i.bf16 %v2366_v53, %v2365_v11  ;;  %v2359_v45 = vsel %vm15800_vm0, %v8405_v41, %v8399_v51  ;;  %v2368_v59 = vsel %vm15806_vm4, %v2360_v19, 0.0  ;;  %vm15809_vm12 = vmmov %vm15807_vm5 }
 0xd4c   : > { %8407 = vrot.lane.b32.xlu0 %v8406_v29, %s15438_s19  ;;  %v8451_v21 = vpack.i.bf16 %v2368_v59, %v2359_v45  ;;  %vm15810_vm9 = vcmask 1031168   ;;  %vm15813_vm4 = vcmask 883712  }
 0xd4d   : > { %8447 = vrot.lane.b32.xlu1 %v8446_v30, %s15438_s19  ;;  %vm15811_vm11 = vmmov %vm15810_vm9 }
 0xd4e   : > { %vm15812_vm0 = vmmov %vm15810_vm9 }
 0xd50   : > { %8412 = vrot.lane.b32.xlu0 %v8406_v29, %s15423_s2 }
 0xd51   : > { %8457 = vrot.lane.b32.xlu1 %v8456_v54, %s15438_s19 }
 0xd54   : > { %8417 = vrot.lane.b32.xlu0 %v8406_v29, %s15381_s24 }
 0xd55   : > { %8462 = vrot.lane.b32.xlu1 %v8446_v30, %s15423_s2 }
 0xd58   : > { %8422 = vrot.lane.b32.xlu0 %v8406_v29, %s15413_s21 }
 0xd59   : > { %8472 = vrot.lane.b32.xlu1 %v8456_v54, %s15423_s2 }
 0xd5c   : > { %8427 = vrot.lane.b32.xlu0 %v8406_v29, %s15802_s23 }
 0xd5d   : > { %8477 = vrot.lane.b32.xlu1 %v8446_v30, %s15381_s24 }
 0xd60   : > { %8432 = vrot.lane.b32.xlu0 %v8406_v29, %s15383_s29 }
 0xd61   : > { %8487 = vrot.lane.b32.xlu1 %v8456_v54, %s15381_s24 }
 0xd64   : > { %8437 = vrot.lane.b32.xlu0 %v8406_v29, %s15803_s26 }
 0xd65   : > { %8492 = vrot.lane.b32.xlu1 %v8446_v30, %s15413_s21 }
 0xd68   : > { %8442 = vrot.lane.b32.xlu0 %v8406_v29, %s15805_s27 }
 0xd69   : > { %8502 = vrot.lane.b32.xlu1 %v8456_v54, %s15413_s21 }
 0xd6c   : > { %8452 = vrot.lane.b32.xlu0 %v8451_v21, %s15438_s19 }
 0xd6d   : > { %8507 = vrot.lane.b32.xlu1 %v8446_v30, %s15802_s23 }
 0xd70   : > { %8467 = vrot.lane.b32.xlu0 %v8451_v21, %s15423_s2 }
 0xd71   : > { %8517 = vrot.lane.b32.xlu1 %v8456_v54, %s15802_s23 }
 0xd74   : > { %8482 = vrot.lane.b32.xlu0 %v8451_v21, %s15381_s24  ;;  %s15923_s24 = smov 1  }
 0xd75   : > { %8522 = vrot.lane.b32.xlu1 %v8446_v30, %s15383_s29 }
 0xd78   : > { %8497 = vrot.lane.b32.xlu0 %v8451_v21, %s15413_s21 }
 0xd79   : > { %8532 = vrot.lane.b32.xlu1 %v8456_v54, %s15383_s29 }
 0xd7c   : > { %8512 = vrot.lane.b32.xlu0 %v8451_v21, %s15802_s23 }
 0xd7d   : > { %8537 = vrot.lane.b32.xlu1 %v8446_v30, %s15803_s26 }
 0xd80   : > { %8527 = vrot.lane.b32.xlu0 %v8451_v21, %s15383_s29  ;;  %s15929_s29 = smov 113  }
 0xd81   : > { %8547 = vrot.lane.b32.xlu1 %v8456_v54, %s15803_s26 }
 0xd84   : > { %8542 = vrot.lane.b32.xlu0 %v8451_v21, %s15803_s26 }
 0xd85   : > { %8552 = vrot.lane.b32.xlu1 %v8446_v30, %s15805_s27 }
 0xd88   : > { %8557 = vrot.lane.b32.xlu0 %v8451_v21, %s15805_s27 }
 0xd89   : > { %8562 = vrot.lane.b32.xlu1 %v8456_v54, %s15805_s27 }
 0xdbe   : > { %v8408_v61 = vpop.permute.xlu0 %8407 }
 0xdbf   : > { %v12055_v36 = vpop.permute.xlu1 %8447  ;;  %v8410_v58 = vunpack.i.h.bf16 %v8408_v61  ;;  %v8409_v43 = vunpack.i.l.bf16 %v8408_v61 }
 0xdc0   : > { %v8449_v40 = vunpack.i.l.bf16 %v12055_v36 }
 0xdc1   : > { %v2390_v52 = vsel %vm15807_vm5, %v8409_v43, %v8410_v58  ;;  %vm15814_vm5 = vmmov %vm15813_vm4 }
 0xdc2   : > { %v2391_v33 = vsel %vm15808_vm10, %v8410_v58, %v8449_v40  ;;  %v8413_v15 = vpop.permute.xlu0 %8412  ;;  %vm15815_vm10 = vmmov %vm15813_vm4 }
 0xdc3   : > { %v12060_v6 = vpop.permute.xlu1 %8457  ;;  %v8566_v13 = vpack.i.bf16 %v2391_v33, %v2390_v52  ;;  %v8415_v42 = vunpack.i.h.bf16 %v8413_v15  ;;  %v8414_v35 = vunpack.i.l.bf16 %v8413_v15 }
 0xdc4   : > { %v8459_v26 = vunpack.i.l.bf16 %v12060_v6 }
 0xdc5   : > { %8567 = vrot.lane.b32.xlu0 %v8566_v13, %s15413_s21  ;;  %v2412_v14 = vsel %vm15810_vm9, %v8414_v35, %v8415_v42 }
 0xdc6   : > { %v2389_v55 = vsel %vm15809_vm12, %v8459_v26, %v8409_v43  ;;  %v8418_v41 = vpop.permute.xlu0 %8417  ;;  %vm15816_vm12 = vcmask 875520  }
 0xdc7   : > { %v12065_v62 = vpop.permute.xlu1 %8462  ;;  %v8571_v5 = vpack.i.bf16 %v8449_v40, %v2389_v55  ;;  %v8420_v54 = vunpack.i.h.bf16 %v8418_v41  ;;  %v8419_v18 = vunpack.i.l.bf16 %v8418_v41  ;;  %vm15817_vm9 = vmmov %vm15816_vm12 }
 0xdc8   : > { %v8464_v2 = vunpack.i.l.bf16 %v12065_v62 }
 0xdc9   : > { %8572 = vrot.lane.b32.xlu0 %v8571_v5, %s15413_s21  ;;  %v2434_v61 = vsel %vm15813_vm4, %v8419_v18, %v8420_v54 }
 0xdca   : > { %v2413_v60 = vsel %vm15811_vm11, %v8415_v42, %v8464_v2  ;;  %v8423_v29 = vpop.permute.xlu0 %8422  ;;  %vm15818_vm11 = vmmov %vm15817_vm9 }
 0xdcb   : > { %v12071_v30 = vpop.permute.xlu1 %8472  ;;  %v8576_v53 = vpack.i.bf16 %v2413_v60, %v2412_v14  ;;  %v8425_v15 = vunpack.i.h.bf16 %v8423_v29  ;;  %v8424_v13 = vunpack.i.l.bf16 %v8423_v29 }
 0xdcc   : > { %v8474_v11 = vunpack.i.l.bf16 %v12071_v30 }
 0xdcd   : > { %8577 = vrot.lane.b32.xlu0 %v8576_v53, %s15413_s21  ;;  %v12098_v5 = vsel %vm15816_vm12, %v8424_v13, %v8425_v15 }
 0xdce   : > { %v2411_v51 = vsel %vm15812_vm0, %v8474_v11, %v8414_v35  ;;  %v8428_v19 = vpop.permute.xlu0 %8427  ;;  %vm15819_vm0 = vcmask 1039360  }
 0xdcf   : > { %v12076_v45 = vpop.permute.xlu1 %8477  ;;  %v8581_v59 = vpack.i.bf16 %v8464_v2, %v2411_v51  ;;  %v8430_v11 = vunpack.i.h.bf16 %v8428_v19  ;;  %vm15820_vm4 = vmmov %vm15819_vm0 }
 0xdd0   : > { %v8479_v21 = vunpack.i.l.bf16 %v12076_v45  ;;  %vm15823_vm12 = vmmov %vm15819_vm0 }
 0xdd1   : > { %8582 = vrot.lane.b32.xlu0 %v8581_v59, %s15413_s21  ;;  %v8450_v59 = vunpack.i.h.bf16 %v12055_v36 }
 0xdd2   : > { %v2435_v58 = vsel %vm15814_vm5, %v8420_v54, %v8479_v21  ;;  %v12082_v43 = vpop.permute.xlu0 %8432  ;;  %v8429_v54 = vunpack.i.l.bf16 %v8428_v19  ;;  %vm15821_vm5 = vcmask 867328  }
 0xdd3   : > { %v12084_v40 = vpop.permute.xlu1 %8487  ;;  %v8586_v52 = vpack.i.bf16 %v2435_v58, %v2434_v61  ;;  %v8435_v28 = vunpack.i.h.bf16 %v12082_v43 }
 0xdd4   : > { %v8489_v33 = vunpack.i.l.bf16 %v12084_v40 }
 0xdd5   : > { %8587 = vrot.lane.b32.xlu0 %v8586_v52, %s15413_s21 }
 0xdd6   : > { %v2433_v26 = vsel %vm15815_vm10, %v8489_v33, %v8419_v18  ;;  %v12089_v55 = vpop.permute.xlu0 %8437  ;;  %v8460_v33 = vunpack.i.h.bf16 %v12060_v6  ;;  %vm15822_vm10 = vmmov %vm15821_vm5 }
 0xdd7   : > { %v12091_v42 = vpop.permute.xlu1 %8492  ;;  %v8591_v35 = vpack.i.bf16 %v8479_v21, %v2433_v26 }
 0xdd8   : > { %v12094_v41 = vunpack.i.l.bf16 %v12091_v42  ;;  %v2392_v6 = vsel %vm15823_vm12, %v8460_v33, %v8450_v59  ;;  %vm15830_vm12 = vcmask 875520  }
 0xdd9   : > { %8592 = vrot.lane.b32.xlu0 %v8591_v35, %s15413_s21 }
 0xdda   : > { %v12102_v2 = vsel %vm15817_vm9, %v8425_v15, %v12094_v41  ;;  %v12104_v14 = vpop.permute.xlu0 %8442  ;;  %vm15824_vm9 = vmmov %vm15821_vm5 }
 0xddb   : > { %v12106_v60 = vpop.permute.xlu1 %8502  ;;  %v8596_v29 = vpack.i.bf16 %v12102_v2, %v12098_v5 }
 0xddc   : > { %v8504_v53 = vunpack.i.l.bf16 %v12106_v60 }
 0xddd   : > { %8597 = vrot.lane.b32.xlu0 %v8596_v29, %s15413_s21 }
 0xdde   : > { %v12113_v18 = vsel %vm15818_vm11, %v8504_v53, %v8424_v13  ;;  %v8453_v51 = vpop.permute.xlu0 %8452  ;;  %v2478_v13 = vsel %vm15821_vm5, %v8429_v54, %v8430_v11  ;;  %vm15825_vm11 = vcmask 1031168  }
 0xddf   : > { %v12116_v21 = vpop.permute.xlu1 %8507  ;;  %v8455_v61 = vunpack.i.h.bf16 %v8453_v51  ;;  %v8454_v58 = vunpack.i.l.bf16 %v8453_v51  ;;  %v8601_v52 = vpack.i.bf16 %v12094_v41, %v12113_v18 }
 0xde0   : > { %v8509_v15 = vunpack.i.l.bf16 %v12116_v21 }
 0xde1   : > { %v2393_v26 = vsel %vm15819_vm0, %v8450_v59, %v8454_v58  ;;  %v2394_v19 = vsel %vm15820_vm4, %v8454_v58, %v8455_v61  ;;  %8602 = vrot.lane.b32.xlu0 %v8601_v52, %s15413_s21  ;;  %v8465_v58 = vunpack.i.h.bf16 %v12065_v62  ;;  %v8475_v52 = vunpack.i.h.bf16 %v12071_v30  ;;  %vm15826_vm0 = vmmov %vm15825_vm11 }
 0xde2   : > { %v2479_v36 = vsel %vm15822_vm10, %v8430_v11, %v8509_v15  ;;  %v8468_v35 = vpop.permute.xlu0 %8467  ;;  %v8646_v29 = vpack.i.bf16 %v2394_v19, %v2393_v26  ;;  %v8434_v11 = vunpack.i.l.bf16 %v12082_v43  ;;  %v8651_v26 = vpack.i.bf16 %v8455_v61, %v2392_v6  ;;  %vm15828_vm5 = vmmov %vm15826_vm0 }
 0xde3   : > { %v12127_v53 = vpop.permute.xlu1 %8517  ;;  %v8470_v51 = vunpack.i.h.bf16 %v8468_v35  ;;  %v8469_v38 = vunpack.i.l.bf16 %v8468_v35  ;;  %v8606_v57 = vpack.i.bf16 %v2479_v36, %v2478_v13  ;;  %vm15827_vm4 = vcmask 719872  }
 0xde4   : > { %v8519_v3 = vunpack.i.l.bf16 %v12127_v53  ;;  %8647 = vrot.lane.b32.xlu1 %v8646_v29, %s15413_s21  ;;  %v2500_v30 = vsel %vm15827_vm4, %v8434_v11, %v8435_v28  ;;  %v8505_v43 = vunpack.i.h.bf16 %v12106_v60  ;;  %vm15829_vm10 = vmmov %vm15827_vm4  ;;  %v8480_v60 = vunpack.i.h.bf16 %v12076_v45 }
 0xde5   : > { %8607 = vrot.lane.b32.xlu0 %v8606_v57, %s15413_s21  ;;  %v2415_v59 = vsel %vm15825_vm11, %v8465_v58, %v8469_v38  ;;  %v2416_v33 = vsel %vm15826_vm0, %v8469_v38, %v8470_v51  ;;  %v2414_v57 = vsel %vm15828_vm5, %v8475_v52, %v8465_v58  ;;  %v8440_v58 = vunpack.i.h.bf16 %v12089_v55  ;;  %vm15833_vm0 = vmmov %vm15827_vm4 }
 0xde6   : > { %v2477_v19 = vsel %vm15824_vm9, %v8519_v3, %v8429_v54  ;;  %v8483_v13 = vpop.permute.xlu0 %8482  ;;  %v8495_v3 = vunpack.i.h.bf16 %v12091_v42  ;;  %v8656_v29 = vpack.i.bf16 %v2416_v33, %v2415_v59  ;;  %v8439_v52 = vunpack.i.l.bf16 %v12089_v55  ;;  %vm15831_vm9 = vmmov %vm15830_vm12 }
 0xde7   : > { %v12140_v36 = vpop.permute.xlu1 %8522  ;;  %v8611_v35 = vpack.i.bf16 %v8509_v15, %v2477_v19  ;;  %v8485_v38 = vunpack.i.h.bf16 %v8483_v13  ;;  %v8484_v15 = vunpack.i.l.bf16 %v8483_v13  ;;  %vm15832_vm11 = vmmov %vm15831_vm9  ;;  %v8661_v33 = vpack.i.bf16 %v8470_v51, %v2414_v57 }
 0xde8   : > { %v8524_v62 = vunpack.i.l.bf16 %v12140_v36  ;;  %8652 = vrot.lane.b32.xlu1 %v8651_v26, %s15413_s21  ;;  %vm15834_vm4 = vcmask 883712  }
 0xde9   : > { %8612 = vrot.lane.b32.xlu0 %v8611_v35, %s15413_s21  ;;  %vm15835_vm5 = vmmov %vm15834_vm4 }
 0xdea   : > { %v2501_v54 = vsel %vm15829_vm10, %v8435_v28, %v8524_v62  ;;  %v8498_v61 = vpop.permute.xlu0 %8497  ;;  %v2458_v28 = vsel %vm15830_vm12, %v8505_v43, %v8495_v3  ;;  %v2438_v43 = vsel %vm15835_vm5, %v8484_v15, %v8485_v38  ;;  %vm15836_vm10 = vcmask 711680  }
 0xdeb   : > { %v12150_v6 = vpop.permute.xlu1 %8532  ;;  %v12152_v19 = vunpack.i.h.bf16 %v8498_v61  ;;  %v8499_v26 = vunpack.i.l.bf16 %v8498_v61  ;;  %v8616_v27 = vpack.i.bf16 %v2501_v54, %v2500_v30  ;;  %v2437_v54 = vsel %vm15834_vm4, %v8480_v60, %v8484_v15  ;;  %vm15837_vm12 = vmmov %vm15836_vm10 }
 0xdec   : > { %v8534_v42 = vunpack.i.l.bf16 %v12150_v6  ;;  %8657 = vrot.lane.b32.xlu1 %v8656_v29, %s15413_s21  ;;  %v7289_v51 = vpack.c.bf16 %v2458_v28, %v12113_v18  ;;  %v8666_v57 = vpack.i.bf16 %v2438_v43, %v2437_v54  ;;  %v8444_v15 = vunpack.i.l.bf16 %v12104_v14 }
 0xded   : > { %8617 = vrot.lane.b32.xlu0 %v8616_v27, %s15413_s21  ;;  %v7323_v13 = vpack.c.bf16 %v12152_v19, %v12094_v41  ;;  %v2459_v59 = vsel %vm15831_vm9, %v8495_v3, %v8499_v26  ;;  %v2460_v45 = vsel %vm15832_vm11, %v8499_v26, %v12152_v19  ;;  %vm15838_vm9 = vmmov %vm15834_vm4 }
 0xdee   : > { %v2499_v35 = vsel %vm15833_vm0, %v8534_v42, %v8434_v11  ;;  %v7287_v55 = vpack.c.bf16 %v2459_v59, %v12098_v5  ;;  %v7325_v30 = vpack.c.bf16 %v2460_v45, %v12102_v2  ;;  %v8490_v11 = vunpack.i.h.bf16 %v12084_v40  ;;  %vm15839_vm11 = vmmov %vm15836_vm10 }
 0xdef   : > { %v12171_v27 = vpop.permute.xlu1 %8537  ;;  %7324 = vmatprep.subr.bf16.mxu1 %v7323_v13  ;;  %v8621_v41 = vpack.i.bf16 %v8524_v62, %v2499_v35  ;;  %v2522_v5 = vsel %vm15836_vm10, %v8439_v52, %v8440_v58  ;;  %v8445_v40 = vunpack.i.h.bf16 %v12104_v14  ;;  %vm15840_vm0 = vcmask 703488  }
 0xdf0   : > { %v8539_v3 = vunpack.i.l.bf16 %v12171_v27  ;;  %8662 = vrot.lane.b32.xlu1 %v8661_v33, %s15413_s21  ;;  %7288 = vmatprep.subr.bf16.mxu0 %v7287_v55  ;;  %v2436_v18 = vsel %vm15838_vm9, %v8490_v11, %v8480_v60  ;;  %v8513_v33 = vpop.permute.xlu0 %8512  ;;  %v8676_v55 = vpack.i.bf16 %v2460_v45, %v2459_v59  ;;  %vm15841_vm4 = vmmov %vm15840_vm0  ;;  %vm15843_vm10 = vcmask 867328  }
 0xdf1   : > { %7326 = vmatpush1.bf16.msra.mxu1 %v7325_v30  ;;  %8622 = vrot.lane.b32.xlu0 %v8621_v41, %s15413_s21  ;;  %v8671_v26 = vpack.i.bf16 %v8485_v38, %v2436_v18  ;;  %v2544_v60 = vsel %vm15840_vm0, %v8444_v15, %v8445_v40  ;;  %v8515_v54 = vunpack.i.h.bf16 %v8513_v33  ;;  %v8514_v14 = vunpack.i.l.bf16 %v8513_v33  ;;  %vm15842_vm5 = vmmov %vm15840_vm0 }
 0xdf2   : > { %v2523_v2 = vsel %vm15837_vm12, %v8440_v58, %v8539_v3  ;;  %7290 = vmatpush1.bf16.msra.mxu0 %v7289_v51  ;;  %v8510_v41 = vunpack.i.h.bf16 %v12116_v21  ;;  %v8681_v51 = vpack.i.bf16 %v12152_v19, %v2458_v28  ;;  %vm15844_vm12 = vmmov %vm15843_vm10  ;;  %v2557_v21 = vld [vmem:[%s15845_s7] sm:$0xff]  ;;  %v8525_v19 = vunpack.i.h.bf16 %v12140_v36 }
 0xdf3   : > { %v12180_v61 = vpop.permute.xlu1 %8547  ;;  %v8626_v62 = vpack.i.bf16 %v2523_v2, %v2522_v5  ;;  %v2482_v59 = vsel %vm15844_vm12, %v8514_v14, %v8515_v54  ;;  %v8520_v2 = vunpack.i.h.bf16 %v12127_v53  ;;  %vm15846_vm9 = vmmov %vm15843_vm10  ;;  %v2559_v53 = vld [vmem:[%s15845_s7 + $0x10] sm:$0xff] }
 0xdf4   : > { %v8549_v29 = vunpack.i.l.bf16 %v12180_v61  ;;  %8667 = vrot.lane.b32.xlu1 %v8666_v57, %s15413_s21  ;;  %v2481_v11 = vsel %vm15843_vm10, %v8510_v41, %v8514_v14  ;;  %v8528_v5 = vpop.permute.xlu0 %8527 }
 0xdf5   : > { %8627 = vrot.lane.b32.xlu0 %v8626_v62, %s15413_s21  ;;  %v8686_v57 = vpack.i.bf16 %v2482_v59, %v2481_v11  ;;  %v8530_v62 = vunpack.i.h.bf16 %v8528_v5  ;;  %v2480_v28 = vsel %vm15846_vm9, %v8520_v2, %v8510_v41  ;;  %vm15853_vm9 = vcmask 703488  }
 0xdf6   : > { %v2521_v58 = vsel %vm15839_vm11, %v8549_v29, %v8439_v52  ;;  %v8529_v29 = vunpack.i.l.bf16 %v8528_v5  ;;  %v8691_v18 = vpack.i.bf16 %v8515_v54, %v2480_v28  ;;  %vm15847_vm11 = vcmask 719872   ;;  %v2550_v5 = vld [vmem:[#allocation8 + $0x8] sm:$0xff] }
 0xdf7   : > { %v12189_v42 = vpop.permute.xlu1 %8552  ;;  %v8631_v13 = vpack.i.bf16 %v8539_v3, %v2521_v58  ;;  %vm15848_vm0 = vmmov %vm15847_vm11  ;;  %v8535_v58 = vunpack.i.h.bf16 %v12150_v6  ;;  %v8550_v6 = vunpack.i.h.bf16 %v12180_v61 }
 0xdf8   : > { %v8554_v35 = vunpack.i.l.bf16 %v12189_v42  ;;  %8672 = vrot.lane.b32.xlu1 %v8671_v26, %s15413_s21  ;;  %v8543_v26 = vpop.permute.xlu0 %8542 }
 0xdf9   : > { %8632 = vrot.lane.b32.xlu0 %v8631_v13, %s15413_s21  ;;  %v8545_v36 = vunpack.i.h.bf16 %v8543_v26  ;;  %v8544_v33 = vunpack.i.l.bf16 %v8543_v26 }
 0xdfa   : > { %v2545_v30 = vsel %vm15841_vm4, %v8445_v40, %v8554_v35  ;;  %v2503_v40 = vsel %vm15847_vm11, %v8525_v19, %v8529_v29  ;;  %vm15849_vm4 = vmmov %vm15848_vm0 }
 0xdfb   : > { %v8563_v38 = vpop.permute.xlu1 %8562  ;;  %v8636_v43 = vpack.i.bf16 %v2545_v30, %v2544_v60  ;;  %v2502_v60 = vsel %vm15849_vm4, %v8535_v58, %v8525_v19  ;;  %vm15854_vm11 = vmmov %vm15853_vm9 }
 0xdfc   : > { %v8564_v52 = vunpack.i.l.bf16 %v8563_v38  ;;  %8677 = vrot.lane.b32.xlu1 %v8676_v55, %s15413_s21  ;;  %v8701_v55 = vpack.i.bf16 %v8530_v62, %v2502_v60  ;;  %v8558_v14 = vpop.permute.xlu0 %8557  ;;  %v8565_v11 = vunpack.i.h.bf16 %v8563_v38  ;;  %vm15855_vm4 = vmmov %vm15853_vm9  ;;  %v2558_v38 = vld [vmem:[%s15845_s7 + $0x8] sm:$0xff] }
 0xdfd   : > { %8637 = vrot.lane.b32.xlu0 %v8636_v43, %s15413_s21  ;;  %v8559_v41 = vunpack.i.l.bf16 %v8558_v14 }
 0xdfe   : > { %v2543_v3 = vsel %vm15842_vm5, %v8564_v52, %v8444_v15  ;;  %v2504_v15 = vsel %vm15848_vm0, %v8529_v29, %v8530_v62  ;;  %vm15850_vm5 = vcmask 711680   ;;  %v8560_v52 = vunpack.i.h.bf16 %v8558_v14 }
 0xdff   : > { %v8641_v45 = vpack.i.bf16 %v8554_v35, %v2543_v3  ;;  %v8696_v13 = vpack.i.bf16 %v2504_v15, %v2503_v40  ;;  %v8540_v35 = vunpack.i.h.bf16 %v12171_v27  ;;  %vm15851_vm10 = vmmov %vm15850_vm5  ;;  %v8555_v3 = vunpack.i.h.bf16 %v12189_v42 }
 0xe00   : > { %8682 = vrot.lane.b32.xlu1 %v8681_v51, %s15413_s21  ;;  %v2526_v54 = vsel %vm15851_vm10, %v8544_v33, %v8545_v36  ;;  %vm15852_vm12 = vmmov %vm15850_vm5  ;;  %vm15398_vm0 = vcmask 130048  }
 0xe01   : > { %8642 = vrot.lane.b32.xlu0 %v8641_v45, %s15413_s21  ;;  %v2525_v30 = vsel %vm15850_vm5, %v8540_v35, %v8544_v33  ;;  %v2524_v27 = vsel %vm15852_vm12, %v8550_v6, %v8540_v35  ;;  %v2547_v59 = vsel %vm15853_vm9, %v8555_v3, %v8559_v41  ;;  %v2548_v45 = vsel %vm15854_vm11, %v8559_v41, %v8560_v52 }
 0xe02   : > { %v8706_v43 = vpack.i.bf16 %v2526_v54, %v2525_v30  ;;  %v8711_v51 = vpack.i.bf16 %v8545_v36, %v2524_v27  ;;  %7133 = vmatprep.mubr.msk.f32.mxu0 %vm15398_vm0, %v2550_v5  ;;  %7137 = vmatprep.mubr.msk.f32.mxu1 %vm15398_vm0, %v2550_v5  ;;  %v8716_v61 = vpack.i.bf16 %v2548_v45, %v2547_v59  ;;  %vm15856_vm5 = vcmask 875520  }
 0xe03   : > { %v2546_v2 = vsel %vm15855_vm4, %v8565_v11, %v8555_v3  ;;  %vm15857_vm10 = vmmov %vm15856_vm5 }
 0xe04   : > { %8687 = vrot.lane.b32.xlu1 %v8686_v57, %s15413_s21  ;;  %v8721_v42 = vpack.i.bf16 %v8560_v52, %v2546_v2  ;;  %v2560_v57 = vld [vmem:[%s15845_s7 + $0x18] sm:$0xff]  ;;  %vm15858_vm12 = vmmov %vm15856_vm5 }
 0xe05   : > { %2563 = vperm.xlu0 %8044, %v2557_v21   ;;  %vm15859_vm9 = vmmov %vm15856_vm5 }
 0xe06   : > { %vm15860_vm11 = vmmov %vm15856_vm5 }
 0xe07   : > { %vm15861_vm4 = vmmov %vm15856_vm5 }
 0xe08   : > { %8692 = vrot.lane.b32.xlu1 %v8691_v18, %s15413_s21 }
 0xe09   : > { %2573 = vperm.xlu0 %8044, %v2559_v53  }
 0xe0c   : > { %8697 = vrot.lane.b32.xlu1 %v8696_v13, %s15413_s21 }
 0xe10   : > { %8702 = vrot.lane.b32.xlu1 %v8701_v55, %s15413_s21 }
 0xe14   : > { %8707 = vrot.lane.b32.xlu1 %v8706_v43, %s15413_s21 }
 0xe18   : > { %8712 = vrot.lane.b32.xlu1 %v8711_v51, %s15413_s21 }
 0xe1c   : > { %8717 = vrot.lane.b32.xlu1 %v8716_v61, %s15413_s21 }
 0xe20   : > { %8722 = vrot.lane.b32.xlu1 %v8721_v42, %s15413_s21  ;;  %s15982_s21 = smov 108  }
 0xe24   : > { %2568 = vperm.xlu1 %8185, %v2558_v38  }
 0xe28   : > { %2578 = vperm.xlu1 %8185, %v2560_v57  }
 0xe37   : > { %v8568_v21 = vpop.permute.xlu0 %8567 }
 0xe38   : > { %v8570_v53 = vunpack.i.h.bf16 %v8568_v21  ;;  %v8569_v40 = vunpack.i.l.bf16 %v8568_v21 }
 0xe3a   : > { %v2710_v35 = vsel %vm15856_vm5, %v8569_v40, %v8570_v53  ;;  %vm15862_vm5 = vmmov %vm15861_vm4 }
 0xe3b   : > { %v8573_v62 = vpop.permute.xlu0 %8572 }
 0xe3c   : > { %v8575_v36 = vunpack.i.h.bf16 %v8573_v62  ;;  %v8574_v33 = vunpack.i.l.bf16 %v8573_v62 }
 0xe3e   : > { %v2711_v6 = vsel %vm15858_vm12, %v8570_v53, %v8575_v36  ;;  %v2709_v43 = vsel %vm15859_vm9, %v8574_v33, %v8569_v40  ;;  %vm15864_vm12 = vmmov %vm15861_vm4 }
 0xe3f   : > { %v8578_v29 = vpop.permute.xlu0 %8577  ;;  %vm15865_vm9 = vmmov %vm15861_vm4 }
 0xe40   : > { %v8580_v52 = vunpack.i.h.bf16 %v8578_v29  ;;  %v8579_v41 = vunpack.i.l.bf16 %v8578_v29 }
 0xe42   : > { %v2716_v57 = vsel %vm15862_vm5, %v8579_v41, %v8580_v52  ;;  %vm15867_vm5 = vmmov %vm15861_vm4 }
 0xe43   : > { %v8583_v19 = vpop.permute.xlu0 %8582 }
 0xe44   : > { %v8585_v42 = vunpack.i.h.bf16 %v8583_v19  ;;  %v8584_v38 = vunpack.i.l.bf16 %v8583_v19 }
 0xe47   : > { %v12243_v28 = vpop.permute.xlu0 %8587 }
 0xe48   : > { %v8589_v19 = vunpack.i.l.bf16 %v12243_v28 }
 0xe4b   : > { %v12245_v18 = vpop.permute.xlu0 %8592 }
 0xe4f   : > { %v12247_v26 = vpop.permute.xlu0 %8597 }
 0xe53   : > { %v12253_v3 = vpop.permute.xlu0 %8602 }
 0xe56   : > { %v8648_v15 = vpop.permute.xlu1 %8647 }
 0xe57   : > { %v8650_v58 = vunpack.i.h.bf16 %v8648_v15  ;;  %v8649_v13 = vunpack.i.l.bf16 %v8648_v15  ;;  %v12259_v53 = vpop.permute.xlu0 %8607 }
 0xe59   : > { %v2713_v60 = vsel %vm15857_vm10, %v8649_v13, %v8650_v58  ;;  %vm15863_vm10 = vmmov %vm15861_vm4 }
 0xe5a   : > { %v8653_v55 = vpop.permute.xlu1 %8652  ;;  %v7291_v30 = vpack.c.bf16 %v2713_v60, %v2710_v35 }
 0xe5b   : > { %v8655_v54 = vunpack.i.h.bf16 %v8653_v55  ;;  %v8654_v14 = vunpack.i.l.bf16 %v8653_v55 }
 0xe5c   : > { %7292 = vmatprep.subr.bf16.mxu0 %v7291_v30 }
 0xe5d   : > { %v2712_v27 = vsel %vm15860_vm11, %v8654_v14, %v8649_v13  ;;  %v2714_v51 = vsel %vm15861_vm4, %v8650_v58, %v8655_v54  ;;  %v7327_v11 = vpack.c.bf16 %v8655_v54, %v8575_v36  ;;  %v2715_v58 = vsel %vm15864_vm12, %v8584_v38, %v8579_v41  ;;  %vm15866_vm11 = vmmov %vm15861_vm4  ;;  %v12269_v41 = vpop.permute.xlu0 %8612 }
 0xe5e   : > { %v8658_v59 = vpop.permute.xlu1 %8657  ;;  %v7293_v45 = vpack.c.bf16 %v2712_v27, %v2709_v43  ;;  %v7329_v5 = vpack.c.bf16 %v2714_v51, %v2711_v6  ;;  %v2717_v13 = vsel %vm15865_vm9, %v8580_v52, %v8585_v42  ;;  %v8590_v36 = vunpack.i.h.bf16 %v12243_v28  ;;  %vm15869_vm12 = vmmov %vm15861_vm4 }
 0xe5f   : > { %v8660_v61 = vunpack.i.h.bf16 %v8658_v59  ;;  %v8659_v2 = vunpack.i.l.bf16 %v8658_v59  ;;  %7328 = vmatprep.subr.bf16.mxu1 %v7327_v11  ;;  %v8595_v43 = vunpack.i.h.bf16 %v12245_v18  ;;  %v8594_v52 = vunpack.i.l.bf16 %v12245_v18  ;;  %vm15870_vm9 = vmmov %vm15861_vm4 }
 0xe60   : > { %7294 = vmatpush1.bf16.msra.mxu0 %v7293_v45  ;;  %7330 = vmatpush1.bf16.msra.mxu1 %v7329_v5  ;;  %v2722_v28 = vsel %vm15867_vm5, %v8589_v19, %v8590_v36  ;;  %v8599_v18 = vunpack.i.l.bf16 %v12247_v26  ;;  %vm15872_vm5 = vmmov %vm15861_vm4 }
 0xe61   : > { %v2719_v21 = vsel %vm15863_vm10, %v8659_v2, %v8660_v61  ;;  %vm15868_vm10 = vmmov %vm15861_vm4  ;;  %v2721_v5 = vsel %vm15869_vm12, %v8594_v52, %v8589_v19 }
 0xe62   : > { %v8663_v62 = vpop.permute.xlu1 %8662  ;;  %v7295_v29 = vpack.c.bf16 %v2719_v21, %v2716_v57  ;;  %vm15874_vm12 = vmmov %vm15861_vm4 }
 0xe63   : > { %v8665_v40 = vunpack.i.h.bf16 %v8663_v62  ;;  %v8664_v15 = vunpack.i.l.bf16 %v8663_v62 }
 0xe64   : > { %7296 = vmatprep.subr.bf16.mxu0 %v7295_v29 }
 0xe65   : > { %v2718_v33 = vsel %vm15866_vm11, %v8664_v15, %v8659_v2  ;;  %v2720_v35 = vsel %vm15861_vm4, %v8660_v61, %v8665_v40  ;;  %v7331_v60 = vpack.c.bf16 %v8665_v40, %v8585_v42  ;;  %v2723_v61 = vsel %vm15870_vm9, %v8590_v36, %v8595_v43  ;;  %vm15871_vm11 = vmmov %vm15861_vm4  ;;  %v12279_v40 = vpop.permute.xlu0 %8617 }
 0xe66   : > { %v8668_v55 = vpop.permute.xlu1 %8667  ;;  %v7297_v30 = vpack.c.bf16 %v2718_v33, %v2715_v58  ;;  %v7333_v54 = vpack.c.bf16 %v2720_v35, %v2717_v13  ;;  %v8600_v2 = vunpack.i.h.bf16 %v12247_v26  ;;  %v8605_v13 = vunpack.i.h.bf16 %v12253_v3  ;;  %vm15875_vm9 = vmmov %vm15861_vm4 }
 0xe67   : > { %v8670_v14 = vunpack.i.h.bf16 %v8668_v55  ;;  %v8669_v6 = vunpack.i.l.bf16 %v8668_v55  ;;  %7332 = vmatprep.subr.bf16.mxu1 %v7331_v60  ;;  %v8604_v36 = vunpack.i.l.bf16 %v12253_v3 }
 0xe68   : > { %7298 = vmatpush1.bf16.msra.mxu0 %v7297_v30  ;;  %7334 = vmatpush1.bf16.msra.mxu1 %v7333_v54  ;;  %v2728_v26 = vsel %vm15872_vm5, %v8599_v18, %v8600_v2  ;;  %v2729_v54 = vsel %vm15875_vm9, %v8600_v2, %v8605_v13  ;;  %vm15877_vm5 = vmmov %vm15861_vm4 }
 0xe69   : > { %v2725_v27 = vsel %vm15868_vm10, %v8669_v6, %v8670_v14  ;;  %vm15873_vm10 = vmmov %vm15861_vm4  ;;  %v2727_v30 = vsel %vm15874_vm12, %v8604_v36, %v8599_v18  ;;  %v8623_v3 = vpop.permute.xlu0 %8622 }
 0xe6a   : > { %v8673_v51 = vpop.permute.xlu1 %8672  ;;  %v7299_v11 = vpack.c.bf16 %v2725_v27, %v2722_v28  ;;  %vm15879_vm12 = vmmov %vm15861_vm4 }
 0xe6b   : > { %v8675_v59 = vunpack.i.h.bf16 %v8673_v51  ;;  %v8674_v45 = vunpack.i.l.bf16 %v8673_v51  ;;  %vm15880_vm9 = vmmov %vm15861_vm4 }
 0xe6c   : > { %7300 = vmatprep.subr.bf16.mxu0 %v7299_v11 }
 0xe6d   : > { %v2724_v42 = vsel %vm15871_vm11, %v8674_v45, %v8669_v6  ;;  %v2726_v38 = vsel %vm15861_vm4, %v8670_v14, %v8675_v59  ;;  %v7335_v57 = vpack.c.bf16 %v8675_v59, %v8595_v43  ;;  %v8610_v14 = vunpack.i.h.bf16 %v12259_v53  ;;  %vm15876_vm11 = vmmov %vm15861_vm4 }
 0xe6e   : > { %v8678_v21 = vpop.permute.xlu1 %8677  ;;  %v7301_v62 = vpack.c.bf16 %v2724_v42, %v2721_v5  ;;  %v7337_v29 = vpack.c.bf16 %v2726_v38, %v2723_v61  ;;  %v8609_v6 = vunpack.i.l.bf16 %v12259_v53  ;;  %v8615_v5 = vunpack.i.h.bf16 %v12269_v41  ;;  %v8628_v38 = vpop.permute.xlu0 %8627 }
 0xe6f   : > { %v8680_v15 = vunpack.i.h.bf16 %v8678_v21  ;;  %v8679_v58 = vunpack.i.l.bf16 %v8678_v21  ;;  %7336 = vmatprep.subr.bf16.mxu1 %v7335_v57  ;;  %v8614_v61 = vunpack.i.l.bf16 %v12269_v41  ;;  %v8619_v41 = vunpack.i.l.bf16 %v12279_v40 }
 0xe70   : > { %7302 = vmatpush1.bf16.msra.mxu0 %v7301_v62  ;;  %7338 = vmatpush1.bf16.msra.mxu1 %v7337_v29  ;;  %v2734_v53 = vsel %vm15877_vm5, %v8609_v6, %v8610_v14  ;;  %v2735_v29 = vsel %vm15880_vm9, %v8610_v14, %v8615_v5  ;;  %vm15882_vm5 = vmmov %vm15861_vm4 }
 0xe71   : > { %v2731_v19 = vsel %vm15873_vm10, %v8679_v58, %v8680_v15  ;;  %vm15878_vm10 = vmmov %vm15861_vm4  ;;  %v2733_v62 = vsel %vm15879_vm12, %v8614_v61, %v8609_v6 }
 0xe72   : > { %v8683_v33 = vpop.permute.xlu1 %8682  ;;  %v7303_v35 = vpack.c.bf16 %v2731_v19, %v2728_v26  ;;  %vm15884_vm12 = vmmov %vm15861_vm4 }
 0xe73   : > { %v8685_v60 = vunpack.i.h.bf16 %v8683_v33  ;;  %v8684_v55 = vunpack.i.l.bf16 %v8683_v33  ;;  %vm15885_vm9 = vmmov %vm15861_vm4 }
 0xe74   : > { %7304 = vmatprep.subr.bf16.mxu0 %v7303_v35 }
 0xe75   : > { %v2730_v43 = vsel %vm15876_vm11, %v8684_v55, %v8679_v58  ;;  %v2732_v52 = vsel %vm15861_vm4, %v8680_v15, %v8685_v60  ;;  %v7339_v28 = vpack.c.bf16 %v8685_v60, %v8605_v13  ;;  %v8620_v15 = vunpack.i.h.bf16 %v12279_v40  ;;  %vm15881_vm11 = vmmov %vm15861_vm4 }
 0xe76   : > { %v8688_v27 = vpop.permute.xlu1 %8687  ;;  %v7305_v51 = vpack.c.bf16 %v2730_v43, %v2727_v30  ;;  %v7341_v11 = vpack.c.bf16 %v2732_v52, %v2729_v54  ;;  %v8625_v55 = vunpack.i.h.bf16 %v8623_v3  ;;  %v8624_v30 = vunpack.i.l.bf16 %v8623_v3  ;;  %v8633_v54 = vpop.permute.xlu0 %8632 }
 0xe77   : > { %v8690_v59 = vunpack.i.h.bf16 %v8688_v27  ;;  %v8689_v45 = vunpack.i.l.bf16 %v8688_v27  ;;  %7340 = vmatprep.subr.bf16.mxu1 %v7339_v28  ;;  %v2740_v14 = vsel %vm15882_vm5, %v8619_v41, %v8620_v15  ;;  %vm15887_vm5 = vmmov %vm15861_vm4 }
 0xe78   : > { %7306 = vmatpush1.bf16.msra.mxu0 %v7305_v51  ;;  %7342 = vmatpush1.bf16.msra.mxu1 %v7341_v11  ;;  %v2739_v27 = vsel %vm15884_vm12, %v8624_v30, %v8619_v41  ;;  %v2741_v51 = vsel %vm15885_vm9, %v8620_v15, %v8625_v55  ;;  %v8630_v11 = vunpack.i.h.bf16 %v8628_v38  ;;  %vm15889_vm12 = vmmov %vm15861_vm4 }
 0xe79   : > { %v2737_v2 = vsel %vm15878_vm10, %v8689_v45, %v8690_v59  ;;  %vm15883_vm10 = vmmov %vm15861_vm4 }
 0xe7a   : > { %v8693_v18 = vpop.permute.xlu1 %8692  ;;  %v7307_v42 = vpack.c.bf16 %v2737_v2, %v2734_v53  ;;  %vm15890_vm9 = vmmov %vm15861_vm4 }
 0xe7b   : > { %v8695_v57 = vunpack.i.h.bf16 %v8693_v18  ;;  %v8694_v21 = vunpack.i.l.bf16 %v8693_v18  ;;  %v8638_v18 = vpop.permute.xlu0 %8637 }
 0xe7c   : > { %7308 = vmatprep.subr.bf16.mxu0 %v7307_v42 }
 0xe7d   : > { %v2736_v58 = vsel %vm15881_vm11, %v8694_v21, %v8689_v45  ;;  %v2738_v13 = vsel %vm15861_vm4, %v8690_v59, %v8695_v57  ;;  %v7343_v36 = vpack.c.bf16 %v8695_v57, %v8615_v5  ;;  %v8629_v59 = vunpack.i.l.bf16 %v8628_v38  ;;  %vm15886_vm11 = vmmov %vm15861_vm4 }
 0xe7e   : > { %v8698_v26 = vpop.permute.xlu1 %8697  ;;  %v7309_v19 = vpack.c.bf16 %v2736_v58, %v2733_v62  ;;  %v7345_v33 = vpack.c.bf16 %v2738_v13, %v2735_v29  ;;  %v8635_v21 = vunpack.i.h.bf16 %v8633_v54  ;;  %v8634_v62 = vunpack.i.l.bf16 %v8633_v54 }
 0xe7f   : > { %v8700_v35 = vunpack.i.h.bf16 %v8698_v26  ;;  %v8699_v60 = vunpack.i.l.bf16 %v8698_v26  ;;  %7344 = vmatprep.subr.bf16.mxu1 %v7343_v36  ;;  %v2746_v29 = vsel %vm15887_vm5, %v8629_v59, %v8630_v11  ;;  %vm15892_vm5 = vmmov %vm15861_vm4 }
 0xe80   : > { %7310 = vmatpush1.bf16.msra.mxu0 %v7309_v19  ;;  %7346 = vmatpush1.bf16.msra.mxu1 %v7345_v33  ;;  %v2745_v36 = vsel %vm15889_vm12, %v8634_v62, %v8629_v59  ;;  %v2747_v26 = vsel %vm15890_vm9, %v8630_v11, %v8635_v21  ;;  %v8640_v19 = vunpack.i.h.bf16 %v8638_v18  ;;  %v8639_v33 = vunpack.i.l.bf16 %v8638_v18  ;;  %vm15894_vm12 = vmmov %vm15861_vm4  ;;  %v2552_v62 = vld [vmem:[#allocation8 + $0x18] sm:$0xff] }
 0xe81   : > { %v2743_v40 = vsel %vm15883_vm10, %v8699_v60, %v8700_v35  ;;  %vm15888_vm10 = vmmov %vm15861_vm4 }
 0xe82   : > { %v8703_v6 = vpop.permute.xlu1 %8702  ;;  %v7311_v43 = vpack.c.bf16 %v2743_v40, %v2740_v14  ;;  %vm15895_vm9 = vmmov %vm15861_vm4 }
 0xe83   : > { %v8705_v52 = vunpack.i.h.bf16 %v8703_v6  ;;  %v8704_v28 = vunpack.i.l.bf16 %v8703_v6 }
 0xe84   : > { %7312 = vmatprep.subr.bf16.mxu0 %v7311_v43 }
 0xe85   : > { %v2742_v3 = vsel %vm15886_vm11, %v8704_v28, %v8699_v60  ;;  %v2744_v45 = vsel %vm15861_vm4, %v8700_v35, %v8705_v52  ;;  %v7347_v5 = vpack.c.bf16 %v8705_v52, %v8625_v55  ;;  %v8643_v35 = vpop.permute.xlu0 %8642  ;;  %vm15891_vm11 = vmmov %vm15861_vm4 }
 0xe86   : > { %v8708_v61 = vpop.permute.xlu1 %8707  ;;  %v7313_v53 = vpack.c.bf16 %v2742_v3, %v2739_v27  ;;  %v7349_v2 = vpack.c.bf16 %v2744_v45, %v2741_v51  ;;  %v8644_v52 = vunpack.i.l.bf16 %v8643_v35  ;;  %v8645_v28 = vunpack.i.h.bf16 %v8643_v35 }
 0xe87   : > { %v8710_v42 = vunpack.i.h.bf16 %v8708_v61  ;;  %v8709_v57 = vunpack.i.l.bf16 %v8708_v61  ;;  %7348 = vmatprep.subr.bf16.mxu1 %v7347_v5  ;;  %v2752_v27 = vsel %vm15892_vm5, %v8639_v33, %v8640_v19  ;;  %vm15897_vm5 = vcmask 1031168  }
 0xe88   : > { %7314 = vmatpush1.bf16.msra.mxu0 %v7313_v53  ;;  %7350 = vmatpush1.bf16.msra.mxu1 %v7349_v2  ;;  %v2751_v5 = vsel %vm15894_vm12, %v8644_v52, %v8639_v33  ;;  %v2753_v61 = vsel %vm15895_vm9, %v8640_v19, %v8645_v28  ;;  %vm15899_vm12 = vmmov %vm15897_vm5  ;;  %vm15900_vm9 = vcmask 113664  }
 0xe89   : > { %v2749_v38 = vsel %vm15888_vm10, %v8709_v57, %v8710_v42  ;;  %vm15893_vm10 = vmmov %vm15861_vm4 }
 0xe8a   : > { %v8713_v15 = vpop.permute.xlu1 %8712  ;;  %v7315_v41 = vpack.c.bf16 %v2749_v38, %v2746_v29  ;;  %v2551_v29 = vld [vmem:[#allocation8 + $0x10] sm:$0xff]  ;;  %v2554_v38 = vld [vmem:[#allocation8 + $0x28] sm:$0xff] }
 0xe8b   : > { %v8715_v58 = vunpack.i.h.bf16 %v8713_v15  ;;  %v8714_v13 = vunpack.i.l.bf16 %v8713_v15  ;;  %v2553_v15 = vld [vmem:[#allocation8 + $0x20] sm:$0xff] }
 0xe8c   : > { %7316 = vmatprep.subr.bf16.mxu0 %v7315_v41  ;;  %v2556_v41 = vld [vmem:[#allocation8 + $0x38] sm:$0xff] }
 0xe8d   : > { %v2748_v60 = vsel %vm15891_vm11, %v8714_v13, %v8709_v57  ;;  %v2750_v55 = vsel %vm15861_vm4, %v8710_v42, %v8715_v58  ;;  %v7351_v30 = vpack.c.bf16 %v8715_v58, %v8635_v21  ;;  %vm15896_vm11 = vmmov %vm15861_vm4  ;;  %v2549_v21 = vld [vmem:[#allocation8] sm:$0xff]  ;;  %v2555_v58 = vld [vmem:[#allocation8 + $0x30] sm:$0xff]  ;;  %v2564_v13 = vpop.permute.xlu0 %2563 }
 0xe8e   : > { %v8718_v54 = vpop.permute.xlu1 %8717  ;;  %v7317_v14 = vpack.c.bf16 %v2748_v60, %v2745_v36  ;;  %v7353_v40 = vpack.c.bf16 %v2750_v55, %v2747_v26 }
 0xe8f   : > { %v8720_v6 = vunpack.i.h.bf16 %v8718_v54  ;;  %v8719_v43 = vunpack.i.l.bf16 %v8718_v54  ;;  %7352 = vmatprep.subr.bf16.mxu1 %v7351_v30 }
 0xe90   : > { %7318 = vmatpush1.bf16.msra.mxu0 %v7317_v14  ;;  %7354 = vmatpush1.bf16.msra.mxu1 %v7353_v40 }
 0xe91   : > { %v2755_v51 = vsel %vm15893_vm10, %v8719_v43, %v8720_v6  ;;  %vm15898_vm10 = vmmov %vm15897_vm5 }
 0xe92   : > { %v8723_v11 = vpop.permute.xlu1 %8722  ;;  %v7319_v59 = vpack.c.bf16 %v2755_v51, %v2752_v27 }
 0xe93   : > { %v8725_v3 = vunpack.i.h.bf16 %v8723_v11  ;;  %v8724_v45 = vunpack.i.l.bf16 %v8723_v11 }
 0xe94   : > { %7320 = vmatprep.subr.bf16.mxu0 %v7319_v59 }
 0xe95   : > { %v2754_v53 = vsel %vm15896_vm11, %v8724_v45, %v8719_v43  ;;  %v2756_v2 = vsel %vm15861_vm4, %v8720_v6, %v8725_v3  ;;  %v7355_v18 = vpack.c.bf16 %v8725_v3, %v8645_v28  ;;  %vm15901_vm11 = vmmov %vm15897_vm5 }
 0xe96   : > { %v7321_v42 = vpack.c.bf16 %v2754_v53, %v2751_v5  ;;  %v7357_v57 = vpack.c.bf16 %v2756_v2, %v2753_v61  ;;  %v2574_v53 = vpop.permute.xlu0 %2573  ;;  %vm15902_vm4 = vmmov %vm15900_vm9 }
 0xe97   : > { %7356 = vmatprep.subr.bf16.mxu1 %v7355_v18 }
 0xe98   : > { %7322 = vmatpush1.bf16.msra.mxu0 %v7321_v42  ;;  %7358 = vmatpush1.bf16.msra.mxu1 %v7357_v57 }
 0xe9b   : > { %2907 = vmatmul.mubr.f32.vlgmr.msra.gmra.mrb[6].mxu0 %v2549_v21  ;;  %2996 = vmatmul.mubr.f32.vlgmr.msra.gmra.mrb[6].mxu1 %v2549_v21 }
 0xe9c   : > { %7134 = vmatprep.mubr.msk.f32.mxu0 %vm15398_vm0, %v2552_v62  ;;  %7138 = vmatprep.mubr.msk.f32.mxu1 %vm15398_vm0, %v2552_v62 }
 0xe9f   : > { %2913 = vmatmul.mubr.f32.gmra.mrb[8].mxu0 %v2551_v29  ;;  %3002 = vmatmul.mubr.f32.gmra.mrb[8].mxu1 %v2551_v29 }
 0xea0   : > { %7135 = vmatprep.mubr.msk.f32.mxu0 %vm15398_vm0, %v2554_v38  ;;  %7139 = vmatprep.mubr.msk.f32.mxu1 %vm15398_vm0, %v2554_v38 }
 0xea3   : > { %2919 = vmatmul.mubr.f32.gmra.mrb[10].mxu0 %v2553_v15  ;;  %3008 = vmatmul.mubr.f32.gmra.mrb[10].mxu1 %v2553_v15  ;;  %v2569_v54 = vpop.permute.xlu1 %2568 }
 0xea4   : > { %7136 = vmatprep.mubr.msk.f32.mxu0 %vm15398_vm0, %v2556_v41  ;;  %7140 = vmatprep.mubr.msk.f32.mxu1 %vm15398_vm0, %v2556_v41 }
 0xea7   : > { %2925 = vmatmul.mubr.f32.gmra.mrb[12].mxu0 %v2555_v58  ;;  %3014 = vmatmul.mubr.f32.gmra.mrb[12].mxu1 %v2555_v58 }
 0xf6e   : > { %v2908_v36 = vpop.f32.mrb[6].mxu0  ;;  %v2997_v26 = vpop.f32.mrb[6].mxu1 }
 0xf6f   : > { %v2909_v19 = vadd.f32 %v2908_v36, %v2564_v13  ;;  %v12325_v33 = vadd.f32 %v2997_v26, %v2564_v13  ;;  %v2910_v35 = vpop.f32.mrb[7].mxu0  ;;  %v2999_v60 = vpop.f32.mrb[7].mxu1 }
 0xf70   : > { %v12327_v55 = vadd.f32 %v2910_v35, %v2564_v13  ;;  %v12329_v30 = vadd.f32 %v2999_v60, %v2564_v13 }
 0xf71   : > { %v12331_v14 = vmax.f32 %v2909_v19, 0.0  ;;  %v3022_v40 = vmax.f32 %v12325_v33, 0.0  ;;  %v2579_v19 = vpop.permute.xlu1 %2578 }
 0xf72   : > { %v3021_v6 = vmax.f32 %v12327_v55, 0.0  ;;  %v3023_v43 = vmax.f32 %v12329_v30, 0.0  ;;  %v2914_v52 = vpop.f32.mrb[8].mxu0  ;;  %v3003_v28 = vpop.f32.mrb[8].mxu1 }
 0xf73   : > { %v2915_v27 = vadd.f32 %v2914_v52, %v2569_v54  ;;  %v12336_v51 = vadd.f32 %v3003_v28, %v2569_v54  ;;  %v2916_v11 = vpop.f32.mrb[9].mxu0  ;;  %v3005_v59 = vpop.f32.mrb[9].mxu1 }
 0xf74   : > { %v8731_v3 = vpack.i.bf16 %v3021_v6, %v12331_v14  ;;  %v8726_v45 = vpack.i.bf16 %v3023_v43, %v3022_v40  ;;  %v12345_v5 = vadd.f32 %v2916_v11, %v2569_v54  ;;  %v12347_v61 = vadd.f32 %v3005_v59, %v2569_v54 }
 0xf75   : > { %v12349_v2 = vmax.f32 %v2915_v27, 0.0  ;;  %v3026_v18 = vmax.f32 %v12336_v51, 0.0 }
 0xf76   : > { %v3027_v42 = vmax.f32 %v12347_v61, 0.0  ;;  %v3009_v57 = vpop.f32.mrb[10].mxu1  ;;  %8727 = vrot.lane.b32.xlu1 %v8726_v45, %s15423_s2  ;;  %v2920_v21 = vpop.f32.mrb[10].mxu0  ;;  %8732 = vrot.lane.b32.xlu0 %v8731_v3, %s15423_s2  ;;  %v15393_v29 = vmax.f32 %v12345_v5, 0.0 }
 0xf77   : > { %v8741_v62 = vpack.i.bf16 %v12349_v2, %v12331_v14  ;;  %v12358_v38 = vadd.f32 %v3009_v57, %v2574_v53  ;;  %v2921_v15 = vadd.f32 %v2920_v21, %v2574_v53  ;;  %v2922_v41 = vpop.f32.mrb[11].mxu0  ;;  %v3011_v58 = vpop.f32.mrb[11].mxu1 }
 0xf78   : > { %v8736_v13 = vpack.i.bf16 %v3027_v42, %v3026_v18  ;;  %v12364_v36 = vadd.f32 %v2922_v41, %v2574_v53  ;;  %v12366_v26 = vadd.f32 %v3011_v58, %v2574_v53  ;;  %v8746_v28 = vpack.i.bf16 %v15393_v29, %v12349_v2 }
 0xf79   : > { %v12368_v35 = vmax.f32 %v2921_v15, 0.0  ;;  %v15391_v27 = vmax.f32 %v12358_v38, 0.0 }
 0xf7a   : > { %v15392_v60 = vmax.f32 %v12364_v36, 0.0  ;;  %v3015_v54 = vpop.f32.mrb[12].mxu1  ;;  %8737 = vrot.lane.b32.xlu1 %v8736_v13, %s15423_s2  ;;  %v2926_v52 = vpop.f32.mrb[12].mxu0  ;;  %8742 = vrot.lane.b32.xlu0 %v8741_v62, %s15409_s20  ;;  %v15389_v11 = vmax.f32 %v12366_v26, 0.0 }
 0xf7b   : > { %v2927_v59 = vadd.f32 %v2926_v52, %v2579_v19  ;;  %v2928_v3 = vpop.f32.mrb[13].mxu0  ;;  %v3017_v45 = vpop.f32.mrb[13].mxu1  ;;  %v12381_v57 = vadd.f32 %v3015_v54, %v2579_v19 }
 0xf7c   : > { %v8756_v53 = vpack.i.bf16 %v15392_v60, %v12368_v35  ;;  %v12383_v21 = vadd.f32 %v2928_v3, %v2579_v19  ;;  %v12385_v62 = vadd.f32 %v3017_v45, %v2579_v19  ;;  %v8751_v58 = vpack.i.bf16 %v15389_v11, %v15391_v27 }
 0xf7d   : > { %v12387_v15 = vmax.f32 %v2927_v59, 0.0  ;;  %v15395_v13 = vmax.f32 %v12381_v57, 0.0 }
 0xf7e   : > { %v15390_v41 = vmax.f32 %v12383_v21, 0.0  ;;  %8757 = vrot.lane.b32.xlu1 %v8756_v53, %s15423_s2  ;;  %8747 = vrot.lane.b32.xlu0 %v8746_v28, %s15423_s2  ;;  %v15394_v54 = vmax.f32 %v12385_v62, 0.0 }
 0xf7f   : > { %v8771_v52 = vpack.i.bf16 %v12387_v15, %v12368_v35 }
 0xf80   : > { %v8766_v19 = vpack.i.bf16 %v15390_v41, %v12387_v15  ;;  %v8761_v28 = vpack.i.bf16 %v15394_v54, %v15395_v13 }
 0xf82   : > { %8767 = vrot.lane.b32.xlu1 %v8766_v19, %s15423_s2  ;;  %8752 = vrot.lane.b32.xlu0 %v8751_v58, %s15423_s2 }
 0xf86   : > { %8772 = vrot.lane.b32.xlu1 %v8771_v52, %s15409_s20  ;;  %8762 = vrot.lane.b32.xlu0 %v8761_v28, %s15423_s2  ;;  %s15966_s20 = smov 104   ;;  %s16017_s2 = smov 24  }
 0xfe8   : > { %v8728_v59 = vpop.permute.xlu1 %8727  ;;  %v8733_v3 = vpop.permute.xlu0 %8732 }
 0xfe9   : > { %v8730_v45 = vunpack.i.h.bf16 %v8728_v59  ;;  %v8729_v53 = vunpack.i.l.bf16 %v8728_v59  ;;  %v8735_v11 = vunpack.i.h.bf16 %v8733_v3  ;;  %v8734_v19 = vunpack.i.l.bf16 %v8733_v3 }
 0xfeb   : > { %v3085_v58 = vsel %vm15897_vm5, %v8735_v11, %v8729_v53  ;;  %v3084_v41 = vsel %vm15898_vm10, %v8734_v19, %v8735_v11  ;;  %v3086_v27 = vsel %vm15899_vm12, %v8729_v53, %v8730_v45  ;;  %vm15903_vm10 = vmmov %vm15897_vm5 }
 0xfec   : > { %v8738_v60 = vpop.permute.xlu1 %8737  ;;  %v8743_v29 = vpop.permute.xlu0 %8742  ;;  %v12417_v52 = vsel %vm11362_vm2, %v3084_v41, %v12331_v14  ;;  %v12423_v28 = vsel %vm11332_vm7, %v3085_v58, %v3021_v6  ;;  %v12435_v6 = vsel %vm11344_vm15, %v3086_v27, %v3022_v40  ;;  %vm15904_vm12 = vmmov %vm15897_vm5 }
 0xfed   : > { %v8740_v59 = vunpack.i.h.bf16 %v8738_v60  ;;  %v8739_v3 = vunpack.i.l.bf16 %v8738_v60  ;;  %v8745_v54 = vunpack.i.h.bf16 %v8743_v29  ;;  %v8744_v13 = vunpack.i.l.bf16 %v8743_v29 }
 0xfee   : > { %v8781_v11 = vpack.i.bf16 %v12423_v28, %v12417_v52 }
 0xfef   : > { %v3124_v53 = vsel %vm15900_vm9, %v8730_v45, %v8744_v13  ;;  %v3089_v19 = vsel %vm15901_vm11, %v8739_v3, %v8740_v59  ;;  %v3125_v14 = vsel %vm15902_vm4, %v8740_v59, %v8745_v54  ;;  %vm15906_vm9 = vmmov %vm15897_vm5 }
 0xff0   : > { %8782 = vrot.lane.b32.xlu0 %v8781_v11, %s15438_s19  ;;  %v8758_v55 = vpop.permute.xlu1 %8757  ;;  %v8748_v41 = vpop.permute.xlu0 %8747  ;;  %v12441_v29 = vsel %vm11348_vm3, %v3124_v53, %v3023_v43  ;;  %v12451_v30 = vsel %vm11344_vm15, %v3089_v19, %v3026_v18  ;;  %v12457_v40 = vsel %vm11348_vm3, %v3125_v14, %v3027_v42  ;;  %v15905_v18 = vmax.f32 %v12345_v5, 0.0  ;;  %vm15907_vm11 = vmmov %vm15897_vm5 }
 0xff1   : > { %v8760_v60 = vunpack.i.h.bf16 %v8758_v55  ;;  %v8759_v13 = vunpack.i.l.bf16 %v8758_v55  ;;  %v8750_v45 = vunpack.i.h.bf16 %v8748_v41  ;;  %v8749_v54 = vunpack.i.l.bf16 %v8748_v41  ;;  %vm15908_vm4 = vmmov %vm15897_vm5 }
 0xff2   : > { %v8776_v58 = vpack.i.bf16 %v12441_v29, %v12435_v6  ;;  %v8786_v14 = vpack.i.bf16 %v12457_v40, %v12451_v30 }
 0xff3   : > { %v3088_v59 = vsel %vm15897_vm5, %v8750_v45, %v8739_v3  ;;  %v3087_v33 = vsel %vm15903_vm10, %v8749_v54, %v8750_v45  ;;  %v3090_v43 = vsel %vm15904_vm12, %v8759_v13, %v8760_v60  ;;  %vm15910_vm5 = vcmask 113664   ;;  %vm15912_vm12 = vmmov %vm15908_vm4 }
 0xff4   : > { %8777 = vrot.lane.b32.xlu1 %v8776_v58, %s15438_s19  ;;  %v8768_v27 = vpop.permute.xlu1 %8767  ;;  %v8753_v3 = vpop.permute.xlu0 %8752  ;;  %v12464_v51 = vsel %vm11362_vm2, %v3087_v33, %v12349_v2  ;;  %v12470_v61 = vsel %vm11332_vm7, %v3088_v59, %v15905_v18  ;;  %v12484_v54 = vsel %vm11362_vm2, %v3090_v43, %v12368_v35  ;;  %v15909_v58 = vmax.f32 %v12364_v36, 0.0  ;;  %vm15911_vm10 = vmmov %vm15910_vm5 }
 0xff5   : > { %v8770_v11 = vunpack.i.h.bf16 %v8768_v27  ;;  %v8769_v42 = vunpack.i.l.bf16 %v8768_v27  ;;  %v8755_v53 = vunpack.i.h.bf16 %v8753_v3  ;;  %v8754_v19 = vunpack.i.l.bf16 %v8753_v3 }
 0xff6   : > { %v8791_v55 = vpack.i.bf16 %v12470_v61, %v12464_v51 }
 0xff7   : > { %v3093_v41 = vsel %vm15906_vm9, %v8769_v42, %v8770_v11  ;;  %v3091_v2 = vsel %vm15907_vm11, %v8760_v60, %v8754_v19  ;;  %v3092_v5 = vsel %vm15908_vm4, %v8754_v19, %v8755_v53  ;;  %v8796_v42 = vpack.i.bf16 %v12464_v51, %v12417_v52  ;;  %vm15914_vm9 = vmmov %vm15908_vm4 }
 0xff8   : > { %8787 = vrot.lane.b32.xlu1 %v8786_v14, %s15438_s19  ;;  %8792 = vrot.lane.b32.xlu0 %v8791_v55, %s15438_s19  ;;  %v8773_v13 = vpop.permute.xlu1 %8772  ;;  %v8763_v45 = vpop.permute.xlu0 %8762  ;;  %v12490_v59 = vsel %vm11332_vm7, %v3091_v2, %v15909_v58  ;;  %v12499_v35 = vsel %vm11362_vm2, %v3093_v41, %v12387_v15  ;;  %v15913_v14 = vmax.f32 %v12358_v38, 0.0  ;;  %v15915_v15 = vmax.f32 %v12383_v21, 0.0 }
 0xff9   : > { %v8775_v60 = vunpack.i.h.bf16 %v8773_v13  ;;  %v8774_v33 = vunpack.i.l.bf16 %v8773_v13  ;;  %v8765_v27 = vunpack.i.h.bf16 %v8763_v45  ;;  %v8764_v3 = vunpack.i.l.bf16 %v8763_v45 }
 0xffa   : > { %v8806_v18 = vpack.i.bf16 %v12490_v59, %v12484_v54  ;;  %v12508_v55 = vsel %vm11344_vm15, %v3092_v5, %v15913_v14  ;;  %v15917_v13 = vmax.f32 %v12381_v57, 0.0  ;;  %v15918_v45 = vmax.f32 %v12385_v62, 0.0 }
 0xffb   : > { %v3126_v36 = vsel %vm15910_vm5, %v8755_v53, %v8774_v33  ;;  %v3127_v43 = vsel %vm15911_vm10, %v8765_v27, %v8775_v60  ;;  %v3094_v19 = vsel %vm15912_vm12, %v8770_v11, %v8764_v3  ;;  %v3095_v2 = vsel %vm15914_vm9, %v8764_v3, %v8765_v27 }
 0xffc   : > { %8807 = vrot.lane.b32.xlu1 %v8806_v18, %s15438_s19  ;;  %8797 = vrot.lane.b32.xlu0 %v8796_v42, %s15401_s28  ;;  %v12517_v53 = vsel %vm11332_vm7, %v3094_v19, %v15915_v15  ;;  %v15916_v11 = vmax.f32 %v12366_v26, 0.0  ;;  %v12533_v21 = vsel %vm11344_vm15, %v3095_v2, %v15917_v13  ;;  %v12539_v26 = vsel %vm11348_vm3, %v3127_v43, %v15918_v45 }
 0xffd   : > { %v8816_v41 = vpack.i.bf16 %v12517_v53, %v12499_v35  ;;  %v8821_v58 = vpack.i.bf16 %v12499_v35, %v12484_v54  ;;  %v8811_v57 = vpack.i.bf16 %v12539_v26, %v12533_v21  ;;  %vm15919_vm11 = vcmask 1039360  }
 0xffe   : > { %v12523_v38 = vsel %vm11348_vm3, %v3126_v36, %v15916_v11  ;;  %vm15920_vm4 = vmmov %vm15919_vm11  ;;  %vm15925_vm9 = vcmask 121856  }
 0xfff   : > { %v8801_v5 = vpack.i.bf16 %v12523_v38, %v12508_v55  ;;  %vm15921_vm5 = vmmov %vm15920_vm4 }
0x1000   : > { %8817 = vrot.lane.b32.xlu1 %v8816_v41, %s15438_s19  ;;  %vm15922_vm10 = vmmov %vm15920_vm4 }
0x1001   : > { %8802 = vrot.lane.b32.xlu0 %v8801_v5, %s15438_s19  ;;  %vm15924_vm12 = vmmov %vm15920_vm4 }
0x1004   : > { %8822 = vrot.lane.b32.xlu1 %v8821_v58, %s15401_s28  ;;  %s15956_s28 = smov 88  }
0x1005   : > { %8812 = vrot.lane.b32.xlu0 %v8811_v57, %s15438_s19 }
0x1062   : > { %v8783_v60 = vpop.permute.xlu0 %8782 }
0x1063   : > { %v8785_v62 = vunpack.i.h.bf16 %v8783_v60  ;;  %v8784_v33 = vunpack.i.l.bf16 %v8783_v60 }
0x1065   : > { %v3192_v18 = vsel %vm15919_vm11, %v8784_v33, %v8785_v62  ;;  %vm15926_vm11 = vmmov %vm15925_vm9 }
0x1066   : > { %v8778_v27 = vpop.permute.xlu1 %8777  ;;  %v12559_v11 = vsel %vm11391_vm14, %v3192_v18, %v12417_v52 }
0x1067   : > { %v8779_v3 = vunpack.i.l.bf16 %v8778_v27  ;;  %v8780_v41 = vunpack.i.h.bf16 %v8778_v27 }
0x1069   : > { %v3193_v42 = vsel %vm15920_vm4, %v8785_v62, %v8779_v3  ;;  %v3194_v27 = vsel %vm15924_vm12, %v8779_v3, %v8780_v41  ;;  %vm15930_vm12 = vmmov %vm15920_vm4 }
0x106a   : > { %v8788_v36 = vpop.permute.xlu1 %8787  ;;  %v8793_v43 = vpop.permute.xlu0 %8792  ;;  %v12554_v19 = vsel %vm11378_vm13, %v3193_v42, %v12423_v28 }
0x106b   : > { %v8789_v14 = vunpack.i.l.bf16 %v8788_v36  ;;  %v8795_v2 = vunpack.i.h.bf16 %v8793_v43  ;;  %v8794_v15 = vunpack.i.l.bf16 %v8793_v43  ;;  %v8826_v5 = vpack.i.bf16 %v12554_v19, %v12559_v11 }
0x106c   : > { %v8790_v60 = vunpack.i.h.bf16 %v8788_v36 }
0x106d   : > { %v3196_v13 = vsel %vm15921_vm5, %v8795_v2, %v8789_v14  ;;  %v3195_v45 = vsel %vm15922_vm10, %v8794_v15, %v8795_v2  ;;  %8827 = vrot.lane.b32.xlu0 %v8826_v5, %s15923_s24  ;;  %vm15927_vm5 = vmmov %vm15920_vm4 }
0x106e   : > { %v8808_v28 = vpop.permute.xlu1 %8807  ;;  %v8798_v58 = vpop.permute.xlu0 %8797  ;;  %v12569_v57 = vsel %vm11391_vm14, %v3195_v45, %v12464_v51  ;;  %v12574_v52 = vsel %vm11378_vm13, %v3196_v13, %v12470_v61  ;;  %v3197_v36 = vsel %vm15920_vm4, %v8789_v14, %v8790_v60  ;;  %vm15928_vm10 = vmmov %vm15920_vm4 }
0x106f   : > { %v8800_v62 = vunpack.i.h.bf16 %v8798_v58  ;;  %v8799_v33 = vunpack.i.l.bf16 %v8798_v58  ;;  %v8836_v18 = vpack.i.bf16 %v12574_v52, %v12569_v57  ;;  %v8810_v13 = vunpack.i.h.bf16 %v8808_v28 }
0x1070   : > { %v8809_v45 = vunpack.i.l.bf16 %v8808_v28 }
0x1071   : > { %v3233_v42 = vsel %vm15925_vm9, %v8790_v60, %v8800_v62  ;;  %v3232_v43 = vsel %vm15926_vm11, %v8780_v41, %v8799_v33  ;;  %8837 = vrot.lane.b32.xlu0 %v8836_v18, %s15923_s24  ;;  %v12596_v41 = vsel %vm11374_vm8, %v3194_v27, %v12435_v6  ;;  %v12609_v6 = vsel %vm11374_vm8, %v3197_v36, %v12451_v30  ;;  %vm15931_vm11 = vmmov %vm15925_vm9 }
0x1072   : > { %v8818_v51 = vpop.permute.xlu1 %8817  ;;  %v12585_v61 = vsel %vm11400_vm6, %v3232_v43, %v12441_v29  ;;  %v12590_v3 = vsel %vm11400_vm6, %v3233_v42, %v12457_v40  ;;  %v3198_v42 = vsel %vm15930_vm12, %v8809_v45, %v8810_v13  ;;  %vm15934_vm12 = vcmask 7168  }
0x1073   : > { %v8803_v2 = vpop.permute.xlu0 %8802  ;;  %v8831_v29 = vpack.i.bf16 %v12585_v61, %v12596_v41  ;;  %v8846_v58 = vpack.i.bf16 %v12590_v3, %v12585_v61  ;;  %v8820_v43 = vunpack.i.h.bf16 %v8818_v51 }
0x1074   : > { %v8805_v15 = vunpack.i.h.bf16 %v8803_v2  ;;  %v8804_v5 = vunpack.i.l.bf16 %v8803_v2  ;;  %v8819_v2 = vunpack.i.l.bf16 %v8818_v51 }
0x1075   : > { %8832 = vrot.lane.b32.xlu1 %v8831_v29, %s15923_s24  ;;  %8847 = vrot.lane.b32.xlu0 %v8846_v58, %s15929_s29 }
0x1076   : > { %v3199_v40 = vsel %vm15927_vm5, %v8810_v13, %v8804_v5  ;;  %v3200_v62 = vsel %vm15928_vm10, %v8804_v5, %v8805_v15  ;;  %v8823_v14 = vpop.permute.xlu1 %8822  ;;  %v8841_v5 = vpack.i.bf16 %v12590_v3, %v12609_v6  ;;  %vm15932_vm5 = vmmov %vm15920_vm4  ;;  %v12637_v13 = vsel %vm11391_vm14, %v3198_v42, %v12484_v54 }
0x1077   : > { %v8813_v60 = vpop.permute.xlu0 %8812  ;;  %v8825_v28 = vunpack.i.h.bf16 %v8823_v14  ;;  %v8824_v33 = vunpack.i.l.bf16 %v8823_v14  ;;  %v12620_v30 = vsel %vm11378_vm13, %v3199_v40, %v12490_v59  ;;  %v12627_v51 = vsel %vm11374_vm8, %v3200_v62, %v12508_v55  ;;  %vm15933_vm10 = vmmov %vm15920_vm4 }
0x1078   : > { %v8815_v27 = vunpack.i.h.bf16 %v8813_v60  ;;  %v8814_v18 = vunpack.i.l.bf16 %v8813_v60  ;;  %v3201_v45 = vsel %vm15933_vm10, %v8819_v2, %v8820_v43  ;;  %v8851_v40 = vpack.i.bf16 %v12620_v30, %v12637_v13 }
0x1079   : > { %v3234_v29 = vsel %vm15925_vm9, %v8805_v15, %v8824_v33  ;;  %8842 = vrot.lane.b32.xlu1 %v8841_v5, %s15923_s24  ;;  %v12664_v62 = vsel %vm11391_vm14, %v3201_v45, %v12499_v35  ;;  %vm15935_vm9 = vmmov %vm15934_vm12  ;;  %vm15939_vm10 = vnez %v15585_v50 }
0x107a   : > { %v3235_v58 = vsel %vm15931_vm11, %v8815_v27, %v8825_v28  ;;  %v3203_v8 = vsel %vm15920_vm4, %v8814_v18, %v8815_v27  ;;  %v3202_v36 = vsel %vm15932_vm5, %v8820_v43, %v8814_v18  ;;  %v12632_v15 = vsel %vm11400_vm6, %v3234_v29, %v12523_v38  ;;  %vm15936_vm11 = vmmov %vm15935_vm9 }
0x107b   : > { %v8856_v59 = vpack.i.bf16 %v12632_v15, %v12627_v51  ;;  %v12647_v55 = vsel %vm11374_vm8, %v3203_v8, %v12533_v21  ;;  %v12652_v38 = vsel %vm11400_vm6, %v3235_v58, %v12539_v26  ;;  %v12658_v54 = vsel %vm11378_vm13, %v3202_v36, %v12517_v53  ;;  %vm15937_vm4 = vmmov %vm15935_vm9 }
0x107c   : > { %v8866_v8 = vpack.i.bf16 %v12652_v38, %v12647_v55  ;;  %v8861_v21 = vpack.i.bf16 %v12658_v54, %v12664_v62  ;;  %v8871_v53 = vpack.i.bf16 %v12652_v38, %v12632_v15  ;;  %vm15938_vm5 = vmmov %vm15937_vm4  ;;  %vm15962_vm13 = vnez %v15600_v22 }
0x107d   : > { %8857 = vrot.lane.b32.xlu0 %v8856_v59, %s15923_s24  ;;  %8852 = vrot.lane.b32.xlu1 %v8851_v40, %s15923_s24  ;;  %vm15949_vm0 = vmmov %vm15938_vm5 }
0x107e   : > { %vm15950_vm6 = vmmov %vm15949_vm0 }
0x1081   : > { %8867 = vrot.lane.b32.xlu0 %v8866_v8, %s15923_s24  ;;  %8862 = vrot.lane.b32.xlu1 %v8861_v21, %s15923_s24 }
0x1085   : > { %8872 = vrot.lane.b32.xlu1 %v8871_v53, %s15929_s29 }
0x10df   : > { %v8828_v26 = vpop.permute.xlu0 %8827 }
0x10e0   : > { %v8830_v14 = vunpack.i.h.bf16 %v8828_v26  ;;  %v8829_v60 = vunpack.i.l.bf16 %v8828_v26 }
0x10e2   : > { %v3312_v27 = vsel %vm15934_vm12, %v8829_v60, %v8830_v14  ;;  %vm15940_vm12 = vmmov %vm15937_vm4 }
0x10e3   : > { %v8838_v35 = vpop.permute.xlu0 %8837  ;;  %v12683_v40 = vsel %vm15939_vm10, %v3312_v27, %v12554_v19 }
0x10e4   : > { %v8840_v28 = vunpack.i.h.bf16 %v8838_v35  ;;  %v8839_v33 = vunpack.i.l.bf16 %v8838_v35 }
0x10e6   : > { %v3315_v18 = vsel %vm15935_vm9, %v8839_v33, %v8840_v28  ;;  %vm15941_vm9 = vnez %v15588_v56 }
0x10e7   : > { %v8833_v42 = vpop.permute.xlu1 %8832  ;;  %v8848_v43 = vpop.permute.xlu0 %8847  ;;  %v12694_v26 = vsel %vm15939_vm10, %v3315_v18, %v12574_v52 }
0x10e8   : > { %v8835_v2 = vunpack.i.h.bf16 %v8833_v42  ;;  %v8834_v5 = vunpack.i.l.bf16 %v8833_v42  ;;  %v8850_v29 = vunpack.i.h.bf16 %v8848_v43  ;;  %v8849_v58 = vunpack.i.l.bf16 %v8848_v43 }
0x10ea   : > { %v3313_v36 = vsel %vm15936_vm11, %v8830_v14, %v8834_v5  ;;  %v3314_v59 = vsel %vm15937_vm4, %v8834_v5, %v8835_v2  ;;  %v3340_v45 = vsel %vm15938_vm5, %v8849_v58, %v8829_v60  ;;  %v3341_v8 = vsel %vm15940_vm12, %v8850_v29, %v8839_v33  ;;  %vm15944_vm12 = vmmov %vm15938_vm5 }
0x10eb   : > { %v8843_v21 = vpop.permute.xlu1 %8842  ;;  %v12689_v53 = vsel %vm15941_vm9, %v3314_v59, %v12585_v61  ;;  %vm15942_vm11 = vnez %v15582_v44  ;;  %vm15943_vm4 = vnez %v15591_v4 }
0x10ec   : > { %v12699_v14 = vsel %vm15942_vm11, %v3313_v36, %v12596_v41  ;;  %v8845_v19 = vunpack.i.h.bf16 %v8843_v21  ;;  %v8844_v60 = vunpack.i.l.bf16 %v8843_v21  ;;  %v8881_v35 = vpack.i.bf16 %v12694_v26, %v12689_v53 }
0x10ed   : > { %v8876_v33 = vpack.i.bf16 %v12699_v14, %v12683_v40  ;;  %v12708_v61 = vsel %vm15943_vm4, %v3340_v45, %v12559_v11  ;;  %v12717_v18 = vsel %vm15943_vm4, %v3341_v8, %v12569_v57 }
0x10ee   : > { %v3316_v52 = vsel %vm15938_vm5, %v8840_v28, %v8844_v60  ;;  %v3317_v27 = vsel %vm15944_vm12, %v8844_v60, %v8845_v19  ;;  %8882 = vrot.lane.b32.xlu1 %v8881_v35, %s15945_s25  ;;  %vm15946_vm12 = vmmov %vm15938_vm5 }
0x10ef   : > { %8877 = vrot.lane.b32.xlu0 %v8876_v33, %s15945_s25  ;;  %v8858_v41 = vpop.permute.xlu0 %8857  ;;  %v8853_v42 = vpop.permute.xlu1 %8852  ;;  %v12722_v11 = vsel %vm15941_vm9, %v3317_v27, %v12590_v3  ;;  %v12727_v28 = vsel %vm15942_vm11, %v3316_v52, %v12609_v6  ;;  %v8896_v6 = vpack.i.bf16 %v12717_v18, %v12708_v61 }
0x10f0   : > { %v8860_v43 = vunpack.i.h.bf16 %v8858_v41  ;;  %v8859_v2 = vunpack.i.l.bf16 %v8858_v41  ;;  %v8855_v5 = vunpack.i.h.bf16 %v8853_v42  ;;  %v8854_v29 = vunpack.i.l.bf16 %v8853_v42 }
0x10f1   : > { %v8891_v58 = vpack.i.bf16 %v12722_v11, %v12689_v53  ;;  %v8886_v57 = vpack.i.bf16 %v12722_v11, %v12727_v28 }
0x10f2   : > { %v3318_v36 = vsel %vm15938_vm5, %v8854_v29, %v8855_v5  ;;  %v3319_v59 = vsel %vm15946_vm12, %v8855_v5, %v8859_v2  ;;  %v3320_v35 = vsel %vm15938_vm5, %v8859_v2, %v8860_v43  ;;  %vm15948_vm12 = vmmov %vm15938_vm5  ;;  %vm15952_vm5 = vcmask 15360  }
0x10f3   : > { %8892 = vrot.lane.b32.xlu1 %v8891_v58, %s15947_s14  ;;  %8887 = vrot.lane.b32.xlu0 %v8886_v57, %s15945_s25  ;;  %v8868_v3 = vpop.permute.xlu0 %8867  ;;  %v8863_v45 = vpop.permute.xlu1 %8862  ;;  %v12742_v19 = vsel %vm15939_vm10, %v3318_v36, %v12620_v30  ;;  %v12747_v60 = vsel %vm15942_vm11, %v3319_v59, %v12627_v51  ;;  %v12770_v2 = vsel %vm15941_vm9, %v3320_v35, %v12632_v15 }
0x10f4   : > { %v8870_v8 = vunpack.i.h.bf16 %v8868_v3  ;;  %v8869_v21 = vunpack.i.l.bf16 %v8868_v3  ;;  %v8865_v33 = vunpack.i.h.bf16 %v8863_v45  ;;  %v8864_v52 = vunpack.i.l.bf16 %v8863_v45 }
0x10f5   : > { %v8901_v27 = vpack.i.bf16 %v12747_v60, %v12742_v19 }
0x10f6   : > { %v3323_v41 = vsel %vm15948_vm12, %v8869_v21, %v8870_v8  ;;  %v3321_v42 = vsel %vm15949_vm0, %v8864_v52, %v8865_v33  ;;  %v3322_v5 = vsel %vm15950_vm6, %v8865_v33, %v8869_v21  ;;  %vm15951_vm6 = vmmov %vm15949_vm0 }
0x10f7   : > { %8902 = vrot.lane.b32.xlu1 %v8901_v27, %s15945_s25  ;;  %8897 = vrot.lane.b32.xlu0 %v8896_v6, %s15945_s25  ;;  %v12760_v30 = vsel %vm15941_vm9, %v3323_v41, %v12652_v38  ;;  %v8873_v51 = vpop.permute.xlu1 %8872  ;;  %v12765_v43 = vsel %vm15942_vm11, %v3322_v5, %v12647_v55  ;;  %v12775_v58 = vsel %vm15939_vm10, %v3321_v42, %v12658_v54  ;;  %vm15953_vm12 = vmmov %vm15952_vm5 }
0x10f8   : > { %v8875_v57 = vunpack.i.h.bf16 %v8873_v51  ;;  %v8874_v36 = vunpack.i.l.bf16 %v8873_v51  ;;  %v8911_v38 = vpack.i.bf16 %v12760_v30, %v12765_v43  ;;  %v8906_v59 = vpack.i.bf16 %v12775_v58, %v12770_v2 }
0x10fa   : > { %v3342_v55 = vsel %vm15951_vm6, %v8874_v36, %v8854_v29  ;;  %v3343_v3 = vsel %vm15949_vm0, %v8875_v57, %v8864_v52  ;;  %v8916_v29 = vpack.i.bf16 %v12760_v30, %v12770_v2  ;;  %vm15954_vm6 = vnez %v15594_v10 }
0x10fb   : > { %8912 = vrot.lane.b32.xlu1 %v8911_v38, %s15945_s25  ;;  %8907 = vrot.lane.b32.xlu0 %v8906_v59, %s15945_s25  ;;  %v12788_v15 = vsel %vm15943_vm4, %v3342_v55, %v12637_v13  ;;  %v12793_v54 = vsel %vm15943_vm4, %v3343_v3, %v12664_v62  ;;  %vm15955_vm0 = vnez %v15597_v16  ;;  %vm15958_vm4 = vmmov %vm15952_vm5 }
0x10fc   : > { %v8921_v6 = vpack.i.bf16 %v12793_v54, %v12788_v15  ;;  %vm15959_vm9 = vmmov %vm15958_vm4 }
0x10fd   : > { %vm15960_vm11 = vmmov %vm15958_vm4 }
0x10fe   : > { %vm15961_vm10 = vmmov %vm15958_vm4 }
0x10ff   : > { %8922 = vrot.lane.b32.xlu1 %v8921_v6, %s15945_s25  ;;  %8917 = vrot.lane.b32.xlu0 %v8916_v29, %s15947_s14 }
0x1160   : > { %v8883_v45 = vpop.permute.xlu1 %8882 }
0x1161   : > { %v8878_v8 = vpop.permute.xlu0 %8877  ;;  %v8884_v21 = vunpack.i.l.bf16 %v8883_v45  ;;  %v8885_v59 = vunpack.i.h.bf16 %v8883_v45 }
0x1162   : > { %v8880_v13 = vunpack.i.h.bf16 %v8878_v8  ;;  %v8879_v35 = vunpack.i.l.bf16 %v8878_v8 }
0x1164   : > { %v3422_v33 = vsel %vm15952_vm5, %v8880_v13, %v8884_v21  ;;  %v3421_v62 = vsel %vm15953_vm12, %v8879_v35, %v8880_v13  ;;  %vm15957_vm12 = vmmov %vm15952_vm5 }
0x1165   : > { %v8893_v52 = vpop.permute.xlu1 %8892  ;;  %v8888_v27 = vpop.permute.xlu0 %8887  ;;  %v12806_v41 = vsel %vm15954_vm6, %v3421_v62, %v12699_v14  ;;  %v12811_v42 = vsel %vm15955_vm0, %v3422_v33, %v12689_v53 }
0x1166   : > { %v8926_v5 = vpack.i.bf16 %v12811_v42, %v12806_v41  ;;  %v8889_v51 = vunpack.i.l.bf16 %v8888_v27  ;;  %v8890_v57 = vunpack.i.h.bf16 %v8888_v27  ;;  %v8895_v55 = vunpack.i.h.bf16 %v8893_v52 }
0x1167   : > { %v8894_v14 = vunpack.i.l.bf16 %v8893_v52 }
0x1168   : > { %8927 = vrot.lane.b32.xlu0 %v8926_v5, %s15956_s28  ;;  %v3424_v29 = vsel %vm15952_vm5, %v8885_v59, %v8889_v51  ;;  %v3425_v21 = vsel %vm15959_vm9, %v8889_v51, %v8890_v57  ;;  %vm15963_vm5 = vnez %v15603_v31  ;;  %vm15965_vm9 = vmmov %vm15958_vm4 }
0x1169   : > { %v8903_v36 = vpop.permute.xlu1 %8902  ;;  %v8898_v38 = vpop.permute.xlu0 %8897 }
0x116a   : > { %v8900_v3 = vunpack.i.h.bf16 %v8898_v38  ;;  %v8899_v6 = vunpack.i.l.bf16 %v8898_v38 }
0x116c   : > { %v3449_v8 = vsel %vm15957_vm12, %v8895_v55, %v8900_v3  ;;  %v3420_v53 = vsel %vm15958_vm4, %v8899_v6, %v8879_v35  ;;  %v3423_v13 = vsel %vm15960_vm11, %v8900_v3, %v8885_v59  ;;  %v3448_v33 = vsel %vm15961_vm10, %v8894_v14, %v8899_v6  ;;  %vm15964_vm10 = vmmov %vm15958_vm4 }
0x116d   : > { %v8913_v62 = vpop.permute.xlu1 %8912  ;;  %v8908_v27 = vpop.permute.xlu0 %8907  ;;  %v12825_v45 = vsel %vm15962_vm13, %v3449_v8, %v12717_v18  ;;  %v12830_v35 = vsel %vm15963_vm5, %v3420_v53, %v12683_v40  ;;  %v12835_v57 = vsel %vm15962_vm13, %v3448_v33, %v12708_v61  ;;  %v12842_v18 = vsel %vm15954_vm6, %v3424_v29, %v12727_v28  ;;  %vm15967_vm11 = vmmov %vm15958_vm4 }
0x116e   : > { %v8915_v52 = vunpack.i.h.bf16 %v8913_v62  ;;  %v8914_v5 = vunpack.i.l.bf16 %v8913_v62  ;;  %v8910_v38 = vunpack.i.h.bf16 %v8908_v27  ;;  %v8909_v51 = vunpack.i.l.bf16 %v8908_v27  ;;  %vm15968_vm12 = vmmov %vm15958_vm4 }
0x116f   : > { %v8941_v59 = vpack.i.bf16 %v12825_v45, %v12835_v57  ;;  %v12847_v55 = vsel %vm15955_vm0, %v3425_v21, %v12722_v11  ;;  %v8905_v40 = vunpack.i.h.bf16 %v8903_v36  ;;  %v8904_v3 = vunpack.i.l.bf16 %v8903_v36 }
0x1170   : > { %v8931_v6 = vpack.i.bf16 %v12830_v35, %v12835_v57  ;;  %v12854_v8 = vsel %vm15963_vm5, %v3423_v13, %v12694_v26  ;;  %v3431_v28 = vsel %vm15964_vm10, %v8914_v5, %v8915_v52  ;;  %v3430_v29 = vsel %vm15965_vm9, %v8910_v38, %v8914_v5  ;;  %vm15969_vm10 = vmmov %vm15958_vm4 }
0x1171   : > { %v8923_v61 = vpop.permute.xlu1 %8922  ;;  %v8918_v14 = vpop.permute.xlu0 %8917  ;;  %8942 = vrot.lane.b32.xlu0 %v8941_v59, %s15966_s20  ;;  %v3428_v36 = vsel %vm15967_vm11, %v8905_v40, %v8909_v51  ;;  %v8946_v62 = vpack.i.bf16 %v12854_v8, %v12825_v45  ;;  %v3427_v26 = vsel %vm15958_vm4, %v8904_v3, %v8905_v40  ;;  %v8936_v13 = vpack.i.bf16 %v12847_v55, %v12842_v18  ;;  %vm15970_vm9 = vmmov %vm15958_vm4 }
0x1172   : > { %v8924_v11 = vunpack.i.l.bf16 %v8923_v61  ;;  %v8919_v53 = vunpack.i.l.bf16 %v8918_v14  ;;  %8932 = vrot.lane.b32.xlu1 %v8931_v6, %s15956_s28  ;;  %v8925_v21 = vunpack.i.h.bf16 %v8923_v61  ;;  %v8920_v33 = vunpack.i.h.bf16 %v8918_v14  ;;  %vm15971_vm11 = vmmov %vm15958_vm4 }
0x1173   : > { %v12869_v27 = vsel %vm15954_vm6, %v3430_v29, %v12765_v43  ;;  %v12874_v52 = vsel %vm15955_vm0, %v3431_v28, %v12760_v30  ;;  %v12882_v59 = vsel %vm15955_vm0, %v3428_v36, %v12770_v2  ;;  %v12891_v30 = vsel %vm15954_vm6, %v3427_v26, %v12747_v60 }
0x1174   : > { %v3426_v5 = vsel %vm15968_vm12, %v8924_v11, %v8904_v3  ;;  %v3450_v51 = vsel %vm15969_vm10, %v8919_v53, %v8924_v11  ;;  %v3451_v40 = vsel %vm15970_vm9, %v8920_v33, %v8925_v21  ;;  %v8956_v43 = vpack.i.bf16 %v12874_v52, %v12869_v27 }
0x1175   : > { %8947 = vrot.lane.b32.xlu0 %v8946_v62, %s15956_s28  ;;  %v8951_v3 = vpack.i.bf16 %v12882_v59, %v12891_v30  ;;  %v12898_v2 = vsel %vm15962_vm13, %v3450_v51, %v12788_v15  ;;  %v12903_v6 = vsel %vm15963_vm5, %v3426_v5, %v12742_v19  ;;  %v12909_v60 = vsel %vm15962_vm13, %v3451_v40, %v12793_v54 }
0x1176   : > { %8937 = vrot.lane.b32.xlu1 %v8936_v13, %s15956_s28  ;;  %v3429_v61 = vsel %vm15971_vm11, %v8925_v21, %v8910_v38  ;;  %v8961_v15 = vpack.i.bf16 %v12903_v6, %v12898_v2  ;;  %v8966_v14 = vpack.i.bf16 %v12909_v60, %v12898_v2  ;;  %vm15972_vm4 = vcmask 719872  }
0x1177   : > { %v12921_v19 = vsel %vm15963_vm5, %v3429_v61, %v12775_v58  ;;  %vm15973_vm12 = vcmask 850944   ;;  %vm15974_vm10 = vmmov %vm15972_vm4  ;;  %vm15976_vm11 = vnez %v15612_v47  ;;  %vm15977_vm5 = vnez %v15609_v46 }
0x1178   : > { %v8971_v54 = vpack.i.bf16 %v12921_v19, %v12909_v60  ;;  %vm15975_vm9 = vmmov %vm15972_vm4  ;;  %vm15983_vm0 = vcmask 850944   ;;  %vm15988_vm6 = vcmask 850944  }
0x1179   : > { %8957 = vrot.lane.b32.xlu0 %v8956_v43, %s15956_s28  ;;  %vm15981_vm13 = vmmov %vm15975_vm9 }
0x117a   : > { %8952 = vrot.lane.b32.xlu1 %v8951_v3, %s15956_s28 }
0x117d   : > { %8962 = vrot.lane.b32.xlu0 %v8961_v15, %s15956_s28 }
0x117e   : > { %8967 = vrot.lane.b32.xlu1 %v8966_v14, %s15966_s20 }
0x1182   : > { %8972 = vrot.lane.b32.xlu1 %v8971_v54, %s15956_s28 }
0x11da   : > { %v8928_v38 = vpop.permute.xlu0 %8927 }
0x11db   : > { %v8930_v28 = vunpack.i.h.bf16 %v8928_v38  ;;  %v8929_v29 = vunpack.i.l.bf16 %v8928_v38 }
0x11dd   : > { %v3518_v62 = vsel %vm15972_vm4, %v8929_v29, %v8930_v28  ;;  %vm15978_vm4 = vnez %v15606_v39 }
0x11e3   : > { %v8943_v11 = vpop.permute.xlu0 %8942 }
0x11e4   : > { %v8944_v53 = vunpack.i.l.bf16 %v8943_v11  ;;  %v8933_v36 = vpop.permute.xlu1 %8932  ;;  %v8945_v38 = vunpack.i.h.bf16 %v8943_v11 }
0x11e5   : > { %v8935_v21 = vunpack.i.h.bf16 %v8933_v36  ;;  %v8934_v33 = vunpack.i.l.bf16 %v8933_v36 }
0x11e6   : > { %v3552_v58 = vsel %vm15973_vm12, %v3518_v62, %v8944_v53  ;;  %v12946_v28 = vsel %vm15978_vm4, %v8944_v53, %v12811_v42  ;;  %vm15979_vm12 = vmmov %vm15975_vm9 }
0x11e7   : > { %v3517_v26 = vsel %vm15974_vm10, %v8935_v21, %v8929_v29  ;;  %v3516_v13 = vsel %vm15975_vm9, %v8934_v33, %v8935_v21  ;;  %v8948_v5 = vpop.permute.xlu0 %8947  ;;  %vm15980_vm10 = vnez %v15619_v63 }
0x11e8   : > { %v8950_v51 = vunpack.i.h.bf16 %v8948_v5  ;;  %v8949_v40 = vunpack.i.l.bf16 %v8948_v5  ;;  %v8938_v43 = vpop.permute.xlu1 %8937  ;;  %v12934_v3 = vsel %vm15976_vm11, %v3516_v13, %v12835_v57  ;;  %v12939_v61 = vsel %vm15977_vm5, %v3517_v26, %v12830_v35 }
0x11e9   : > { %v8940_v15 = vunpack.i.h.bf16 %v8938_v43  ;;  %v8939_v14 = vunpack.i.l.bf16 %v8938_v43  ;;  %v8976_v54 = vpack.i.bf16 %v12939_v61, %v12934_v3  ;;  %v12952_v57 = vsel %vm15980_vm10, %v3552_v58, %v12806_v41 }
0x11ea   : > { %v3519_v29 = vsel %vm15979_vm12, %v8949_v40, %v8950_v51  ;;  %v8981_v26 = vpack.i.bf16 %v12946_v28, %v12952_v57 }
0x11eb   : > { %v3520_v35 = vsel %vm15975_vm9, %v8950_v51, %v8939_v14  ;;  %v3521_v36 = vsel %vm15981_vm13, %v8939_v14, %v8940_v15  ;;  %8977 = vrot.lane.b32.xlu0 %v8976_v54, %s15982_s21  ;;  %v8958_v21 = vpop.permute.xlu0 %8957  ;;  %v12960_v11 = vsel %vm15976_vm11, %v3519_v29, %v12825_v45  ;;  %v12982_v51 = vsel %vm15978_vm4, %v8945_v38, %v12847_v55  ;;  %vm15984_vm13 = vmmov %vm15975_vm9 }
0x11ec   : > { %v3553_v42 = vsel %vm15983_vm0, %v3521_v36, %v8945_v38  ;;  %v8953_v53 = vpop.permute.xlu1 %8952  ;;  %v12966_v41 = vsel %vm15977_vm5, %v3520_v35, %v12854_v8  ;;  %v8960_v33 = vunpack.i.h.bf16 %v8958_v21  ;;  %v8959_v62 = vunpack.i.l.bf16 %v8958_v21  ;;  %vm15985_vm0 = vmmov %vm15975_vm9 }
0x11ed   : > { %v8986_v58 = vpack.i.bf16 %v12966_v41, %v12960_v11  ;;  %v8955_v13 = vunpack.i.h.bf16 %v8953_v53  ;;  %v8954_v5 = vunpack.i.l.bf16 %v8953_v53  ;;  %v12975_v45 = vsel %vm15980_vm10, %v3553_v42, %v12842_v18  ;;  %vm15986_vm12 = vmmov %vm15985_vm0 }
0x11ee   : > { %v3527_v14 = vsel %vm15984_vm13, %v8959_v62, %v8960_v33  ;;  %v8996_v18 = vpack.i.bf16 %v12982_v51, %v12975_v45  ;;  %vm15987_vm9 = vmmov %vm15985_vm0  ;;  %v8991_v55 = vpack.i.bf16 %v12960_v11, %v12934_v3 }
0x11ef   : > { %8987 = vrot.lane.b32.xlu1 %v8986_v58, %s15982_s21  ;;  %8982 = vrot.lane.b32.xlu0 %v8981_v26, %s15982_s21  ;;  %v8963_v8 = vpop.permute.xlu0 %8962  ;;  %v3524_v35 = vsel %vm15985_vm0, %v8954_v5, %v8955_v13  ;;  %vm15989_vm13 = vmmov %vm15988_vm6 }
0x11f0   : > { %v8965_v40 = vunpack.i.h.bf16 %v8963_v8  ;;  %v8964_v43 = vunpack.i.l.bf16 %v8963_v8  ;;  %v8968_v15 = vpop.permute.xlu1 %8967 }
0x11f1   : > { %v8970_v54 = vunpack.i.h.bf16 %v8968_v15  ;;  %v8969_v29 = vunpack.i.l.bf16 %v8968_v15 }
0x11f2   : > { %v3522_v36 = vsel %vm15986_vm12, %v8964_v43, %v8965_v40  ;;  %v3523_v21 = vsel %vm15987_vm9, %v8965_v40, %v8954_v5  ;;  %vm15991_vm12 = vcmask 883712  }
0x11f3   : > { %v3555_v38 = vsel %vm15988_vm6, %v3527_v14, %v8970_v54  ;;  %v12996_v42 = vsel %vm15978_vm4, %v8970_v54, %v12874_v52  ;;  %v3554_v53 = vsel %vm15989_vm13, %v3524_v35, %v8969_v29  ;;  %8997 = vrot.lane.b32.xlu1 %v8996_v18, %s15982_s21  ;;  %8992 = vrot.lane.b32.xlu0 %v8991_v55, %s15757_s15  ;;  %vm15990_vm6 = vmmov %vm15985_vm0 }
0x11f4   : > { %v8973_v33 = vpop.permute.xlu1 %8972  ;;  %v13004_v58 = vsel %vm15976_vm11, %v3522_v36, %v12898_v2  ;;  %v13009_v26 = vsel %vm15977_vm5, %v3523_v21, %v12903_v6  ;;  %v13014_v52 = vsel %vm15980_vm10, %v3555_v38, %v12869_v27  ;;  %v13023_v2 = vsel %vm15978_vm4, %v8969_v29, %v12882_v59  ;;  %vm15992_vm9 = vmmov %vm15991_vm12 }
0x11f5   : > { %v8975_v13 = vunpack.i.h.bf16 %v8973_v33  ;;  %v8974_v5 = vunpack.i.l.bf16 %v8973_v33  ;;  %v9001_v8 = vpack.i.bf16 %v13009_v26, %v13004_v58  ;;  %v9011_v40 = vpack.i.bf16 %v12996_v42, %v13014_v52 }
0x11f6   : > { %v13028_v6 = vsel %vm15980_vm10, %v3554_v53, %v12891_v30  ;;  %vm15993_vm13 = vnez %v15622_v9  ;;  %vm16001_vm4 = vnez %v15626_v20 }
0x11f7   : > { %v3526_v27 = vsel %vm15990_vm6, %v8975_v13, %v8959_v62  ;;  %v3525_v43 = vsel %vm15985_vm0, %v8974_v5, %v8975_v13  ;;  %9002 = vrot.lane.b32.xlu1 %v9001_v8, %s15982_s21  ;;  %9012 = vrot.lane.b32.xlu0 %v9011_v40, %s15982_s21  ;;  %v9006_v30 = vpack.i.bf16 %v13023_v2, %v13028_v6  ;;  %vm15995_vm0 = vmmov %vm15992_vm9 }
0x11f8   : > { %v13037_v15 = vsel %vm15976_vm11, %v3525_v43, %v12909_v60  ;;  %v13042_v59 = vsel %vm15977_vm5, %v3526_v27, %v12921_v19  ;;  %vm15994_vm6 = vnez %v15634_v34  ;;  %vm15998_vm5 = vmmov %vm15995_vm0  ;;  %vm15999_vm11 = vcmask 1014784  }
0x11f9   : > { %v9016_v62 = vpack.i.bf16 %v13042_v59, %v13037_v15  ;;  %v9021_v14 = vpack.i.bf16 %v13037_v15, %v13004_v58  ;;  %vm16000_vm10 = vmmov %vm15999_vm11 }
0x11fb   : > { %9007 = vrot.lane.b32.xlu1 %v9006_v30, %s15982_s21  ;;  %9017 = vrot.lane.b32.xlu0 %v9016_v62, %s15982_s21 }
0x11ff   : > { %9022 = vrot.lane.b32.xlu1 %v9021_v14, %s15757_s15 }
0x125d   : > { %v8978_v60 = vpop.permute.xlu0 %8977 }
0x125e   : > { %v8980_v54 = vunpack.i.h.bf16 %v8978_v60  ;;  %v8979_v29 = vunpack.i.l.bf16 %v8978_v60 }
0x1260   : > { %v3620_v35 = vsel %vm15991_vm12, %v8979_v29, %v8980_v54  ;;  %vm15996_vm12 = vmmov %vm15995_vm0 }
0x1261   : > { %v8988_v19 = vpop.permute.xlu1 %8987  ;;  %v8983_v18 = vpop.permute.xlu0 %8982  ;;  %v13058_v13 = vsel %vm15993_vm13, %v3620_v35, %v12934_v3 }
0x1262   : > { %v8984_v36 = vunpack.i.l.bf16 %v8983_v18  ;;  %v8990_v21 = vunpack.i.h.bf16 %v8988_v19  ;;  %v8989_v55 = vunpack.i.l.bf16 %v8988_v19  ;;  %v8985_v38 = vunpack.i.h.bf16 %v8983_v18 }
0x1264   : > { %v3621_v53 = vsel %vm15992_vm9, %v8980_v54, %v8984_v36  ;;  %v3623_v30 = vsel %vm15995_vm0, %v8989_v55, %v8990_v21  ;;  %v3622_v60 = vsel %vm15996_vm12, %v8984_v36, %v8985_v38  ;;  %vm15997_vm9 = vmmov %vm15995_vm0  ;;  %vm16002_vm0 = vnez %v15629_v25 }
0x1265   : > { %v8998_v33 = vpop.permute.xlu1 %8997  ;;  %v13063_v5 = vsel %vm15994_vm6, %v3621_v53, %v12939_v61  ;;  %v8993_v27 = vpop.permute.xlu0 %8992  ;;  %vm16005_vm12 = vmmov %vm15998_vm5 }
0x1266   : > { %v9000_v8 = vunpack.i.h.bf16 %v8998_v33  ;;  %v8999_v40 = vunpack.i.l.bf16 %v8998_v33  ;;  %v9026_v43 = vpack.i.bf16 %v13063_v5, %v13058_v13  ;;  %v8995_v62 = vunpack.i.h.bf16 %v8993_v27 }
0x1267   : > { %v8994_v14 = vunpack.i.l.bf16 %v8993_v27 }
0x1268   : > { %v3625_v3 = vsel %vm15997_vm9, %v8999_v40, %v9000_v8  ;;  %9027 = vrot.lane.b32.xlu0 %v9026_v43, %s15766_s22  ;;  %v3624_v54 = vsel %vm15998_vm5, %v8990_v21, %v8999_v40  ;;  %v13087_v21 = vsel %vm15993_vm13, %v3623_v30, %v12960_v11  ;;  %v13108_v8 = vsel %vm16001_vm4, %v8995_v62, %v12982_v51 }
0x1269   : > { %v3657_v61 = vsel %vm15999_vm11, %v3625_v3, %v8995_v62  ;;  %v3656_v29 = vsel %vm16000_vm10, %v3622_v60, %v8994_v14  ;;  %v13077_v19 = vsel %vm16001_vm4, %v8994_v14, %v12946_v28  ;;  %v9003_v18 = vpop.permute.xlu1 %9002  ;;  %v9013_v53 = vpop.permute.xlu0 %9012  ;;  %vm16003_vm11 = vmmov %vm15998_vm5  ;;  %vm16006_vm9 = vcmask 1014784  }
0x126a   : > { %v9005_v35 = vunpack.i.h.bf16 %v9003_v18  ;;  %v9004_v55 = vunpack.i.l.bf16 %v9003_v18  ;;  %v13082_v36 = vsel %vm16002_vm0, %v3656_v29, %v12952_v57  ;;  %v13096_v33 = vsel %vm16002_vm0, %v3657_v61, %v12975_v45  ;;  %vm16004_vm10 = vmmov %vm15998_vm5 }
0x126b   : > { %v9036_v38 = vpack.i.bf16 %v13087_v21, %v13082_v36  ;;  %v9031_v28 = vpack.i.bf16 %v13077_v19, %v13082_v36  ;;  %v13101_v57 = vsel %vm15994_vm6, %v3624_v54, %v12966_v41  ;;  %v9015_v27 = vunpack.i.h.bf16 %v9013_v53 }
0x126c   : > { %v3626_v40 = vsel %vm15998_vm5, %v9004_v55, %v9005_v35  ;;  %v9014_v30 = vunpack.i.l.bf16 %v9013_v53  ;;  %v9041_v41 = vpack.i.bf16 %v13108_v8, %v13096_v33  ;;  %v9046_v60 = vpack.i.bf16 %v13096_v33, %v13101_v57  ;;  %vm16007_vm5 = vmmov %vm16006_vm9 }
0x126d   : > { %9037 = vrot.lane.b32.xlu1 %v9036_v38, %s15766_s22  ;;  %9032 = vrot.lane.b32.xlu0 %v9031_v28, %s15769_s18  ;;  %v9008_v11 = vpop.permute.xlu1 %9007  ;;  %v9018_v43 = vpop.permute.xlu0 %9017  ;;  %v13121_v62 = vsel %vm15993_vm13, %v3626_v40, %v13004_v58 }
0x126e   : > { %v9009_v45 = vunpack.i.l.bf16 %v9008_v11  ;;  %v9010_v14 = vunpack.i.h.bf16 %v9008_v11  ;;  %v9020_v54 = vunpack.i.h.bf16 %v9018_v43  ;;  %v9019_v29 = vunpack.i.l.bf16 %v9018_v43 }
0x126f   : > { %v3631_v53 = vsel %vm16004_vm10, %v9014_v30, %v9015_v27 }
0x1270   : > { %v3627_v3 = vsel %vm16003_vm11, %v9005_v35, %v9009_v45  ;;  %v3628_v38 = vsel %vm16005_vm12, %v9009_v45, %v9010_v14  ;;  %vm16008_vm11 = vmmov %vm16004_vm10  ;;  %v3630_v43 = vsel %vm16004_vm10, %v9020_v54, %v9014_v30  ;;  %vm16009_vm12 = vcmask 162816  }
0x1271   : > { %9042 = vrot.lane.b32.xlu1 %v9041_v41, %s15769_s18  ;;  %9047 = vrot.lane.b32.xlu0 %v9046_v60, %s15766_s22  ;;  %v9023_v51 = vpop.permute.xlu1 %9022  ;;  %v13126_v61 = vsel %vm15994_vm6, %v3627_v3, %v13009_v26  ;;  %v3629_v27 = vsel %vm16008_vm11, %v9019_v29, %v9020_v54  ;;  %vm16012_vm11 = vcmask 31744  }
0x1272   : > { %v9025_v18 = vunpack.i.h.bf16 %v9023_v51  ;;  %v9024_v55 = vunpack.i.l.bf16 %v9023_v51  ;;  %v9051_v35 = vpack.i.bf16 %v13126_v61, %v13121_v62  ;;  %vm16013_vm10 = vmmov %vm16012_vm11 }
0x1274   : > { %v13135_v58 = vsel %vm16001_vm4, %v9025_v18, %v12996_v42  ;;  %v3658_v28 = vsel %vm16006_vm9, %v3628_v38, %v9024_v55  ;;  %v3659_v26 = vsel %vm16007_vm5, %v3631_v53, %v9025_v18  ;;  %v13142_v11 = vsel %vm16001_vm4, %v9024_v55, %v13023_v2  ;;  %vm16011_vm5 = vmmov %vm16009_vm12 }
0x1275   : > { %9052 = vrot.lane.b32.xlu1 %v9051_v35, %s15766_s22  ;;  %v13148_v40 = vsel %vm16002_vm0, %v3658_v28, %v13028_v6  ;;  %v13153_v42 = vsel %vm16002_vm0, %v3659_v26, %v13014_v52  ;;  %v13166_v6 = vsel %vm15993_vm13, %v3629_v27, %v13037_v15  ;;  %v13171_v52 = vsel %vm15994_vm6, %v3630_v43, %v13042_v59  ;;  %vm16015_vm0 = vmmov %vm16011_vm5 }
0x1276   : > { %v9056_v45 = vpack.i.bf16 %v13142_v11, %v13148_v40  ;;  %v9061_v2 = vpack.i.bf16 %v13135_v58, %v13153_v42  ;;  %v9066_v14 = vpack.i.bf16 %v13166_v6, %v13148_v40  ;;  %v9071_v30 = vpack.i.bf16 %v13153_v42, %v13171_v52  ;;  %vm16016_vm4 = vmmov %vm16015_vm0 }
0x1277   : > { %vm16010_vm9 = vnez %v15643_v1 }
0x1278   : > { %9062 = vrot.lane.b32.xlu0 %v9061_v2, %s15769_s18 }
0x1279   : > { %9057 = vrot.lane.b32.xlu1 %v9056_v45, %s15769_s18 }
0x127c   : > { %9067 = vrot.lane.b32.xlu0 %v9066_v14, %s15766_s22 }
0x127d   : > { %9072 = vrot.lane.b32.xlu1 %v9071_v30, %s15766_s22 }
0x12da   : > { %v9028_v41 = vpop.permute.xlu0 %9027 }
0x12db   : > { %v9030_v15 = vunpack.i.h.bf16 %v9028_v41  ;;  %v9029_v51 = vunpack.i.l.bf16 %v9028_v41 }
0x12dd   : > { %v3740_v43 = vsel %vm16011_vm5, %v9029_v51, %v9030_v15 }
0x12df   : > { %v9038_v60 = vpop.permute.xlu1 %9037  ;;  %v9033_v3 = vpop.permute.xlu0 %9032 }
0x12e0   : > { %v9039_v54 = vunpack.i.l.bf16 %v9038_v60  ;;  %v9035_v29 = vunpack.i.h.bf16 %v9033_v3  ;;  %v9034_v18 = vunpack.i.l.bf16 %v9033_v3  ;;  %v9040_v35 = vunpack.i.h.bf16 %v9038_v60 }
0x12e2   : > { %v3741_v59 = vsel %vm16009_vm12, %v9030_v15, %v9039_v54  ;;  %v13183_v55 = vsel %vm15771_vm1, %v9039_v54, %v13077_v19  ;;  %v3700_v14 = vsel %vm16012_vm11, %v9034_v18, %v9035_v29  ;;  %vm16014_vm12 = vmmov %vm16011_vm5  ;;  %vm16018_vm5 = vnez %v15637_v48 }
0x12e3   : > { %v9043_v53 = vpop.permute.xlu1 %9042  ;;  %v9048_v38 = vpop.permute.xlu0 %9047  ;;  %v13188_v28 = vsel %vm16010_vm9, %v3741_v59, %v13082_v36  ;;  %vm16019_vm11 = vmmov %vm16015_vm0 }
0x12e4   : > { %v9045_v26 = vunpack.i.h.bf16 %v9043_v53  ;;  %v9044_v27 = vunpack.i.l.bf16 %v9043_v53  ;;  %v9050_v45 = vunpack.i.h.bf16 %v9048_v38  ;;  %v9049_v2 = vunpack.i.l.bf16 %v9048_v38 }
0x12e5   : > { %v9076_v19 = vpack.i.bf16 %v13183_v55, %v13188_v28  ;;  %v3764_v18 = vsel %vm16019_vm11, %v3700_v14, %v9029_v51  ;;  %vm16023_vm11 = vmmov %vm16015_vm0 }
0x12e6   : > { %v3701_v30 = vsel %vm16013_vm10, %v9044_v27, %v9045_v26  ;;  %v13198_v41 = vsel %vm15771_vm1, %v9050_v45, %v13108_v8  ;;  %v3742_v36 = vsel %vm16014_vm12, %v9040_v35, %v9049_v2  ;;  %v3743_v60 = vsel %vm16015_vm0, %v9049_v2, %v9050_v45  ;;  %vm16021_vm10 = vmmov %vm16015_vm0 }
0x12e7   : > { %v3765_v3 = vsel %vm16016_vm4, %v3701_v30, %v9040_v35  ;;  %9077 = vrot.lane.b32.xlu0 %v9076_v19, %s16017_s2  ;;  %v9053_v15 = vpop.permute.xlu1 %9052  ;;  %v13207_v54 = vsel %vm16010_vm9, %v3743_v60, %v13096_v33  ;;  %v13214_v8 = vsel %vm16018_vm5, %v3740_v43, %v13063_v5  ;;  %v13222_v35 = vsel %vm16018_vm5, %v3742_v36, %v13101_v57  ;;  %vm16022_vm12 = vmmov %vm16015_vm0 }
0x12e8   : > { %v9086_v29 = vpack.i.bf16 %v13198_v41, %v13207_v54  ;;  %v9081_v59 = vpack.i.bf16 %v13188_v28, %v13214_v8  ;;  %vm16020_vm4 = vnez %v15646_v12  ;;  %v9091_v51 = vpack.i.bf16 %v13207_v54, %v13222_v35 }
0x12e9   : > { %v13228_v53 = vsel %vm16020_vm4, %v3765_v3, %v13087_v21  ;;  %v13236_v38 = vsel %vm16020_vm4, %v3764_v18, %v13058_v13  ;;  %v9055_v26 = vunpack.i.h.bf16 %v9053_v15  ;;  %v9054_v27 = vunpack.i.l.bf16 %v9053_v15 }
0x12ea   : > { %9087 = vrot.lane.b32.xlu1 %v9086_v29, %s16017_s2  ;;  %v9063_v33 = vpop.permute.xlu0 %9062  ;;  %v9096_v57 = vpack.i.bf16 %v13228_v53, %v13236_v38 }
0x12eb   : > { %9082 = vrot.lane.b32.xlu0 %v9081_v59, %s15782_s1  ;;  %v9058_v5 = vpop.permute.xlu1 %9057  ;;  %v9065_v45 = vunpack.i.h.bf16 %v9063_v33  ;;  %v9064_v2 = vunpack.i.l.bf16 %v9063_v33 }
0x12ec   : > { %v9060_v30 = vunpack.i.h.bf16 %v9058_v5  ;;  %v9059_v36 = vunpack.i.l.bf16 %v9058_v5  ;;  %v3744_v5 = vsel %vm16023_vm11, %v9054_v27, %v9055_v26 }
0x12ee   : > { %9092 = vrot.lane.b32.xlu1 %v9091_v51, %s15782_s1  ;;  %v9068_v21 = vpop.permute.xlu0 %9067 }
0x12ef   : > { %9097 = vrot.lane.b32.xlu0 %v9096_v57, %s15782_s1  ;;  %v9073_v43 = vpop.permute.xlu1 %9072  ;;  %v9070_v14 = vunpack.i.h.bf16 %v9068_v21  ;;  %v9069_v19 = vunpack.i.l.bf16 %v9068_v21 }
0x12f0   : > { %v9075_v60 = vunpack.i.h.bf16 %v9073_v43  ;;  %v9074_v13 = vunpack.i.l.bf16 %v9073_v43 }
0x12f1   : > { %v3745_v3 = vsel %vm16015_vm0, %v9055_v26, %v9069_v19  ;;  %v13246_v15 = vsel %vm15771_vm1, %v9069_v19, %v13142_v11  ;;  %vm16024_vm0 = vcmask 31744  }
0x12f2   : > { %v13251_v29 = vsel %vm15771_vm1, %v9075_v60, %v13135_v58  ;;  %v3747_v18 = vsel %vm16021_vm10, %v9074_v13, %v9075_v60  ;;  %v3746_v59 = vsel %vm16022_vm12, %v9070_v14, %v9074_v13  ;;  %v13258_v33 = vsel %vm16010_vm9, %v3745_v3, %v13148_v40  ;;  %vm16025_vm10 = vmmov %vm16024_vm0 }
0x12f3   : > { %v9101_v11 = vpack.i.bf16 %v13246_v15, %v13258_v33  ;;  %v13266_v51 = vsel %vm16010_vm9, %v3747_v18, %v13153_v42  ;;  %v3702_v58 = vsel %vm16024_vm0, %v9059_v36, %v9060_v30  ;;  %v3703_v57 = vsel %vm16025_vm10, %v9064_v2, %v9065_v45  ;;  %vm16026_vm12 = vmmov %vm16023_vm11 }
0x12f4   : > { %v9111_v21 = vpack.i.bf16 %v13251_v29, %v13266_v51  ;;  %v3767_v40 = vsel %vm16026_vm12, %v3703_v57, %v9070_v14  ;;  %v13277_v26 = vsel %vm16018_vm5, %v3746_v59, %v13171_v52  ;;  %v13283_v42 = vsel %vm16018_vm5, %v3744_v5, %v13126_v61  ;;  %v16027_v59 = vld [vmem:[#allocation51_spill] sm:$0xff] }
0x12f5   : > { %9102 = vrot.lane.b32.xlu1 %v9101_v11, %s16017_s2  ;;  %v3766_v45 = vsel %vm16023_vm11, %v3702_v58, %v9054_v27  ;;  %v9106_v2 = vpack.i.bf16 %v13258_v33, %v13283_v42  ;;  %v9116_v43 = vpack.i.bf16 %v13266_v51, %v13277_v26  ;;  %v13293_v52 = vsel %vm16020_vm4, %v3767_v40, %v13166_v6  ;;  %v16030_v40 = vld [vmem:[#allocation52_spill] sm:$0xff] }
0x12f6   : > { %9112 = vrot.lane.b32.xlu0 %v9111_v21, %s16017_s2  ;;  %v13300_v61 = vsel %vm16020_vm4, %v3766_v45, %v13121_v62  ;;  %vm16028_vm0 = vnez %v16027_v59  ;;  %vm16029_vm10 = vcmask 326656   ;;  %vm16031_vm12 = vnez %v16030_v40 }
0x12f7   : > { %v9121_v27 = vpack.i.bf16 %v13293_v52, %v13300_v61  ;;  %vm16032_vm11 = vcmask 195584   ;;  %vm16034_vm5 = vmmov %vm16029_vm10 }
0x12f8   : > { %vm16033_vm4 = vmmov %vm16032_vm11 }
0x12f9   : > { %9107 = vrot.lane.b32.xlu1 %v9106_v2, %s15782_s1  ;;  %vm16035_vm9 = vmmov %vm16034_vm5 }
0x12fa   : > { %9117 = vrot.lane.b32.xlu0 %v9116_v43, %s15782_s1  ;;  %vm16036_vm1 = vmmov %vm16034_vm5 }
0x12fb   : > { %vm16037_vm6 = vmmov %vm16036_vm1 }
0x12fd   : > { %9122 = vrot.lane.b32.xlu1 %v9121_v27, %s15782_s1 }
0x1359   : > { %v9078_v14 = vpop.permute.xlu0 %9077 }
0x135a   : > { %v9080_v60 = vunpack.i.h.bf16 %v9078_v14  ;;  %v9079_v13 = vunpack.i.l.bf16 %v9078_v14 }
0x135c   : > { %v9088_v19 = vpop.permute.xlu1 %9087  ;;  %v3808_v14 = vsel %vm16032_vm11, %v9079_v13, %v9080_v60  ;;  %v16038_v13 = vld [vmem:[#allocation53_spill] sm:$0xff] }
0x135d   : > { %v9083_v30 = vpop.permute.xlu0 %9082  ;;  %v9090_v3 = vunpack.i.h.bf16 %v9088_v19  ;;  %v9089_v18 = vunpack.i.l.bf16 %v9088_v19 }
0x135e   : > { %v9085_v36 = vunpack.i.h.bf16 %v9083_v30  ;;  %v9084_v6 = vunpack.i.l.bf16 %v9083_v30 }
0x135f   : > { %v3809_v19 = vsel %vm16033_vm4, %v9089_v18, %v9090_v3  ;;  %vm16039_vm4 = vnez %v16038_v13  ;;  %v16040_v3 = vld [vmem:[#allocation54_spill] sm:$0xff] }
0x1360   : > { %v3879_v5 = vsel %vm16028_vm0, %v9085_v36, %v13183_v55  ;;  %v3849_v62 = vsel %vm16029_vm10, %v9084_v6, %v9085_v36  ;;  %v9093_v11 = vpop.permute.xlu1 %9092  ;;  %vm16041_vm11 = vnez %v16040_v3 }
0x1361   : > { %v9095_v58 = vunpack.i.h.bf16 %v9093_v11  ;;  %v9094_v57 = vunpack.i.l.bf16 %v9093_v11  ;;  %v9098_v21 = vpop.permute.xlu0 %9097  ;;  %v3878_v45 = vsel %vm16031_vm12, %v3849_v62, %v13188_v28 }
0x1362   : > { %v9100_v2 = vunpack.i.h.bf16 %v9098_v21  ;;  %v9099_v43 = vunpack.i.l.bf16 %v9098_v21  ;;  %v9126_v27 = vpack.i.bf16 %v3879_v5, %v3878_v45 }
0x1363   : > { %v3883_v55 = vsel %vm16028_vm0, %v9095_v58, %v13198_v41  ;;  %v3851_v30 = vsel %vm16029_vm10, %v9094_v57, %v9095_v58  ;;  %vm16045_vm10 = vmmov %vm16036_vm1 }
0x1364   : > { %v3850_v36 = vsel %vm16034_vm5, %v9100_v2, %v9094_v57  ;;  %v3873_v11 = vsel %vm16035_vm9, %v3809_v19, %v9100_v2  ;;  %v3848_v12 = vsel %vm16036_vm1, %v9099_v43, %v9084_v6  ;;  %v3872_v28 = vsel %vm16037_vm6, %v3808_v14, %v9099_v43  ;;  %9127 = vrot.lane.b32.xlu0 %v9126_v27, %s15792_s16  ;;  %vm16042_vm6 = vmmov %vm16036_vm1 }
0x1365   : > { %v3882_v60 = vsel %vm16031_vm12, %v3851_v30, %v13207_v54  ;;  %v3876_v41 = vsel %vm16039_vm4, %v3872_v28, %v13236_v38  ;;  %v3877_v18 = vsel %vm16041_vm11, %v3848_v12, %v13214_v8  ;;  %v3880_v6 = vsel %vm16039_vm4, %v3873_v11, %v13228_v53 }
0x1366   : > { %v9136_v5 = vpack.i.bf16 %v3883_v55, %v3882_v60  ;;  %v9131_v62 = vpack.i.bf16 %v3877_v18, %v3876_v41  ;;  %v3881_v57 = vsel %vm16041_vm11, %v3850_v36, %v13222_v35  ;;  %vm16043_vm9 = vcmask 195584  }
0x1367   : > { %v9103_v58 = vpop.permute.xlu1 %9102  ;;  %v9141_v38 = vpack.i.bf16 %v3881_v57, %v3880_v6  ;;  %vm16044_vm5 = vmmov %vm16043_vm9 }
0x1368   : > { %9137 = vrot.lane.b32.xlu1 %v9136_v5, %s15792_s16  ;;  %9132 = vrot.lane.b32.xlu0 %v9131_v62, %s15792_s16  ;;  %v9113_v54 = vpop.permute.xlu0 %9112  ;;  %v9105_v45 = vunpack.i.h.bf16 %v9103_v58  ;;  %v9104_v12 = vunpack.i.l.bf16 %v9103_v58 }
0x1369   : > { %v9115_v27 = vunpack.i.h.bf16 %v9113_v54  ;;  %v9114_v53 = vunpack.i.l.bf16 %v9113_v54 }
0x136a   : > { %v3810_v5 = vsel %vm16043_vm9, %v9104_v12, %v9105_v45 }
0x136b   : > { %v9108_v21 = vpop.permute.xlu1 %9107  ;;  %v3811_v62 = vsel %vm16044_vm5, %v9114_v53, %v9115_v27 }
0x136c   : > { %9142 = vrot.lane.b32.xlu1 %v9141_v38, %s15792_s16  ;;  %v9110_v8 = vunpack.i.h.bf16 %v9108_v21  ;;  %v9109_v2 = vunpack.i.l.bf16 %v9108_v21  ;;  %v9118_v43 = vpop.permute.xlu0 %9117 }
0x136d   : > { %v9120_v14 = vunpack.i.h.bf16 %v9118_v43  ;;  %v9119_v19 = vunpack.i.l.bf16 %v9118_v43 }
0x136e   : > { %v3887_v35 = vsel %vm16028_vm0, %v9110_v8, %v13246_v15  ;;  %v3853_v55 = vsel %vm16036_vm1, %v9109_v2, %v9110_v8 }
0x136f   : > { %v3891_v30 = vsel %vm16028_vm0, %v9120_v14, %v13251_v29  ;;  %v3855_v36 = vsel %vm16042_vm6, %v9119_v19, %v9120_v14  ;;  %v9123_v11 = vpop.permute.xlu1 %9122  ;;  %v3886_v28 = vsel %vm16031_vm12, %v3853_v55, %v13258_v33  ;;  %vm16046_vm6 = vmmov %vm16036_vm1 }
0x1370   : > { %v9125_v60 = vunpack.i.h.bf16 %v9123_v11  ;;  %v9124_v41 = vunpack.i.l.bf16 %v9123_v11  ;;  %v3890_v18 = vsel %vm16031_vm12, %v3855_v36, %v13266_v51  ;;  %v9146_v15 = vpack.i.bf16 %v3887_v35, %v3886_v28  ;;  %vm16047_vm0 = vmmov %vm16036_vm1 }
0x1371   : > { %v9156_v58 = vpack.i.bf16 %v3891_v30, %v3890_v18 }
0x1372   : > { %v3852_v29 = vsel %vm16045_vm10, %v9124_v41, %v9109_v2  ;;  %v3854_v6 = vsel %vm16036_vm1, %v9125_v60, %v9119_v19  ;;  %v3874_v57 = vsel %vm16046_vm6, %v3810_v5, %v9124_v41  ;;  %v3875_v33 = vsel %vm16047_vm0, %v3811_v62, %v9125_v60  ;;  %9147 = vrot.lane.b32.xlu0 %v9146_v15, %s15792_s16 }
0x1373   : > { %9157 = vrot.lane.b32.xlu1 %v9156_v58, %s15792_s16  ;;  %v3888_v51 = vsel %vm16039_vm4, %v3875_v33, %v13293_v52  ;;  %v3889_v54 = vsel %vm16041_vm11, %v3854_v6, %v13277_v26  ;;  %v3884_v38 = vsel %vm16039_vm4, %v3874_v57, %v13300_v61  ;;  %v3885_v21 = vsel %vm16041_vm11, %v3852_v29, %v13283_v42 }
0x1374   : > { %v9161_v45 = vpack.i.bf16 %v3889_v54, %v3888_v51  ;;  %v9151_v12 = vpack.i.bf16 %v3885_v21, %v3884_v38  ;;  %vm16048_vm0 = vcmask 343040   ;;  %vm16051_vm10 = vcmask 474112  }
0x1375   : > { %vm16049_vm9 = vmmov %vm16048_vm0 }
0x1376   : > { %9152 = vrot.lane.b32.xlu0 %v9151_v12, %s15792_s16  ;;  %vm16050_vm5 = vmmov %vm16048_vm0 }
0x1377   : > { %9162 = vrot.lane.b32.xlu1 %v9161_v45, %s15792_s16  ;;  %vm16052_vm1 = vmmov %vm16048_vm0 }
0x1378   : > { %vm16053_vm6 = vmmov %vm16048_vm0 }
0x13d6   : > { %v9128_v8 = vpop.permute.xlu0 %9127 }
0x13d7   : > { %v9130_v52 = vunpack.i.h.bf16 %v9128_v8  ;;  %v9129_v2 = vunpack.i.l.bf16 %v9128_v8 }
0x13d9   : > { %v3942_v19 = vsel %vm16050_vm5, %v9129_v2, %v9130_v52  ;;  %vm16057_vm5 = vmmov %vm16048_vm0 }
0x13da   : > { %v9138_v43 = vpop.permute.xlu1 %9137  ;;  %v9133_v27 = vpop.permute.xlu0 %9132  ;;  %v3964_v36 = vsel %vm16051_vm10, %v3942_v19, 0.0 }
0x13db   : > { %v9135_v26 = vunpack.i.h.bf16 %v9133_v27  ;;  %v9134_v53 = vunpack.i.l.bf16 %v9133_v27  ;;  %v9140_v15 = vunpack.i.h.bf16 %v9138_v43  ;;  %v9139_v5 = vunpack.i.l.bf16 %v9138_v43 }
0x13dd   : > { %v3941_v14 = vsel %vm16048_vm0, %v9135_v26, %v9129_v2  ;;  %v3940_v61 = vsel %vm16049_vm9, %v9134_v53, %v9135_v26  ;;  %v3960_v41 = vsel %vm16048_vm0, 0.0, %v9134_v53  ;;  %vm16056_vm9 = vmmov %vm16048_vm0 }
0x13de   : > { %v9143_v42 = vpop.permute.xlu1 %9142  ;;  %v9166_v35 = vpack.i.bf16 %v3941_v14, %v3940_v61  ;;  %v3945_v62 = vsel %vm16056_vm9, %v9139_v5, %v9140_v15  ;;  %vm16060_vm9 = vmmov %vm16048_vm0 }
0x13df   : > { %v9145_v55 = vunpack.i.h.bf16 %v9143_v42  ;;  %v9144_v30 = vunpack.i.l.bf16 %v9143_v42  ;;  %v3965_v29 = vsel %vm16051_vm10, %v3945_v62, 0.0 }
0x13e0   : > { %9167 = vrot.lane.b32.xlu0 %v9166_v35, %s15438_s19 }
0x13e1   : > { %v3943_v11 = vsel %vm16052_vm1, %v9144_v30, %v9145_v55  ;;  %v3961_v60 = vsel %vm16053_vm6, 0.0, %v9144_v30  ;;  %v3944_v58 = vsel %vm16057_vm5, %v9145_v55, %v9139_v5  ;;  %vm16058_vm1 = vmmov %vm16048_vm0 }
0x13e2   : > { %v9206_v28 = vpack.i.bf16 %v3943_v11, %v3964_v36  ;;  %v9216_v18 = vpack.i.bf16 %v3961_v60, %v3960_v41  ;;  %v9211_v6 = vpack.i.bf16 %v3965_v29, %v3944_v58  ;;  %vm16059_vm6 = vmmov %vm16048_vm0 }
0x13e3   : > { %vm16061_vm5 = vmmov %vm16051_vm10 }
0x13e4   : > { %9207 = vrot.lane.b32.xlu1 %v9206_v28, %s15438_s19  ;;  %9172 = vrot.lane.b32.xlu0 %v9166_v35, %s16054_s0  ;;  %v9148_v57 = vpop.permute.xlu0 %9147  ;;  %vm16062_vm10 = vmmov %vm16048_vm0 }
0x13e5   : > { %v9158_v33 = vpop.permute.xlu1 %9157  ;;  %v9149_v45 = vunpack.i.l.bf16 %v9148_v57  ;;  %v9150_v12 = vunpack.i.h.bf16 %v9148_v57 }
0x13e6   : > { %v9160_v55 = vunpack.i.h.bf16 %v9158_v33  ;;  %v9159_v30 = vunpack.i.l.bf16 %v9158_v33 }
0x13e7   : > { %v3948_v27 = vsel %vm16048_vm0, %v9149_v45, %v9150_v12 }
0x13e8   : > { %9217 = vrot.lane.b32.xlu1 %v9216_v18, %s15438_s19  ;;  %9177 = vrot.lane.b32.xlu0 %v9166_v35, %s15982_s21  ;;  %v9153_v51 = vpop.permute.xlu0 %9152  ;;  %v3966_v14 = vsel %vm16061_vm5, %v3948_v27, 0.0 }
0x13e9   : > { %v9155_v54 = vunpack.i.h.bf16 %v9153_v51  ;;  %v9154_v38 = vunpack.i.l.bf16 %v9153_v51  ;;  %v9163_v21 = vpop.permute.xlu1 %9162 }
0x13ea   : > { %v9165_v8 = vunpack.i.h.bf16 %v9163_v21  ;;  %v9164_v52 = vunpack.i.l.bf16 %v9163_v21 }
0x13eb   : > { %v3946_v2 = vsel %vm16058_vm1, %v9154_v38, %v9155_v54  ;;  %v3947_v43 = vsel %vm16059_vm6, %v9155_v54, %v9149_v45  ;;  %vm16063_vm1 = vmmov %vm16048_vm0 }
0x13ec   : > { %9222 = vrot.lane.b32.xlu1 %v9206_v28, %s16054_s0  ;;  %9182 = vrot.lane.b32.xlu0 %v9166_v35, %s16055_s3  ;;  %v9326_v26 = vpack.i.bf16 %v3947_v43, %v3946_v2  ;;  %v3949_v53 = vsel %vm16060_vm9, %v9164_v52, %v9165_v8  ;;  %v3963_v19 = vsel %vm16062_vm10, 0.0, %v9164_v52  ;;  %v3962_v42 = vsel %vm16063_vm1, 0.0, %v9154_v38  ;;  %vm16064_vm6 = vmmov %vm16048_vm0 }
0x13ed   : > { %v9366_v61 = vpack.i.bf16 %v3949_v53, %v3966_v14  ;;  %v3951_v36 = vsel %vm16064_vm6, %v9159_v30, %v9160_v55  ;;  %v3950_v11 = vsel %vm16048_vm0, %v9165_v8, %v9159_v30  ;;  %vm16065_vm9 = vmmov %vm16061_vm5  ;;  %vm16066_vm5 = vcmask 1039360  }
0x13ee   : > { %vm16067_vm10 = vmmov %vm16066_vm5  ;;  %vm16069_vm6 = vcmask 1031168  }
0x13ef   : > { %vm16068_vm1 = vmmov %vm16066_vm5 }
0x13f0   : > { %9232 = vrot.lane.b32.xlu1 %v9216_v18, %s16054_s0  ;;  %9187 = vrot.lane.b32.xlu0 %v9166_v35, %s15802_s23  ;;  %vm16070_vm0 = vmmov %vm16069_vm6 }
0x13f4   : > { %9237 = vrot.lane.b32.xlu1 %v9206_v28, %s15982_s21  ;;  %9192 = vrot.lane.b32.xlu0 %v9166_v35, %s15956_s28 }
0x13f8   : > { %9247 = vrot.lane.b32.xlu1 %v9216_v18, %s15982_s21  ;;  %9197 = vrot.lane.b32.xlu0 %v9166_v35, %s15803_s26 }
0x13fc   : > { %9252 = vrot.lane.b32.xlu1 %v9206_v28, %s16055_s3  ;;  %9202 = vrot.lane.b32.xlu0 %v9166_v35, %s15805_s27  ;;  %v9376_v35 = vpack.i.bf16 %v3963_v19, %v3962_v42 }
0x1400   : > { %9262 = vrot.lane.b32.xlu1 %v9216_v18, %s16055_s3  ;;  %9212 = vrot.lane.b32.xlu0 %v9211_v6, %s15438_s19 }
0x1404   : > { %9267 = vrot.lane.b32.xlu1 %v9206_v28, %s15802_s23  ;;  %9227 = vrot.lane.b32.xlu0 %v9211_v6, %s16054_s0 }
0x1408   : > { %9277 = vrot.lane.b32.xlu1 %v9216_v18, %s15802_s23  ;;  %9242 = vrot.lane.b32.xlu0 %v9211_v6, %s15982_s21 }
0x140c   : > { %9282 = vrot.lane.b32.xlu1 %v9206_v28, %s15956_s28  ;;  %9257 = vrot.lane.b32.xlu0 %v9211_v6, %s16055_s3 }
0x1410   : > { %9292 = vrot.lane.b32.xlu1 %v9216_v18, %s15956_s28  ;;  %9272 = vrot.lane.b32.xlu0 %v9211_v6, %s15802_s23 }
0x1414   : > { %9297 = vrot.lane.b32.xlu1 %v9206_v28, %s15803_s26  ;;  %9287 = vrot.lane.b32.xlu0 %v9211_v6, %s15956_s28 }
0x1418   : > { %9307 = vrot.lane.b32.xlu1 %v9216_v18, %s15803_s26  ;;  %9302 = vrot.lane.b32.xlu0 %v9211_v6, %s15803_s26 }
0x141c   : > { %9312 = vrot.lane.b32.xlu1 %v9206_v28, %s15805_s27  ;;  %9317 = vrot.lane.b32.xlu0 %v9211_v6, %s15805_s27  ;;  %v3967_v28 = vsel %vm16065_vm9, %v3951_v36, 0.0  ;;  %vm16071_vm9 = vmmov %vm16070_vm0 }
0x141d   : > { %v9371_v60 = vpack.i.bf16 %v3967_v28, %v3950_v11 }
0x1420   : > { %9322 = vrot.lane.b32.xlu1 %v9216_v18, %s15805_s27  ;;  %9327 = vrot.lane.b32.xlu0 %v9326_v26, %s15438_s19 }
0x1424   : > { %9367 = vrot.lane.b32.xlu1 %v9366_v61, %s15438_s19  ;;  %9332 = vrot.lane.b32.xlu0 %v9326_v26, %s16054_s0 }
0x1428   : > { %9377 = vrot.lane.b32.xlu1 %v9376_v35, %s15438_s19  ;;  %9337 = vrot.lane.b32.xlu0 %v9326_v26, %s15982_s21 }
0x142c   : > { %9382 = vrot.lane.b32.xlu1 %v9366_v61, %s16054_s0  ;;  %9342 = vrot.lane.b32.xlu0 %v9326_v26, %s16055_s3 }
0x1430   : > { %9392 = vrot.lane.b32.xlu1 %v9376_v35, %s16054_s0  ;;  %9347 = vrot.lane.b32.xlu0 %v9326_v26, %s15802_s23 }
0x1434   : > { %9397 = vrot.lane.b32.xlu1 %v9366_v61, %s15982_s21  ;;  %9352 = vrot.lane.b32.xlu0 %v9326_v26, %s15956_s28 }
0x1438   : > { %9407 = vrot.lane.b32.xlu1 %v9376_v35, %s15982_s21  ;;  %9357 = vrot.lane.b32.xlu0 %v9326_v26, %s15803_s26 }
0x143c   : > { %9412 = vrot.lane.b32.xlu1 %v9366_v61, %s16055_s3  ;;  %9362 = vrot.lane.b32.xlu0 %v9326_v26, %s15805_s27 }
0x1440   : > { %9422 = vrot.lane.b32.xlu1 %v9376_v35, %s16055_s3  ;;  %9372 = vrot.lane.b32.xlu0 %v9371_v60, %s15438_s19 }
0x1444   : > { %9427 = vrot.lane.b32.xlu1 %v9366_v61, %s15802_s23  ;;  %9387 = vrot.lane.b32.xlu0 %v9371_v60, %s16054_s0 }
0x1448   : > { %9437 = vrot.lane.b32.xlu1 %v9376_v35, %s15802_s23  ;;  %9402 = vrot.lane.b32.xlu0 %v9371_v60, %s15982_s21 }
0x144c   : > { %9442 = vrot.lane.b32.xlu1 %v9366_v61, %s15956_s28  ;;  %9417 = vrot.lane.b32.xlu0 %v9371_v60, %s16055_s3 }
0x1450   : > { %9452 = vrot.lane.b32.xlu1 %v9376_v35, %s15956_s28  ;;  %9432 = vrot.lane.b32.xlu0 %v9371_v60, %s15802_s23 }
0x1452   : > { %v9168_v41 = vpop.permute.xlu0 %9167 }
0x1453   : > { %v9170_v62 = vunpack.i.h.bf16 %v9168_v41  ;;  %v9169_v58 = vunpack.i.l.bf16 %v9168_v41 }
0x1454   : > { %9457 = vrot.lane.b32.xlu1 %v9366_v61, %s15803_s26  ;;  %9447 = vrot.lane.b32.xlu0 %v9371_v60, %s15956_s28 }
0x1455   : > { %v4009_v51 = vsel %vm16067_vm10, %v9169_v58, %v9170_v62 }
0x1456   : > { %v13456_v18 = vpop.permute.xlu1 %9207  ;;  %v9173_v15 = vpop.permute.xlu0 %9172 }
0x1457   : > { %v9209_v5 = vunpack.i.l.bf16 %v13456_v18  ;;  %v9175_v54 = vunpack.i.h.bf16 %v9173_v15  ;;  %v9174_v38 = vunpack.i.l.bf16 %v9173_v15 }
0x1458   : > { %9467 = vrot.lane.b32.xlu1 %v9376_v35, %s15803_s26  ;;  %9462 = vrot.lane.b32.xlu0 %v9371_v60, %s15803_s26 }
0x1459   : > { %v4010_v57 = vsel %vm16066_vm5, %v9170_v62, %v9209_v5  ;;  %v4053_v2 = vsel %vm16069_vm6, %v9174_v38, %v9175_v54  ;;  %vm16072_vm5 = vcmask 883712   ;;  %vm16075_vm6 = vcmask 875520  }
0x145a   : > { %v13461_v29 = vpop.permute.xlu1 %9217  ;;  %v9178_v6 = vpop.permute.xlu0 %9177  ;;  %v9486_v12 = vpack.i.bf16 %v4010_v57, %v4009_v51  ;;  %vm16073_vm10 = vmmov %vm16072_vm5 }
0x145b   : > { %v9219_v33 = vunpack.i.l.bf16 %v13461_v29  ;;  %v9180_v19 = vunpack.i.h.bf16 %v9178_v6  ;;  %v9179_v42 = vunpack.i.l.bf16 %v9178_v6 }
0x145c   : > { %9472 = vrot.lane.b32.xlu1 %v9366_v61, %s15805_s27  ;;  %9477 = vrot.lane.b32.xlu0 %v9371_v60, %s15805_s27 }
0x145d   : > { %v4008_v8 = vsel %vm16068_vm1, %v9219_v33, %v9169_v58  ;;  %v4097_v28 = vsel %vm16072_vm5, %v9179_v42, %v9180_v19  ;;  %vm16074_vm1 = vmmov %vm16072_vm5  ;;  %vm16078_vm5 = vcmask 1039360  }
0x145e   : > { %v13468_v21 = vpop.permute.xlu1 %9222  ;;  %v9183_v45 = vpop.permute.xlu0 %9182  ;;  %v9491_v14 = vpack.i.bf16 %v9209_v5, %v4008_v8 }
0x145f   : > { %v9224_v52 = vunpack.i.l.bf16 %v13468_v21  ;;  %v9185_v58 = vunpack.i.h.bf16 %v9183_v45  ;;  %v9184_v6 = vunpack.i.l.bf16 %v9183_v45 }
0x1460   : > { %9482 = vrot.lane.b32.xlu1 %v9376_v35, %s15805_s27  ;;  %9487 = vrot.lane.b32.xlu0 %v9486_v12, %s16055_s3 }
0x1461   : > { %v4054_v43 = vsel %vm16070_vm0, %v9175_v54, %v9224_v52  ;;  %v13508_v12 = vsel %vm16075_vm6, %v9184_v6, %v9185_v58  ;;  %vm16076_vm0 = vmmov %vm16075_vm6 }
0x1462   : > { %v13476_v27 = vpop.permute.xlu1 %9232  ;;  %v13478_v26 = vpop.permute.xlu0 %9187  ;;  %v9496_v53 = vpack.i.bf16 %v4054_v43, %v4053_v2  ;;  %v15434_v43 = vunpack.i.h.bf16 %v13456_v18 }
0x1463   : > { %v9234_v61 = vunpack.i.l.bf16 %v13476_v27 }
0x1464   : > { %9497 = vrot.lane.b32.xlu0 %v9496_v53, %s16055_s3  ;;  %9492 = vrot.lane.b32.xlu1 %v9491_v14, %s16055_s3 }
0x1465   : > { %v4052_v35 = vsel %vm16071_vm9, %v9234_v61, %v9174_v38  ;;  %vm16077_vm9 = vmmov %vm16076_vm0 }
0x1466   : > { %v13484_v55 = vpop.permute.xlu1 %9237  ;;  %v13486_v30 = vpop.permute.xlu0 %9192  ;;  %v9501_v36 = vpack.i.bf16 %v9224_v52, %v4052_v35 }
0x1467   : > { %v9239_v11 = vunpack.i.l.bf16 %v13484_v55 }
0x1468   : > { %9502 = vrot.lane.b32.xlu0 %v9501_v36, %s16055_s3 }
0x1469   : > { %v4098_v60 = vsel %vm16073_vm10, %v9180_v19, %v9239_v11  ;;  %v9190_v19 = vunpack.i.h.bf16 %v13478_v26  ;;  %vm16079_vm10 = vmmov %vm16078_vm5 }
0x146a   : > { %v13492_v41 = vpop.permute.xlu1 %9247  ;;  %v13494_v15 = vpop.permute.xlu0 %9197  ;;  %v9506_v5 = vpack.i.bf16 %v4098_v60, %v4097_v28 }
0x146b   : > { %v9249_v62 = vunpack.i.l.bf16 %v13492_v41 }
0x146c   : > { %9507 = vrot.lane.b32.xlu0 %v9506_v5, %s16055_s3 }
0x146d   : > { %v4096_v57 = vsel %vm16074_vm1, %v9249_v62, %v9179_v42  ;;  %v9189_v42 = vunpack.i.l.bf16 %v13478_v26  ;;  %v9225_v62 = vunpack.i.h.bf16 %v13468_v21  ;;  %vm16080_vm1 = vcmask 867328  }
0x146e   : > { %v13499_v33 = vpop.permute.xlu1 %9252  ;;  %v13501_v51 = vpop.permute.xlu0 %9202  ;;  %v9511_v54 = vpack.i.bf16 %v9239_v11, %v4096_v57  ;;  %vm16081_vm6 = vmmov %vm16080_vm1 }
0x146f   : > { %v13504_v38 = vunpack.i.l.bf16 %v13499_v33 }
0x1470   : > { %9512 = vrot.lane.b32.xlu0 %v9511_v54, %s16055_s3  ;;  %v4185_v54 = vsel %vm16080_vm1, %v9189_v42, %v9190_v19 }
0x1471   : > { %v13512_v8 = vsel %vm16076_vm0, %v9185_v58, %v13504_v38  ;;  %vm16082_vm0 = vcmask 1031168  }
0x1472   : > { %v9263_v45 = vpop.permute.xlu1 %9262  ;;  %v13514_v52 = vpop.permute.xlu0 %9212  ;;  %v9516_v2 = vpack.i.bf16 %v13512_v8, %v13508_v12 }
0x1473   : > { %v9264_v53 = vunpack.i.l.bf16 %v9263_v45  ;;  %v15433_v14 = vunpack.i.h.bf16 %v13514_v52  ;;  %v9214_v61 = vunpack.i.l.bf16 %v13514_v52 }
0x1474   : > { %9517 = vrot.lane.b32.xlu0 %v9516_v2, %s16055_s3 }
0x1475   : > { %v13525_v35 = vsel %vm16077_vm9, %v9264_v53, %v9184_v6  ;;  %v4012_v36 = vsel %vm16078_vm5, %v15434_v43, %v9214_v61  ;;  %v4013_v11 = vsel %vm16079_vm10, %v9214_v61, %v15433_v14  ;;  %vm16083_vm9 = vmmov %vm16082_vm0  ;;  %v9235_v14 = vunpack.i.h.bf16 %v13476_v27 }
0x1476   : > { %v13533_v28 = vpop.permute.xlu1 %9267  ;;  %v9228_v60 = vpop.permute.xlu0 %9227  ;;  %v9521_v5 = vpack.i.bf16 %v13504_v38, %v13525_v35  ;;  %v9566_v57 = vpack.i.bf16 %v4013_v11, %v4012_v36  ;;  %v9194_v36 = vunpack.i.l.bf16 %v13486_v30  ;;  %vm16084_vm5 = vmmov %vm16080_vm1  ;;  %vm16086_vm1 = vcmask 719872  }
0x1477   : > { %v9269_v26 = vunpack.i.l.bf16 %v13533_v28  ;;  %v9230_v58 = vunpack.i.h.bf16 %v9228_v60  ;;  %v9229_v6 = vunpack.i.l.bf16 %v9228_v60  ;;  %vm16085_vm10 = vmmov %vm16082_vm0 }
0x1478   : > { %9522 = vrot.lane.b32.xlu0 %v9521_v5, %s16055_s3  ;;  %9567 = vrot.lane.b32.xlu1 %v9566_v57, %s16055_s3  ;;  %v9195_v5 = vunpack.i.h.bf16 %v13486_v30  ;;  %v9255_v57 = vunpack.i.h.bf16 %v13499_v33 }
0x1479   : > { %v4186_v2 = vsel %vm16081_vm6, %v9190_v19, %v9269_v26  ;;  %v4056_v53 = vsel %vm16082_vm0, %v9225_v62, %v9229_v6  ;;  %v4057_v61 = vsel %vm16083_vm9, %v9229_v6, %v9230_v58  ;;  %v9265_v19 = vunpack.i.h.bf16 %v9263_v45 }
0x147a   : > { %v13546_v21 = vpop.permute.xlu1 %9277  ;;  %v9243_v43 = vpop.permute.xlu0 %9242  ;;  %v9526_v3 = vpack.i.bf16 %v4186_v2, %v4185_v54  ;;  %v9576_v60 = vpack.i.bf16 %v4057_v61, %v4056_v53  ;;  %v9240_v6 = vunpack.i.h.bf16 %v13484_v55  ;;  %v4055_v54 = vsel %vm16085_vm10, %v9235_v14, %v9225_v62 }
0x147b   : > { %v9279_v11 = vunpack.i.l.bf16 %v13546_v21  ;;  %v9245_v13 = vunpack.i.h.bf16 %v9243_v43  ;;  %v9244_v40 = vunpack.i.l.bf16 %v9243_v43  ;;  %v4229_v45 = vsel %vm16086_vm1, %v9194_v36, %v9195_v5 }
0x147c   : > { %9527 = vrot.lane.b32.xlu0 %v9526_v3, %s16055_s3  ;;  %9577 = vrot.lane.b32.xlu1 %v9576_v60, %s16055_s3  ;;  %vm16087_vm6 = vcmask 875520   ;;  %v9581_v55 = vpack.i.bf16 %v9230_v58, %v4055_v54  ;;  %vm16088_vm0 = vcmask 883712  }
0x147d   : > { %v4184_v27 = vsel %vm16084_vm5, %v9279_v11, %v9189_v42  ;;  %v4143_v42 = vsel %vm16087_vm6, %v9265_v19, %v9255_v57  ;;  %v4100_v33 = vsel %vm16088_vm0, %v9240_v6, %v9244_v40  ;;  %vm16089_vm9 = vmmov %vm16088_vm0 }
0x147e   : > { %v13557_v2 = vpop.permute.xlu1 %9282  ;;  %v9258_v30 = vpop.permute.xlu0 %9257  ;;  %v9531_v53 = vpack.i.bf16 %v9269_v26, %v4184_v27  ;;  %v4101_v14 = vsel %vm16089_vm9, %v9244_v40, %v9245_v13  ;;  %vm16090_vm5 = vmmov %vm16086_vm1  ;;  %vm16094_vm9 = vcmask 711680  }
0x147f   : > { %v9284_v43 = vunpack.i.l.bf16 %v13557_v2  ;;  %v13561_v61 = vunpack.i.h.bf16 %v9258_v30  ;;  %v9259_v3 = vunpack.i.l.bf16 %v9258_v30  ;;  %vm16091_vm10 = vmmov %vm16087_vm6  ;;  %v7361_v30 = vpack.c.bf16 %v4143_v42, %v13525_v35 }
0x1480   : > { %9532 = vrot.lane.b32.xlu0 %v9531_v53, %s16055_s3  ;;  %vm16092_vm1 = vmmov %vm16087_vm6  ;;  %9582 = vrot.lane.b32.xlu1 %v9581_v55, %s16055_s3  ;;  %v9200_v53 = vunpack.i.h.bf16 %v13494_v15 }
0x1481   : > { %v4230_v62 = vsel %vm16090_vm5, %v9195_v5, %v9284_v43  ;;  %v7431_v26 = vpack.c.bf16 %v13561_v61, %v13504_v38  ;;  %v4144_v60 = vsel %vm16091_vm10, %v9255_v57, %v9259_v3  ;;  %v4145_v11 = vsel %vm16092_vm1, %v9259_v3, %v13561_v61  ;;  %vm16093_vm6 = vmmov %vm16090_vm5 }
0x1482   : > { %v13574_v19 = vpop.permute.xlu1 %9292  ;;  %v13576_v58 = vpop.permute.xlu0 %9272  ;;  %v7359_v40 = vpack.c.bf16 %v4144_v60, %v13508_v12  ;;  %v7433_v27 = vpack.c.bf16 %v4145_v11, %v13512_v8  ;;  %v9536_v54 = vpack.i.bf16 %v4230_v62, %v4229_v45  ;;  %v9250_v5 = vunpack.i.h.bf16 %v13492_v41  ;;  %vm16095_vm5 = vmmov %vm16094_vm9 }
0x1483   : > { %v9294_v38 = vunpack.i.l.bf16 %v13574_v19  ;;  %7432 = vmatprep.subr.bf16.mxu1 %v7431_v26  ;;  %v9586_v57 = vpack.i.bf16 %v4101_v14, %v4100_v33  ;;  %v9199_v3 = vunpack.i.l.bf16 %v13494_v15  ;;  %vm16096_vm10 = vmmov %vm16095_vm5  ;;  %vm16097_vm1 = vcmask 703488  }
0x1484   : > { %7360 = vmatprep.subr.bf16.mxu0 %v7359_v40  ;;  %7434 = vmatpush1.bf16.msra.mxu1 %v7433_v27  ;;  %v4099_v45 = vsel %vm16088_vm0, %v9250_v5, %v9240_v6  ;;  %v9205_v6 = vunpack.i.h.bf16 %v13501_v51  ;;  %v9596_v40 = vpack.i.bf16 %v4145_v11, %v4144_v60  ;;  %v9275_v27 = vunpack.i.h.bf16 %v13576_v58 }
0x1485   : > { %v4228_v55 = vsel %vm16093_vm6, %v9294_v38, %v9194_v36  ;;  %9537 = vrot.lane.b32.xlu0 %v9536_v54, %s16055_s3  ;;  %9587 = vrot.lane.b32.xlu1 %v9586_v57, %s16055_s3  ;;  %v9591_v33 = vpack.i.bf16 %v9245_v13, %v4099_v45  ;;  %v4273_v14 = vsel %vm16094_vm9, %v9199_v3, %v9200_v53  ;;  %v9204_v13 = vunpack.i.l.bf16 %v13501_v51  ;;  %vm16100_vm9 = vmmov %vm16097_vm1 }
0x1486   : > { %7362 = vmatpush1.bf16.msra.mxu0 %v7361_v30  ;;  %v13588_v41 = vpop.permute.xlu1 %9297  ;;  %v13590_v12 = vpop.permute.xlu0 %9287  ;;  %v9541_v8 = vpack.i.bf16 %v9284_v43, %v4228_v55  ;;  %v9274_v54 = vunpack.i.l.bf16 %v13576_v58  ;;  %v9601_v51 = vpack.i.bf16 %v13561_v61, %v4143_v42  ;;  %vm16098_vm6 = vcmask 867328  }
0x1487   : > { %v9299_v35 = vunpack.i.l.bf16 %v13588_v41  ;;  %v4317_v11 = vsel %vm16097_vm1, %v9204_v13, %v9205_v6  ;;  %vm16099_vm0 = vmmov %vm16098_vm6 }
0x1489   : > { %v4274_v15 = vsel %vm16095_vm5, %v9200_v53, %v9299_v35  ;;  %9542 = vrot.lane.b32.xlu0 %v9541_v8, %s16055_s3  ;;  %9592 = vrot.lane.b32.xlu1 %v9591_v33, %s16055_s3  ;;  %v9270_v53 = vunpack.i.h.bf16 %v13533_v28  ;;  %v9290_v33 = vunpack.i.h.bf16 %v13590_v12  ;;  %vm16101_vm5 = vmmov %vm16097_vm1  ;;  %vm16103_vm1 = vcmask 719872  }
0x148a   : > { %v13598_v36 = vpop.permute.xlu1 %9307  ;;  %v13600_v62 = vpop.permute.xlu0 %9302  ;;  %v9546_v26 = vpack.i.bf16 %v4274_v15, %v4273_v14  ;;  %v9289_v14 = vunpack.i.l.bf16 %v13590_v12 }
0x148b   : > { %v9309_v43 = vunpack.i.l.bf16 %v13598_v36  ;;  %v4188_v58 = vsel %vm16098_vm6, %v9270_v53, %v9274_v54  ;;  %vm16104_vm6 = vmmov %vm16103_vm1 }
0x148d   : > { %v4272_v5 = vsel %vm16096_vm10, %v9309_v43, %v9199_v3  ;;  %9547 = vrot.lane.b32.xlu0 %v9546_v26, %s16055_s3  ;;  %9597 = vrot.lane.b32.xlu1 %v9596_v40, %s16055_s3  ;;  %v4189_v3 = vsel %vm16099_vm0, %v9274_v54, %v9275_v27  ;;  %v9220_v26 = vunpack.i.h.bf16 %v13461_v29  ;;  %vm16102_vm10 = vmmov %vm16099_vm0  ;;  %v16105_v29 = vunpack.i.h.bf16 %v13456_v18 }
0x148e   : > { %v13610_v38 = vpop.permute.xlu1 %9312  ;;  %v13612_v57 = vpop.permute.xlu0 %9317  ;;  %v9551_v30 = vpack.i.bf16 %v9299_v35, %v4272_v5  ;;  %v9280_v35 = vunpack.i.h.bf16 %v13546_v21  ;;  %v9606_v42 = vpack.i.bf16 %v4189_v3, %v4188_v58  ;;  %v9285_v21 = vunpack.i.h.bf16 %v13557_v2 }
0x148f   : > { %v9314_v60 = vunpack.i.l.bf16 %v13610_v38  ;;  %vm16106_vm0 = vcmask 1039360   ;;  %v9295_v3 = vunpack.i.h.bf16 %v13574_v19  ;;  %v9300_v19 = vunpack.i.h.bf16 %v13588_v41 }
0x1490   : > { %v4187_v54 = vsel %vm16102_vm10, %v9280_v35, %v9270_v53  ;;  %v4232_v12 = vsel %vm16103_vm1, %v9285_v21, %v9289_v14  ;;  %v9305_v35 = vunpack.i.h.bf16 %v13600_v62  ;;  %vm16110_vm10 = vmmov %vm16103_vm1 }
0x1491   : > { %v4318_v55 = vsel %vm16100_vm9, %v9205_v6, %v9314_v60  ;;  %9552 = vrot.lane.b32.xlu0 %v9551_v30, %s16055_s3  ;;  %9602 = vrot.lane.b32.xlu1 %v9601_v51, %s16055_s3  ;;  %v9611_v5 = vpack.i.bf16 %v9275_v27, %v4187_v54  ;;  %v4011_v51 = vsel %vm16106_vm0, %v9220_v26, %v16105_v29  ;;  %v16107_v27 = vunpack.i.h.bf16 %v13514_v52  ;;  %vm16108_vm9 = vmmov %vm16106_vm0 }
0x1492   : > { %v13623_v8 = vpop.permute.xlu1 %9322  ;;  %v9328_v45 = vpop.permute.xlu0 %9327  ;;  %v9556_v28 = vpack.i.bf16 %v4318_v55, %v4317_v11  ;;  %vm16111_vm1 = vmmov %vm16106_vm0  ;;  %v9310_v54 = vunpack.i.h.bf16 %v13598_v36 }
0x1493   : > { %v9324_v61 = vunpack.i.l.bf16 %v13623_v8  ;;  %v9330_v11 = vunpack.i.h.bf16 %v9328_v45  ;;  %v9329_v58 = vunpack.i.l.bf16 %v9328_v45  ;;  %v9304_v45 = vunpack.i.l.bf16 %v13600_v62 }
0x1495   : > { %v4316_v15 = vsel %vm16101_vm5, %v9324_v61, %v9204_v13  ;;  %9557 = vrot.lane.b32.xlu0 %v9556_v28, %s16055_s3  ;;  %9607 = vrot.lane.b32.xlu1 %v9606_v42, %s16055_s3  ;;  %v4233_v13 = vsel %vm16104_vm6, %v9289_v14, %v9290_v33  ;;  %vm16109_vm5 = vmmov %vm16106_vm0  ;;  %v4231_v14 = vsel %vm16110_vm10, %v9295_v3, %v9285_v21  ;;  %vm16112_vm6 = vcmask 711680  }
0x1496   : > { %v13633_v43 = vpop.permute.xlu1 %9367  ;;  %v9333_v6 = vpop.permute.xlu0 %9332  ;;  %v9561_v40 = vpack.i.bf16 %v9314_v60, %v4316_v15  ;;  %v9571_v60 = vpack.i.bf16 %v16107_v27, %v4011_v51  ;;  %v9616_v18 = vpack.i.bf16 %v4233_v13, %v4232_v12  ;;  %v4015_v61 = vsel %vm16109_vm5, %v9329_v58, %v9330_v11  ;;  %vm16113_vm0 = vmmov %vm16112_vm6 }
0x1497   : > { %v9369_v30 = vunpack.i.l.bf16 %v13633_v43  ;;  %v9621_v26 = vpack.i.bf16 %v9290_v33, %v4231_v14  ;;  %v4277_v12 = vsel %vm16113_vm0, %v9304_v45, %v9305_v35  ;;  %v9335_v13 = vunpack.i.h.bf16 %v9333_v6  ;;  %vm16115_vm5 = vmmov %vm16113_vm0 }
0x1498   : > { %v9334_v29 = vunpack.i.l.bf16 %v9333_v6  ;;  %v9315_v27 = vunpack.i.h.bf16 %v13610_v38  ;;  %v9319_v6 = vunpack.i.l.bf16 %v13612_v57 }
0x1499   : > { %9562 = vrot.lane.b32.xlu0 %v9561_v40, %s16055_s3  ;;  %9612 = vrot.lane.b32.xlu1 %v9611_v5, %s16055_s3  ;;  %v4016_v55 = vsel %vm16108_vm9, %v9330_v11, %v9369_v30  ;;  %v4276_v5 = vsel %vm16112_vm6, %v9300_v19, %v9304_v45  ;;  %vm16114_vm9 = vcmask 1031168   ;;  %vm16118_vm6 = vcmask 703488  }
0x149a   : > { %v13645_v2 = vpop.permute.xlu1 %9377  ;;  %v13647_v53 = vpop.permute.xlu0 %9337  ;;  %v9646_v15 = vpack.i.bf16 %v4016_v55, %v4015_v61  ;;  %v9626_v36 = vpack.i.bf16 %v4277_v12, %v4276_v5  ;;  %vm16116_vm10 = vmmov %vm16114_vm9  ;;  %v4320_v61 = vsel %vm16118_vm6, %v9315_v27, %v9319_v6 }
0x149b   : > { %v9379_v28 = vunpack.i.l.bf16 %v13645_v2  ;;  %v4059_v3 = vsel %vm16116_vm10, %v9334_v29, %v9335_v13  ;;  %vm16119_vm0 = vmmov %vm16118_vm6  ;;  %v9340_v14 = vunpack.i.h.bf16 %v13647_v53  ;;  %vm16124_vm6 = vcmask 875520  }
0x149d   : > { %9572 = vrot.lane.b32.xlu0 %v9571_v60, %s16055_s3  ;;  %9617 = vrot.lane.b32.xlu1 %v9616_v18, %s16055_s3  ;;  %v4014_v40 = vsel %vm16111_vm1, %v9379_v28, %v9329_v58  ;;  %v4275_v58 = vsel %vm16115_vm5, %v9310_v54, %v9300_v19  ;;  %v9320_v60 = vunpack.i.h.bf16 %v13612_v57  ;;  %vm16117_vm1 = vmmov %vm16114_vm9  ;;  %v9325_v19 = vunpack.i.h.bf16 %v13623_v8 }
0x149e   : > { %v13659_v42 = vpop.permute.xlu1 %9382  ;;  %v13661_v52 = vpop.permute.xlu0 %9342  ;;  %v9651_v33 = vpack.i.bf16 %v9369_v30, %v4014_v40  ;;  %v9631_v18 = vpack.i.bf16 %v9305_v35, %v4275_v58  ;;  %vm16121_vm5 = vmmov %vm16119_vm0 }
0x149f   : > { %v9384_v62 = vunpack.i.l.bf16 %v13659_v42  ;;  %v4321_v57 = vsel %vm16119_vm0, %v9319_v6, %v9320_v60  ;;  %v4319_v8 = vsel %vm16121_vm5, %v9325_v19, %v9315_v27  ;;  %v9344_v58 = vunpack.i.l.bf16 %v13661_v52 }
0x14a0   : > { %v9636_v12 = vpack.i.bf16 %v4321_v57, %v4320_v61  ;;  %vm16125_vm0 = vcmask 1039360  }
0x14a1   : > { %9647 = vrot.lane.b32.xlu0 %v9646_v15, %s16055_s3  ;;  %9622 = vrot.lane.b32.xlu1 %v9621_v26, %s16055_s3  ;;  %v4060_v51 = vsel %vm16114_vm9, %v9335_v13, %v9384_v62  ;;  %v9339_v15 = vunpack.i.l.bf16 %v13647_v53  ;;  %vm16120_vm9 = vcmask 883712   ;;  %vm16127_vm5 = vmmov %vm16125_vm0 }
0x14a2   : > { %v13672_v41 = vpop.permute.xlu1 %9392  ;;  %v13674_v21 = vpop.permute.xlu0 %9347  ;;  %v9656_v28 = vpack.i.bf16 %v4060_v51, %v4059_v3  ;;  %vm16122_vm10 = vmmov %vm16120_vm9  ;;  %v9370_v3 = vunpack.i.h.bf16 %v13633_v43  ;;  %v9380_v43 = vunpack.i.h.bf16 %v13645_v2 }
0x14a3   : > { %v9394_v11 = vunpack.i.l.bf16 %v13672_v41  ;;  %v4103_v13 = vsel %vm16122_vm10, %v9339_v15, %v9340_v14  ;;  %vm16128_vm10 = vmmov %vm16124_vm6 }
0x14a5   : > { %9652 = vrot.lane.b32.xlu0 %v9651_v33, %s16055_s3  ;;  %9627 = vrot.lane.b32.xlu1 %v9626_v36, %s16055_s3  ;;  %v4058_v45 = vsel %vm16117_vm1, %v9394_v11, %v9334_v29  ;;  %vm16123_vm1 = vmmov %vm16120_vm9  ;;  %v9641_v11 = vpack.i.bf16 %v9320_v60, %v4319_v8  ;;  %v9345_v36 = vunpack.i.h.bf16 %v13661_v52 }
0x14a6   : > { %v13685_v30 = vpop.permute.xlu1 %9397  ;;  %v13687_v55 = vpop.permute.xlu0 %9352  ;;  %v9661_v40 = vpack.i.bf16 %v9384_v62, %v4058_v45 }
0x14a7   : > { %v9399_v38 = vunpack.i.l.bf16 %v13685_v30 }
0x14a9   : > { %9657 = vrot.lane.b32.xlu0 %v9656_v28, %s16055_s3  ;;  %9632 = vrot.lane.b32.xlu1 %v9631_v18, %s16055_s3  ;;  %v4104_v54 = vsel %vm16120_vm9, %v9340_v14, %v9399_v38  ;;  %vm16126_vm9 = vmmov %vm16124_vm6 }
0x14aa   : > { %v13698_v26 = vpop.permute.xlu1 %9407  ;;  %v13700_v35 = vpop.permute.xlu0 %9357  ;;  %v9666_v33 = vpack.i.bf16 %v4104_v54, %v4103_v13  ;;  %v4147_v52 = vsel %vm16126_vm9, %v9344_v58, %v9345_v36  ;;  %v9350_v13 = vunpack.i.h.bf16 %v13674_v21 }
0x14ab   : > { %v9409_v5 = vunpack.i.l.bf16 %v13698_v26 }
0x14ad   : > { %9662 = vrot.lane.b32.xlu0 %v9661_v40, %s16055_s3  ;;  %9637 = vrot.lane.b32.xlu1 %v9636_v12, %s16055_s3  ;;  %v4102_v62 = vsel %vm16123_vm1, %v9409_v5, %v9339_v15  ;;  %vm16129_vm1 = vmmov %vm16125_vm0 }
0x14ae   : > { %v13708_v53 = vpop.permute.xlu1 %9412  ;;  %v13710_v29 = vpop.permute.xlu0 %9362  ;;  %v9671_v45 = vpack.i.bf16 %v9399_v38, %v4102_v62 }
0x14af   : > { %v13714_v51 = vunpack.i.l.bf16 %v13708_v53 }
0x14b1   : > { %9667 = vrot.lane.b32.xlu0 %v9666_v33, %s16055_s3  ;;  %9642 = vrot.lane.b32.xlu1 %v9641_v11, %s16055_s3  ;;  %v13723_v61 = vsel %vm16124_vm6, %v9345_v36, %v13714_v51  ;;  %v9349_v33 = vunpack.i.l.bf16 %v13674_v21  ;;  %v9385_v11 = vunpack.i.h.bf16 %v13659_v42  ;;  %vm16130_vm6 = vcmask 867328  }
0x14b2   : > { %v9423_v27 = vpop.permute.xlu1 %9422  ;;  %v9373_v6 = vpop.permute.xlu0 %9372  ;;  %v9676_v38 = vpack.i.bf16 %v13723_v61, %v4147_v52  ;;  %v9415_v21 = vunpack.i.h.bf16 %v13708_v53  ;;  %v9395_v42 = vunpack.i.h.bf16 %v13672_v41 }
0x14b3   : > { %v9375_v28 = vunpack.i.h.bf16 %v9373_v6  ;;  %v9374_v18 = vunpack.i.l.bf16 %v9373_v6  ;;  %v9424_v60 = vunpack.i.l.bf16 %v9423_v27  ;;  %v9425_v36 = vunpack.i.h.bf16 %v9423_v27 }
0x14b5   : > { %v4018_v57 = vsel %vm16125_vm0, %v9370_v3, %v9374_v18  ;;  %9672 = vrot.lane.b32.xlu0 %v9671_v45, %s16055_s3  ;;  %v4019_v19 = vsel %vm16127_vm5, %v9374_v18, %v9375_v28  ;;  %v4146_v40 = vsel %vm16128_vm10, %v9424_v60, %v9344_v58  ;;  %v4017_v58 = vsel %vm16129_vm1, %v9380_v43, %v9370_v3  ;;  %vm16133_vm5 = vmmov %vm16130_vm6 }
0x14b6   : > { %v13729_v14 = vpop.permute.xlu1 %9427  ;;  %v9388_v15 = vpop.permute.xlu0 %9387  ;;  %v9726_v5 = vpack.i.bf16 %v4019_v19, %v4018_v57  ;;  %v9681_v6 = vpack.i.bf16 %v13714_v51, %v4146_v40  ;;  %v9731_v18 = vpack.i.bf16 %v9375_v28, %v4017_v58  ;;  %vm16131_vm0 = vcmask 1031168   ;;  %vm16134_vm1 = vmmov %vm16133_vm5 }
0x14b7   : > { %v9429_v54 = vunpack.i.l.bf16 %v13729_v14  ;;  %v9390_v12 = vunpack.i.h.bf16 %v9388_v15  ;;  %v9389_v8 = vunpack.i.l.bf16 %v9388_v15  ;;  %vm16132_vm9 = vmmov %vm16131_vm0  ;;  %v4191_v27 = vsel %vm16133_vm5, %v9349_v33, %v9350_v13 }
0x14b8   : > { %9727 = vrot.lane.b32.xlu1 %v9726_v5, %s16055_s3  ;;  %v13758_v15 = vsel %vm16128_vm10, %v9425_v36, %v9415_v21  ;;  %vm16137_vm5 = vcmask 719872  }
0x14b9   : > { %9677 = vrot.lane.b32.xlu0 %v9676_v38, %s16055_s3  ;;  %v4192_v45 = vsel %vm16130_vm6, %v9350_v13, %v9429_v54  ;;  %v4062_v57 = vsel %vm16131_vm0, %v9385_v11, %v9389_v8  ;;  %v4063_v19 = vsel %vm16132_vm9, %v9389_v8, %v9390_v12  ;;  %vm16135_vm6 = vmmov %vm16128_vm10  ;;  %vm16138_vm10 = vcmask 883712  }
0x14ba   : > { %v13739_v62 = vpop.permute.xlu1 %9437  ;;  %v13741_v2 = vpop.permute.xlu0 %9402  ;;  %v9686_v38 = vpack.i.bf16 %v4192_v45, %v4191_v27  ;;  %v9736_v58 = vpack.i.bf16 %v4063_v19, %v4062_v57  ;;  %vm16136_vm0 = vmmov %vm16135_vm6  ;;  %v9355_v45 = vunpack.i.h.bf16 %v13687_v55 }
0x14bb   : > { %v9439_v60 = vunpack.i.l.bf16 %v13739_v62  ;;  %v9405_v8 = vunpack.i.h.bf16 %v13741_v2  ;;  %v9404_v13 = vunpack.i.l.bf16 %v13741_v2 }
0x14bc   : > { %9732 = vrot.lane.b32.xlu1 %v9731_v18, %s16055_s3 }
0x14bd   : > { %9682 = vrot.lane.b32.xlu0 %v9681_v6, %s16055_s3  ;;  %v4190_v5 = vsel %vm16134_vm1, %v9439_v60, %v9349_v33  ;;  %v9354_v33 = vunpack.i.l.bf16 %v13687_v55  ;;  %vm16139_vm1 = vmmov %vm16138_vm10 }
0x14be   : > { %v13755_v3 = vpop.permute.xlu1 %9442  ;;  %v9418_v28 = vpop.permute.xlu0 %9417  ;;  %v9691_v27 = vpack.i.bf16 %v9429_v54, %v4190_v5 }
0x14bf   : > { %v13760_v43 = vunpack.i.h.bf16 %v9418_v28  ;;  %v9419_v53 = vunpack.i.l.bf16 %v9418_v28  ;;  %v9444_v41 = vunpack.i.l.bf16 %v13755_v3 }
0x14c0   : > { %9737 = vrot.lane.b32.xlu1 %v9736_v58, %s16055_s3 }
0x14c1   : > { %9687 = vrot.lane.b32.xlu0 %v9686_v38, %s16055_s3  ;;  %v7435_v6 = vpack.c.bf16 %v13760_v43, %v13714_v51  ;;  %v4150_v36 = vsel %vm16135_vm6, %v9415_v21, %v9419_v53  ;;  %v4151_v18 = vsel %vm16136_vm0, %v9419_v53, %v13760_v43  ;;  %v9400_v51 = vunpack.i.h.bf16 %v13685_v30  ;;  %vm16140_vm6 = vmmov %vm16137_vm5 }
0x14c2   : > { %v13775_v60 = vpop.permute.xlu1 %9452  ;;  %v13777_v57 = vpop.permute.xlu0 %9432  ;;  %v7363_v2 = vpack.c.bf16 %v4150_v36, %v4147_v52  ;;  %v7437_v19 = vpack.c.bf16 %v4151_v18, %v13723_v61  ;;  %v4061_v21 = vsel %vm16132_vm9, %v9395_v42, %v9385_v11  ;;  %v4236_v53 = vsel %vm16137_vm5, %v9355_v45, %v9444_v41  ;;  %vm16141_vm0 = vmmov %vm16137_vm5 }
0x14c3   : > { %7436 = vmatprep.subr.bf16.mxu1 %v7435_v6  ;;  %v9741_v28 = vpack.i.bf16 %v9390_v12, %v4061_v21  ;;  %v9454_v55 = vunpack.i.l.bf16 %v13775_v60  ;;  %v7365_v38 = vpack.c.bf16 %v13758_v15, %v4146_v40  ;;  %v4106_v58 = vsel %vm16138_vm10, %v9400_v51, %v9404_v13  ;;  %vm16142_vm9 = vmmov %vm16139_vm1 }
0x14c4   : > { %7364 = vmatprep.subr.bf16.mxu0 %v7363_v2  ;;  %7438 = vmatpush1.bf16.msra.mxu1 %v7437_v19  ;;  %v4107_v52 = vsel %vm16139_vm1, %v9404_v13, %v9405_v8  ;;  %v4235_v30 = vsel %vm16140_vm6, %v9354_v33, %v9355_v45  ;;  %v9410_v12 = vunpack.i.h.bf16 %v13698_v26  ;;  %v9360_v13 = vunpack.i.h.bf16 %v13700_v35 }
0x14c5   : > { %9692 = vrot.lane.b32.xlu0 %v9691_v27, %s16055_s3  ;;  %9742 = vrot.lane.b32.xlu1 %v9741_v28, %s16055_s3  ;;  %v9696_v11 = vpack.i.bf16 %v4236_v53, %v4235_v30  ;;  %v4234_v40 = vsel %vm16141_vm0, %v9454_v55, %v9354_v33  ;;  %v9746_v5 = vpack.i.bf16 %v4107_v52, %v4106_v58  ;;  %v9359_v6 = vunpack.i.l.bf16 %v13700_v35 }
0x14c6   : > { %7366 = vmatpush1.bf16.msra.mxu0 %v7365_v38  ;;  %v13790_v61 = vpop.permute.xlu1 %9457  ;;  %v13792_v54 = vpop.permute.xlu0 %9447  ;;  %v4105_v26 = vsel %vm16142_vm9, %v9410_v12, %v9400_v51  ;;  %v9701_v19 = vpack.i.bf16 %v9444_v41, %v4234_v40  ;;  %vm16143_vm5 = vcmask 711680   ;;  %v9756_v38 = vpack.i.bf16 %v4151_v18, %v4150_v36 }
0x14c7   : > { %v9459_v42 = vunpack.i.l.bf16 %v13790_v61  ;;  %v9751_v21 = vpack.i.bf16 %v9405_v8, %v4105_v26  ;;  %vm16144_vm10 = vmmov %vm16143_vm5  ;;  %v9435_v41 = vunpack.i.h.bf16 %v13777_v57  ;;  %v9434_v58 = vunpack.i.l.bf16 %v13777_v57 }
0x14c8   : > { %v4279_v28 = vsel %vm16144_vm10, %v9359_v6, %v9360_v13  ;;  %vm16145_vm1 = vmmov %vm16143_vm5  ;;  %v9365_v52 = vunpack.i.h.bf16 %v13710_v29  ;;  %v9364_v30 = vunpack.i.l.bf16 %v13710_v29  ;;  %v9430_v36 = vunpack.i.h.bf16 %v13729_v14 }
0x14c9   : > { %9697 = vrot.lane.b32.xlu0 %v9696_v11, %s16055_s3  ;;  %9747 = vrot.lane.b32.xlu1 %v9746_v5, %s16055_s3  ;;  %v4280_v33 = vsel %vm16143_vm5, %v9360_v13, %v9459_v42  ;;  %vm16146_vm6 = vcmask 703488   ;;  %v9761_v57 = vpack.i.bf16 %v13760_v43, %v13758_v15  ;;  %vm16147_vm0 = vcmask 867328  }
0x14ca   : > { %v13801_v45 = vpop.permute.xlu1 %9467  ;;  %v13803_v2 = vpop.permute.xlu0 %9462  ;;  %v9706_v55 = vpack.i.bf16 %v4280_v33, %v4279_v28  ;;  %v4194_v13 = vsel %vm16147_vm0, %v9430_v36, %v9434_v58  ;;  %vm16148_vm9 = vmmov %vm16147_vm0  ;;  %v9440_v14 = vunpack.i.h.bf16 %v13739_v62  ;;  %v9450_v15 = vunpack.i.h.bf16 %v13792_v54 }
0x14cb   : > { %v9469_v27 = vunpack.i.l.bf16 %v13801_v45  ;;  %v4195_v29 = vsel %vm16148_vm9, %v9434_v58, %v9435_v41  ;;  %vm16149_vm5 = vmmov %vm16146_vm6  ;;  %v9449_v43 = vunpack.i.l.bf16 %v13792_v54  ;;  %v4334_v58 = vld [vmem:[%s15218_s9] sm:$0xff] }
0x14cc   : > { %vm16150_vm10 = vmmov %vm16149_vm5 }
0x14cd   : > { %9702 = vrot.lane.b32.xlu0 %v9701_v19, %s16055_s3  ;;  %9752 = vrot.lane.b32.xlu1 %v9751_v21, %s16055_s3  ;;  %v4278_v51 = vsel %vm16145_vm1, %v9469_v27, %v9359_v6  ;;  %v4323_v6 = vsel %vm16149_vm5, %v9364_v30, %v9365_v52  ;;  %v9766_v21 = vpack.i.bf16 %v4195_v29, %v4194_v13  ;;  %v9445_v27 = vunpack.i.h.bf16 %v13755_v3  ;;  %vm16151_vm1 = vmmov %vm16147_vm0 }
0x14ce   : > { %v13811_v35 = vpop.permute.xlu1 %9472  ;;  %v13813_v53 = vpop.permute.xlu0 %9477  ;;  %v9711_v18 = vpack.i.bf16 %v9459_v42, %v4278_v51  ;;  %v4193_v28 = vsel %vm16151_vm1, %v9440_v14, %v9430_v36  ;;  %v9455_v3 = vunpack.i.h.bf16 %v13775_v60  ;;  %v9460_v36 = vunpack.i.h.bf16 %v13790_v61 }
0x14cf   : > { %v9474_v8 = vunpack.i.l.bf16 %v13811_v35  ;;  %v9771_v62 = vpack.i.bf16 %v9435_v41, %v4193_v28  ;;  %v9464_v41 = vunpack.i.l.bf16 %v13803_v2  ;;  %vm16155_vm5 = vcmask 711680  }
0x14d0   : > { %v9475_v29 = vunpack.i.h.bf16 %v13811_v35  ;;  %v9479_v61 = vunpack.i.l.bf16 %v13813_v53  ;;  %vm16157_vm1 = vmmov %vm16155_vm5 }
0x14d1   : > { %9707 = vrot.lane.b32.xlu0 %v9706_v55, %s16055_s3  ;;  %9757 = vrot.lane.b32.xlu1 %v9756_v38, %s16055_s3  ;;  %v4324_v40 = vsel %vm16146_vm6, %v9365_v52, %v9474_v8  ;;  %vm16152_vm6 = vcmask 719872  }
0x14d2   : > { %v13823_v12 = vpop.permute.xlu1 %9482  ;;  %v13825_v11 = vpop.permute.xlu0 %9487  ;;  %v9716_v42 = vpack.i.bf16 %v4324_v40, %v4323_v6  ;;  %v4238_v38 = vsel %vm16152_vm6, %v9445_v27, %v9449_v43  ;;  %vm16153_vm0 = vmmov %vm16152_vm6  ;;  %vm16158_vm6 = vcmask 703488  }
0x14d3   : > { %v9484_v5 = vunpack.i.l.bf16 %v13823_v12  ;;  %v4239_v51 = vsel %vm16153_vm0, %v9449_v43, %v9450_v15  ;;  %vm16154_vm9 = vmmov %vm16153_vm0  ;;  %v4326_v35 = vsel %vm16158_vm6, %v9475_v29, %v9479_v61 }
0x14d4   : > { %v9776_v52 = vpack.i.bf16 %v4239_v51, %v4238_v38  ;;  %vm16159_vm0 = vmmov %vm16158_vm6 }
0x14d5   : > { %9712 = vrot.lane.b32.xlu0 %v9711_v18, %s16055_s3  ;;  %9762 = vrot.lane.b32.xlu1 %v9761_v57, %s16055_s3  ;;  %v4322_v19 = vsel %vm16150_vm10, %v9484_v5, %v9364_v30  ;;  %v4237_v18 = vsel %vm16154_vm9, %v9455_v3, %v9445_v27  ;;  %v9470_v5 = vunpack.i.h.bf16 %v13801_v45  ;;  %v4282_v57 = vsel %vm16155_vm5, %v9460_v36, %v9464_v41  ;;  %vm16156_vm10 = vmmov %vm16155_vm5 }
0x14d6   : > { %v13837_v26 = vpop.permute.xlu0 %9497  ;;  %v9721_v55 = vpack.i.bf16 %v9474_v8, %v4322_v19  ;;  %v9465_v8 = vunpack.i.h.bf16 %v13803_v2  ;;  %v9781_v40 = vpack.i.bf16 %v9450_v15, %v4237_v18  ;;  %v4329_v2 = vld [vmem:[%s15217_s8 + $0x8] sm:$0xff]  ;;  %v9493_v6 = vpop.permute.xlu1 %9492  ;;  %v9489_v15 = vunpack.i.l.bf16 %v13825_v11 }
0x14d7   : > { %4913 = vmatprep.mubr.f32.mxu0 %v4329_v2  ;;  %5067 = vmatprep.mubr.f32.mxu1 %v4329_v2  ;;  %v4281_v45 = vsel %vm16157_vm1, %v9470_v5, %v9460_v36  ;;  %vm16160_vm9 = vcmask 875520  }
0x14d8   : > { %v4283_v60 = vsel %vm16156_vm10, %v9464_v41, %v9465_v8  ;;  %v9791_v43 = vpack.i.bf16 %v9465_v8, %v4281_v45  ;;  %vm16161_vm5 = vmmov %vm16160_vm9 }
0x14d9   : > { %9717 = vrot.lane.b32.xlu0 %v9716_v42, %s16055_s3  ;;  %9767 = vrot.lane.b32.xlu1 %v9766_v21, %s16055_s3  ;;  %v9786_v14 = vpack.i.bf16 %v4283_v60, %v4282_v57  ;;  %v9480_v42 = vunpack.i.h.bf16 %v13813_v53  ;;  %v9490_v21 = vunpack.i.h.bf16 %v13825_v11  ;;  %vm16162_vm10 = vmmov %vm16159_vm0 }
0x14da   : > { %v13845_v33 = vpop.permute.xlu0 %9502  ;;  %vm16164_vm1 = vmmov %vm16161_vm5 }
0x14db   : > { %v4327_v28 = vsel %vm16159_vm0, %v9479_v61, %v9480_v42  ;;  %v4603_v51 = vsel %vm16160_vm9, %v9489_v15, %v9490_v21  ;;  %vm16165_vm6 = vmmov %vm16164_vm1  ;;  %v16172_v31 = vunpack.i.h.bf16 %v13845_v33 }
0x14dc   : > { %v9796_v11 = vpack.i.bf16 %v4327_v28, %v4326_v35  ;;  %v9494_v28 = vunpack.i.l.bf16 %v9493_v6  ;;  %vm16166_vm0 = vmmov %vm16164_vm1 }
0x14dd   : > { %9722 = vrot.lane.b32.xlu0 %v9721_v55, %s16055_s3  ;;  %9772 = vrot.lane.b32.xlu1 %v9771_v62, %s16055_s3  ;;  %v9485_v55 = vunpack.i.h.bf16 %v13823_v12  ;;  %vm16167_vm9 = vmmov %vm16166_vm0 }
0x14de   : > { %v13853_v54 = vpop.permute.xlu0 %9507 }
0x14df   : > { %v4325_v8 = vsel %vm16162_vm10, %v9485_v55, %v9475_v29  ;;  %vm16171_vm10 = vmmov %vm16166_vm0 }
0x14e0   : > { %v9801_v36 = vpack.i.bf16 %v9480_v42, %v4325_v8  ;;  %v4602_v8 = vsel %vm16165_vm6, %v9494_v28, %v9489_v15  ;;  %v9500_v28 = vunpack.i.h.bf16 %v13837_v26  ;;  %vm16174_vm6 = vmmov %vm16166_vm0 }
0x14e1   : > { %4338 = vperm.xlu0 %8044, %v4334_v58   ;;  %9777 = vrot.lane.b32.xlu1 %v9776_v52, %s16055_s3 }
0x14e2   : > { %v13862_v30 = vpop.permute.xlu0 %9512 }
0x14e3   : > { %v16175_v46 = vunpack.i.h.bf16 %v13862_v30 }
0x14e5   : > { %9782 = vrot.lane.b32.xlu1 %v9781_v40, %s16055_s3  ;;  %v4335_v40 = vld [vmem:[%s15218_s9 + $0x8] sm:$0xff] }
0x14e6   : > { %v13870_v13 = vpop.permute.xlu0 %9517 }
0x14e7   : > { %v9520_v20 = vunpack.i.h.bf16 %v13870_v13 }
0x14e9   : > { %9787 = vrot.lane.b32.xlu1 %v9786_v14, %s16055_s3 }
0x14ea   : > { %v13880_v19 = vpop.permute.xlu0 %9522  ;;  %v9568_v27 = vpop.permute.xlu1 %9567 }
0x14eb   : > { %v9570_v62 = vunpack.i.h.bf16 %v9568_v27  ;;  %v9569_v38 = vunpack.i.l.bf16 %v9568_v27  ;;  %v9495_v27 = vunpack.i.h.bf16 %v9493_v6 }
0x14ed   : > { %9792 = vrot.lane.b32.xlu1 %v9791_v43, %s16055_s3  ;;  %v4606_v58 = vsel %vm16161_vm5, %v9569_v38, %v9570_v62  ;;  %vm16170_vm5 = vmmov %vm16166_vm0 }
0x14ee   : > { %v13888_v53 = vpop.permute.xlu0 %9527  ;;  %v13892_v3 = vpop.permute.xlu1 %9577  ;;  %v7367_v52 = vpack.c.bf16 %v4606_v58, %v4603_v51 }
0x14ef   : > { %v9580_v34 = vunpack.i.h.bf16 %v13892_v3  ;;  %v9530_v47 = vunpack.i.h.bf16 %v13888_v53  ;;  %v9529_v63 = vunpack.i.l.bf16 %v13888_v53 }
0x14f0   : > { %7368 = vmatprep.subr.bf16.mxu0 %v7367_v52  ;;  %v4604_v52 = vsel %vm16164_vm1, %v9490_v21, %v9495_v27  ;;  %vm16173_vm1 = vmmov %vm16166_vm0 }
0x14f1   : > { %9797 = vrot.lane.b32.xlu1 %v9796_v11, %s16055_s3 }
0x14f2   : > { %v13896_v12 = vpop.permute.xlu0 %9532  ;;  %v13898_v41 = vpop.permute.xlu1 %9582 }
0x14f3   : > { %v9585_v24 = vunpack.i.h.bf16 %v13898_v41 }
0x14f5   : > { %9802 = vrot.lane.b32.xlu1 %v9801_v36, %s16055_s3 }
0x14f7   : > { %v13901_v18 = vpop.permute.xlu0 %9537  ;;  %v13906_v5 = vpop.permute.xlu1 %9587 }
0x14f8   : > { %v9589_v32 = vunpack.i.l.bf16 %v13906_v5 }
0x14f9   : > { %4343 = vperm.xlu1 %8185, %v4335_v40  }
0x14fb   : > { %v13908_v57 = vpop.permute.xlu0 %9542  ;;  %v13910_v60 = vpop.permute.xlu1 %9592 }
0x14ff   : > { %v13912_v2 = vpop.permute.xlu0 %9547  ;;  %v13914_v29 = vpop.permute.xlu1 %9597 }
0x1503   : > { %v13916_v61 = vpop.permute.xlu0 %9552  ;;  %v13918_v14 = vpop.permute.xlu1 %9602 }
0x1507   : > { %v13920_v45 = vpop.permute.xlu0 %9557  ;;  %v13922_v42 = vpop.permute.xlu1 %9607 }
0x150b   : > { %v13924_v43 = vpop.permute.xlu0 %9562  ;;  %v13926_v35 = vpop.permute.xlu1 %9612 }
0x150c   : > { %16163 = vst [vmem:[#allocation55_spill] sm:$0xff] %v13924_v43 }
0x150f   : > { %v9573_v55 = vpop.permute.xlu0 %9572  ;;  %v13928_v11 = vpop.permute.xlu1 %9617 }
0x1510   : > { %v9575_v51 = vunpack.i.h.bf16 %v9573_v55  ;;  %v9574_v58 = vunpack.i.l.bf16 %v9573_v55 }
0x1512   : > { %v4605_v36 = vsel %vm16166_vm0, %v9574_v58, %v9569_v38  ;;  %v4607_v40 = vsel %vm16167_vm9, %v9570_v62, %v9575_v51  ;;  %v7439_v59 = vpack.c.bf16 %v9575_v51, %v9495_v27  ;;  %v9510_v58 = vunpack.i.h.bf16 %v13853_v54  ;;  %vm16176_vm9 = vmmov %vm16166_vm0 }
0x1513   : > { %v13934_v48 = vpop.permute.xlu0 %9647  ;;  %v7369_v1 = vpack.c.bf16 %v4605_v36, %v4602_v8  ;;  %v7441_v49 = vpack.c.bf16 %v4607_v40, %v4604_v52  ;;  %v13936_v25 = vpop.permute.xlu1 %9622  ;;  %v9509_v52 = vunpack.i.l.bf16 %v13853_v54  ;;  %v9514_v36 = vunpack.i.l.bf16 %v13862_v30 }
0x1514   : > { %7440 = vmatprep.subr.bf16.mxu1 %v7439_v59  ;;  %v9499_v59 = vunpack.i.l.bf16 %v13837_v26  ;;  %v9519_v26 = vunpack.i.l.bf16 %v13870_v13  ;;  %v9524_v54 = vunpack.i.l.bf16 %v13880_v19  ;;  %v9650_v39 = vunpack.i.h.bf16 %v13934_v48 }
0x1515   : > { %7370 = vmatpush1.bf16.msra.mxu0 %v7369_v1  ;;  %7442 = vmatpush1.bf16.msra.mxu1 %v7441_v49  ;;  %v9504_v49 = vunpack.i.l.bf16 %v13845_v33  ;;  %v9579_v1 = vunpack.i.l.bf16 %v13892_v3  ;;  %v9649_v13 = vunpack.i.l.bf16 %v13934_v48  ;;  %v13981_v3 = vsel %vm16173_vm1, %v9500_v28, %v16172_v31  ;;  %vm16179_vm1 = vmmov %vm16166_vm0 }
0x1516   : > { %v4615_v8 = vsel %vm16171_vm10, %v9499_v59, %v9500_v28  ;;  %v13992_v53 = vsel %vm16176_vm9, %v9509_v52, %v9510_v58  ;;  %vm16178_vm10 = vmmov %vm16166_vm0  ;;  %v14001_v28 = vsel %vm16179_vm1, %v9524_v54, %v9519_v26  ;;  %v9584_v54 = vunpack.i.l.bf16 %v13898_v41 }
0x1517   : > { %v13938_v6 = vpop.permute.xlu0 %9652  ;;  %v13940_v55 = vpop.permute.xlu1 %9627  ;;  %v13969_v9 = vsel %vm16170_vm5, %v9504_v49, %v9499_v59  ;;  %v13984_v49 = vsel %vm16174_vm6, %v9514_v36, %v9509_v52  ;;  %v13989_v59 = vsel %vm16166_vm0, %v9510_v58, %v16175_v46  ;;  %vm16177_vm5 = vmmov %vm16166_vm0  ;;  %v13998_v31 = vsel %vm16178_vm10, %v9519_v26, %v9520_v20 }
0x1518   : > { %v4618_v4 = vsel %vm16177_vm5, %v9579_v1, %v9580_v34  ;;  %v16180_v36 = vunpack.i.h.bf16 %v13880_v19  ;;  %vm16181_vm6 = vmmov %vm16166_vm0  ;;  %v9655_v58 = vunpack.i.h.bf16 %v13938_v6  ;;  %v9654_v52 = vunpack.i.l.bf16 %v13938_v6 }
0x1519   : > { %vm16182_vm9 = vmmov %vm16166_vm0  ;;  %v9534_v26 = vunpack.i.l.bf16 %v13896_v12  ;;  %v9590_v6 = vunpack.i.h.bf16 %v13906_v5 }
0x151a   : > { %v14006_v46 = vsel %vm16181_vm6, %v9520_v20, %v16180_v36  ;;  %vm16183_vm5 = vmmov %vm16166_vm0  ;;  %v7375_v36 = vpack.c.bf16 %v4618_v4, %v4615_v8 }
0x151b   : > { %v13942_v21 = vpop.permute.xlu0 %9657  ;;  %v13944_v15 = vpop.permute.xlu1 %9632  ;;  %v14014_v50 = vsel %vm16183_vm5, %v9529_v63, %v9530_v47  ;;  %vm16184_vm10 = vmmov %vm16166_vm0 }
0x151c   : > { %v4608_v7 = vsel %vm16184_vm10, %v9654_v52, %v9649_v13  ;;  %vm16185_vm1 = vmmov %vm16166_vm0  ;;  %v9660_v17 = vunpack.i.h.bf16 %v13942_v21 }
0x151d   : > { %v4610_v0 = vsel %vm16185_vm1, %v9650_v39, %v9655_v58  ;;  %vm16186_vm6 = vmmov %vm16166_vm0 }
0x151e   : > { %vm16188_vm5 = vmmov %vm16166_vm0 }
0x151f   : > { %v13946_v38 = vpop.permute.xlu0 %9662  ;;  %v13948_v62 = vpop.permute.xlu1 %9637  ;;  %v4617_v5 = vsel %vm16188_vm5, %v9584_v54, %v9579_v1  ;;  %vm16189_vm10 = vmmov %vm16166_vm0  ;;  %v9539_v1 = vunpack.i.l.bf16 %v13901_v18  ;;  %v9595_v54 = vunpack.i.h.bf16 %v13910_v60 }
0x1520   : > { %16168 = vst [vmem:[#allocation56_spill] sm:$0xff] %v13948_v62  ;;  %v4619_v52 = vsel %vm16189_vm10, %v9580_v34, %v9585_v24  ;;  %vm16191_vm1 = vmmov %vm16166_vm0  ;;  %v9540_v34 = vunpack.i.h.bf16 %v13901_v18 }
0x1521   : > { %vm16195_vm5 = vmmov %vm16166_vm0 }
0x1522   : > { %vm16196_vm10 = vmmov %vm16166_vm0 }
0x1523   : > { %v13950_v27 = vpop.permute.xlu0 %9667  ;;  %v13962_v40 = vpop.permute.xlu1 %9642 }
0x1524   : > { %16169 = vst [vmem:[#allocation57_spill] sm:$0xff] %v13962_v40  ;;  %v9659_v40 = vunpack.i.l.bf16 %v13942_v21  ;;  %v16190_v21 = vunpack.i.h.bf16 %v13845_v33 }
0x1526   : > { %v7447_v62 = vpack.c.bf16 %v9585_v24, %v16190_v21  ;;  %v4621_v24 = vsel %vm16166_vm0, %v9659_v40, %v9660_v17 }
0x1527   : > { %v13956_v51 = vpop.permute.xlu0 %9672 }
0x152a   : > { %v9728_v22 = vpop.permute.xlu1 %9727 }
0x152b   : > { %v13994_v16 = vpop.permute.xlu0 %9677  ;;  %v9730_v48 = vunpack.i.h.bf16 %v9728_v22  ;;  %v9729_v10 = vunpack.i.l.bf16 %v9728_v22  ;;  %v4609_v22 = vsel %vm16166_vm0, %v9649_v13, %v9650_v39 }
0x152d   : > { %v4612_v44 = vsel %vm16182_vm9, %v9729_v10, %v9730_v48  ;;  %vm16187_vm9 = vmmov %vm16166_vm0 }
0x152e   : > { %v9733_v37 = vpop.permute.xlu1 %9732  ;;  %v7371_v20 = vpack.c.bf16 %v4612_v44, %v4609_v22 }
0x152f   : > { %v9735_v23 = vunpack.i.h.bf16 %v9733_v37  ;;  %v9734_v56 = vunpack.i.l.bf16 %v9733_v37  ;;  %v14025_v43 = vpop.permute.xlu0 %9682  ;;  %v14030_v37 = vsel %vm16187_vm9, %v9534_v26, %v9529_v63  ;;  %v4630_v63 = vsel %vm16191_vm1, %v9589_v32, %v9590_v6  ;;  %vm16194_vm9 = vmmov %vm16166_vm0 }
0x1530   : > { %7372 = vmatprep.subr.bf16.mxu0 %v7371_v20  ;;  %vm16197_vm1 = vmmov %vm16166_vm0 }
0x1531   : > { %v4611_v44 = vsel %vm16186_vm6, %v9734_v56, %v9729_v10  ;;  %v4613_v4 = vsel %vm16166_vm0, %v9730_v48, %v9735_v23  ;;  %v7443_v41 = vpack.c.bf16 %v9735_v23, %v9655_v58  ;;  %v9594_v56 = vunpack.i.l.bf16 %v13910_v60  ;;  %vm16193_vm6 = vmmov %vm16166_vm0 }
0x1532   : > { %v9738_v8 = vpop.permute.xlu1 %9737  ;;  %v7373_v13 = vpack.c.bf16 %v4611_v44, %v4608_v7  ;;  %v7445_v39 = vpack.c.bf16 %v4613_v4, %v4610_v0  ;;  %v9665_v23 = vunpack.i.h.bf16 %v13946_v38  ;;  %v9664_v10 = vunpack.i.l.bf16 %v13946_v38 }
0x1533   : > { %v9740_v22 = vunpack.i.h.bf16 %v9738_v8  ;;  %v9739_v20 = vunpack.i.l.bf16 %v9738_v8  ;;  %7444 = vmatprep.subr.bf16.mxu1 %v7443_v41  ;;  %v16192_v0 = vunpack.i.h.bf16 %v13896_v12  ;;  %v7377_v48 = vpack.c.bf16 %v4617_v5, %v13969_v9 }
0x1534   : > { %7374 = vmatpush1.bf16.msra.mxu0 %v7373_v13  ;;  %7446 = vmatpush1.bf16.msra.mxu1 %v7445_v39  ;;  %v7449_v58 = vpack.c.bf16 %v4619_v52, %v13981_v3  ;;  %v4620_v41 = vsel %vm16196_vm10, %v9664_v10, %v9659_v40  ;;  %v4622_v8 = vsel %vm16197_vm1, %v9660_v17, %v9665_v23  ;;  %v9670_v13 = vunpack.i.h.bf16 %v13950_v27  ;;  %vm16202_vm10 = vmmov %vm16166_vm0 }
0x1535   : > { %v14043_v7 = vsel %vm16193_vm6, %v9530_v47, %v16192_v0  ;;  %7376 = vmatprep.subr.bf16.mxu0 %v7375_v36  ;;  %7448 = vmatprep.subr.bf16.mxu1 %v7447_v62  ;;  %v4624_v33 = vsel %vm16194_vm9, %v9739_v20, %v9740_v22  ;;  %v14052_v47 = vpop.permute.xlu0 %9687  ;;  %v7383_v62 = vpack.c.bf16 %v4630_v63, %v13992_v53  ;;  %v9669_v9 = vunpack.i.l.bf16 %v13950_v27  ;;  %vm16198_vm6 = vmmov %vm16166_vm0 }
0x1536   : > { %v7379_v26 = vpack.c.bf16 %v4624_v33, %v4621_v24  ;;  %v4629_v36 = vsel %vm16195_vm5, %v9594_v56, %v9589_v32  ;;  %v9600_v53 = vunpack.i.h.bf16 %v13914_v29  ;;  %v9599_v32 = vunpack.i.l.bf16 %v13914_v29  ;;  %vm16199_vm9 = vmmov %vm16166_vm0 }
0x1537   : > { %v9743_v38 = vpop.permute.xlu1 %9742  ;;  %v4631_v17 = vsel %vm16199_vm9, %v9590_v6, %v9595_v54  ;;  %v16200_v27 = vunpack.i.h.bf16 %v13862_v30  ;;  %vm16201_vm5 = vmmov %vm16166_vm0  ;;  %v9544_v6 = vunpack.i.l.bf16 %v13908_v57  ;;  %v7385_v30 = vpack.c.bf16 %v4629_v36, %v13984_v49 }
0x1538   : > { %v9745_v44 = vunpack.i.h.bf16 %v9743_v38  ;;  %v9744_v4 = vunpack.i.l.bf16 %v9743_v38  ;;  %7378 = vmatpush1.bf16.msra.mxu0 %v7377_v48  ;;  %7450 = vmatpush1.bf16.msra.mxu1 %v7449_v58  ;;  %v14075_v29 = vsel %vm16201_vm5, %v9539_v1, %v9540_v34  ;;  %v4633_v0 = vsel %vm16202_vm10, %v9669_v9, %v9670_v13  ;;  %vm16203_vm1 = vmmov %vm16166_vm0 }
0x1539   : > { %7380 = vmatprep.subr.bf16.mxu0 %v7379_v26  ;;  %v7455_v10 = vpack.c.bf16 %v9595_v54, %v16200_v27  ;;  %v14078_v63 = vpop.permute.xlu0 %9692  ;;  %v9604_v24 = vunpack.i.l.bf16 %v13918_v14  ;;  %v7457_v38 = vpack.c.bf16 %v4631_v17, %v13989_v59  ;;  %v9605_v26 = vunpack.i.h.bf16 %v13918_v14  ;;  %vm16205_vm9 = vmmov %vm16166_vm0 }
0x153a   : > { %v4623_v60 = vsel %vm16198_vm6, %v9744_v4, %v9739_v20  ;;  %v4625_v3 = vsel %vm16166_vm0, %v9740_v22, %v9745_v44  ;;  %v7451_v5 = vpack.c.bf16 %v9745_v44, %v9665_v23  ;;  %v9545_v20 = vunpack.i.h.bf16 %v13908_v57  ;;  %vm16204_vm6 = vmmov %vm16166_vm0 }
0x153b   : > { %v9748_v39 = vpop.permute.xlu1 %9747  ;;  %v7381_v40 = vpack.c.bf16 %v4623_v60, %v4620_v41  ;;  %v7453_v52 = vpack.c.bf16 %v4625_v3, %v4622_v8  ;;  %v9675_v22 = vunpack.i.h.bf16 %v13956_v51  ;;  %v9674_v23 = vunpack.i.l.bf16 %v13956_v51  ;;  %vm16206_vm5 = vmmov %vm16166_vm0 }
0x153c   : > { %v9750_v21 = vunpack.i.h.bf16 %v9748_v39  ;;  %v9749_v56 = vunpack.i.l.bf16 %v9748_v39  ;;  %7452 = vmatprep.subr.bf16.mxu1 %v7451_v5  ;;  %v4642_v58 = vsel %vm16204_vm6, %v9599_v32, %v9600_v53  ;;  %v9610_v54 = vunpack.i.h.bf16 %v13922_v42  ;;  %vm16207_vm10 = vmmov %vm16166_vm0 }
0x153d   : > { %7382 = vmatpush1.bf16.msra.mxu0 %v7381_v40  ;;  %7454 = vmatpush1.bf16.msra.mxu1 %v7453_v52  ;;  %v9609_v49 = vunpack.i.l.bf16 %v13922_v42  ;;  %v4634_v36 = vsel %vm16205_vm9, %v9670_v13, %v9675_v22  ;;  %v9680_v41 = vunpack.i.h.bf16 %v13994_v16  ;;  %v9679_v59 = vunpack.i.l.bf16 %v13994_v16  ;;  %vm16209_vm6 = vmmov %vm16166_vm0  ;;  %v14098_v52 = vpop.permute.xlu0 %9697 }
0x153e   : > { %7384 = vmatprep.subr.bf16.mxu0 %v7383_v62  ;;  %7456 = vmatprep.subr.bf16.mxu1 %v7455_v10  ;;  %v4636_v51 = vsel %vm16203_vm1, %v9749_v56, %v9750_v21  ;;  %v4632_v62 = vsel %vm16166_vm0, %v9674_v23, %v9669_v9  ;;  %vm16208_vm1 = vmmov %vm16166_vm0  ;;  %v7391_v9 = vpack.c.bf16 %v4642_v58, %v13998_v31  ;;  %v16210_v16 = vunpack.i.h.bf16 %v13880_v19 }
0x153f   : > { %v9753_v33 = vpop.permute.xlu1 %9752  ;;  %v7387_v48 = vpack.c.bf16 %v4636_v51, %v4633_v0  ;;  %v4641_v3 = vsel %vm16208_vm1, %v9604_v24, %v9599_v32  ;;  %v4643_v13 = vsel %vm16209_vm6, %v9600_v53, %v9605_v26  ;;  %v9685_v10 = vunpack.i.h.bf16 %v14025_v43  ;;  %vm16211_vm9 = vmmov %vm16166_vm0 }
0x1540   : > { %v9755_v44 = vunpack.i.h.bf16 %v9753_v33  ;;  %v9754_v4 = vunpack.i.l.bf16 %v9753_v33  ;;  %v9684_v32 = vunpack.i.l.bf16 %v14025_v43  ;;  %v4654_v31 = vsel %vm16166_vm0, %v9609_v49, %v9610_v54  ;;  %vm16214_vm1 = vmmov %vm16166_vm0 }
0x1541   : > { %7386 = vmatpush1.bf16.msra.mxu0 %v7385_v30  ;;  %7458 = vmatpush1.bf16.msra.mxu1 %v7457_v38  ;;  %v14111_v53 = vsel %vm16211_vm9, %v9544_v6, %v9539_v1  ;;  %v9550_v19 = vunpack.i.h.bf16 %v13912_v2  ;;  %v9549_v43 = vunpack.i.l.bf16 %v13912_v2  ;;  %v7393_v0 = vpack.c.bf16 %v4641_v3, %v14001_v28  ;;  %vm16215_vm6 = vmmov %vm16166_vm0 }
0x1542   : > { %v4635_v8 = vsel %vm16206_vm5, %v9754_v4, %v9749_v56  ;;  %v4637_v14 = vsel %vm16207_vm10, %v9750_v21, %v9755_v44  ;;  %7388 = vmatprep.subr.bf16.mxu0 %v7387_v48  ;;  %v7459_v60 = vpack.c.bf16 %v9755_v44, %v9675_v22  ;;  %v7463_v56 = vpack.c.bf16 %v9605_v26, %v16210_v16  ;;  %vm16212_vm5 = vmmov %vm16166_vm0 }
0x1543   : > { %v9758_v5 = vpop.permute.xlu1 %9757  ;;  %v7389_v39 = vpack.c.bf16 %v4635_v8, %v4632_v62  ;;  %v7461_v40 = vpack.c.bf16 %v4637_v14, %v4634_v36  ;;  %v9614_v21 = vunpack.i.l.bf16 %v13926_v35  ;;  %v4645_v22 = vsel %vm16212_vm5, %v9679_v59, %v9680_v41  ;;  %vm16213_vm10 = vmmov %vm16166_vm0 }
0x1544   : > { %v9760_v17 = vunpack.i.h.bf16 %v9758_v5  ;;  %v9759_v27 = vunpack.i.l.bf16 %v9758_v5  ;;  %7460 = vmatprep.subr.bf16.mxu1 %v7459_v60  ;;  %v7465_v51 = vpack.c.bf16 %v4643_v13, %v14006_v46  ;;  %v9615_v33 = vunpack.i.h.bf16 %v13926_v35  ;;  %v14126_v46 = vpop.permute.xlu0 %9702  ;;  %vm16216_vm9 = vmmov %vm16166_vm0 }
0x1545   : > { %7390 = vmatpush1.bf16.msra.mxu0 %v7389_v39  ;;  %7462 = vmatpush1.bf16.msra.mxu1 %v7461_v40  ;;  %v7399_v38 = vpack.c.bf16 %v4654_v31, %v14014_v50  ;;  %v4653_v48 = vsel %vm16214_vm1, %v9614_v21, %v9609_v49  ;;  %v4644_v58 = vsel %vm16215_vm6, %v9684_v32, %v9679_v59  ;;  %v9690_v44 = vunpack.i.h.bf16 %v14052_v47  ;;  %vm16217_vm5 = vmmov %vm16166_vm0 }
0x1546   : > { %7392 = vmatprep.subr.bf16.mxu0 %v7391_v9  ;;  %7464 = vmatprep.subr.bf16.mxu1 %v7463_v56  ;;  %v4648_v23 = vsel %vm16213_vm10, %v9759_v27, %v9760_v17  ;;  %v4646_v26 = vsel %vm16166_vm0, %v9680_v41, %v9685_v10  ;;  %v9689_v28 = vunpack.i.l.bf16 %v14052_v47  ;;  %v9620_v49 = vunpack.i.h.bf16 %v13928_v11  ;;  %vm16218_vm10 = vmmov %vm16166_vm0 }
0x1547   : > { %v9763_v30 = vpop.permute.xlu1 %9762  ;;  %v7395_v24 = vpack.c.bf16 %v4648_v23, %v4645_v22  ;;  %v9619_v62 = vunpack.i.l.bf16 %v13928_v11  ;;  %v4655_v8 = vsel %vm16218_vm10, %v9610_v54, %v9615_v33  ;;  %v16219_v60 = vunpack.i.h.bf16 %v13896_v12  ;;  %vm16220_vm1 = vmmov %vm16166_vm0 }
0x1548   : > { %v9765_v1 = vunpack.i.h.bf16 %v9763_v30  ;;  %v9764_v6 = vunpack.i.l.bf16 %v9763_v30  ;;  %v14142_v5 = vsel %vm16220_vm1, %v9540_v34, %v9545_v20  ;;  %v9695_v11 = vunpack.i.h.bf16 %v14078_v63  ;;  %vm16221_vm6 = vmmov %vm16166_vm0  ;;  %v14162_v56 = vpop.permute.xlu0 %9707 }
0x1549   : > { %7394 = vmatpush1.bf16.msra.mxu0 %v7393_v0  ;;  %7466 = vmatpush1.bf16.msra.mxu1 %v7465_v51  ;;  %v7471_v3 = vpack.c.bf16 %v9615_v33, %v16219_v60  ;;  %v9694_v39 = vunpack.i.l.bf16 %v14078_v63  ;;  %v14151_v12 = vsel %vm16221_vm6, %v9549_v43, %v9550_v19  ;;  %v9555_v42 = vunpack.i.h.bf16 %v13916_v61  ;;  %vm16224_vm10 = vmmov %vm16166_vm0 }
0x154a   : > { %v4647_v35 = vsel %vm16216_vm9, %v9764_v6, %v9759_v27  ;;  %v4649_v4 = vsel %vm16217_vm5, %v9760_v17, %v9765_v1  ;;  %7396 = vmatprep.subr.bf16.mxu0 %v7395_v24  ;;  %v7467_v50 = vpack.c.bf16 %v9765_v1, %v9685_v10  ;;  %v7401_v18 = vpack.c.bf16 %v4653_v48, %v14030_v37  ;;  %vm16222_vm9 = vmmov %vm16166_vm0 }
0x154b   : > { %v9768_v36 = vpop.permute.xlu1 %9767  ;;  %v7397_v41 = vpack.c.bf16 %v4647_v35, %v4644_v58  ;;  %v7469_v59 = vpack.c.bf16 %v4649_v4, %v4646_v26  ;;  %v4657_v34 = vsel %vm16166_vm0, %v9689_v28, %v9690_v44  ;;  %v9624_v63 = vunpack.i.l.bf16 %v13936_v25  ;;  %vm16223_vm5 = vmmov %vm16166_vm0 }
0x154c   : > { %v9770_v47 = vunpack.i.h.bf16 %v9768_v36  ;;  %v9769_v14 = vunpack.i.l.bf16 %v9768_v36  ;;  %7468 = vmatprep.subr.bf16.mxu1 %v7467_v50  ;;  %v7473_v9 = vpack.c.bf16 %v4655_v8, %v14043_v7  ;;  %v4666_v17 = vsel %vm16223_vm5, %v9619_v62, %v9620_v49  ;;  %vm16225_vm1 = vmmov %vm16166_vm0  ;;  %v14182_v35 = vpop.permute.xlu0 %9712 }
0x154d   : > { %7398 = vmatpush1.bf16.msra.mxu0 %v7397_v41  ;;  %7470 = vmatpush1.bf16.msra.mxu1 %v7469_v59  ;;  %v9625_v27 = vunpack.i.h.bf16 %v13936_v25  ;;  %v9630_v16 = vunpack.i.h.bf16 %v13940_v55  ;;  %v9629_v10 = vunpack.i.l.bf16 %v13940_v55  ;;  %v4656_v32 = vsel %vm16224_vm10, %v9694_v39, %v9689_v28  ;;  %vm16226_vm6 = vmmov %vm16166_vm0 }
0x154e   : > { %7400 = vmatprep.subr.bf16.mxu0 %v7399_v38  ;;  %7472 = vmatprep.subr.bf16.mxu1 %v7471_v3  ;;  %v4660_v54 = vsel %vm16222_vm9, %v9769_v14, %v9770_v47  ;;  %v4658_v31 = vsel %vm16225_vm1, %v9690_v44, %v9695_v11  ;;  %v9700_v22 = vunpack.i.h.bf16 %v14098_v52  ;;  %v9699_v7 = vunpack.i.l.bf16 %v14098_v52  ;;  %vm16227_vm9 = vmmov %vm16166_vm0 }
0x154f   : > { %v9773_v40 = vpop.permute.xlu1 %9772  ;;  %v7403_v13 = vpack.c.bf16 %v4660_v54, %v4657_v34  ;;  %v4665_v0 = vsel %vm16227_vm9, %v9624_v63, %v9619_v62  ;;  %v7407_v33 = vpack.c.bf16 %v4666_v17, %v14075_v29  ;;  %vm16228_vm5 = vmmov %vm16166_vm0  ;;  %v7479_v52 = vpack.c.bf16 %v9625_v27, %v9545_v20  ;;  %v16237_v63 = vld [vmem:[#allocation56_spill] sm:$0xff] }
0x1550   : > { %v9775_v21 = vunpack.i.h.bf16 %v9773_v40  ;;  %v9774_v37 = vunpack.i.l.bf16 %v9773_v40  ;;  %v4667_v1 = vsel %vm16228_vm5, %v9620_v49, %v9625_v27  ;;  %v9634_v48 = vunpack.i.l.bf16 %v13944_v15  ;;  %vm16229_vm10 = vmmov %vm16166_vm0 }
0x1551   : > { %7402 = vmatpush1.bf16.msra.mxu0 %v7401_v18  ;;  %7474 = vmatpush1.bf16.msra.mxu1 %v7473_v9  ;;  %v9705_v58 = vunpack.i.h.bf16 %v14126_v46  ;;  %v9704_v26 = vunpack.i.l.bf16 %v14126_v46  ;;  %v4678_v44 = vsel %vm16229_vm10, %v9629_v10, %v9630_v16  ;;  %v9554_v29 = vunpack.i.l.bf16 %v13916_v61  ;;  %vm16230_vm1 = vmmov %vm16166_vm0  ;;  %v16243_v61 = vld [vmem:[#allocation57_spill] sm:$0xff] }
0x1552   : > { %v4659_v25 = vsel %vm16226_vm6, %v9774_v37, %v9769_v14  ;;  %v4661_v23 = vsel %vm16166_vm0, %v9770_v47, %v9775_v21  ;;  %7404 = vmatprep.subr.bf16.mxu0 %v7403_v13  ;;  %v7475_v30 = vpack.c.bf16 %v9775_v21, %v9695_v11  ;;  %v9560_v28 = vunpack.i.h.bf16 %v13920_v45  ;;  %vm16231_vm6 = vmmov %vm16166_vm0  ;;  %v14203_v13 = vpop.permute.xlu0 %9717 }
0x1553   : > { %v9778_v51 = vpop.permute.xlu1 %9777  ;;  %v7405_v55 = vpack.c.bf16 %v4659_v25, %v4656_v32  ;;  %v7477_v24 = vpack.c.bf16 %v4661_v23, %v4658_v31  ;;  %v4669_v57 = vsel %vm16230_vm1, %v9699_v7, %v9700_v22  ;;  %v9635_v4 = vunpack.i.h.bf16 %v13944_v15  ;;  %vm16232_vm9 = vmmov %vm16166_vm0 }
0x1554   : > { %v9780_v6 = vunpack.i.h.bf16 %v9778_v51  ;;  %v9779_v38 = vunpack.i.l.bf16 %v9778_v51  ;;  %7476 = vmatprep.subr.bf16.mxu1 %v7475_v30  ;;  %v7409_v46 = vpack.c.bf16 %v4665_v0, %v14111_v53  ;;  %v7481_v49 = vpack.c.bf16 %v4667_v1, %v14142_v5  ;;  %vm16233_vm5 = vmmov %vm16166_vm0 }
0x1555   : > { %7406 = vmatpush1.bf16.msra.mxu0 %v7405_v55  ;;  %7478 = vmatpush1.bf16.msra.mxu1 %v7477_v24  ;;  %v9559_v36 = vunpack.i.l.bf16 %v13920_v45  ;;  %v7415_v8 = vpack.c.bf16 %v4678_v44, %v14151_v12  ;;  %v4677_v47 = vsel %vm16166_vm0, %v9634_v48, %v9629_v10  ;;  %v4668_v14 = vsel %vm16232_vm9, %v9704_v26, %v9699_v7  ;;  %vm16234_vm10 = vmmov %vm16166_vm0  ;;  %v16239_v10 = vld [vmem:[#allocation55_spill] sm:$0xff] }
0x1556   : > { %7408 = vmatprep.subr.bf16.mxu0 %v7407_v33  ;;  %7480 = vmatprep.subr.bf16.mxu1 %v7479_v52  ;;  %v4672_v20 = vsel %vm16231_vm6, %v9779_v38, %v9780_v6  ;;  %v4670_v60 = vsel %vm16233_vm5, %v9700_v22, %v9705_v58  ;;  %v9710_v15 = vunpack.i.h.bf16 %v14162_v56  ;;  %v9709_v53 = vunpack.i.l.bf16 %v14162_v56  ;;  %vm16235_vm1 = vmmov %vm16166_vm0 }
0x1557   : > { %v9783_v50 = vpop.permute.xlu1 %9782  ;;  %v7411_v62 = vpack.c.bf16 %v4672_v20, %v4669_v57  ;;  %vm16236_vm6 = vmmov %vm16166_vm0  ;;  %v7487_v54 = vpack.c.bf16 %v9635_v4, %v9555_v42  ;;  %v9640_v40 = vunpack.i.h.bf16 %v16237_v63  ;;  %v9639_v9 = vunpack.i.l.bf16 %v16237_v63 }
0x1558   : > { %v9785_v41 = vunpack.i.h.bf16 %v9783_v50  ;;  %v9784_v59 = vunpack.i.l.bf16 %v9783_v50  ;;  %v4679_v39 = vsel %vm16236_vm6, %v9630_v16, %v9635_v4  ;;  %v4674_v56 = vsel %vm16166_vm0, %v9554_v29, %v9549_v43  ;;  %vm16238_vm9 = vmmov %vm16166_vm0 }
0x1559   : > { %7410 = vmatpush1.bf16.msra.mxu0 %v7409_v46  ;;  %7482 = vmatpush1.bf16.msra.mxu1 %v7481_v49  ;;  %v4676_v16 = vsel %vm16238_vm9, %v9550_v19, %v9555_v42  ;;  %v9715_v21 = vunpack.i.h.bf16 %v14182_v35  ;;  %v9714_v37 = vunpack.i.l.bf16 %v14182_v35  ;;  %v9565_v32 = vunpack.i.h.bf16 %v16239_v10  ;;  %vm16240_vm5 = vmmov %vm16166_vm0 }
0x155a   : > { %v4671_v3 = vsel %vm16234_vm10, %v9784_v59, %v9779_v38  ;;  %v4673_v5 = vsel %vm16235_vm1, %v9780_v6, %v9785_v41  ;;  %7412 = vmatprep.subr.bf16.mxu0 %v7411_v62  ;;  %v7483_v11 = vpack.c.bf16 %v9785_v41, %v9705_v58  ;;  %v4681_v31 = vsel %vm16240_vm5, %v9709_v53, %v9710_v15  ;;  %vm16241_vm10 = vmmov %vm16166_vm0  ;;  %v9723_v38 = vpop.permute.xlu0 %9722  ;;  %v4328_v59 = vld [vmem:[%s15217_s8] sm:$0xff] }
0x155b   : > { %v9788_v12 = vpop.permute.xlu1 %9787  ;;  %v7413_v18 = vpack.c.bf16 %v4671_v3, %v4668_v14  ;;  %v7485_v34 = vpack.c.bf16 %v4673_v5, %v4670_v60  ;;  %vm16242_vm1 = vmmov %vm16166_vm0  ;;  %v9644_v19 = vunpack.i.l.bf16 %v16243_v61  ;;  %v7417_v22 = vpack.c.bf16 %v4677_v47, %v4674_v56  ;;  %v4332_v3 = vld [vmem:[%s15217_s8 + $0x20] sm:$0xff] }
0x155c   : > { %v9790_v17 = vunpack.i.h.bf16 %v9788_v12  ;;  %v9789_v27 = vunpack.i.l.bf16 %v9788_v12  ;;  %7484 = vmatprep.subr.bf16.mxu1 %v7483_v11  ;;  %v4687_v2 = vsel %vm16242_vm1, %v9559_v36, %v9560_v28  ;;  %v7489_v7 = vpack.c.bf16 %v4679_v39, %v4676_v16  ;;  %vm16244_vm6 = vmmov %vm16166_vm0  ;;  %v4331_v39 = vld [vmem:[%s15217_s8 + $0x18] sm:$0xff] }
0x155d   : > { %7414 = vmatpush1.bf16.msra.mxu0 %v7413_v18  ;;  %7486 = vmatpush1.bf16.msra.mxu1 %v7485_v34  ;;  %v9645_v23 = vunpack.i.h.bf16 %v16243_v61  ;;  %v4690_v51 = vsel %vm16244_vm6, %v9639_v9, %v9640_v40  ;;  %v9564_v55 = vunpack.i.l.bf16 %v16239_v10  ;;  %v4680_v24 = vsel %vm16166_vm0, %v9714_v37, %v9709_v53  ;;  %vm16245_vm9 = vmmov %vm16166_vm0 }
0x155e   : > { %7416 = vmatprep.subr.bf16.mxu0 %v7415_v8  ;;  %7488 = vmatprep.subr.bf16.mxu1 %v7487_v54  ;;  %v4684_v43 = vsel %vm16241_vm10, %v9789_v27, %v9790_v17  ;;  %v4682_v33 = vsel %vm16245_vm9, %v9710_v15, %v9715_v21  ;;  %v9720_v1 = vunpack.i.h.bf16 %v14203_v13  ;;  %v9719_v6 = vunpack.i.l.bf16 %v14203_v13  ;;  %vm16246_vm5 = vmmov %vm16166_vm0  ;;  %v4333_v13 = vld [vmem:[%s15217_s8 + $0x28] sm:$0xff] }
0x155f   : > { %v9793_v42 = vpop.permute.xlu1 %9792  ;;  %v7419_v25 = vpack.c.bf16 %v4684_v43, %v4681_v31  ;;  %vm16247_vm10 = vmmov %vm16166_vm0  ;;  %v7423_v57 = vpack.c.bf16 %v4690_v51, %v4687_v2  ;;  %v7495_v46 = vpack.c.bf16 %v9645_v23, %v9565_v32  ;;  %v4686_v49 = vsel %vm16166_vm0, %v9564_v55, %v9559_v36 }
0x1560   : > { %v9795_v30 = vunpack.i.h.bf16 %v9793_v42  ;;  %v9794_v0 = vunpack.i.l.bf16 %v9793_v42  ;;  %vm16248_vm1 = vmmov %vm16166_vm0  ;;  %v9725_v62 = vunpack.i.h.bf16 %v9723_v38  ;;  %v9724_v41 = vunpack.i.l.bf16 %v9723_v38 }
0x1561   : > { %7418 = vmatpush1.bf16.msra.mxu0 %v7417_v22  ;;  %7490 = vmatpush1.bf16.msra.mxu1 %v7489_v7  ;;  %v4689_v26 = vsel %vm16248_vm1, %v9644_v19, %v9639_v9  ;;  %vm16249_vm6 = vmmov %vm16166_vm0  ;;  %v16256_v9 = vmov 0.0  }
0x1562   : > { %v4683_v52 = vsel %vm16246_vm5, %v9794_v0, %v9789_v27  ;;  %v4685_v48 = vsel %vm16247_vm10, %v9790_v17, %v9795_v30  ;;  %7420 = vmatprep.subr.bf16.mxu0 %v7419_v25  ;;  %v7491_v58 = vpack.c.bf16 %v9795_v30, %v9715_v21  ;;  %v4691_v20 = vsel %vm16249_vm6, %v9640_v40, %v9645_v23  ;;  %vm16250_vm9 = vmmov %vm16166_vm0  ;;  %v4330_v40 = vld [vmem:[%s15217_s8 + $0x10] sm:$0xff]  ;;  %v4339_v17 = vpop.permute.xlu0 %4338 }
0x1563   : > { %v9798_v44 = vpop.permute.xlu1 %9797  ;;  %v7421_v29 = vpack.c.bf16 %v4683_v52, %v4680_v24  ;;  %v7493_v35 = vpack.c.bf16 %v4685_v48, %v4682_v33  ;;  %v4688_v8 = vsel %vm16250_vm9, %v9560_v28, %v9565_v32  ;;  %vm16251_vm5 = vmmov %vm16166_vm0  ;;  %v7425_v36 = vpack.c.bf16 %v4689_v26, %v4686_v49 }
0x1564   : > { %v9800_v4 = vunpack.i.h.bf16 %v9798_v44  ;;  %v9799_v50 = vunpack.i.l.bf16 %v9798_v44  ;;  %7492 = vmatprep.subr.bf16.mxu1 %v7491_v58  ;;  %v4693_v47 = vsel %vm16251_vm5, %v9719_v6, %v9720_v1  ;;  %vm16252_vm10 = vmmov %vm16166_vm0  ;;  %v7497_v15 = vpack.c.bf16 %v4691_v20, %v4688_v8 }
0x1565   : > { %7422 = vmatpush1.bf16.msra.mxu0 %v7421_v29  ;;  %7494 = vmatpush1.bf16.msra.mxu1 %v7493_v35  ;;  %vm16253_vm1 = vmmov %vm16166_vm0  ;;  %vm4842_vm5 = vcmask 261120  }
0x1566   : > { %7424 = vmatprep.subr.bf16.mxu0 %v7423_v57  ;;  %7496 = vmatprep.subr.bf16.mxu1 %v7495_v46  ;;  %v4696_v14 = vsel %vm16252_vm10, %v9799_v50, %v9800_v4  ;;  %v4692_v45 = vsel %vm16253_vm1, %v9724_v41, %v9719_v6  ;;  %vm16254_vm6 = vmmov %vm16166_vm0  ;;  %vm16258_vm10 = vcmask 1031168  }
0x1567   : > { %v9803_v60 = vpop.permute.xlu1 %9802  ;;  %v7427_v53 = vpack.c.bf16 %v4696_v14, %v4693_v47  ;;  %v4694_v28 = vsel %vm16254_vm6, %v9720_v1, %v9725_v62  ;;  %vm16255_vm9 = vmmov %vm16166_vm0 }
0x1568   : > { %v9805_v5 = vunpack.i.h.bf16 %v9803_v60  ;;  %v9804_v11 = vunpack.i.l.bf16 %v9803_v60  ;;  %4914 = vmatmul.mubr.f32.vlgmr.msra.gmra.mrb[14].mxu0 %v4328_v59  ;;  %5068 = vmatmul.mubr.f32.vlgmr.msra.gmra.mrb[14].mxu1 %v4328_v59  ;;  %vm16259_vm1 = vmmov %vm16258_vm10 }
0x1569   : > { %7426 = vmatpush1.bf16.msra.mxu0 %v7425_v36  ;;  %7498 = vmatpush1.bf16.msra.mxu1 %v7497_v15  ;;  %vm16262_vm6 = vmmov %vm16259_vm1 }
0x156a   : > { %v4695_v12 = vsel %vm16166_vm0, %v9804_v11, %v9799_v50  ;;  %v4697_v18 = vsel %vm16255_vm9, %v9800_v4, %v9805_v5  ;;  %7428 = vmatprep.subr.bf16.mxu0 %v7427_v53  ;;  %4919 = vmatprep.mubr.f32.mxu0 %v4332_v3  ;;  %v7499_v34 = vpack.c.bf16 %v9805_v5, %v9725_v62  ;;  %vm16263_vm0 = vmmov %vm16259_vm1 }
0x156b   : > { %5073 = vmatprep.mubr.f32.mxu1 %v4332_v3  ;;  %v7429_v54 = vpack.c.bf16 %v4695_v12, %v4692_v45  ;;  %v7501_v63 = vpack.c.bf16 %v4697_v18, %v4694_v28  ;;  %vm16264_vm9 = vmmov %vm16263_vm0 }
0x156c   : > { %4920 = vmatmul.mubr.f32.gmra.mrb[16].mxu0 %v4331_v39  ;;  %5074 = vmatmul.mubr.f32.gmra.mrb[16].mxu1 %v4331_v39 }
0x156d   : > { %7500 = vmatprep.subr.bf16.mxu1 %v7499_v34  ;;  %7430 = vmatpush1.bf16.msra.mxu0 %v7429_v54 }
0x156e   : > { %7502 = vmatpush1.bf16.msra.mxu1 %v7501_v63  ;;  %4990 = vmatprep.mubr.f32.mxu0 %v16256_v9 }
0x156f   : > { %5144 = vmatprep.mubr.f32.mxu1 %v16256_v9 }
0x1570   : > { %7141 = vmatmul.mubr.msk.f32.vlgmr.msra.gmra.mrb[14].mxu0 %vm4842_vm5, %v4330_v40 }
0x1571   : > { %7143 = vmatmul.mubr.msk.f32.vlgmr.msra.gmra.mrb[14].mxu1 %vm4842_vm5, %v4330_v40  ;;  %4996 = vmatprep.mubr.f32.mxu0 %v16256_v9 }
0x1572   : > { %5150 = vmatprep.mubr.f32.mxu1 %v16256_v9 }
0x1574   : > { %7142 = vmatmul.mubr.msk.f32.gmra.mrb[16].mxu0 %vm4842_vm5, %v4333_v13 }
0x1575   : > { %7144 = vmatmul.mubr.msk.f32.gmra.mrb[16].mxu1 %vm4842_vm5, %v4333_v13  ;;  %vm16266_vm5 = vcmask 113664  }
0x1578   : > { %v4344_v2 = vpop.permute.xlu1 %4343 }
0x1643   : > { %v4992_v27 = vpop.f32.mrb[14].mxu0 }
0x1644   : > { %v7673_v56 = vadd.f32 %v4992_v27, %v4339_v17  ;;  %v5146_v16 = vpop.f32.mrb[14].mxu1  ;;  %v4994_v21 = vpop.f32.mrb[15].mxu0 }
0x1645   : > { %v14266_v37 = vadd.f32 %v5146_v16, %v4339_v17  ;;  %v7674_v10 = vadd.f32 %v4994_v21, %v4339_v17  ;;  %v5148_v32 = vpop.f32.mrb[15].mxu1 }
0x1646   : > { %v5157_v31 = vmax.f32 %v7673_v56, 0.0  ;;  %v7678_v43 = vadd.f32 %v5148_v32, %v4339_v17 }
0x1647   : > { %v5159_v61 = vmax.f32 %v14266_v37, 0.0  ;;  %v5158_v19 = vmax.f32 %v7674_v10, 0.0  ;;  %v4998_v42 = vpop.f32.mrb[16].mxu0 }
0x1648   : > { %v5160_v22 = vmax.f32 %v7678_v43, 0.0  ;;  %v7675_v7 = vadd.f32 %v4998_v42, %v4344_v2  ;;  %v5152_v25 = vpop.f32.mrb[16].mxu1  ;;  %v5000_v23 = vpop.f32.mrb[17].mxu0 }
0x1649   : > { %v9811_v30 = vpack.i.bf16 %v5158_v19, %v5157_v31  ;;  %v7679_v0 = vadd.f32 %v5152_v25, %v4344_v2  ;;  %v7676_v51 = vadd.f32 %v5000_v23, %v4344_v2  ;;  %v5154_v55 = vpop.f32.mrb[17].mxu1 }
0x164a   : > { %v9806_v24 = vpack.i.bf16 %v5160_v22, %v5159_v61  ;;  %v5161_v33 = vmax.f32 %v7675_v7, 0.0  ;;  %v7680_v1 = vadd.f32 %v5154_v55, %v4344_v2 }
0x164b   : > { %v5163_v6 = vmax.f32 %v7679_v0, 0.0  ;;  %v5162_v38 = vmax.f32 %v7676_v51, 0.0  ;;  %9812 = vrot.lane.b32.xlu0 %v9811_v30, %s16054_s0 }
0x164c   : > { %v5164_v52 = vmax.f32 %v7680_v1, 0.0  ;;  %9807 = vrot.lane.b32.xlu1 %v9806_v24, %s16054_s0  ;;  %v9826_v26 = vpack.i.bf16 %v5161_v33, %v5157_v31  ;;  %v16276_v24 = vld [vmem:[#allocation29_spill] sm:$0xff] }
0x164d   : > { %v9821_v48 = vpack.i.bf16 %v5162_v38, %v5161_v33 }
0x164e   : > { %v9816_v58 = vpack.i.bf16 %v5164_v52, %v5163_v6 }
0x164f   : > { %9822 = vrot.lane.b32.xlu0 %v9821_v48, %s16054_s0 }
0x1650   : > { %9817 = vrot.lane.b32.xlu1 %v9816_v58, %s16054_s0  ;;  %v16279_v58 = vld [vmem:[#allocation28_spill] sm:$0xff] }
0x1653   : > { %9827 = vrot.lane.b32.xlu0 %v9826_v26, %s16257_s5 }
0x16bd   : > { %v9813_v44 = vpop.permute.xlu0 %9812 }
0x16be   : > { %v9808_v29 = vpop.permute.xlu1 %9807  ;;  %v9815_v35 = vunpack.i.h.bf16 %v9813_v44  ;;  %v9814_v57 = vunpack.i.l.bf16 %v9813_v44 }
0x16bf   : > { %v9809_v20 = vunpack.i.l.bf16 %v9808_v29  ;;  %v9810_v50 = vunpack.i.h.bf16 %v9808_v29 }
0x16c0   : > { %v5189_v4 = vsel %vm16258_vm10, %v9814_v57, %v9815_v35  ;;  %vm16267_vm10 = vmmov %vm16266_vm5 }
0x16c1   : > { %v5190_v46 = vsel %vm16259_vm1, %v9815_v35, %v9809_v20  ;;  %v9823_v49 = vpop.permute.xlu0 %9822  ;;  %v5211_v41 = vsel %vm11362_vm2, %v5189_v4, %v5157_v31  ;;  %v5191_v3 = vsel %vm16263_vm0, %v9809_v20, %v9810_v50  ;;  %vm16270_vm1 = vmmov %vm16263_vm0  ;;  %v16281_v35 = vld [vmem:[#allocation30_spill] sm:$0xff] }
0x16c2   : > { %v9818_v59 = vpop.permute.xlu1 %9817  ;;  %v9825_v8 = vunpack.i.h.bf16 %v9823_v49  ;;  %v9824_v47 = vunpack.i.l.bf16 %v9823_v49  ;;  %v5212_v60 = vsel %vm11332_vm7, %v5190_v46, %v5158_v19  ;;  %v5213_v9 = vsel %vm11344_vm15, %v5191_v3, %v5159_v61 }
0x16c3   : > { %v9819_v36 = vunpack.i.l.bf16 %v9818_v59  ;;  %v9836_v15 = vpack.i.bf16 %v5212_v60, %v5211_v41  ;;  %v9820_v28 = vunpack.i.h.bf16 %v9818_v59 }
0x16c4   : > { %v5192_v53 = vsel %vm16262_vm6, %v9824_v47, %v9825_v8  ;;  %vm16272_vm6 = vcmask 1039360  }
0x16c5   : > { %v5193_v5 = vsel %vm16264_vm9, %v9825_v8, %v9819_v36  ;;  %9837 = vrot.lane.b32.xlu1 %v9836_v15, %s16265_s6  ;;  %v9828_v11 = vpop.permute.xlu0 %9827  ;;  %v5215_v45 = vsel %vm11362_vm2, %v5192_v53, %v5161_v33  ;;  %v5194_v27 = vsel %vm16270_vm1, %v9819_v36, %v9820_v28  ;;  %vm16273_vm0 = vmmov %vm16272_vm6  ;;  %vm16280_vm1 = vnez %v16279_v58 }
0x16c6   : > { %v9830_v39 = vunpack.i.h.bf16 %v9828_v11  ;;  %v9829_v12 = vunpack.i.l.bf16 %v9828_v11  ;;  %v5216_v18 = vsel %vm11332_vm7, %v5193_v5, %v5162_v38  ;;  %v9851_v16 = vpack.i.bf16 %v5215_v45, %v5211_v41  ;;  %vm16274_vm9 = vmmov %vm16273_vm0 }
0x16c7   : > { %v9846_v34 = vpack.i.bf16 %v5216_v18, %v5215_v45  ;;  %v5217_v37 = vsel %vm11344_vm15, %v5194_v27, %v5163_v6 }
0x16c8   : > { %v5210_v54 = vsel %vm16266_vm5, %v9820_v28, %v9830_v39  ;;  %v5209_v63 = vsel %vm16267_vm10, %v9810_v50, %v9829_v12  ;;  %vm16275_vm5 = vmmov %vm16273_vm0  ;;  %vm16277_vm10 = vcmask 121856  }
0x16c9   : > { %9847 = vrot.lane.b32.xlu1 %v9846_v34, %s16265_s6  ;;  %v5214_v17 = vsel %vm11348_vm3, %v5209_v63, %v5160_v22  ;;  %v5218_v21 = vsel %vm11348_vm3, %v5210_v54, %v5164_v52  ;;  %v16278_v52 = vld [vmem:[#allocation27_spill] sm:$0xff]  ;;  %v16287_v34 = vld [vmem:[#allocation32_spill] sm:$0xff] }
0x16ca   : > { %v9831_v56 = vpack.i.bf16 %v5214_v17, %v5213_v9  ;;  %v9841_v10 = vpack.i.bf16 %v5218_v21, %v5217_v37 }
0x16cc   : > { %9832 = vrot.lane.b32.xlu0 %v9831_v56, %s16265_s6  ;;  %v16290_v56 = vld [vmem:[#allocation31_spill] sm:$0xff] }
0x16cd   : > { %9852 = vrot.lane.b32.xlu1 %v9851_v16, %s16271_s4 }
0x16d0   : > { %9842 = vrot.lane.b32.xlu0 %v9841_v10, %s16265_s6 }
0x1737   : > { %v9838_v32 = vpop.permute.xlu1 %9837 }
0x1738   : > { %v9840_v31 = vunpack.i.h.bf16 %v9838_v32  ;;  %v9839_v43 = vunpack.i.l.bf16 %v9838_v32 }
0x173a   : > { %v5243_v42 = vsel %vm16272_vm6, %v9839_v43, %v9840_v31  ;;  %vm16282_vm6 = vnez %v16281_v35 }
0x173b   : > { %v9848_v2 = vpop.permute.xlu1 %9847  ;;  %v5265_v33 = vsel %vm11391_vm14, %v5243_v42, %v5211_v41 }
0x173c   : > { %v9850_v61 = vunpack.i.h.bf16 %v9848_v2  ;;  %v9849_v19 = vunpack.i.l.bf16 %v9848_v2 }
0x173e   : > { %v9833_v22 = vpop.permute.xlu0 %9832  ;;  %v5246_v0 = vsel %vm16273_vm0, %v9849_v19, %v9850_v61 }
0x173f   : > { %v9835_v7 = vunpack.i.h.bf16 %v9833_v22  ;;  %v9834_v25 = vunpack.i.l.bf16 %v9833_v22  ;;  %v9853_v23 = vpop.permute.xlu1 %9852  ;;  %v5269_v8 = vsel %vm11391_vm14, %v5246_v0, %v5215_v45 }
0x1740   : > { %v9854_v30 = vunpack.i.l.bf16 %v9853_v23  ;;  %v9855_v1 = vunpack.i.h.bf16 %v9853_v23 }
0x1741   : > { %v5244_v51 = vsel %vm16274_vm9, %v9840_v31, %v9834_v25  ;;  %v5245_v55 = vsel %vm16275_vm5, %v9834_v25, %v9835_v7  ;;  %vm16283_vm9 = vmmov %vm16273_vm0 }
0x1742   : > { %v5263_v6 = vsel %vm16277_vm10, %v9835_v7, %v9854_v30  ;;  %v9843_v38 = vpop.permute.xlu0 %9842  ;;  %v5267_v48 = vsel %vm11374_vm8, %v5245_v55, %v5213_v9  ;;  %v5266_v26 = vsel %vm16280_vm1, %v5244_v51, %v5212_v60  ;;  %vm16284_vm5 = vmmov %vm16277_vm10  ;;  %vm16285_vm10 = vcmask 7168  }
0x1743   : > { %v9845_v44 = vunpack.i.h.bf16 %v9843_v38  ;;  %v9844_v29 = vunpack.i.l.bf16 %v9843_v38  ;;  %v5268_v57 = vsel %vm16282_vm6, %v5263_v6, %v5214_v17  ;;  %v9856_v20 = vpack.i.bf16 %v5266_v26, %v5265_v33 }
0x1744   : > { %v9861_v4 = vpack.i.bf16 %v5268_v57, %v5267_v48 }
0x1745   : > { %v5247_v50 = vsel %vm16273_vm0, %v9850_v61, %v9844_v29  ;;  %v5248_v46 = vsel %vm16283_vm9, %v9844_v29, %v9845_v44  ;;  %v5264_v49 = vsel %vm16284_vm5, %v9845_v44, %v9855_v1  ;;  %9857 = vrot.lane.b32.xlu0 %v9856_v20, %s15923_s24  ;;  %vm16286_vm0 = vmmov %vm16285_vm10  ;;  %vm16288_vm9 = vnez %v16287_v34  ;;  %v16294_v61 = vld [vmem:[#allocation33_spill] sm:$0xff]  ;;  %v16298_v1 = vld [vmem:[#allocation34_spill] sm:$0xff] }
0x1746   : > { %9862 = vrot.lane.b32.xlu1 %v9861_v4, %s15923_s24  ;;  %v5271_v41 = vsel %vm11374_vm8, %v5248_v46, %v5217_v37  ;;  %v5272_v59 = vsel %vm16282_vm6, %v5264_v49, %v5218_v21  ;;  %v5270_v47 = vsel %vm16280_vm1, %v5247_v50, %v5216_v18  ;;  %vm16289_vm5 = vmmov %vm16286_vm0  ;;  %vm16291_vm6 = vnez %v16290_v56 }
0x1747   : > { %v9871_v60 = vpack.i.bf16 %v5272_v59, %v5271_v41  ;;  %v9866_v36 = vpack.i.bf16 %v5270_v47, %v5269_v8  ;;  %v9876_v15 = vpack.i.bf16 %v5272_v59, %v5268_v57  ;;  %vm16293_vm14 = vmmov %vm16286_vm0 }
0x1749   : > { %9867 = vrot.lane.b32.xlu0 %v9866_v36, %s15923_s24  ;;  %v16304_v36 = vld [vmem:[#allocation36_spill] sm:$0xff] }
0x174a   : > { %9872 = vrot.lane.b32.xlu1 %v9871_v60, %s15923_s24 }
0x174d   : > { %9877 = vrot.lane.b32.xlu0 %v9876_v15, %s15929_s29 }
0x17b7   : > { %v9858_v53 = vpop.permute.xlu0 %9857 }
0x17b8   : > { %v9863_v3 = vpop.permute.xlu1 %9862  ;;  %v9860_v5 = vunpack.i.h.bf16 %v9858_v53  ;;  %v9859_v11 = vunpack.i.l.bf16 %v9858_v53 }
0x17b9   : > { %v9865_v28 = vunpack.i.h.bf16 %v9863_v3  ;;  %v9864_v39 = vunpack.i.l.bf16 %v9863_v3 }
0x17ba   : > { %v5303_v45 = vsel %vm16285_vm10, %v9859_v11, %v9860_v5  ;;  %vm16292_vm10 = vmmov %vm16286_vm0 }
0x17bb   : > { %v5304_v12 = vsel %vm16286_vm0, %v9860_v5, %v9864_v39  ;;  %v9868_v18 = vpop.permute.xlu0 %9867  ;;  %v14336_v54 = vsel %vm16288_vm9, %v5303_v45, %v5266_v26  ;;  %v5305_v63 = vsel %vm16289_vm5, %v9864_v39, %v9865_v28  ;;  %vm16295_vm5 = vnez %v16294_v61 }
0x17bc   : > { %v9873_v9 = vpop.permute.xlu1 %9872  ;;  %v9870_v17 = vunpack.i.h.bf16 %v9868_v18  ;;  %v9869_v27 = vunpack.i.l.bf16 %v9868_v18  ;;  %v5321_v16 = vsel %vm16291_vm6, %v5304_v12, %v5267_v48  ;;  %v5322_v19 = vsel %vm16295_vm5, %v5305_v63, %v5268_v57 }
0x17bd   : > { %v9875_v21 = vunpack.i.h.bf16 %v9873_v9  ;;  %v9874_v37 = vunpack.i.l.bf16 %v9873_v9  ;;  %v9881_v10 = vpack.i.bf16 %v5321_v16, %v14336_v54 }
0x17be   : > { %v5306_v32 = vsel %vm16292_vm10, %v9869_v27, %v9870_v17  ;;  %vm16296_vm10 = vmmov %vm16286_vm0 }
0x17bf   : > { %v5308_v31 = vsel %vm16286_vm0, %v9874_v37, %v9875_v21  ;;  %v5307_v43 = vsel %vm16293_vm14, %v9870_v17, %v9874_v37  ;;  %9882 = vrot.lane.b32.xlu1 %v9881_v10, %s15945_s25  ;;  %v9878_v2 = vpop.permute.xlu0 %9877  ;;  %v5324_v42 = vsel %vm16288_vm9, %v5306_v32, %v5270_v47  ;;  %vm16297_vm14 = vmmov %vm16286_vm0  ;;  %vm16299_vm0 = vnez %v16298_v1  ;;  %v16302_v47 = vld [vmem:[#allocation35_spill] sm:$0xff]  ;;  %v16311_v37 = vld [vmem:[#allocation37_spill] sm:$0xff] }
0x17c0   : > { %v9880_v22 = vunpack.i.h.bf16 %v9878_v2  ;;  %v9879_v7 = vunpack.i.l.bf16 %v9878_v2  ;;  %v9886_v25 = vpack.i.bf16 %v5324_v42, %v5322_v19  ;;  %v5325_v23 = vsel %vm16291_vm6, %v5307_v43, %v5271_v41 }
0x17c1   : > { %v5326_v30 = vsel %vm16295_vm5, %v5308_v31, %v5272_v59  ;;  %vm16305_vm5 = vnez %v16304_v36  ;;  %v16313_v31 = vld [vmem:[#allocation38_spill] sm:$0xff] }
0x17c2   : > { %v5317_v0 = vsel %vm16296_vm10, %v9879_v7, %v9859_v11  ;;  %v5318_v51 = vsel %vm16297_vm14, %v9880_v22, %v9869_v27  ;;  %9887 = vrot.lane.b32.xlu0 %v9886_v25, %s15945_s25  ;;  %v9891_v55 = vpack.i.bf16 %v5326_v30, %v5325_v23  ;;  %v9896_v48 = vpack.i.bf16 %v5326_v30, %v5322_v19 }
0x17c3   : > { %v5319_v6 = vsel %vm16299_vm0, %v5317_v0, %v5265_v33  ;;  %v5323_v38 = vsel %vm16299_vm0, %v5318_v51, %v5269_v8  ;;  %vm16300_vm10 = vcmask 15360   ;;  %vm16303_vm0 = vnez %v16302_v47 }
0x17c4   : > { %9892 = vrot.lane.b32.xlu1 %v9891_v55, %s15945_s25  ;;  %v9901_v26 = vpack.i.bf16 %v5323_v38, %v5319_v6  ;;  %vm16301_vm14 = vmmov %vm16300_vm10 }
0x17c5   : > { %vm16306_vm9 = vmmov %vm16300_vm10 }
0x17c6   : > { %9897 = vrot.lane.b32.xlu0 %v9896_v48, %s15947_s14  ;;  %vm16307_vm6 = vmmov %vm16306_vm9 }
0x17c8   : > { %9902 = vrot.lane.b32.xlu1 %v9901_v26, %s15945_s25 }
0x1831   : > { %v9883_v44 = vpop.permute.xlu1 %9882 }
0x1832   : > { %v9885_v29 = vunpack.i.h.bf16 %v9883_v44  ;;  %v9884_v57 = vunpack.i.l.bf16 %v9883_v44 }
0x1834   : > { %v9888_v20 = vpop.permute.xlu0 %9887  ;;  %v5358_v4 = vsel %vm16300_vm10, %v9884_v57, %v9885_v29  ;;  %vm16308_vm10 = vmmov %vm16307_vm6 }
0x1835   : > { %v9890_v50 = vunpack.i.h.bf16 %v9888_v20  ;;  %v9889_v46 = vunpack.i.l.bf16 %v9888_v20  ;;  %v14368_v60 = vsel %vm16303_vm0, %v5358_v4, %v5321_v16  ;;  %v16318_v20 = vld [vmem:[#allocation39_spill] sm:$0xff] }
0x1836   : > { %v9893_v33 = vpop.permute.xlu1 %9892 }
0x1837   : > { %v5359_v49 = vsel %vm16301_vm14, %v9885_v29, %v9889_v46  ;;  %v9895_v41 = vunpack.i.h.bf16 %v9893_v33  ;;  %v9894_v59 = vunpack.i.l.bf16 %v9893_v33  ;;  %vm16310_vm14 = vmmov %vm16307_vm6 }
0x1838   : > { %v9898_v8 = vpop.permute.xlu0 %9897  ;;  %v5376_v15 = vsel %vm16305_vm5, %v5359_v49, %v5322_v19 }
0x1839   : > { %v5361_v53 = vsel %vm16306_vm9, %v9890_v50, %v9894_v59  ;;  %v5362_v3 = vsel %vm16307_vm6, %v9894_v59, %v9895_v41  ;;  %v9900_v5 = vunpack.i.h.bf16 %v9898_v8  ;;  %v9899_v11 = vunpack.i.l.bf16 %v9898_v8  ;;  %vm16309_vm9 = vmmov %vm16307_vm6  ;;  %v16323_v41 = vld [vmem:[#allocation42_spill] sm:$0xff] }
0x183a   : > { %v9903_v28 = vpop.permute.xlu1 %9902  ;;  %v5379_v39 = vsel %vm16303_vm0, %v5361_v53, %v5325_v23  ;;  %v5380_v45 = vsel %vm16305_vm5, %v5362_v3, %v5326_v30  ;;  %v9906_v12 = vpack.i.bf16 %v5376_v15, %v14368_v60  ;;  %vm16312_vm0 = vnez %v16311_v37 }
0x183b   : > { %v9905_v18 = vunpack.i.h.bf16 %v9903_v28  ;;  %v9904_v63 = vunpack.i.l.bf16 %v9903_v28  ;;  %v9911_v9 = vpack.i.bf16 %v5380_v45, %v5379_v39  ;;  %vm16314_vm5 = vnez %v16313_v31  ;;  %v16327_v28 = vld [vmem:[#allocation40_spill] sm:$0xff] }
0x183c   : > { %9907 = vrot.lane.b32.xlu0 %v9906_v12, %s15956_s28  ;;  %vm16324_vm1 = vnez %v16323_v41 }
0x183d   : > { %v5360_v17 = vsel %vm16308_vm10, %v9905_v18, %v9890_v50  ;;  %v5372_v27 = vsel %vm16309_vm9, %v9900_v5, %v9905_v18  ;;  %v5357_v16 = vsel %vm16307_vm6, %v9904_v63, %v9884_v57  ;;  %v5371_v21 = vsel %vm16310_vm14, %v9899_v11, %v9904_v63  ;;  %9912 = vrot.lane.b32.xlu1 %v9911_v9, %s15956_s28  ;;  %v16325_v5 = vld [vmem:[#allocation41_spill] sm:$0xff] }
0x183e   : > { %v5373_v10 = vsel %vm16312_vm0, %v5371_v21, %v5319_v6  ;;  %v5377_v32 = vsel %vm16312_vm0, %v5372_v27, %v5323_v38  ;;  %v5374_v43 = vsel %vm16314_vm5, %v5357_v16, %v14336_v54  ;;  %v5378_v22 = vsel %vm16314_vm5, %v5360_v17, %v5324_v42 }
0x183f   : > { %v9921_v2 = vpack.i.bf16 %v5377_v32, %v5373_v10  ;;  %v9916_v19 = vpack.i.bf16 %v5374_v43, %v5373_v10  ;;  %v9926_v7 = vpack.i.bf16 %v5378_v22, %v5377_v32  ;;  %vm16315_vm10 = vcmask 719872  }
0x1840   : > { %vm16316_vm9 = vmmov %vm16315_vm10  ;;  %vm16317_vm6 = vcmask 850944   ;;  %vm16319_vm14 = vnez %v16318_v20 }
0x1841   : > { %9922 = vrot.lane.b32.xlu0 %v9921_v2, %s15966_s20  ;;  %9917 = vrot.lane.b32.xlu1 %v9916_v19, %s15956_s28  ;;  %vm16320_vm5 = vmmov %vm16317_vm6 }
0x1842   : > { %vm16321_vm0 = vmmov %vm16316_vm9 }
0x1843   : > { %vm16322_vm8 = vmmov %vm16321_vm0 }
0x1845   : > { %9927 = vrot.lane.b32.xlu0 %v9926_v7, %s15956_s28 }
0x18ae   : > { %v9908_v25 = vpop.permute.xlu0 %9907 }
0x18af   : > { %v9913_v23 = vpop.permute.xlu1 %9912  ;;  %v9910_v51 = vunpack.i.h.bf16 %v9908_v25  ;;  %v9909_v55 = vunpack.i.l.bf16 %v9908_v25 }
0x18b0   : > { %v9915_v30 = vunpack.i.h.bf16 %v9913_v23  ;;  %v9914_v0 = vunpack.i.l.bf16 %v9913_v23 }
0x18b1   : > { %v5407_v29 = vsel %vm16316_vm9, %v9909_v55, %v9910_v51  ;;  %vm16328_vm9 = vnez %v16327_v28 }
0x18b2   : > { %v5410_v42 = vsel %vm16315_vm10, %v9914_v0, %v9915_v30  ;;  %vm16326_vm10 = vnez %v16325_v5 }
0x18b3   : > { %v9923_v6 = vpop.permute.xlu0 %9922  ;;  %v9918_v54 = vpop.permute.xlu1 %9917 }
0x18b4   : > { %v9925_v38 = vunpack.i.h.bf16 %v9923_v6  ;;  %v9924_v48 = vunpack.i.l.bf16 %v9923_v6  ;;  %v9920_v26 = vunpack.i.h.bf16 %v9918_v54  ;;  %v9919_v44 = vunpack.i.l.bf16 %v9918_v54  ;;  %v16333_v6 = vld [vmem:[#allocation43_spill] sm:$0xff] }
0x18b6   : > { %v5424_v57 = vsel %vm16317_vm6, %v5410_v42, %v9925_v38  ;;  %v5432_v4 = vsel %vm16319_vm14, %v9925_v38, %v5380_v45  ;;  %v5423_v50 = vsel %vm16320_vm5, %v5407_v29, %v9924_v48  ;;  %v5406_v46 = vsel %vm16321_vm0, %v9920_v26, %v9909_v55  ;;  %vm16329_vm6 = vmmov %vm16321_vm0  ;;  %v16334_v38 = vld [vmem:[#allocation46_spill] sm:$0xff] }
0x18b7   : > { %v5405_v33 = vsel %vm16322_vm8, %v9919_v44, %v9920_v26  ;;  %v9928_v49 = vpop.permute.xlu0 %9927  ;;  %v5431_v59 = vsel %vm16324_vm1, %v5424_v57, %v5379_v39  ;;  %v5426_v12 = vsel %vm16328_vm9, %v5406_v46, %v5374_v43  ;;  %vm16330_vm5 = vmmov %vm16321_vm0  ;;  %v5428_v9 = vsel %vm16319_vm14, %v9924_v48, %v5376_v15 }
0x18b8   : > { %v9930_v8 = vunpack.i.h.bf16 %v9928_v49  ;;  %v9929_v53 = vunpack.i.l.bf16 %v9928_v49  ;;  %v9941_v3 = vpack.i.bf16 %v5432_v4, %v5431_v59  ;;  %v5425_v11 = vsel %vm16326_vm10, %v5405_v33, %v5373_v10  ;;  %v16339_v33 = vld [vmem:[#allocation44_spill] sm:$0xff] }
0x18b9   : > { %v9931_v63 = vpack.i.bf16 %v5426_v12, %v5425_v11  ;;  %v5427_v27 = vsel %vm16324_vm1, %v5423_v50, %v14368_v60  ;;  %vm16331_vm8 = vcmask 883712   ;;  %vm16338_vm1 = vcmask 1014784  }
0x18ba   : > { %v5409_v45 = vsel %vm16329_vm6, %v9930_v8, %v9914_v0  ;;  %v5408_v18 = vsel %vm16330_vm5, %v9929_v53, %v9930_v8  ;;  %9942 = vrot.lane.b32.xlu0 %v9941_v3, %s15982_s21  ;;  %v9936_v21 = vpack.i.bf16 %v5428_v9, %v5427_v27  ;;  %vm16332_vm0 = vmmov %vm16331_vm8  ;;  %vm16335_vm6 = vnez %v16334_v38  ;;  %v16342_v3 = vld [vmem:[#allocation45_spill] sm:$0xff] }
0x18bb   : > { %v5429_v39 = vsel %vm16326_vm10, %v5408_v18, %v5377_v32  ;;  %v5430_v17 = vsel %vm16328_vm9, %v5409_v45, %v5378_v22  ;;  %9932 = vrot.lane.b32.xlu1 %v9931_v63, %s15982_s21  ;;  %vm16336_vm5 = vmmov %vm16332_vm0  ;;  %vm16343_vm9 = vnez %v16342_v3 }
0x18bc   : > { %v9946_v16 = vpack.i.bf16 %v5430_v17, %v5429_v39  ;;  %v9951_v10 = vpack.i.bf16 %v5429_v39, %v5425_v11  ;;  %vm16341_vm10 = vmmov %vm16338_vm1 }
0x18be   : > { %9947 = vrot.lane.b32.xlu0 %v9946_v16, %s15982_s21 }
0x18bf   : > { %9937 = vrot.lane.b32.xlu1 %v9936_v21, %s15982_s21 }
0x18c3   : > { %9952 = vrot.lane.b32.xlu1 %v9951_v10, %s15757_s15 }
0x192c   : > { %v9943_v15 = vpop.permute.xlu0 %9942 }
0x192d   : > { %v9933_v32 = vpop.permute.xlu1 %9932  ;;  %v9945_v25 = vunpack.i.h.bf16 %v9943_v15  ;;  %v9944_v23 = vunpack.i.l.bf16 %v9943_v15 }
0x192e   : > { %v9935_v43 = vunpack.i.h.bf16 %v9933_v32  ;;  %v9934_v2 = vunpack.i.l.bf16 %v9933_v32 }
0x192f   : > { %v5462_v57 = vsel %vm16336_vm5, %v9944_v23, %v9945_v25 }
0x1930   : > { %v5457_v22 = vsel %vm16331_vm8, %v9934_v2, %v9935_v43  ;;  %v9948_v7 = vpop.permute.xlu0 %9947  ;;  %vm16337_vm8 = vmmov %vm16332_vm0 }
0x1931   : > { %v9938_v19 = vpop.permute.xlu1 %9937  ;;  %v9950_v51 = vunpack.i.h.bf16 %v9948_v7  ;;  %v14431_v54 = vsel %vm15993_vm13, %v5457_v22, %v5425_v11  ;;  %v9949_v26 = vunpack.i.l.bf16 %v9948_v7 }
0x1932   : > { %v9939_v60 = vunpack.i.l.bf16 %v9938_v19  ;;  %v9940_v30 = vunpack.i.h.bf16 %v9938_v19 }
0x1933   : > { %v5460_v45 = vsel %vm16336_vm5, %v9949_v26, %v9950_v51 }
0x1934   : > { %v5458_v0 = vsel %vm16332_vm0, %v9935_v43, %v9939_v60  ;;  %v5459_v50 = vsel %vm16337_vm8, %v9939_v60, %v9940_v30  ;;  %vm16340_vm0 = vnez %v16339_v33  ;;  %vm16344_vm8 = vmmov %vm16336_vm5 }
0x1935   : > { %v9953_v55 = vpop.permute.xlu1 %9952  ;;  %v5478_v48 = vsel %vm16335_vm6, %v5458_v0, %v5426_v12  ;;  %v5461_v18 = vsel %vm16344_vm8, %v9950_v51, %v9944_v23  ;;  %v16346_v51 = vld [vmem:[#allocation48_spill] sm:$0xff] }
0x1936   : > { %v9955_v44 = vunpack.i.h.bf16 %v9953_v55  ;;  %v9954_v42 = vunpack.i.l.bf16 %v9953_v55  ;;  %v9956_v29 = vpack.i.bf16 %v5478_v48, %v14431_v54 }
0x1938   : > { %v5476_v46 = vsel %vm16338_vm1, %v5462_v57, %v9955_v44  ;;  %v5484_v49 = vsel %vm16340_vm0, %v9955_v44, %v5432_v4  ;;  %v5475_v8 = vsel %vm16341_vm10, %v5459_v50, %v9954_v42  ;;  %v5480_v53 = vsel %vm16340_vm0, %v9954_v42, %v5428_v9  ;;  %9957 = vrot.lane.b32.xlu0 %v9956_v29, %s15766_s22  ;;  %v16350_v29 = vld [vmem:[#allocation49_spill] sm:$0xff] }
0x1939   : > { %v5483_v11 = vsel %vm16343_vm9, %v5476_v46, %v5431_v59  ;;  %v5479_v12 = vsel %vm16343_vm9, %v5475_v8, %v5427_v27  ;;  %v5481_v4 = vsel %vm15993_vm13, %v5460_v45, %v5429_v39  ;;  %v5482_v9 = vsel %vm16335_vm6, %v5461_v18, %v5430_v17 }
0x193a   : > { %v9966_v63 = vpack.i.bf16 %v5484_v49, %v5483_v11  ;;  %v9961_v16 = vpack.i.bf16 %v5480_v53, %v5479_v12  ;;  %v9971_v59 = vpack.i.bf16 %v5481_v4, %v5479_v12  ;;  %v9976_v21 = vpack.i.bf16 %v5483_v11, %v5482_v9 }
0x193b   : > { %vm16345_vm1 = vcmask 162816   ;;  %vm16347_vm10 = vnez %v16346_v51  ;;  %vm16351_vm6 = vnez %v16350_v29 }
0x193c   : > { %9967 = vrot.lane.b32.xlu1 %v9966_v63, %s15769_s18  ;;  %9962 = vrot.lane.b32.xlu0 %v9961_v16, %s15769_s18  ;;  %vm16348_vm5 = vmmov %vm16345_vm1  ;;  %v16356_v63 = vld [vmem:[#allocation47_spill] sm:$0xff] }
0x193d   : > { %vm16349_vm8 = vmmov %vm16345_vm1 }
0x193e   : > { %vm16352_vm9 = vmmov %vm16345_vm1 }
0x193f   : > { %vm16355_vm13 = vmmov %vm16348_vm5 }
0x1940   : > { %9972 = vrot.lane.b32.xlu1 %v9971_v59, %s15766_s22  ;;  %9977 = vrot.lane.b32.xlu0 %v9976_v21, %s15766_s22 }
0x19aa   : > { %v9958_v27 = vpop.permute.xlu0 %9957 }
0x19ab   : > { %v9960_v32 = vunpack.i.h.bf16 %v9958_v27  ;;  %v9959_v43 = vunpack.i.l.bf16 %v9958_v27  ;;  %v16359_v27 = vld [vmem:[#allocation50_spill] sm:$0xff] }
0x19ad   : > { %v5517_v50 = vsel %vm16352_vm9, %v9959_v43, %v9960_v32  ;;  %vm16358_vm9 = vmmov %vm16349_vm8 }
0x19ae   : > { %v9968_v10 = vpop.permute.xlu1 %9967  ;;  %v9963_v15 = vpop.permute.xlu0 %9962 }
0x19af   : > { %v9970_v25 = vunpack.i.h.bf16 %v9968_v10  ;;  %v9969_v23 = vunpack.i.l.bf16 %v9968_v10  ;;  %v9965_v17 = vunpack.i.h.bf16 %v9963_v15  ;;  %v9964_v30 = vunpack.i.l.bf16 %v9963_v15 }
0x19b2   : > { %v9973_v2 = vpop.permute.xlu1 %9972  ;;  %v9978_v19 = vpop.permute.xlu0 %9977 }
0x19b3   : > { %v9975_v22 = vunpack.i.h.bf16 %v9973_v2  ;;  %v9974_v7 = vunpack.i.l.bf16 %v9973_v2  ;;  %v9980_v60 = vunpack.i.h.bf16 %v9978_v19  ;;  %v9979_v39 = vunpack.i.l.bf16 %v9978_v19 }
0x19b5   : > { %v5518_v0 = vsel %vm16345_vm1, %v9960_v32, %v9974_v7  ;;  %v5534_v55 = vsel %vm16347_vm10, %v9974_v7, %v5480_v53  ;;  %v5538_v26 = vsel %vm16347_vm10, %v9980_v60, %v5484_v49  ;;  %v5519_v44 = vsel %vm16348_vm5, %v9975_v22, %v9979_v39 }
0x19b6   : > { %v5520_v42 = vsel %vm16349_vm8, %v9979_v39, %v9980_v60  ;;  %v5533_v57 = vsel %vm16351_vm6, %v5518_v0, %v5479_v12  ;;  %vm16353_vm1 = vcmask 31744   ;;  %vm16357_vm5 = vnez %v16356_v63 }
0x19b7   : > { %v5537_v46 = vsel %vm16351_vm6, %v5520_v42, %v5483_v11  ;;  %v9981_v8 = vpack.i.bf16 %v5534_v55, %v5533_v57  ;;  %v5498_v45 = vsel %vm16353_vm1, %v9969_v23, %v9970_v25  ;;  %vm16354_vm0 = vmmov %vm16353_vm1  ;;  %v5536_v16 = vsel %vm16357_vm5, %v5519_v44, %v5482_v9 }
0x19b8   : > { %v5497_v53 = vsel %vm16354_vm0, %v9964_v30, %v9965_v17  ;;  %v9991_v18 = vpack.i.bf16 %v5538_v26, %v5537_v46  ;;  %v5530_v49 = vsel %vm16355_vm13, %v5498_v45, %v9975_v22  ;;  %v5532_v12 = vsel %vm16357_vm5, %v5517_v50, %v5478_v48  ;;  %v16361_v17 = vld [vmem:[#allocation51_spill] sm:$0xff] }
0x19b9   : > { %9982 = vrot.lane.b32.xlu1 %v9981_v8, %s16017_s2  ;;  %v5529_v11 = vsel %vm16358_vm9, %v5497_v53, %v9959_v43  ;;  %v9986_v59 = vpack.i.bf16 %v5533_v57, %v5532_v12  ;;  %v9996_v21 = vpack.i.bf16 %v5537_v46, %v5536_v16  ;;  %vm16360_vm8 = vnez %v16359_v27 }
0x19ba   : > { %9992 = vrot.lane.b32.xlu0 %v9991_v18, %s16017_s2  ;;  %v5535_v10 = vsel %vm16360_vm8, %v5530_v49, %v5481_v4  ;;  %v5531_v9 = vsel %vm16360_vm8, %v5529_v11, %v14431_v54  ;;  %vm16362_vm13 = vnez %v16361_v17  ;;  %vm16363_vm0 = vcmask 326656  }
0x19bb   : > { %v10001_v15 = vpack.i.bf16 %v5535_v10, %v5531_v9  ;;  %vm16364_vm1 = vmmov %vm16363_vm0  ;;  %vm16366_vm9 = vcmask 195584  }
0x19bc   : > { %vm16367_vm8 = vmmov %vm16366_vm9 }
0x19bd   : > { %9987 = vrot.lane.b32.xlu1 %v9986_v59, %s15782_s1  ;;  %vm16370_vm6 = vmmov %vm16363_vm0 }
0x19be   : > { %9997 = vrot.lane.b32.xlu0 %v9996_v21, %s15782_s1 }
0x19c1   : > { %10002 = vrot.lane.b32.xlu1 %v10001_v15, %s15782_s1 }
0x1a2b   : > { %v9983_v32 = vpop.permute.xlu1 %9982 }
0x1a2c   : > { %v9993_v48 = vpop.permute.xlu0 %9992  ;;  %v9985_v43 = vunpack.i.h.bf16 %v9983_v32  ;;  %v9984_v19 = vunpack.i.l.bf16 %v9983_v32 }
0x1a2d   : > { %v9995_v4 = vunpack.i.h.bf16 %v9993_v48  ;;  %v9994_v39 = vunpack.i.l.bf16 %v9993_v48 }
0x1a2f   : > { %v9988_v2 = vpop.permute.xlu1 %9987  ;;  %v5552_v11 = vsel %vm16366_vm9, %v9994_v39, %v9995_v4  ;;  %vm16376_vm9 = vcmask 474112  }
0x1a30   : > { %v9998_v22 = vpop.permute.xlu0 %9997  ;;  %v9990_v7 = vunpack.i.h.bf16 %v9988_v2  ;;  %v9989_v60 = vunpack.i.l.bf16 %v9988_v2 }
0x1a31   : > { %v10000_v25 = vunpack.i.h.bf16 %v9998_v22  ;;  %v9999_v23 = vunpack.i.l.bf16 %v9998_v22 }
0x1a32   : > { %v5588_v30 = vsel %vm16362_vm13, %v9990_v7, %v5534_v55  ;;  %v5572_v54 = vsel %vm16363_vm0, %v9989_v60, %v9990_v7  ;;  %v5551_v55 = vsel %vm16367_vm8, %v9984_v19, %v9985_v43 }
0x1a33   : > { %v5592_v0 = vsel %vm16362_vm13, %v10000_v25, %v5538_v26  ;;  %v5574_v44 = vsel %vm16364_vm1, %v9999_v23, %v10000_v25  ;;  %v10003_v42 = vpop.permute.xlu1 %10002  ;;  %v5587_v8 = vsel %vm16031_vm12, %v5572_v54, %v5533_v57  ;;  %vm16368_vm13 = vmmov %vm16363_vm0 }
0x1a34   : > { %v10005_v45 = vunpack.i.h.bf16 %v10003_v42  ;;  %v10004_v53 = vunpack.i.l.bf16 %v10003_v42  ;;  %v5591_v18 = vsel %vm16031_vm12, %v5574_v44, %v5537_v46  ;;  %v10006_v49 = vpack.i.bf16 %v5588_v30, %v5587_v8  ;;  %vm16369_vm1 = vmmov %vm16363_vm0 }
0x1a35   : > { %v10016_v59 = vpack.i.bf16 %v5592_v0, %v5591_v18 }
0x1a36   : > { %v5573_v21 = vsel %vm16363_vm0, %v10005_v45, %v9999_v23  ;;  %v5584_v26 = vsel %vm16368_vm13, %v5552_v11, %v10005_v45  ;;  %v5571_v15 = vsel %vm16369_vm1, %v10004_v53, %v9989_v60  ;;  %v5583_v32 = vsel %vm16370_vm6, %v5551_v55, %v10004_v53  ;;  %10007 = vrot.lane.b32.xlu0 %v10006_v49, %s15792_s16 }
0x1a37   : > { %10017 = vrot.lane.b32.xlu1 %v10016_v59, %s15792_s16  ;;  %v5589_v46 = vsel %vm16039_vm4, %v5584_v26, %v5535_v10  ;;  %v5590_v2 = vsel %vm16041_vm11, %v5573_v21, %v5536_v16  ;;  %v5585_v43 = vsel %vm16039_vm4, %v5583_v32, %v5531_v9  ;;  %v5586_v19 = vsel %vm16041_vm11, %v5571_v15, %v5532_v12 }
0x1a38   : > { %v10021_v22 = vpack.i.bf16 %v5590_v2, %v5589_v46  ;;  %v10011_v7 = vpack.i.bf16 %v5586_v19, %v5585_v43  ;;  %vm16373_vm6 = vcmask 343040  }
0x1a39   : > { %vm16374_vm8 = vmmov %vm16373_vm6 }
0x1a3a   : > { %10012 = vrot.lane.b32.xlu0 %v10011_v7, %s15792_s16  ;;  %vm16375_vm13 = vmmov %vm16373_vm6 }
0x1a3b   : > { %10022 = vrot.lane.b32.xlu1 %v10021_v22, %s15792_s16  ;;  %vm16377_vm0 = vmmov %vm16373_vm6 }
0x1a3c   : > { %vm16378_vm1 = vmmov %vm16377_vm0 }
0x1a3d   : > { %vm16379_vm11 = vmmov %vm16377_vm0 }
0x1aa8   : > { %v10008_v60 = vpop.permute.xlu0 %10007 }
0x1aa9   : > { %v10018_v4 = vpop.permute.xlu1 %10017  ;;  %v10010_v39 = vunpack.i.h.bf16 %v10008_v60  ;;  %v10009_v25 = vunpack.i.l.bf16 %v10008_v60 }
0x1aaa   : > { %v10020_v55 = vunpack.i.h.bf16 %v10018_v4  ;;  %v10019_v59 = vunpack.i.l.bf16 %v10018_v4 }
0x1aab   : > { %v5619_v23 = vsel %vm16373_vm6, %v10009_v25, %v10010_v39  ;;  %vm16381_vm6 = vmmov %vm16377_vm0 }
0x1aac   : > { %v10013_v10 = vpop.permute.xlu0 %10012  ;;  %v5629_v42 = vsel %vm16376_vm9, %v5619_v23, 0.0 }
0x1aad   : > { %v10023_v16 = vpop.permute.xlu1 %10022  ;;  %v10015_v30 = vunpack.i.h.bf16 %v10013_v10  ;;  %v10014_v54 = vunpack.i.l.bf16 %v10013_v10 }
0x1aae   : > { %v10025_v9 = vunpack.i.h.bf16 %v10023_v16  ;;  %v10024_v0 = vunpack.i.l.bf16 %v10023_v16 }
0x1aaf   : > { %v5618_v12 = vsel %vm16374_vm8, %v10015_v30, %v10009_v25  ;;  %v5617_v44 = vsel %vm16375_vm13, %v10014_v54, %v10015_v30  ;;  %v5627_v49 = vsel %vm16379_vm11, 0.0, %v10014_v54  ;;  %vm16380_vm11 = vmmov %vm16377_vm0  ;;  %vm16383_vm13 = vcmask 1039360  }
0x1ab0   : > { %v5620_v8 = vsel %vm16377_vm0, %v10024_v0, %v10025_v9  ;;  %v10026_v45 = vpack.i.bf16 %v5618_v12, %v5617_v44  ;;  %v5628_v18 = vsel %vm16378_vm1, 0.0, %v10024_v0  ;;  %v5622_v21 = vsel %vm16380_vm11, %v10019_v59, %v10020_v55  ;;  %vm16382_vm8 = vmmov %vm16376_vm9 }
0x1ab1   : > { %v10066_v53 = vpack.i.bf16 %v5620_v8, %v5629_v42  ;;  %v10076_v11 = vpack.i.bf16 %v5628_v18, %v5627_v49  ;;  %v5621_v26 = vsel %vm16381_vm6, %v10025_v9, %v10019_v59  ;;  %v5630_v15 = vsel %vm16382_vm8, %v5622_v21, 0.0  ;;  %vm16384_vm9 = vmmov %vm16383_vm13 }
0x1ab2   : > { %10027 = vrot.lane.b32.xlu0 %v10026_v45, %s16265_s6  ;;  %v10071_v32 = vpack.i.bf16 %v5630_v15, %v5621_v26  ;;  %vm16385_vm0 = vmmov %vm16384_vm9  ;;  %vm16386_vm1 = vcmask 1031168   ;;  %vm16389_vm8 = vcmask 883712  }
0x1ab3   : > { %10067 = vrot.lane.b32.xlu1 %v10066_v53, %s16265_s6  ;;  %vm16387_vm11 = vmmov %vm16386_vm1 }
0x1ab4   : > { %vm16388_vm6 = vmmov %vm16386_vm1 }
0x1ab6   : > { %10032 = vrot.lane.b32.xlu0 %v10026_v45, %s16054_s0 }
0x1ab7   : > { %10077 = vrot.lane.b32.xlu1 %v10076_v11, %s16265_s6 }
0x1aba   : > { %10037 = vrot.lane.b32.xlu0 %v10026_v45, %s15982_s21 }
0x1abb   : > { %10082 = vrot.lane.b32.xlu1 %v10066_v53, %s16054_s0 }
0x1abe   : > { %10042 = vrot.lane.b32.xlu0 %v10026_v45, %s16055_s3 }
0x1abf   : > { %10092 = vrot.lane.b32.xlu1 %v10076_v11, %s16054_s0 }
0x1ac2   : > { %10047 = vrot.lane.b32.xlu0 %v10026_v45, %s15802_s23 }
0x1ac3   : > { %10097 = vrot.lane.b32.xlu1 %v10066_v53, %s15982_s21 }
0x1ac6   : > { %10052 = vrot.lane.b32.xlu0 %v10026_v45, %s15956_s28 }
0x1ac7   : > { %10107 = vrot.lane.b32.xlu1 %v10076_v11, %s15982_s21 }
0x1aca   : > { %10057 = vrot.lane.b32.xlu0 %v10026_v45, %s15803_s26 }
0x1acb   : > { %10112 = vrot.lane.b32.xlu1 %v10066_v53, %s16055_s3 }
0x1ace   : > { %10062 = vrot.lane.b32.xlu0 %v10026_v45, %s15805_s27 }
0x1acf   : > { %10122 = vrot.lane.b32.xlu1 %v10076_v11, %s16055_s3 }
0x1ad2   : > { %10072 = vrot.lane.b32.xlu0 %v10071_v32, %s16265_s6 }
0x1ad3   : > { %10127 = vrot.lane.b32.xlu1 %v10066_v53, %s15802_s23 }
0x1ad6   : > { %10087 = vrot.lane.b32.xlu0 %v10071_v32, %s16054_s0 }
0x1ad7   : > { %10137 = vrot.lane.b32.xlu1 %v10076_v11, %s15802_s23 }
0x1ada   : > { %10102 = vrot.lane.b32.xlu0 %v10071_v32, %s15982_s21 }
0x1adb   : > { %10142 = vrot.lane.b32.xlu1 %v10066_v53, %s15956_s28 }
0x1ade   : > { %10117 = vrot.lane.b32.xlu0 %v10071_v32, %s16055_s3 }
0x1adf   : > { %10152 = vrot.lane.b32.xlu1 %v10076_v11, %s15956_s28 }
0x1ae2   : > { %10132 = vrot.lane.b32.xlu0 %v10071_v32, %s15802_s23 }
0x1ae3   : > { %10157 = vrot.lane.b32.xlu1 %v10066_v53, %s15803_s26 }
0x1ae6   : > { %10147 = vrot.lane.b32.xlu0 %v10071_v32, %s15956_s28 }
0x1ae7   : > { %10167 = vrot.lane.b32.xlu1 %v10076_v11, %s15803_s26 }
0x1aea   : > { %10162 = vrot.lane.b32.xlu0 %v10071_v32, %s15803_s26 }
0x1aeb   : > { %10172 = vrot.lane.b32.xlu1 %v10066_v53, %s15805_s27 }
0x1aee   : > { %10177 = vrot.lane.b32.xlu0 %v10071_v32, %s15805_s27 }
0x1aef   : > { %10182 = vrot.lane.b32.xlu1 %v10076_v11, %s15805_s27 }
0x1b24   : > { %v10028_v46 = vpop.permute.xlu0 %10027 }
0x1b25   : > { %v14559_v2 = vpop.permute.xlu1 %10067  ;;  %v10030_v43 = vunpack.i.h.bf16 %v10028_v46  ;;  %v10029_v19 = vunpack.i.l.bf16 %v10028_v46 }
0x1b26   : > { %v10069_v22 = vunpack.i.l.bf16 %v14559_v2 }
0x1b27   : > { %v5652_v7 = vsel %vm16383_vm13, %v10029_v19, %v10030_v43  ;;  %vm16390_vm13 = vmmov %vm16389_vm8 }
0x1b28   : > { %v5653_v60 = vsel %vm16384_vm9, %v10030_v43, %v10069_v22  ;;  %v10033_v4 = vpop.permute.xlu0 %10032  ;;  %vm16391_vm9 = vmmov %vm16389_vm8 }
0x1b29   : > { %v14564_v39 = vpop.permute.xlu1 %10077  ;;  %v10186_v25 = vpack.i.bf16 %v5653_v60, %v5652_v7  ;;  %v10035_v16 = vunpack.i.h.bf16 %v10033_v4  ;;  %v10034_v30 = vunpack.i.l.bf16 %v10033_v4 }
0x1b2a   : > { %v10079_v10 = vunpack.i.l.bf16 %v14564_v39 }
0x1b2b   : > { %10187 = vrot.lane.b32.xlu0 %v10186_v25, %s16055_s3  ;;  %v5674_v44 = vsel %vm16386_vm1, %v10034_v30, %v10035_v16 }
0x1b2c   : > { %v5651_v23 = vsel %vm16385_vm0, %v10079_v10, %v10029_v19  ;;  %v10038_v54 = vpop.permute.xlu0 %10037  ;;  %vm16392_vm0 = vcmask 875520  }
0x1b2d   : > { %v14569_v9 = vpop.permute.xlu1 %10082  ;;  %v10191_v0 = vpack.i.bf16 %v10069_v22, %v5651_v23  ;;  %v10040_v49 = vunpack.i.h.bf16 %v10038_v54  ;;  %v10039_v11 = vunpack.i.l.bf16 %v10038_v54  ;;  %vm16393_vm1 = vmmov %vm16392_vm0 }
0x1b2e   : > { %v10084_v12 = vunpack.i.l.bf16 %v14569_v9 }
0x1b2f   : > { %10192 = vrot.lane.b32.xlu0 %v10191_v0, %s16055_s3  ;;  %v5696_v32 = vsel %vm16389_vm8, %v10039_v11, %v10040_v49 }
0x1b30   : > { %v5675_v42 = vsel %vm16387_vm11, %v10035_v16, %v10084_v12  ;;  %v10043_v8 = vpop.permute.xlu0 %10042  ;;  %vm16394_vm11 = vmmov %vm16392_vm0 }
0x1b31   : > { %v14575_v45 = vpop.permute.xlu1 %10092  ;;  %v10196_v53 = vpack.i.bf16 %v5675_v42, %v5674_v44  ;;  %v10045_v60 = vunpack.i.h.bf16 %v10043_v8  ;;  %v10044_v4 = vunpack.i.l.bf16 %v10043_v8 }
0x1b32   : > { %v10094_v18 = vunpack.i.l.bf16 %v14575_v45 }
0x1b33   : > { %10197 = vrot.lane.b32.xlu0 %v10196_v53, %s16055_s3  ;;  %v14602_v54 = vsel %vm16392_vm0, %v10044_v4, %v10045_v60 }
0x1b34   : > { %v5673_v55 = vsel %vm16388_vm6, %v10094_v18, %v10034_v30  ;;  %v10048_v59 = vpop.permute.xlu0 %10047  ;;  %vm16395_vm6 = vcmask 1039360  }
0x1b35   : > { %v14580_v21 = vpop.permute.xlu1 %10097  ;;  %v10201_v26 = vpack.i.bf16 %v10084_v12, %v5673_v55  ;;  %v10050_v53 = vunpack.i.h.bf16 %v10048_v59  ;;  %v10049_v18 = vunpack.i.l.bf16 %v10048_v59  ;;  %v10070_v55 = vunpack.i.h.bf16 %v14559_v2  ;;  %vm16396_vm8 = vmmov %vm16395_vm6 }
0x1b36   : > { %v10099_v15 = vunpack.i.l.bf16 %v14580_v21  ;;  %vm16399_vm0 = vmmov %vm16395_vm6 }
0x1b37   : > { %10202 = vrot.lane.b32.xlu0 %v10201_v26, %s16055_s3 }
0x1b38   : > { %v5697_v46 = vsel %vm16390_vm13, %v10040_v49, %v10099_v15  ;;  %v14586_v43 = vpop.permute.xlu0 %10052  ;;  %vm16397_vm13 = vcmask 867328  }
0x1b39   : > { %v14588_v19 = vpop.permute.xlu1 %10107  ;;  %v10206_v22 = vpack.i.bf16 %v5697_v46, %v5696_v32  ;;  %v10055_v50 = vunpack.i.h.bf16 %v14586_v43 }
0x1b3a   : > { %v10109_v7 = vunpack.i.l.bf16 %v14588_v19 }
0x1b3b   : > { %10207 = vrot.lane.b32.xlu0 %v10206_v22, %s16055_s3  ;;  %v10080_v22 = vunpack.i.h.bf16 %v14564_v39 }
0x1b3c   : > { %v5695_v25 = vsel %vm16391_vm9, %v10109_v7, %v10039_v11  ;;  %v14593_v10 = vpop.permute.xlu0 %10057  ;;  %vm16398_vm9 = vmmov %vm16397_vm13 }
0x1b3d   : > { %v14595_v23 = vpop.permute.xlu1 %10112  ;;  %v10211_v16 = vpack.i.bf16 %v10099_v15, %v5695_v25  ;;  %v5654_v39 = vsel %vm16399_vm0, %v10080_v22, %v10070_v55  ;;  %vm16406_vm0 = vcmask 875520  }
0x1b3e   : > { %v14598_v30 = vunpack.i.l.bf16 %v14595_v23 }
0x1b3f   : > { %10212 = vrot.lane.b32.xlu0 %v10211_v16, %s16055_s3 }
0x1b40   : > { %v14606_v0 = vsel %vm16393_vm1, %v10045_v60, %v14598_v30  ;;  %v14608_v12 = vpop.permute.xlu0 %10062  ;;  %vm16400_vm1 = vmmov %vm16398_vm9 }
0x1b41   : > { %v14610_v44 = vpop.permute.xlu1 %10122  ;;  %v10216_v42 = vpack.i.bf16 %v14606_v0, %v14602_v54 }
0x1b42   : > { %v10124_v8 = vunpack.i.l.bf16 %v14610_v44 }
0x1b43   : > { %10217 = vrot.lane.b32.xlu0 %v10216_v42, %s16055_s3 }
0x1b44   : > { %v14617_v49 = vsel %vm16394_vm11, %v10124_v8, %v10044_v4  ;;  %v10073_v11 = vpop.permute.xlu0 %10072  ;;  %v5740_v4 = vsel %vm16397_vm13, %v10049_v18, %v10050_v53  ;;  %vm16401_vm11 = vcmask 1031168  }
0x1b45   : > { %v14620_v26 = vpop.permute.xlu1 %10127  ;;  %v10075_v15 = vunpack.i.h.bf16 %v10073_v11  ;;  %v10074_v32 = vunpack.i.l.bf16 %v10073_v11  ;;  %v10221_v46 = vpack.i.bf16 %v14598_v30, %v14617_v49 }
0x1b46   : > { %v10129_v7 = vunpack.i.l.bf16 %v14620_v26 }
0x1b47   : > { %v5655_v60 = vsel %vm16395_vm6, %v10070_v55, %v10074_v32  ;;  %v5656_v59 = vsel %vm16396_vm8, %v10074_v32, %v10075_v15  ;;  %10222 = vrot.lane.b32.xlu0 %v10221_v46, %s16055_s3  ;;  %v10085_v32 = vunpack.i.h.bf16 %v14569_v9  ;;  %v10095_v46 = vunpack.i.h.bf16 %v14575_v45  ;;  %vm16402_vm6 = vmmov %vm16401_vm11 }
0x1b48   : > { %v5741_v2 = vsel %vm16398_vm9, %v10050_v53, %v10129_v7  ;;  %v10088_v25 = vpop.permute.xlu0 %10087  ;;  %v10266_v16 = vpack.i.bf16 %v5656_v59, %v5655_v60  ;;  %v10054_v53 = vunpack.i.l.bf16 %v14586_v43  ;;  %v10271_v60 = vpack.i.bf16 %v10075_v15, %v5654_v39  ;;  %vm16404_vm13 = vmmov %vm16402_vm6 }
0x1b49   : > { %v14631_v42 = vpop.permute.xlu1 %10137  ;;  %v10090_v8 = vunpack.i.h.bf16 %v10088_v25  ;;  %v10089_v11 = vunpack.i.l.bf16 %v10088_v25  ;;  %v10226_v48 = vpack.i.bf16 %v5741_v2, %v5740_v4  ;;  %vm16403_vm8 = vcmask 719872  }
0x1b4a   : > { %v10139_v57 = vunpack.i.l.bf16 %v14631_v42  ;;  %10267 = vrot.lane.b32.xlu1 %v10266_v16, %s16055_s3  ;;  %v5762_v45 = vsel %vm16403_vm8, %v10054_v53, %v10055_v50  ;;  %v10125_v43 = vunpack.i.h.bf16 %v14610_v44  ;;  %vm16405_vm9 = vmmov %vm16403_vm8  ;;  %v10100_v44 = vunpack.i.h.bf16 %v14580_v21 }
0x1b4b   : > { %10227 = vrot.lane.b32.xlu0 %v10226_v48, %s16055_s3  ;;  %v5677_v55 = vsel %vm16401_vm11, %v10085_v32, %v10089_v11  ;;  %v5678_v22 = vsel %vm16402_vm6, %v10089_v11, %v10090_v8  ;;  %v5676_v48 = vsel %vm16404_vm13, %v10095_v46, %v10085_v32  ;;  %v10060_v32 = vunpack.i.h.bf16 %v14593_v10  ;;  %vm16408_vm11 = vmmov %vm16406_vm0 }
0x1b4c   : > { %v5739_v59 = vsel %vm16400_vm1, %v10139_v57, %v10049_v18  ;;  %v10103_v4 = vpop.permute.xlu0 %10102  ;;  %v10115_v57 = vunpack.i.h.bf16 %v14595_v23  ;;  %v10276_v11 = vpack.i.bf16 %v5678_v22, %v5677_v55  ;;  %v10059_v46 = vunpack.i.l.bf16 %v14593_v10  ;;  %vm16407_vm1 = vmmov %vm16406_vm0 }
0x1b4d   : > { %v14644_v2 = vpop.permute.xlu1 %10142  ;;  %v10231_v25 = vpack.i.bf16 %v10129_v7, %v5739_v59  ;;  %v10105_v15 = vunpack.i.h.bf16 %v10103_v4  ;;  %v10104_v7 = vunpack.i.l.bf16 %v10103_v4  ;;  %v10281_v22 = vpack.i.bf16 %v10090_v8, %v5676_v48  ;;  %vm16409_vm6 = vmmov %vm16403_vm8 }
0x1b4e   : > { %v10144_v9 = vunpack.i.l.bf16 %v14644_v2  ;;  %10272 = vrot.lane.b32.xlu1 %v10271_v60, %s16055_s3  ;;  %vm16410_vm8 = vcmask 883712  }
0x1b4f   : > { %10232 = vrot.lane.b32.xlu0 %v10231_v25, %s16055_s3  ;;  %vm16411_vm13 = vmmov %vm16410_vm8 }
0x1b50   : > { %v5763_v18 = vsel %vm16405_vm9, %v10055_v50, %v10144_v9  ;;  %v10118_v16 = vpop.permute.xlu0 %10117  ;;  %v5720_v50 = vsel %vm16406_vm0, %v10125_v43, %v10115_v57  ;;  %v5700_v43 = vsel %vm16411_vm13, %v10104_v7, %v10105_v15  ;;  %vm16412_vm9 = vcmask 711680  }
0x1b51   : > { %v14654_v39 = vpop.permute.xlu1 %10152  ;;  %v14656_v59 = vunpack.i.h.bf16 %v10118_v16  ;;  %v10119_v60 = vunpack.i.l.bf16 %v10118_v16  ;;  %v10236_v17 = vpack.i.bf16 %v5763_v18, %v5762_v45  ;;  %v5699_v18 = vsel %vm16410_vm8, %v10100_v44, %v10104_v7  ;;  %vm16413_vm0 = vmmov %vm16412_vm9 }
0x1b52   : > { %v10154_v23 = vunpack.i.l.bf16 %v14654_v39  ;;  %10277 = vrot.lane.b32.xlu1 %v10276_v11, %s16055_s3  ;;  %v7505_v8 = vpack.c.bf16 %v5720_v50, %v14617_v49  ;;  %v10286_v48 = vpack.i.bf16 %v5700_v43, %v5699_v18  ;;  %v10064_v7 = vunpack.i.l.bf16 %v14608_v12 }
0x1b53   : > { %10237 = vrot.lane.b32.xlu0 %v10236_v17, %s16055_s3  ;;  %v7539_v4 = vpack.c.bf16 %v14656_v59, %v14598_v30  ;;  %v5721_v55 = vsel %vm16407_vm1, %v10115_v57, %v10119_v60  ;;  %v5722_v21 = vsel %vm16408_vm11, %v10119_v60, %v14656_v59  ;;  %vm16414_vm1 = vmmov %vm16410_vm8 }
0x1b54   : > { %v5761_v25 = vsel %vm16409_vm6, %v10154_v23, %v10054_v53  ;;  %v7503_v10 = vpack.c.bf16 %v5721_v55, %v14602_v54  ;;  %v7541_v45 = vpack.c.bf16 %v5722_v21, %v14606_v0  ;;  %v10110_v53 = vunpack.i.h.bf16 %v14588_v19  ;;  %vm16415_vm11 = vmmov %vm16413_vm0 }
0x1b55   : > { %v14675_v17 = vpop.permute.xlu1 %10157  ;;  %7540 = vmatprep.subr.bf16.mxu1 %v7539_v4  ;;  %v10241_v30 = vpack.i.bf16 %v10144_v9, %v5761_v25  ;;  %v5784_v54 = vsel %vm16412_vm9, %v10059_v46, %v10060_v32  ;;  %v10065_v19 = vunpack.i.h.bf16 %v14608_v12  ;;  %vm16416_vm6 = vcmask 703488  }
0x1b56   : > { %v10159_v57 = vunpack.i.l.bf16 %v14675_v17  ;;  %10282 = vrot.lane.b32.xlu1 %v10281_v22, %s16055_s3  ;;  %7504 = vmatprep.subr.bf16.mxu0 %v7503_v10  ;;  %v5698_v49 = vsel %vm16414_vm1, %v10110_v53, %v10100_v44  ;;  %v10133_v22 = vpop.permute.xlu0 %10132  ;;  %v10296_v10 = vpack.i.bf16 %v5722_v21, %v5721_v55  ;;  %vm16417_vm8 = vmmov %vm16416_vm6  ;;  %vm16419_vm9 = vcmask 867328  }
0x1b57   : > { %7542 = vmatpush1.bf16.msra.mxu1 %v7541_v45  ;;  %10242 = vrot.lane.b32.xlu0 %v10241_v30, %s16055_s3  ;;  %v10291_v60 = vpack.i.bf16 %v10105_v15, %v5698_v49  ;;  %v5806_v44 = vsel %vm16416_vm6, %v10064_v7, %v10065_v19  ;;  %v10135_v18 = vunpack.i.h.bf16 %v10133_v22  ;;  %v10134_v12 = vunpack.i.l.bf16 %v10133_v22  ;;  %vm16418_vm13 = vmmov %vm16416_vm6 }
0x1b58   : > { %v5785_v0 = vsel %vm16413_vm0, %v10060_v32, %v10159_v57  ;;  %7506 = vmatpush1.bf16.msra.mxu0 %v7505_v8  ;;  %v10130_v30 = vunpack.i.h.bf16 %v14620_v26  ;;  %v10301_v8 = vpack.i.bf16 %v14656_v59, %v5720_v50  ;;  %vm16420_vm0 = vmmov %vm16419_vm9  ;;  %v5813_v26 = vld [vmem:[%s15220_s11] sm:$0xff]  ;;  %v10145_v59 = vunpack.i.h.bf16 %v14644_v2 }
0x1b59   : > { %v14684_v16 = vpop.permute.xlu1 %10167  ;;  %v10246_v9 = vpack.i.bf16 %v5785_v0, %v5784_v54  ;;  %v5744_v55 = vsel %vm16420_vm0, %v10134_v12, %v10135_v18  ;;  %v10140_v0 = vunpack.i.h.bf16 %v14631_v42  ;;  %vm16421_vm1 = vmmov %vm16420_vm0  ;;  %v10160_v2 = vunpack.i.h.bf16 %v14675_v17 }
0x1b5a   : > { %v10169_v11 = vunpack.i.l.bf16 %v14684_v16  ;;  %10287 = vrot.lane.b32.xlu1 %v10286_v48, %s16055_s3  ;;  %v5743_v53 = vsel %vm16419_vm9, %v10130_v30, %v10134_v12  ;;  %v10148_v54 = vpop.permute.xlu0 %10147  ;;  %v10170_v12 = vunpack.i.h.bf16 %v14684_v16  ;;  %v5812_v16 = vld [vmem:[%s15219_s10 + $0x8] sm:$0xff] }
0x1b5b   : > { %10247 = vrot.lane.b32.xlu0 %v10246_v9, %s16055_s3  ;;  %v10306_v48 = vpack.i.bf16 %v5744_v55, %v5743_v53  ;;  %v10150_v9 = vunpack.i.h.bf16 %v10148_v54  ;;  %v5742_v50 = vsel %vm16421_vm1, %v10140_v0, %v10130_v30  ;;  %vm16428_vm1 = vcmask 703488  }
0x1b5c   : > { %v5783_v32 = vsel %vm16415_vm11, %v10169_v11, %v10059_v46  ;;  %v10149_v11 = vunpack.i.l.bf16 %v10148_v54  ;;  %v10311_v49 = vpack.i.bf16 %v10135_v18, %v5742_v50  ;;  %vm16422_vm11 = vcmask 719872  }
0x1b5d   : > { %v14693_v23 = vpop.permute.xlu1 %10172  ;;  %v10251_v4 = vpack.i.bf16 %v10159_v57, %v5783_v32  ;;  %vm16423_vm6 = vmmov %vm16422_vm11 }
0x1b5e   : > { %v10174_v25 = vunpack.i.l.bf16 %v14693_v23  ;;  %10292 = vrot.lane.b32.xlu1 %v10291_v60, %s16055_s3  ;;  %v5766_v42 = vsel %vm16423_vm6, %v10149_v11, %v10150_v9  ;;  %v10155_v60 = vunpack.i.h.bf16 %v14654_v39  ;;  %v10175_v30 = vunpack.i.h.bf16 %v14693_v23 }
0x1b5f   : > { %10252 = vrot.lane.b32.xlu0 %v10251_v4, %s16055_s3 }
0x1b60   : > { %v5807_v45 = vsel %vm16417_vm8, %v10065_v19, %v10174_v25  ;;  %v5765_v19 = vsel %vm16422_vm11, %v10145_v59, %v10149_v11  ;;  %vm16424_vm8 = vmmov %vm16423_vm6  ;;  %vm16430_vm6 = vcmask 130048  }
0x1b61   : > { %v10183_v15 = vpop.permute.xlu1 %10182  ;;  %v10256_v43 = vpack.i.bf16 %v5807_v45, %v5806_v44  ;;  %v10316_v32 = vpack.i.bf16 %v5766_v42, %v5765_v19  ;;  %vm16429_vm11 = vmmov %vm16428_vm1  ;;  %7145 = vmatprep.mubr.msk.f32.mxu0 %vm16430_vm6, %v5812_v16 }
0x1b62   : > { %v10184_v46 = vunpack.i.l.bf16 %v10183_v15  ;;  %10297 = vrot.lane.b32.xlu1 %v10296_v10, %s16055_s3 }
0x1b63   : > { %10257 = vrot.lane.b32.xlu0 %v10256_v43, %s16055_s3 }
0x1b64   : > { %v5805_v57 = vsel %vm16418_vm13, %v10184_v46, %v10064_v7  ;;  %v10163_v7 = vpop.permute.xlu0 %10162  ;;  %vm16425_vm13 = vcmask 711680  }
0x1b65   : > { %v10261_v21 = vpack.i.bf16 %v10174_v25, %v5805_v57  ;;  %v10165_v4 = vunpack.i.h.bf16 %v10163_v7  ;;  %v10164_v22 = vunpack.i.l.bf16 %v10163_v7  ;;  %v5764_v25 = vsel %vm16424_vm8, %v10155_v60, %v10145_v59  ;;  %vm16426_vm9 = vmmov %vm16425_vm13 }
0x1b66   : > { %10302 = vrot.lane.b32.xlu1 %v10301_v8, %s16055_s3  ;;  %v10321_v44 = vpack.i.bf16 %v10150_v9, %v5764_v25  ;;  %vm16427_vm0 = vmmov %vm16426_vm9  ;;  %v10185_v8 = vunpack.i.h.bf16 %v10183_v15 }
0x1b67   : > { %10262 = vrot.lane.b32.xlu0 %v10261_v21, %s16055_s3  ;;  %v5787_v10 = vsel %vm16425_vm13, %v10160_v2, %v10164_v22  ;;  %v5788_v45 = vsel %vm16426_vm9, %v10164_v22, %v10165_v4  ;;  %v5786_v17 = vsel %vm16427_vm0, %v10170_v12, %v10160_v2  ;;  %vm16431_vm8 = vmmov %vm16430_vm6  ;;  %vm16433_vm9 = vcmask 875520  }
0x1b68   : > { %v10178_v18 = vpop.permute.xlu0 %10177  ;;  %v10326_v39 = vpack.i.bf16 %v5788_v45, %v5787_v10  ;;  %v10331_v57 = vpack.i.bf16 %v10165_v4, %v5786_v17  ;;  %7146 = vmatprep.mubr.msk.f32.mxu1 %vm16431_vm8, %v5812_v16  ;;  %vm16432_vm13 = vmmov %vm16428_vm1 }
0x1b69   : > { %v10180_v43 = vunpack.i.h.bf16 %v10178_v18  ;;  %v10179_v46 = vunpack.i.l.bf16 %v10178_v18  ;;  %v5808_v23 = vsel %vm16432_vm13, %v10185_v8, %v10175_v30  ;;  %vm16434_vm0 = vmmov %vm16433_vm9 }
0x1b6a   : > { %10307 = vrot.lane.b32.xlu1 %v10306_v48, %s16055_s3  ;;  %vm16437_vm6 = vmmov %vm16434_vm0 }
0x1b6b   : > { %5816 = vperm.xlu0 %8044, %v5813_v26   ;;  %v5809_v53 = vsel %vm16428_vm1, %v10175_v30, %v10179_v46  ;;  %v5810_v55 = vsel %vm16429_vm11, %v10179_v46, %v10180_v43  ;;  %v10341_v15 = vpack.i.bf16 %v10180_v43, %v5808_v23  ;;  %vm16435_vm1 = vmmov %vm16434_vm0 }
0x1b6c   : > { %v10336_v21 = vpack.i.bf16 %v5810_v55, %v5809_v53  ;;  %vm16436_vm11 = vmmov %vm16434_vm0 }
0x1b6d   : > { %vm16438_vm8 = vmmov %vm16434_vm0 }
0x1b6e   : > { %10312 = vrot.lane.b32.xlu1 %v10311_v49, %s16055_s3  ;;  %vm16439_vm13 = vmmov %vm16434_vm0 }
0x1b72   : > { %10317 = vrot.lane.b32.xlu1 %v10316_v32, %s16055_s3 }
0x1b76   : > { %10322 = vrot.lane.b32.xlu1 %v10321_v44, %s16055_s3 }
0x1b7a   : > { %10327 = vrot.lane.b32.xlu1 %v10326_v39, %s16055_s3 }
0x1b7e   : > { %10332 = vrot.lane.b32.xlu1 %v10331_v57, %s16055_s3 }
0x1b82   : > { %10337 = vrot.lane.b32.xlu1 %v10336_v21, %s16055_s3 }
0x1b86   : > { %10342 = vrot.lane.b32.xlu1 %v10341_v15, %s16055_s3 }
0x1b9d   : > { %v10188_v54 = vpop.permute.xlu0 %10187 }
0x1b9e   : > { %v10190_v59 = vunpack.i.h.bf16 %v10188_v54  ;;  %v10189_v50 = vunpack.i.l.bf16 %v10188_v54 }
0x1ba0   : > { %v5948_v4 = vsel %vm16433_vm9, %v10189_v50, %v10190_v59  ;;  %vm16440_vm9 = vmmov %vm16434_vm0 }
0x1ba1   : > { %v10193_v0 = vpop.permute.xlu0 %10192 }
0x1ba2   : > { %v10195_v60 = vunpack.i.h.bf16 %v10193_v0  ;;  %v10194_v32 = vunpack.i.l.bf16 %v10193_v0 }
0x1ba4   : > { %v5949_v45 = vsel %vm16435_vm1, %v10190_v59, %v10195_v60  ;;  %v5947_v18 = vsel %vm16436_vm11, %v10194_v32, %v10189_v50  ;;  %vm16441_vm1 = vmmov %vm16434_vm0 }
0x1ba5   : > { %v10198_v48 = vpop.permute.xlu0 %10197  ;;  %vm16442_vm11 = vmmov %vm16434_vm0 }
0x1ba6   : > { %v10200_v12 = vunpack.i.h.bf16 %v10198_v48  ;;  %v10199_v39 = vunpack.i.l.bf16 %v10198_v48 }
0x1ba8   : > { %v5954_v15 = vsel %vm16439_vm13, %v10199_v39, %v10200_v12  ;;  %vm16445_vm13 = vmmov %vm16434_vm0 }
0x1ba9   : > { %v10203_v26 = vpop.permute.xlu0 %10202 }
0x1baa   : > { %v10205_v21 = vunpack.i.h.bf16 %v10203_v26  ;;  %v10204_v23 = vunpack.i.l.bf16 %v10203_v26 }
0x1bad   : > { %v14741_v9 = vpop.permute.xlu0 %10207 }
0x1bae   : > { %v10209_v26 = vunpack.i.l.bf16 %v14741_v9 }
0x1bb1   : > { %v14743_v11 = vpop.permute.xlu0 %10212 }
0x1bb5   : > { %v14745_v19 = vpop.permute.xlu0 %10217 }
0x1bb9   : > { %v14751_v43 = vpop.permute.xlu0 %10222 }
0x1bbc   : > { %v10268_v49 = vpop.permute.xlu1 %10267 }
0x1bbd   : > { %v10270_v42 = vunpack.i.h.bf16 %v10268_v49  ;;  %v10269_v7 = vunpack.i.l.bf16 %v10268_v49  ;;  %v14757_v59 = vpop.permute.xlu0 %10227 }
0x1bbf   : > { %v5951_v22 = vsel %vm16434_vm0, %v10269_v7, %v10270_v42 }
0x1bc0   : > { %v10273_v2 = vpop.permute.xlu1 %10272  ;;  %v7507_v25 = vpack.c.bf16 %v5951_v22, %v5948_v4 }
0x1bc1   : > { %v10275_v44 = vunpack.i.h.bf16 %v10273_v2  ;;  %v10274_v10 = vunpack.i.l.bf16 %v10273_v2 }
0x1bc2   : > { %7508 = vmatprep.subr.bf16.mxu0 %v7507_v25 }
0x1bc3   : > { %v5950_v46 = vsel %vm16437_vm6, %v10274_v10, %v10269_v7  ;;  %v5952_v30 = vsel %vm16438_vm8, %v10270_v42, %v10275_v44  ;;  %v7543_v17 = vpack.c.bf16 %v10275_v44, %v10195_v60  ;;  %v5953_v42 = vsel %vm16434_vm0, %v10204_v23, %v10199_v39  ;;  %vm16443_vm6 = vmmov %vm16434_vm0  ;;  %v14767_v39 = vpop.permute.xlu0 %10232 }
0x1bc4   : > { %v10278_v57 = vpop.permute.xlu1 %10277  ;;  %v7509_v8 = vpack.c.bf16 %v5950_v46, %v5947_v18  ;;  %v7545_v53 = vpack.c.bf16 %v5952_v30, %v5949_v45  ;;  %v5955_v7 = vsel %vm16441_vm1, %v10200_v12, %v10205_v21  ;;  %v10210_v60 = vunpack.i.h.bf16 %v14741_v9  ;;  %vm16444_vm8 = vmmov %vm16434_vm0 }
0x1bc5   : > { %v10280_v55 = vunpack.i.h.bf16 %v10278_v57  ;;  %v10279_v16 = vunpack.i.l.bf16 %v10278_v57  ;;  %7544 = vmatprep.subr.bf16.mxu1 %v7543_v17  ;;  %v10215_v18 = vunpack.i.h.bf16 %v14743_v11  ;;  %v10214_v12 = vunpack.i.l.bf16 %v14743_v11  ;;  %vm16447_vm1 = vmmov %vm16434_vm0 }
0x1bc6   : > { %7510 = vmatpush1.bf16.msra.mxu0 %v7509_v8  ;;  %7546 = vmatpush1.bf16.msra.mxu1 %v7545_v53  ;;  %v5960_v9 = vsel %vm16444_vm8, %v10209_v26, %v10210_v60  ;;  %v10219_v11 = vunpack.i.l.bf16 %v14745_v19  ;;  %vm16450_vm8 = vmmov %vm16434_vm0 }
0x1bc7   : > { %v5957_v54 = vsel %vm16440_vm9, %v10279_v16, %v10280_v55  ;;  %vm16446_vm9 = vmmov %vm16434_vm0 }
0x1bc8   : > { %v10283_v0 = vpop.permute.xlu1 %10282  ;;  %v7511_v48 = vpack.c.bf16 %v5957_v54, %v5954_v15  ;;  %v5959_v53 = vsel %vm16446_vm9, %v10214_v12, %v10209_v26  ;;  %vm16452_vm9 = vmmov %vm16434_vm0 }
0x1bc9   : > { %v10285_v50 = vunpack.i.h.bf16 %v10283_v0  ;;  %v10284_v49 = vunpack.i.l.bf16 %v10283_v0 }
0x1bca   : > { %7512 = vmatprep.subr.bf16.mxu0 %v7511_v48 }
0x1bcb   : > { %v5956_v32 = vsel %vm16442_vm11, %v10284_v49, %v10279_v16  ;;  %v5958_v4 = vsel %vm16443_vm6, %v10280_v55, %v10285_v50  ;;  %v7547_v22 = vpack.c.bf16 %v10285_v50, %v10205_v21  ;;  %v5961_v55 = vsel %vm16434_vm0, %v10210_v60, %v10215_v18  ;;  %vm16448_vm11 = vmmov %vm16434_vm0  ;;  %v14777_v50 = vpop.permute.xlu0 %10237 }
0x1bcc   : > { %v10288_v2 = vpop.permute.xlu1 %10287  ;;  %v7513_v25 = vpack.c.bf16 %v5956_v32, %v5953_v42  ;;  %v7549_v44 = vpack.c.bf16 %v5958_v4, %v5955_v7  ;;  %v10220_v16 = vunpack.i.h.bf16 %v14745_v19  ;;  %v10225_v7 = vunpack.i.h.bf16 %v14751_v43  ;;  %vm16449_vm6 = vmmov %vm16434_vm0 }
0x1bcd   : > { %v10290_v10 = vunpack.i.h.bf16 %v10288_v2  ;;  %v10289_v45 = vunpack.i.l.bf16 %v10288_v2  ;;  %7548 = vmatprep.subr.bf16.mxu1 %v7547_v22  ;;  %v10224_v60 = vunpack.i.l.bf16 %v14751_v43 }
0x1bce   : > { %7514 = vmatpush1.bf16.msra.mxu0 %v7513_v25  ;;  %7550 = vmatpush1.bf16.msra.mxu1 %v7549_v44  ;;  %v5966_v19 = vsel %vm16449_vm6, %v10219_v11, %v10220_v16  ;;  %v5967_v44 = vsel %vm16452_vm9, %v10220_v16, %v10225_v7  ;;  %vm16455_vm6 = vmmov %vm16434_vm0 }
0x1bcf   : > { %v5963_v46 = vsel %vm16445_vm13, %v10289_v45, %v10290_v10  ;;  %vm16451_vm13 = vmmov %vm16434_vm0  ;;  %v10243_v43 = vpop.permute.xlu0 %10242 }
0x1bd0   : > { %v10293_v30 = vpop.permute.xlu1 %10292  ;;  %v7515_v17 = vpack.c.bf16 %v5963_v46, %v5960_v9  ;;  %v5965_v25 = vsel %vm16451_vm13, %v10224_v60, %v10219_v11  ;;  %vm16457_vm13 = vmmov %vm16434_vm0 }
0x1bd1   : > { %v10295_v57 = vunpack.i.h.bf16 %v10293_v30  ;;  %v10294_v8 = vunpack.i.l.bf16 %v10293_v30  ;;  %vm16458_vm9 = vmmov %vm16434_vm0 }
0x1bd2   : > { %7516 = vmatprep.subr.bf16.mxu0 %v7515_v17 }
0x1bd3   : > { %v5962_v21 = vsel %vm16447_vm1, %v10294_v8, %v10289_v45  ;;  %v5964_v23 = vsel %vm16448_vm11, %v10290_v10, %v10295_v57  ;;  %v7551_v15 = vpack.c.bf16 %v10295_v57, %v10215_v18  ;;  %v10230_v10 = vunpack.i.h.bf16 %v14757_v59  ;;  %vm16453_vm1 = vmmov %vm16434_vm0 }
0x1bd4   : > { %v10298_v54 = vpop.permute.xlu1 %10297  ;;  %v7517_v0 = vpack.c.bf16 %v5962_v21, %v5959_v53  ;;  %v7553_v48 = vpack.c.bf16 %v5964_v23, %v5961_v55  ;;  %v10229_v45 = vunpack.i.l.bf16 %v14757_v59  ;;  %v10235_v53 = vunpack.i.h.bf16 %v14767_v39  ;;  %vm16454_vm11 = vmmov %vm16434_vm0  ;;  %v10248_v23 = vpop.permute.xlu0 %10247 }
0x1bd5   : > { %v10300_v49 = vunpack.i.h.bf16 %v10298_v54  ;;  %v10299_v42 = vunpack.i.l.bf16 %v10298_v54  ;;  %7552 = vmatprep.subr.bf16.mxu1 %v7551_v15  ;;  %v10234_v55 = vunpack.i.l.bf16 %v14767_v39  ;;  %v10239_v39 = vunpack.i.l.bf16 %v14777_v50 }
0x1bd6   : > { %7518 = vmatpush1.bf16.msra.mxu0 %v7517_v0  ;;  %7554 = vmatpush1.bf16.msra.mxu1 %v7553_v48  ;;  %v5972_v59 = vsel %vm16454_vm11, %v10229_v45, %v10230_v10  ;;  %v5973_v48 = vsel %vm16457_vm13, %v10230_v10, %v10235_v53  ;;  %vm16460_vm11 = vmmov %vm16434_vm0 }
0x1bd7   : > { %v5969_v26 = vsel %vm16450_vm8, %v10299_v42, %v10300_v49  ;;  %vm16456_vm8 = vmmov %vm16434_vm0 }
0x1bd8   : > { %v10303_v32 = vpop.permute.xlu1 %10302  ;;  %v7519_v4 = vpack.c.bf16 %v5969_v26, %v5966_v19  ;;  %v5971_v0 = vsel %vm16456_vm8, %v10234_v55, %v10229_v45  ;;  %vm16462_vm8 = vmmov %vm16434_vm0 }
0x1bd9   : > { %v10305_v22 = vunpack.i.h.bf16 %v10303_v32  ;;  %v10304_v2 = vunpack.i.l.bf16 %v10303_v32  ;;  %vm16463_vm13 = vmmov %vm16434_vm0 }
0x1bda   : > { %7520 = vmatprep.subr.bf16.mxu0 %v7519_v4 }
0x1bdb   : > { %v5968_v18 = vsel %vm16434_vm0, %v10304_v2, %v10299_v42  ;;  %v5970_v12 = vsel %vm16453_vm1, %v10300_v49, %v10305_v22  ;;  %v7555_v9 = vpack.c.bf16 %v10305_v22, %v10225_v7  ;;  %v10240_v49 = vunpack.i.h.bf16 %v14777_v50  ;;  %vm16459_vm1 = vmmov %vm16434_vm0 }
0x1bdc   : > { %v10308_v46 = vpop.permute.xlu1 %10307  ;;  %v7521_v30 = vpack.c.bf16 %v5968_v18, %v5965_v25  ;;  %v7557_v17 = vpack.c.bf16 %v5970_v12, %v5967_v44  ;;  %v10245_v2 = vunpack.i.h.bf16 %v10243_v43  ;;  %v10244_v25 = vunpack.i.l.bf16 %v10243_v43  ;;  %v10253_v44 = vpop.permute.xlu0 %10252 }
0x1bdd   : > { %v10310_v57 = vunpack.i.h.bf16 %v10308_v46  ;;  %v10309_v8 = vunpack.i.l.bf16 %v10308_v46  ;;  %7556 = vmatprep.subr.bf16.mxu1 %v7555_v9  ;;  %v5978_v10 = vsel %vm16459_vm1, %v10239_v39, %v10240_v49  ;;  %vm16465_vm1 = vmmov %vm16434_vm0 }
0x1bde   : > { %7522 = vmatpush1.bf16.msra.mxu0 %v7521_v30  ;;  %7558 = vmatpush1.bf16.msra.mxu1 %v7557_v17  ;;  %v5979_v30 = vsel %vm16462_vm8, %v10240_v49, %v10245_v2  ;;  %v10250_v17 = vunpack.i.h.bf16 %v10248_v23  ;;  %vm16468_vm8 = vmmov %vm16434_vm0 }
0x1bdf   : > { %v5975_v16 = vsel %vm16455_vm6, %v10309_v8, %v10310_v57  ;;  %vm16461_vm6 = vmmov %vm16434_vm0 }
0x1be0   : > { %v10313_v11 = vpop.permute.xlu1 %10312  ;;  %v7523_v21 = vpack.c.bf16 %v5975_v16, %v5972_v59  ;;  %v5977_v46 = vsel %vm16461_vm6, %v10244_v25, %v10239_v39  ;;  %vm16467_vm6 = vmmov %vm16434_vm0 }
0x1be1   : > { %v10315_v15 = vunpack.i.h.bf16 %v10313_v11  ;;  %v10314_v54 = vunpack.i.l.bf16 %v10313_v11  ;;  %v10258_v11 = vpop.permute.xlu0 %10257 }
0x1be2   : > { %7524 = vmatprep.subr.bf16.mxu0 %v7523_v21 }
0x1be3   : > { %v5974_v42 = vsel %vm16458_vm9, %v10314_v54, %v10309_v8  ;;  %v5976_v7 = vsel %vm16434_vm0, %v10310_v57, %v10315_v15  ;;  %v7559_v60 = vpack.c.bf16 %v10315_v15, %v10235_v53  ;;  %v10249_v57 = vunpack.i.l.bf16 %v10248_v23  ;;  %vm16464_vm9 = vmmov %vm16434_vm0 }
0x1be4   : > { %v10318_v19 = vpop.permute.xlu1 %10317  ;;  %v7525_v26 = vpack.c.bf16 %v5974_v42, %v5971_v0  ;;  %v7561_v32 = vpack.c.bf16 %v5976_v7, %v5973_v48  ;;  %v10255_v54 = vunpack.i.h.bf16 %v10253_v44  ;;  %v10254_v0 = vunpack.i.l.bf16 %v10253_v44 }
0x1be5   : > { %v10320_v4 = vunpack.i.h.bf16 %v10318_v19  ;;  %v10319_v22 = vunpack.i.l.bf16 %v10318_v19  ;;  %7560 = vmatprep.subr.bf16.mxu1 %v7559_v60  ;;  %v5984_v48 = vsel %vm16434_vm0, %v10249_v57, %v10250_v17 }
0x1be6   : > { %7526 = vmatpush1.bf16.msra.mxu0 %v7525_v26  ;;  %7562 = vmatpush1.bf16.msra.mxu1 %v7561_v32  ;;  %v5985_v19 = vsel %vm16467_vm6, %v10250_v17, %v10255_v54  ;;  %v10260_v26 = vunpack.i.h.bf16 %v10258_v11  ;;  %v10259_v32 = vunpack.i.l.bf16 %v10258_v11  ;;  %vm16473_vm6 = vmmov %vm16434_vm0 }
0x1be7   : > { %v5981_v50 = vsel %vm16460_vm11, %v10319_v22, %v10320_v4  ;;  %vm16466_vm11 = vmmov %vm16434_vm0 }
0x1be8   : > { %v10323_v45 = vpop.permute.xlu1 %10322  ;;  %v7527_v18 = vpack.c.bf16 %v5981_v50, %v5978_v10  ;;  %v5983_v60 = vsel %vm16466_vm11, %v10254_v0, %v10249_v57  ;;  %vm16472_vm11 = vmmov %vm16434_vm0 }
0x1be9   : > { %v10325_v12 = vunpack.i.h.bf16 %v10323_v45  ;;  %v10324_v9 = vunpack.i.l.bf16 %v10323_v45 }
0x1bea   : > { %7528 = vmatprep.subr.bf16.mxu0 %v7527_v18 }
0x1beb   : > { %v5980_v43 = vsel %vm16463_vm13, %v10324_v9, %v10319_v22  ;;  %v5982_v8 = vsel %vm16464_vm9, %v10320_v4, %v10325_v12  ;;  %v7563_v53 = vpack.c.bf16 %v10325_v12, %v10245_v2  ;;  %v10263_v4 = vpop.permute.xlu0 %10262  ;;  %vm16469_vm13 = vmmov %vm16434_vm0 }
0x1bec   : > { %v10328_v55 = vpop.permute.xlu1 %10327  ;;  %v7529_v59 = vpack.c.bf16 %v5980_v43, %v5977_v46  ;;  %v7565_v16 = vpack.c.bf16 %v5982_v8, %v5979_v30  ;;  %v10264_v12 = vunpack.i.l.bf16 %v10263_v4  ;;  %v10265_v9 = vunpack.i.h.bf16 %v10263_v4  ;;  %vm16470_vm9 = vmmov %vm16434_vm0 }
0x1bed   : > { %v10330_v21 = vunpack.i.h.bf16 %v10328_v55  ;;  %v10329_v15 = vunpack.i.l.bf16 %v10328_v55  ;;  %7564 = vmatprep.subr.bf16.mxu1 %v7563_v53  ;;  %v5990_v46 = vsel %vm16470_vm9, %v10259_v32, %v10260_v26 }
0x1bee   : > { %7530 = vmatpush1.bf16.msra.mxu0 %v7529_v59  ;;  %7566 = vmatpush1.bf16.msra.mxu1 %v7565_v16  ;;  %v5991_v55 = vsel %vm16472_vm11, %v10260_v26, %v10265_v9  ;;  %vm16482_vm11 = vnez %v16278_v52 }
0x1bef   : > { %v5987_v23 = vsel %vm16465_vm1, %v10329_v15, %v10330_v21  ;;  %vm16471_vm1 = vmmov %vm16434_vm0  ;;  %v5817_v0 = vpop.permute.xlu0 %5816 }
0x1bf0   : > { %v10333_v49 = vpop.permute.xlu1 %10332  ;;  %v7531_v39 = vpack.c.bf16 %v5987_v23, %v5984_v48  ;;  %v5989_v53 = vsel %vm16471_vm1, %v10264_v12, %v10259_v32  ;;  %vm16478_vm1 = vcmask 113664  }
0x1bf1   : > { %v10335_v42 = vunpack.i.h.bf16 %v10333_v49  ;;  %v10334_v7 = vunpack.i.l.bf16 %v10333_v49 }
0x1bf2   : > { %7532 = vmatprep.subr.bf16.mxu0 %v7531_v39 }
0x1bf3   : > { %v5986_v22 = vsel %vm16468_vm8, %v10334_v7, %v10329_v15  ;;  %v5988_v2 = vsel %vm16469_vm13, %v10330_v21, %v10335_v42  ;;  %v7567_v25 = vpack.c.bf16 %v10335_v42, %v10255_v54  ;;  %vm16474_vm8 = vmmov %vm16434_vm0  ;;  %v5811_v54 = vld [vmem:[%s15219_s10] sm:$0xff]  ;;  %vm16475_vm13 = vcmask 1031168  }
0x1bf4   : > { %v10338_v44 = vpop.permute.xlu1 %10337  ;;  %v7533_v10 = vpack.c.bf16 %v5986_v22, %v5983_v60  ;;  %v7569_v50 = vpack.c.bf16 %v5988_v2, %v5985_v19  ;;  %vm16476_vm9 = vmmov %vm16475_vm13 }
0x1bf5   : > { %v10340_v45 = vunpack.i.h.bf16 %v10338_v44  ;;  %v10339_v18 = vunpack.i.l.bf16 %v10338_v44  ;;  %7568 = vmatprep.subr.bf16.mxu1 %v7567_v25 }
0x1bf6   : > { %7534 = vmatpush1.bf16.msra.mxu0 %v7533_v10  ;;  %7570 = vmatpush1.bf16.msra.mxu1 %v7569_v50 }
0x1bf7   : > { %v5993_v30 = vsel %vm16434_vm0, %v10339_v18, %v10340_v45  ;;  %vm16477_vm0 = vmmov %vm16476_vm9 }
0x1bf8   : > { %v10343_v17 = vpop.permute.xlu1 %10342  ;;  %v7535_v57 = vpack.c.bf16 %v5993_v30, %v5990_v46 }
0x1bf9   : > { %v10345_v43 = vunpack.i.h.bf16 %v10343_v17  ;;  %v10344_v8 = vunpack.i.l.bf16 %v10343_v17 }
0x1bfa   : > { %7536 = vmatprep.subr.bf16.mxu0 %v7535_v57 }
0x1bfb   : > { %v5992_v59 = vsel %vm16473_vm6, %v10344_v8, %v10339_v18  ;;  %v5994_v16 = vsel %vm16474_vm8, %v10340_v45, %v10345_v43  ;;  %v7571_v11 = vpack.c.bf16 %v10345_v43, %v10265_v9  ;;  %vm16484_vm6 = vcmask 121856  }
0x1bfc   : > { %v7537_v21 = vpack.c.bf16 %v5992_v59, %v5989_v53  ;;  %v7573_v15 = vpack.c.bf16 %v5994_v16, %v5991_v55  ;;  %vm16485_vm8 = vnez %v16276_v24 }
0x1bfd   : > { %7572 = vmatprep.subr.bf16.mxu1 %v7571_v11 }
0x1bfe   : > { %7538 = vmatpush1.bf16.msra.mxu0 %v7537_v21  ;;  %7574 = vmatpush1.bf16.msra.mxu1 %v7573_v15 }
0x1c01   : > { %6135 = vmatmul.mubr.f32.vlgmr.msra.gmra.mrb[18].mxu0 %v5811_v54  ;;  %6206 = vmatmul.mubr.f32.vlgmr.msra.gmra.mrb[18].mxu1 %v5811_v54 }
0x1cd4   : > { %v6136_v48 = vpop.f32.mrb[18].mxu0  ;;  %v6207_v23 = vpop.f32.mrb[18].mxu1 }
0x1cd5   : > { %v6208_v49 = vadd.f32 %v6207_v23, %v5817_v0  ;;  %v6138_v39 = vpop.f32.mrb[19].mxu0  ;;  %v6209_v42 = vpop.f32.mrb[19].mxu1  ;;  %v6137_v60 = vadd.f32 %v6136_v48, %v5817_v0 }
0x1cd6   : > { %v6139_v7 = vadd.f32 %v6138_v39, %v5817_v0  ;;  %v6210_v19 = vadd.f32 %v6209_v42, %v5817_v0 }
0x1cd7   : > { %6220 = vrot.lane.b32.xlu1 %v6208_v49, %s16054_s0 }
0x1cd8   : > { %6218 = vrot.lane.b32.xlu0 %v6139_v7, %s16054_s0 }
0x1cdb   : > { %6216 = vrot.lane.b32.xlu1 %v6137_v60, %s16054_s0 }
0x1cdc   : > { %6222 = vrot.lane.b32.xlu0 %v6210_v19, %s16054_s0 }
0x1cdf   : > { %6231 = vrot.lane.b32.xlu1 %v6137_v60, %s16257_s5 }
0x1d49   : > { %v6221_v26 = vpop.permute.xlu1 %6220 }
0x1d4a   : > { %v6219_v32 = vpop.permute.xlu0 %6218 }
0x1d4b   : > { %v6225_v4 = vsel %vm16475_vm13, %v6219_v32, %v6221_v26  ;;  %vm16486_vm13 = vnez %v16281_v35 }
0x1d4c   : > { %v6236_v22 = vsel %vm11332_vm7, %v6225_v4, %v6139_v7  ;;  %vm16479_vm7 = vcmask 1039360  }
0x1d4d   : > { %6245 = vrot.lane.b32.xlu1 %v6236_v22, %s16265_s6  ;;  %v6217_v2 = vpop.permute.xlu1 %6216 }
0x1d4e   : > { %v6223_v25 = vpop.permute.xlu0 %6222  ;;  %v6224_v50 = vsel %vm16477_vm0, %v6217_v2, %v6219_v32  ;;  %vm16488_vm0 = vnez %v16290_v56 }
0x1d4f   : > { %v6226_v44 = vsel %vm16476_vm9, %v6221_v26, %v6223_v25  ;;  %v6235_v12 = vsel %vm11362_vm2, %v6224_v50, %v6137_v60  ;;  %vm16487_vm9 = vcmask 7168  }
0x1d50   : > { %v6237_v10 = vsel %vm11344_vm15, %v6226_v44, %v6208_v49  ;;  %vm16480_vm15 = vnez %v16279_v58 }
0x1d51   : > { %6247 = vrot.lane.b32.xlu0 %v6237_v10, %s16265_s6  ;;  %v6232_v45 = vpop.permute.xlu1 %6231 }
0x1d52   : > { %v6234_v18 = vsel %vm16478_vm1, %v6223_v25, %v6232_v45  ;;  %vm16489_vm1 = vmmov %vm16487_vm9 }
0x1d53   : > { %v6238_v14 = vsel %vm11348_vm3, %v6234_v18, %v6210_v19  ;;  %vm16481_vm3 = vmmov %vm16479_vm7 }
0x1d54   : > { %6249 = vrot.lane.b32.xlu1 %v6238_v14, %s16265_s6  ;;  %vm16483_vm2 = vmmov %vm16481_vm3 }
0x1d55   : > { %6243 = vrot.lane.b32.xlu0 %v6235_v12, %s16265_s6 }
0x1d59   : > { %6258 = vrot.lane.b32.xlu0 %v6235_v12, %s16271_s4  ;;  %s10832_s4 = smov [#allocation11]  }
0x1d5a   : > { %s10720_s7 = sshll.u32 %s10832_s4, 4  ;;  %s10721_s7 = int_to_ptr.vmem [resolvable:$false] %s10720_s7 }
0x1d5b   : > { %s10722_s19 = scalar_lea.vmem %s10721_s7, 512 }
0x1dbf   : > { %v6246_v40 = vpop.permute.xlu1 %6245 }
0x1dc3   : > { %v6248_v9 = vpop.permute.xlu0 %6247 }
0x1dc4   : > { %v6252_v46 = vsel %vm16479_vm7, %v6246_v40, %v6248_v9  ;;  %vm16490_vm7 = vmmov %vm16489_vm1 }
0x1dc5   : > { %v6263_v30 = vsel %vm16480_vm15, %v6252_v46, %v6236_v22  ;;  %vm16491_vm15 = vnez %v16287_v34 }
0x1dc6   : > { %6275 = vrot.lane.b32.xlu0 %v6263_v30, %s15923_s24  ;;  %v6250_v13 = vpop.permute.xlu1 %6249 }
0x1dc7   : > { %v6253_v17 = vsel %vm16481_vm3, %v6248_v9, %v6250_v13  ;;  %v6244_v57 = vpop.permute.xlu0 %6243  ;;  %vm16492_vm3 = vnez %v16294_v61 }
0x1dc8   : > { %v6264_v62 = vsel %vm16482_vm11, %v6253_v17, %v6237_v10  ;;  %v6251_v43 = vsel %vm16483_vm2, %v6244_v57, %v6246_v40  ;;  %vm16493_vm11 = vmmov %vm16489_vm1  ;;  %vm16494_vm2 = vnez %v16298_v1 }
0x1dc9   : > { %6277 = vrot.lane.b32.xlu1 %v6264_v62, %s15923_s24  ;;  %v6262_v58 = vsel %vm16485_vm8, %v6251_v43, %v6235_v12  ;;  %vm16496_vm8 = vnez %v16302_v47 }
0x1dcb   : > { %v6259_v8 = vpop.permute.xlu0 %6258 }
0x1dcc   : > { %v6261_v53 = vsel %vm16484_vm6, %v6250_v13, %v6259_v8  ;;  %vm16495_vm6 = vcmask 15360  }
0x1dcd   : > { %6273 = vrot.lane.b32.xlu1 %v6262_v58, %s15923_s24  ;;  %v6265_v55 = vsel %vm16486_vm13, %v6261_v53, %v6238_v14  ;;  %vm16497_vm13 = vmmov %vm16495_vm6 }
0x1dce   : > { %6279 = vrot.lane.b32.xlu0 %v6265_v55, %s15923_s24 }
0x1dd1   : > { %6267 = vrot.lane.b32.xlu1 %v6265_v55, %s15929_s29 }
0x1e38   : > { %v6276_v52 = vpop.permute.xlu0 %6275 }
0x1e3b   : > { %v6278_v59 = vpop.permute.xlu1 %6277 }
0x1e3c   : > { %v6282_v16 = vsel %vm16487_vm9, %v6276_v52, %v6278_v59  ;;  %vm16498_vm9 = vnez %v16304_v36 }
0x1e3d   : > { %v6291_v11 = vsel %vm16488_vm0, %v6282_v16, %v6264_v62  ;;  %vm16499_vm0 = vmmov %vm16495_vm6 }
0x1e3e   : > { %6304 = vrot.lane.b32.xlu1 %v6291_v11, %s15945_s25 }
0x1e3f   : > { %v6274_v24 = vpop.permute.xlu1 %6273 }
0x1e40   : > { %v6281_v21 = vsel %vm16489_vm1, %v6274_v24, %v6276_v52  ;;  %v6280_v15 = vpop.permute.xlu0 %6279  ;;  %vm16500_vm1 = vnez %v16311_v37 }
0x1e41   : > { %v6283_v35 = vsel %vm16490_vm7, %v6278_v59, %v6280_v15  ;;  %v6290_v54 = vsel %vm16491_vm15, %v6281_v21, %v6263_v30  ;;  %vm16501_vm7 = vmmov %vm16499_vm0  ;;  %vm16502_vm15 = vnez %v16313_v31 }
0x1e42   : > { %6302 = vrot.lane.b32.xlu0 %v6290_v54, %s15945_s25  ;;  %v6292_v0 = vsel %vm16492_vm3, %v6283_v35, %v6265_v55  ;;  %vm16503_vm3 = vcmask 719872  }
0x1e43   : > { %6294 = vrot.lane.b32.xlu1 %v6292_v0, %s15947_s14  ;;  %v6268_v56 = vpop.permute.xlu1 %6267  ;;  %s16626_s14 = sld [smem:[#allocation66_spill]] }
0x1e44   : > { %v6288_v48 = vsel %vm16493_vm11, %v6268_v56, %v6274_v24  ;;  %vm16504_vm11 = vmmov %vm16503_vm3 }
0x1e45   : > { %v6289_v23 = vsel %vm16494_vm2, %v6288_v48, %v6262_v58  ;;  %vm16505_vm2 = vmmov %vm16503_vm3 }
0x1e46   : > { %6306 = vrot.lane.b32.xlu0 %v6292_v0, %s15945_s25 }
0x1e4a   : > { %6300 = vrot.lane.b32.xlu0 %v6289_v23, %s15945_s25 }
0x1eb0   : > { %v6305_v49 = vpop.permute.xlu1 %6304 }
0x1eb4   : > { %v6303_v34 = vpop.permute.xlu0 %6302 }
0x1eb5   : > { %v6309_v39 = vsel %vm16495_vm6, %v6303_v34, %v6305_v49  ;;  %v6295_v1 = vpop.permute.xlu1 %6294  ;;  %vm16506_vm6 = vnez %v16327_v28 }
0x1eb6   : > { %v6318_v61 = vsel %vm16496_vm8, %v6309_v39, %v6291_v11  ;;  %vm16507_vm8 = vnez %v16325_v5 }
0x1eb7   : > { %6328 = vrot.lane.b32.xlu1 %v6318_v61, %s15956_s28 }
0x1eb8   : > { %v6307_v42 = vpop.permute.xlu0 %6306 }
0x1eb9   : > { %v6310_v7 = vsel %vm16497_vm13, %v6305_v49, %v6307_v42  ;;  %vm16508_vm13 = vcmask 850944  }
0x1eba   : > { %v6319_v60 = vsel %vm16498_vm9, %v6310_v7, %v6292_v0  ;;  %vm16510_vm9 = vcmask 883712  }
0x1ebb   : > { %6330 = vrot.lane.b32.xlu0 %v6319_v60, %s15956_s28 }
0x1ebc   : > { %v6301_v19 = vpop.permute.xlu0 %6300 }
0x1ebd   : > { %v6315_v26 = vsel %vm16499_vm0, %v6295_v1, %v6301_v19  ;;  %v6308_v47 = vsel %vm16501_vm7, %v6301_v19, %v6303_v34  ;;  %vm16511_vm0 = vnez %v16333_v6  ;;  %vm16513_vm7 = vcmask 1014784  }
0x1ebe   : > { %v6316_v32 = vsel %vm16500_vm1, %v6315_v26, %v6289_v23  ;;  %v6317_v4 = vsel %vm16502_vm15, %v6308_v47, %v6290_v54  ;;  %vm16512_vm1 = vmmov %vm16510_vm9  ;;  %vm16514_vm15 = vnez %v16339_v33  ;;  %v16525_v54 = vld [vmem:[#allocation51_spill] sm:$0xff] }
0x1ebf   : > { %6324 = vrot.lane.b32.xlu0 %v6316_v32, %s15956_s28  ;;  %6338 = vrot.lane.b32.xlu1 %v6316_v32, %s15966_s20 }
0x1ec3   : > { %6326 = vrot.lane.b32.xlu1 %v6317_v4, %s15956_s28 }
0x1f29   : > { %v6329_v36 = vpop.permute.xlu1 %6328 }
0x1f2d   : > { %v6331_v22 = vpop.permute.xlu0 %6330 }
0x1f2e   : > { %v6334_v45 = vsel %vm16505_vm2, %v6329_v36, %v6331_v22  ;;  %vm16517_vm2 = vnez %v16334_v38 }
0x1f31   : > { %v6339_v2 = vpop.permute.xlu1 %6338  ;;  %v6325_v37 = vpop.permute.xlu0 %6324 }
0x1f32   : > { %v6345_v25 = vsel %vm16319_vm14, %v6339_v2, %v6319_v60  ;;  %v6341_v14 = vsel %vm16508_vm13, %v6334_v45, %v6339_v2  ;;  %vm16509_vm14 = vnez %v16323_v41  ;;  %vm16520_vm13 = vcmask 31744  }
0x1f33   : > { %6356 = vrot.lane.b32.xlu1 %v6345_v25, %s15982_s21  ;;  %v6344_v20 = vsel %vm16509_vm14, %v6341_v14, %v6318_v61  ;;  %vm16521_vm14 = vnez %v16350_v29  ;;  %v16532_v61 = vld [vmem:[#allocation54_spill] sm:$0xff] }
0x1f35   : > { %v6327_v44 = vpop.permute.xlu1 %6326 }
0x1f36   : > { %v6332_v10 = vsel %vm16503_vm3, %v6325_v37, %v6327_v44  ;;  %v6333_v50 = vsel %vm16504_vm11, %v6327_v44, %v6329_v36  ;;  %vm16515_vm3 = vmmov %vm16512_vm1  ;;  %vm16516_vm11 = vnez %v16342_v3 }
0x1f37   : > { %v6343_v31 = vsel %vm16506_vm6, %v6333_v50, %v6317_v4  ;;  %v6342_v18 = vsel %vm16507_vm8, %v6332_v10, %v6316_v32  ;;  %vm16518_vm6 = vcmask 162816  }
0x1f38   : > { %6352 = vrot.lane.b32.xlu1 %v6343_v31, %s15982_s21  ;;  %6350 = vrot.lane.b32.xlu0 %v6342_v18, %s15982_s21  ;;  %vm16519_vm8 = vmmov %vm16518_vm6 }
0x1f3c   : > { %6354 = vrot.lane.b32.xlu0 %v6344_v20, %s15982_s21 }
0x1f40   : > { %6364 = vrot.lane.b32.xlu0 %v6342_v18, %s15757_s15 }
0x1fa5   : > { %v6357_v12 = vpop.permute.xlu1 %6356 }
0x1faa   : > { %v6351_v40 = vpop.permute.xlu0 %6350  ;;  %v6353_v28 = vpop.permute.xlu1 %6352 }
0x1fab   : > { %v6358_v9 = vsel %vm16510_vm9, %v6351_v40, %v6353_v28  ;;  %vm16522_vm9 = vmmov %vm16518_vm6 }
0x1fac   : > { %v6368_v5 = vsel %vm16511_vm0, %v6358_v9, %v6342_v18  ;;  %vm16526_vm0 = vnez %v16525_v54 }
0x1fad   : > { %6382 = vrot.lane.b32.xlu1 %v6368_v5, %s15766_s22 }
0x1fae   : > { %v6355_v46 = vpop.permute.xlu0 %6354 }
0x1faf   : > { %v6360_v30 = vsel %vm16512_vm1, %v6355_v46, %v6357_v12  ;;  %v6359_v57 = vsel %vm16515_vm3, %v6353_v28, %v6355_v46  ;;  %vm16528_vm1 = vcmask 195584   ;;  %vm16533_vm3 = vnez %v16532_v61 }
0x1fb0   : > { %v6369_v6 = vsel %vm16517_vm2, %v6359_v57, %v6343_v31 }
0x1fb2   : > { %v6365_v13 = vpop.permute.xlu0 %6364 }
0x1fb3   : > { %v6367_v41 = vsel %vm16513_vm7, %v6360_v30, %v6365_v13  ;;  %v6371_v17 = vsel %vm16514_vm15, %v6365_v13, %v6345_v25 }
0x1fb4   : > { %6376 = vrot.lane.b32.xlu0 %v6371_v17, %s15769_s18  ;;  %v6370_v62 = vsel %vm16516_vm11, %v6367_v41, %v6344_v20  ;;  %vm16535_vm11 = vcmask 474112  }
0x1fb5   : > { %6374 = vrot.lane.b32.xlu1 %v6370_v62, %s15769_s18  ;;  %s7158_s18 = sshll.u32 %s10929_s17, 8 }
0x1fb6   : > { %s15167_s5 = scalar_lea.hbm %s16626_s14, %s7158_s18 }
0x1fb8   : > { %6384 = vrot.lane.b32.xlu0 %v6369_v6, %s15766_s22 }
0x1fb9   : > { %6386 = vrot.lane.b32.xlu1 %v6370_v62, %s15766_s22  ;;  %s16625_s22 = sld [smem:[#allocation21_spill]] }
0x1fbf   : > { %p16627_p3 = scmp.ne.s32.totalorder %s16625_s22, 0 }
0x201f   : > { %v6383_v43 = vpop.permute.xlu1 %6382 }
0x2026   : > { %v6377_v8 = vpop.permute.xlu0 %6376 }
0x2027   : > { %v6375_v33 = vpop.permute.xlu1 %6374 }
0x2028   : > { %v6378_v59 = vsel %vm16520_vm13, %v6375_v33, %v6377_v8 }
0x2029   : > { %v6394_v11 = vsel %vm16522_vm9, %v6378_v59, %v6383_v43  ;;  %vm16547_vm9 = vmmov %vm16535_vm11 }
0x202a   : > { %v6385_v53 = vpop.permute.xlu0 %6384 }
0x202b   : > { %v6388_v58 = vsel %vm16518_vm6, %v6383_v43, %v6385_v53  ;;  %v6387_v55 = vpop.permute.xlu1 %6386 }
0x202c   : > { %v6398_v3 = vsel %vm16347_vm10, %v6387_v55, %v6371_v17  ;;  %v6396_v52 = vsel %vm16357_vm5, %v6388_v58, %v6369_v6  ;;  %v6389_v38 = vsel %vm16519_vm8, %v6385_v53, %v6387_v55  ;;  %vm16523_vm10 = vnez %v16359_v27 }
0x202d   : > { %6411 = vrot.lane.b32.xlu0 %v6396_v52, %s15782_s1  ;;  %6403 = vrot.lane.b32.xlu1 %v6398_v3, %s16017_s2  ;;  %v6397_v16 = vsel %vm16521_vm14, %v6389_v38, %v6370_v62  ;;  %v6395_v51 = vsel %vm16523_vm10, %v6394_v11, %v6368_v5  ;;  %vm16524_vm5 = vcmask 326656   ;;  %vm10831_vm14 = vmmov 1  }
0x202e   : > { %vm16529_vm7 = vmmov %vm16524_vm5 }
0x202f   : > { %vm16530_vm15 = vmmov %vm16524_vm5 }
0x2030   : > { %vm7625_vm10 = vmpackc.low %vm10831_vm14, %vm16547_vm9 }
0x2031   : > { %6413 = vrot.lane.b32.xlu1 %v6397_v16, %s15782_s1  ;;  %6401 = vrot.lane.b32.xlu0 %v6397_v16, %s16017_s2  ;;  %s16539_s2 = smov 125  }
0x2035   : > { %6409 = vrot.lane.b32.xlu0 %v6395_v51, %s15782_s1 }
0x209f   : > { %v6412_v63 = vpop.permute.xlu0 %6411  ;;  %v6404_v24 = vpop.permute.xlu1 %6403 }
0x20a3   : > { %v6414_v21 = vpop.permute.xlu1 %6413  ;;  %v6402_v15 = vpop.permute.xlu0 %6401 }
0x20a4   : > { %v6416_v35 = vsel %vm16524_vm5, %v6412_v63, %v6414_v21  ;;  %v6425_v29 = vsel %vm16526_vm0, %v6414_v21, %v6398_v3  ;;  %v6405_v27 = vsel %vm16528_vm1, %v6402_v15, %v6404_v24  ;;  %vm16548_vm5 = vcmask 1039360  }
0x20a5   : > { %6436 = vrot.lane.b32.xlu0 %v6425_v29, %s15792_s16  ;;  %v6424_v56 = vsel %vm16031_vm12, %v6416_v35, %v6397_v16  ;;  %vm16534_vm12 = vcmask 343040   ;;  %vm16549_vm0 = vmmov %vm16548_vm5 }
0x20a6   : > { %6434 = vrot.lane.b32.xlu1 %v6424_v56, %s15792_s16  ;;  %vm16550_vm1 = vmmov %vm16549_vm0 }
0x20a7   : > { %v6410_v48 = vpop.permute.xlu0 %6409 }
0x20a8   : > { %v6415_v23 = vsel %vm16529_vm7, %v6410_v48, %v6412_v63  ;;  %v6421_v49 = vsel %vm16530_vm15, %v6405_v27, %v6410_v48  ;;  %vm16551_vm15 = vcmask 1031168  }
0x20a9   : > { %v6422_v39 = vsel %vm16039_vm4, %v6421_v49, %v6395_v51  ;;  %v6423_v42 = vsel %vm16533_vm3, %v6415_v23, %v6396_v52  ;;  %vm16536_vm4 = vmmov %vm16534_vm12 }
0x20aa   : > { %6430 = vrot.lane.b32.xlu1 %v6422_v39, %s15792_s16  ;;  %6432 = vrot.lane.b32.xlu0 %v6423_v42, %s15792_s16  ;;  %vm16537_vm2 = vmmov %vm16536_vm4  ;;  %s16540_s16 = smov 109  }
0x20ab   : > { %vm16538_vm6 = vmmov %vm16537_vm2 }
0x20ac   : > { %vm16546_vm8 = vmmov %vm16537_vm2 }
0x20ad   : > { %vm7147_vm13 = vmneg %vm16546_vm8 }
0x20ae   : > { %vm7578_vm7 = vmpackc.low %vm10831_vm14, %vm7147_vm13  ;;  %vm16559_vm13 = vcmask 891904  }
0x20af   : > { %vm16552_vm3 = vmmov %vm16551_vm15 }
0x20b0   : > { %vm16560_vm14 = vmmov %vm16559_vm13 }
0x20b1   : > { %vm16561_vm9 = vmmov %vm16559_vm13 }
0x2117   : > { %v6437_v7 = vpop.permute.xlu0 %6436 }
0x2118   : > { %v6435_v60 = vpop.permute.xlu1 %6434 }
0x2119   : > { %v14961_v1 = vsel %vm16534_vm12, %v6435_v60, %v6437_v7  ;;  %vm16553_vm12 = vmmov %vm16552_vm3 }
0x211a   : > { %v6446_v32 = vsel %vm16535_vm11, %v14961_v1, 0.0  ;;  %vm16554_vm11 = vcmask 1022976  }
0x211c   : > { %v14963_v19 = vpop.permute.xlu1 %6430  ;;  %v6433_v26 = vpop.permute.xlu0 %6432 }
0x211d   : > { %v6445_v47 = vsel %vm16536_vm4, 0.0, %v14963_v19  ;;  %v14971_v4 = vsel %vm16537_vm2, %v14963_v19, %v6433_v26  ;;  %v14974_v36 = vsel %vm16538_vm6, %v6433_v26, %v6435_v60  ;;  %vm16555_vm4 = vmmov %vm16554_vm11  ;;  %vm16557_vm6 = vcmask 883712  }
0x211e   : > { %v10351_v22 = vpack.i.bf16 %v6445_v47, %v6446_v32  ;;  %v10346_v2 = vpack.i.bf16 %v14974_v36, %v14971_v4  ;;  %v10491_v25 = vpack.i.bf16 %v6446_v32, %v6445_v47  ;;  %vm16556_vm2 = vmmov %vm16555_vm4 }
0x211f   : > { %vm16558_vm8 = vmmov %vm16557_vm6 }
0x2120   : > { %10352 = vrot.lane.b32.xlu0 %v10351_v22, %s16265_s6  ;;  %10347 = vrot.lane.b32.xlu1 %v10346_v2, %s16265_s6 }
0x2124   : > { %10362 = vrot.lane.b32.xlu0 %v10351_v22, %s16054_s0  ;;  %10357 = vrot.lane.b32.xlu1 %v10346_v2, %s16054_s0  ;;  %s16541_s0 = smov 105  }
0x2128   : > { %10372 = vrot.lane.b32.xlu0 %v10351_v22, %s16539_s2  ;;  %10367 = vrot.lane.b32.xlu1 %v10346_v2, %s16539_s2 }
0x212c   : > { %10382 = vrot.lane.b32.xlu0 %v10351_v22, %s15982_s21  ;;  %10377 = vrot.lane.b32.xlu1 %v10346_v2, %s15982_s21  ;;  %s16543_s21 = smov 68  }
0x2130   : > { %10392 = vrot.lane.b32.xlu0 %v10351_v22, %s16540_s16  ;;  %10387 = vrot.lane.b32.xlu1 %v10346_v2, %s16540_s16 }
0x2134   : > { %10402 = vrot.lane.b32.xlu0 %v10351_v22, %s16055_s3  ;;  %10397 = vrot.lane.b32.xlu1 %v10346_v2, %s16055_s3  ;;  %s16542_s3 = smov 85  }
0x2138   : > { %10412 = vrot.lane.b32.xlu0 %v10351_v22, %s15802_s23  ;;  %10407 = vrot.lane.b32.xlu1 %v10346_v2, %s15802_s23  ;;  %s16544_s23 = smov 84  }
0x213c   : > { %6558 = vrot.lane.b32.xlu0 %v14974_v36, %s16541_s0  ;;  %6556 = vrot.lane.b32.xlu1 %v14971_v4, %s16541_s0 }
0x2140   : > { %6554 = vrot.lane.b32.xlu0 %v6445_v47, %s16541_s0  ;;  %6560 = vrot.lane.b32.xlu1 %v6446_v32, %s16541_s0 }
0x2144   : > { %10422 = vrot.lane.b32.xlu0 %v10491_v25, %s15757_s15  ;;  %10417 = vrot.lane.b32.xlu1 %v10346_v2, %s15757_s15 }
0x2148   : > { %10432 = vrot.lane.b32.xlu0 %v10491_v25, %s15966_s20  ;;  %10427 = vrot.lane.b32.xlu1 %v10346_v2, %s15966_s20  ;;  %s16545_s20 = smov 67  }
0x214c   : > { %10442 = vrot.lane.b32.xlu0 %v10346_v2, %s15803_s26  ;;  %10437 = vrot.lane.b32.xlu1 %v10346_v2, %s15956_s28 }
0x2150   : > { %10452 = vrot.lane.b32.xlu0 %v10491_v25, %s15803_s26  ;;  %10447 = vrot.lane.b32.xlu1 %v10491_v25, %s15956_s28  ;;  %s525_s28 = sand.u32 1, %s10782_s30  }
0x2151   : > { %s7124_s15 = sshll.u32 %s525_s28, 4  ;;  %s6987_s17 = scalar_lea.sflag [#allocation4], %s525_s28 }
0x2152   : > { %s527_s1 = scalar_lea.vmem [#allocation11], %s7124_s15 }
0x2153   : > { %s7001_s24 = sshll.u32 %s527_s1, 4  ;;  %s15169_s24 = int_to_ptr.vmem [resolvable:$true] %s7001_s24 }
0x2154   : > { %10462 = vrot.lane.b32.xlu0 %v10346_v2, %s16542_s3  ;;  %10457 = vrot.lane.b32.xlu1 %v10346_v2, %s15805_s27  ;;  %s10716_s6 = scalar_lea.vmem %s15169_s24, 256  ;;  %p10723_p8 = scmp.lt.s32.totalorder %s15169_s24, %s10721_s7 }
0x2155   : > { %p10717_p2 = scmp.ne.s32.totalorder %s15169_s24, %s10716_s6  ;;  %p10724_p11 = scmp.lt.s32.totalorder %s10722_s19, %s10716_s6 }
0x2157   : > { %p10718_p4 = pnand %p10717_p2, %p16627_p3  ;;  %p10725_p13 = por %p10724_p11, %p10723_p8 }
0x2158   : > { %10472 = vrot.lane.b32.xlu0 %v10491_v25, %s16542_s3  ;;  %10467 = vrot.lane.b32.xlu1 %v10491_v25, %s15805_s27 }
0x2159   : > { %p10719_p7 = pneg %p10718_p4 }
0x215b   : > { %p10726_p1 = pnand %p10725_p13, %p10719_p7 }
0x215c   : > { %10482 = vrot.lane.b32.xlu0 %v10346_v2, %s16543_s21  ;;  %10477 = vrot.lane.b32.xlu1 %v10346_v2, %s16544_s23 }
0x2160   : > { %10492 = vrot.lane.b32.xlu0 %v10491_v25, %s16543_s21  ;;  %10487 = vrot.lane.b32.xlu1 %v10491_v25, %s16544_s23 }
0x2164   : > { %10497 = vrot.lane.b32.xlu1 %v10346_v2, %s16545_s20 }
0x2168   : > { %10502 = vrot.lane.b32.xlu1 %v10491_v25, %s16545_s20 }
0x2192   : > { %v10348_v37 = vpop.permute.xlu1 %10347  ;;  %v10353_v44 = vpop.permute.xlu0 %10352 }
0x2193   : > { %v10350_v10 = vunpack.i.h.bf16 %v10348_v37  ;;  %v10349_v50 = vunpack.i.l.bf16 %v10348_v37  ;;  %v10355_v45 = vunpack.i.h.bf16 %v10353_v44  ;;  %v10354_v31 = vunpack.i.l.bf16 %v10353_v44 }
0x2195   : > { %v6457_v18 = vsel %vm16548_vm5, %v10355_v45, %v10349_v50  ;;  %v6459_v14 = vsel %vm16549_vm0, %v10350_v10, %v10354_v31  ;;  %v7624_v20 = vpack.c.bf16 %v10354_v31, %v14961_v1  ;;  %v6458_v12 = vsel %vm16550_vm1, %v10349_v50, %v10350_v10 }
0x2196   : > { %v7577_v40 = vpack.c.bf16 %v6457_v18, %v14963_v19  ;;  %v7627_v28 = vpack.c.bf16 %v6459_v14, %v14974_v36  ;;  %v10358_v9 = vpop.permute.xlu1 %10357  ;;  %v10363_v5 = vpop.permute.xlu0 %10362  ;;  %v7575_v46 = vpack.c.bf16 %v6458_v12, %v14971_v4  ;;  %v10506_v57 = vpack.i.bf16 %v6459_v14, %v6458_v12 }
0x2197   : > { %v10360_v30 = vunpack.i.h.bf16 %v10358_v9  ;;  %v10359_v13 = vunpack.i.l.bf16 %v10358_v9  ;;  %v10365_v41 = vunpack.i.h.bf16 %v10363_v5  ;;  %v10364_v17 = vunpack.i.l.bf16 %v10363_v5  ;;  %7626 = vmatprep.subr.msk.bf16.mxu1 %vm7625_vm10, %v7624_v20  ;;  %vm16562_vm10 = vmmov %vm16557_vm6 }
0x2198   : > { %7576 = vmatprep.subr.bf16.mxu0 %v7575_v46  ;;  %7628 = vmatpush1.bf16.msra.mxu1 %v7627_v28  ;;  %v10511_v38 = vpack.i.bf16 %v10354_v31, %v6457_v18  ;;  %vm16563_vm5 = vcmask 875520   ;;  %vm16565_vm1 = vcmask 867328  }
0x2199   : > { %v6473_v62 = vsel %vm16551_vm15, %v10359_v13, %v10360_v30  ;;  %v6474_v6 = vsel %vm16552_vm3, %v10360_v30, %v10364_v17  ;;  %7579 = vmatpush1.bf16.msk.msra.mxu0 %vm7578_vm7, %v7577_v40  ;;  %v6472_v43 = vsel %vm16553_vm12, %v10365_v41, %v10359_v13  ;;  %10507 = vrot.lane.b32.xlu0 %v10506_v57, %s16545_s20  ;;  %vm16564_vm0 = vmmov %vm16563_vm5  ;;  %vm16569_vm12 = vcmask 588800  }
0x219a   : > { %v10516_v8 = vpack.i.bf16 %v6474_v6, %v6473_v62  ;;  %v10368_v33 = vpop.permute.xlu1 %10367  ;;  %v10373_v53 = vpop.permute.xlu0 %10372  ;;  %v10526_v63 = vpack.i.bf16 %v10364_v17, %v6472_v43  ;;  %vm16566_vm7 = vmmov %vm16565_vm1 }
0x219b   : > { %v10370_v58 = vunpack.i.h.bf16 %v10368_v33  ;;  %v10369_v55 = vunpack.i.l.bf16 %v10368_v33  ;;  %v10375_v3 = vunpack.i.h.bf16 %v10373_v53  ;;  %v10374_v52 = vunpack.i.l.bf16 %v10373_v53  ;;  %vm16567_vm15 = vmmov %vm16564_vm0  ;;  %v6821_v33 = vld [vmem:[#allocation10 + $0x8] sm:$0xff] }
0x219c   : > { %10517 = vrot.lane.b32.xlu1 %v10516_v8, %s16545_s20  ;;  %vm16568_vm3 = vmmov %vm16565_vm1  ;;  %7149 = vmatprep.mubr.msk.f32.mxu0 %vm16569_vm12, %v6821_v33 }
0x219d   : > { %v6487_v59 = vsel %vm16554_vm11, %v10375_v3, %v10369_v55  ;;  %v6489_v16 = vsel %vm16555_vm4, %v10370_v58, %v10374_v52  ;;  %v7629_v11 = vpack.c.bf16 %v10374_v52, %v10364_v17  ;;  %v6488_v51 = vsel %vm16556_vm2, %v10369_v55, %v10370_v58  ;;  %10512 = vrot.lane.b32.xlu0 %v10511_v38, %s16545_s20  ;;  %vm16570_vm11 = vmmov %vm16569_vm12 }
0x219e   : > { %v7582_v24 = vpack.c.bf16 %v6487_v59, %v6472_v43  ;;  %v7631_v21 = vpack.c.bf16 %v6489_v16, %v6474_v6  ;;  %v10378_v15 = vpop.permute.xlu1 %10377  ;;  %v10383_v35 = vpop.permute.xlu0 %10382  ;;  %v7580_v54 = vpack.c.bf16 %v6488_v51, %v6473_v62  ;;  %v10521_v29 = vpack.i.bf16 %v6489_v16, %v6488_v51  ;;  %7151 = vmatprep.mubr.msk.f32.mxu1 %vm16570_vm11, %v6821_v33 }
0x219f   : > { %7630 = vmatprep.subr.bf16.mxu1 %v7629_v11  ;;  %v10380_v0 = vunpack.i.h.bf16 %v10378_v15  ;;  %v10379_v56 = vunpack.i.l.bf16 %v10378_v15  ;;  %v15035_v27 = vunpack.i.l.bf16 %v10383_v35  ;;  %v10531_v42 = vpack.i.bf16 %v10374_v52, %v6487_v59 }
0x21a0   : > { %10527 = vrot.lane.b32.xlu1 %v10526_v63, %s16545_s20  ;;  %7581 = vmatprep.subr.bf16.mxu0 %v7580_v54  ;;  %v10385_v7 = vunpack.i.h.bf16 %v10383_v35  ;;  %vm16571_vm4 = vcmask 859136   ;;  %vm16586_vm11 = vcmask 703488  }
0x21a1   : > { %7632 = vmatpush1.bf16.msra.mxu1 %v7631_v21  ;;  %7583 = vmatpush1.bf16.msra.mxu0 %v7582_v24  ;;  %v15039_v60 = vsel %vm16557_vm6, %v10379_v56, %v10380_v0  ;;  %v15043_v1 = vsel %vm16558_vm8, %v10380_v0, %v15035_v27  ;;  %vm16572_vm2 = vmmov %vm16571_vm4  ;;  %vm16573_vm6 = vcmask 1014784  }
0x21a2   : > { %10522 = vrot.lane.b32.xlu0 %v10521_v29, %s16545_s20  ;;  %v10388_v48 = vpop.permute.xlu1 %10387  ;;  %v10393_v23 = vpop.permute.xlu0 %10392  ;;  %v10541_v37 = vpack.i.bf16 %v15043_v1, %v15039_v60  ;;  %v15055_v44 = vsel %vm16562_vm10, %v10385_v7, %v10379_v56  ;;  %vm16574_vm8 = vmmov %vm16573_vm6 }
0x21a3   : > { %v10390_v49 = vunpack.i.h.bf16 %v10388_v48  ;;  %v10389_v34 = vunpack.i.l.bf16 %v10388_v48  ;;  %v10395_v39 = vunpack.i.h.bf16 %v10393_v23  ;;  %v10394_v61 = vunpack.i.l.bf16 %v10393_v23 }
0x21a4   : > { %v10551_v28 = vpack.i.bf16 %v15035_v27, %v15055_v44 }
0x21a5   : > { %v6683_v19 = vsel %vm16559_vm13, %v10389_v34, %v10390_v49  ;;  %v6684_v26 = vsel %vm16560_vm14, %v10390_v49, %v10394_v61  ;;  %v6682_v36 = vsel %vm16561_vm9, %v10395_v39, %v10389_v34  ;;  %vm16575_vm13 = vmmov %vm16573_vm6  ;;  %vm16577_vm9 = vcmask 850944  }
0x21a6   : > { %v10536_v32 = vpack.i.bf16 %v6684_v26, %v6683_v19  ;;  %10532 = vrot.lane.b32.xlu0 %v10531_v42, %s16545_s20  ;;  %v10398_v47 = vpop.permute.xlu1 %10397  ;;  %v10403_v4 = vpop.permute.xlu0 %10402  ;;  %v10546_v10 = vpack.i.bf16 %v10394_v61, %v6682_v36  ;;  %vm16576_vm14 = vmmov %vm16572_vm2  ;;  %v6822_v42 = vld [vmem:[%s15222_s13] sm:$0xff] }
0x21a7   : > { %v10400_v22 = vunpack.i.h.bf16 %v10398_v47  ;;  %v10399_v2 = vunpack.i.l.bf16 %v10398_v47  ;;  %v15049_v25 = vunpack.i.l.bf16 %v10403_v4  ;;  %v10405_v45 = vunpack.i.h.bf16 %v10403_v4  ;;  %vm16578_vm10 = vmmov %vm16577_vm9 }
0x21a8   : > { %10537 = vrot.lane.b32.xlu1 %v10536_v32, %s16545_s20 }
0x21a9   : > { %v15058_v50 = vsel %vm16563_vm5, %v10399_v2, %v10400_v22  ;;  %v15063_v14 = vsel %vm16564_vm0, %v10400_v22, %v15049_v25  ;;  %v15080_v57 = vsel %vm16567_vm15, %v10405_v45, %v10399_v2  ;;  %vm16579_vm5 = vmmov %vm16577_vm9  ;;  %vm16580_vm0 = vcmask 719872  }
0x21aa   : > { %10542 = vrot.lane.b32.xlu0 %v10541_v37, %s16545_s20  ;;  %v10408_v31 = vpop.permute.xlu1 %10407  ;;  %v10413_v18 = vpop.permute.xlu0 %10412  ;;  %v10556_v30 = vpack.i.bf16 %v15063_v14, %v15058_v50  ;;  %v10566_v6 = vpack.i.bf16 %v15049_v25, %v15080_v57  ;;  %vm16583_vm15 = vmmov %vm16580_vm0 }
0x21ab   : > { %v10410_v20 = vunpack.i.h.bf16 %v10408_v31  ;;  %v10409_v12 = vunpack.i.l.bf16 %v10408_v31  ;;  %v10414_v40 = vunpack.i.l.bf16 %v10413_v18  ;;  %v10415_v5 = vunpack.i.h.bf16 %v10413_v18 }
0x21ac   : > { %10547 = vrot.lane.b32.xlu1 %v10546_v10, %s16545_s20 }
0x21ad   : > { %v15069_v9 = vsel %vm16565_vm1, %v10409_v12, %v10410_v20  ;;  %v15072_v46 = vsel %vm16566_vm7, %v10410_v20, %v10414_v40  ;;  %v6547_v62 = vsel %vm16568_vm3, %v10415_v5, %v10409_v12  ;;  %vm16581_vm1 = vcmask 711680   ;;  %vm16582_vm7 = vmmov %vm16580_vm0 }
0x21ae   : > { %v10561_v13 = vpack.i.bf16 %v15072_v46, %v15069_v9  ;;  %10552 = vrot.lane.b32.xlu0 %v10551_v28, %s16545_s20  ;;  %v6557_v41 = vpop.permute.xlu1 %6556  ;;  %v6559_v17 = vpop.permute.xlu0 %6558  ;;  %v10571_v53 = vpack.i.bf16 %v10414_v40, %v6547_v62  ;;  %v7590_v34 = vpack.c.bf16 %v6547_v62, %v15080_v57  ;;  %v7588_v61 = vpack.c.bf16 %v15069_v9, %v15058_v50  ;;  %vm16584_vm3 = vmmov %vm16581_vm1 }
0x21af   : > { %v6563_v58 = vsel %vm16571_vm4, %v6557_v41, %v6559_v17  ;;  %v7639_v7 = vpack.c.bf16 %v15072_v46, %v15063_v14  ;;  %vm16585_vm12 = vmmov %vm16581_vm1  ;;  %vm16587_vm4 = vcmask 695296  }
0x21b0   : > { %10557 = vrot.lane.b32.xlu1 %v10556_v30, %s16545_s20 }
0x21b2   : > { %10562 = vrot.lane.b32.xlu0 %v10561_v13, %s16545_s20  ;;  %v6561_v43 = vpop.permute.xlu1 %6560  ;;  %v6555_v8 = vpop.permute.xlu0 %6554 }
0x21b3   : > { %v6564_v11 = vsel %vm16572_vm2, %v6559_v17, %v6561_v43  ;;  %v6562_v56 = vsel %vm16576_vm14, %v6555_v8, %v6557_v41  ;;  %vm16588_vm2 = vmmov %vm16586_vm11  ;;  %vm16592_vm14 = vcmask 687104  }
0x21b4   : > { %10567 = vrot.lane.b32.xlu1 %v10566_v6, %s16545_s20 }
0x21b6   : > { %10572 = vrot.lane.b32.xlu0 %v10571_v53, %s16545_s20  ;;  %v10418_v55 = vpop.permute.xlu1 %10417  ;;  %v10423_v3 = vpop.permute.xlu0 %10422 }
0x21b7   : > { %v10420_v52 = vunpack.i.h.bf16 %v10418_v55  ;;  %v10419_v38 = vunpack.i.l.bf16 %v10418_v55  ;;  %v10425_v59 = vunpack.i.h.bf16 %v10423_v3  ;;  %v10424_v16 = vunpack.i.l.bf16 %v10423_v3 }
0x21b8   : > { %6751 = vrot.lane.b32.xlu1 %v6563_v58, %s16545_s20 }
0x21b9   : > { %v6504_v51 = vsel %vm16573_vm6, %v10420_v52, %v10425_v59  ;;  %v6502_v63 = vsel %vm16574_vm8, %v10424_v16, %v10419_v38  ;;  %v7633_v24 = vpack.c.bf16 %v15035_v27, %v10425_v59  ;;  %v6503_v21 = vsel %vm16575_vm13, %v10419_v38, %v10420_v52  ;;  %vm16589_vm6 = vmmov %vm16588_vm2 }
0x21ba   : > { %v7586_v15 = vpack.c.bf16 %v15055_v44, %v6502_v63  ;;  %v7635_v35 = vpack.c.bf16 %v15043_v1, %v6504_v51  ;;  %6753 = vrot.lane.b32.xlu0 %v6564_v11, %s16545_s20  ;;  %v10428_v54 = vpop.permute.xlu1 %10427  ;;  %v10433_v29 = vpop.permute.xlu0 %10432  ;;  %v7584_v0 = vpack.c.bf16 %v15039_v60, %v6503_v21  ;;  %v7637_v27 = vpack.c.bf16 %v10414_v40, %v15049_v25  ;;  %vm16590_vm8 = vmmov %vm16587_vm4 }
0x21bb   : > { %v10430_v48 = vunpack.i.h.bf16 %v10428_v54  ;;  %v10429_v23 = vunpack.i.l.bf16 %v10428_v54  ;;  %v10435_v49 = vunpack.i.h.bf16 %v10433_v29  ;;  %7634 = vmatprep.subr.bf16.mxu1 %v7633_v24  ;;  %v10434_v39 = vunpack.i.l.bf16 %v10433_v29  ;;  %vm16591_vm13 = vmmov %vm16587_vm4 }
0x21bc   : > { %6749 = vrot.lane.b32.xlu1 %v6562_v56, %s16545_s20  ;;  %7585 = vmatprep.subr.bf16.mxu0 %v7584_v0 }
0x21bd   : > { %7636 = vmatpush1.bf16.msra.mxu1 %v7635_v35  ;;  %7587 = vmatpush1.bf16.msra.mxu0 %v7586_v15  ;;  %v6579_v60 = vsel %vm16577_vm9, %v10430_v48, %v10435_v49  ;;  %v6578_v26 = vsel %vm16578_vm10, %v10429_v23, %v10430_v48  ;;  %v7641_v22 = vpack.c.bf16 %v10435_v49, %v6561_v43  ;;  %vm16593_vm9 = vcmask 556032   ;;  %vm16594_vm10 = vmmov %vm16592_vm14 }
0x21be   : > { %6755 = vrot.lane.b32.xlu0 %v6561_v43, %s16545_s20  ;;  %7638 = vmatprep.subr.bf16.mxu1 %v7637_v27  ;;  %v10438_v1 = vpop.permute.xlu1 %10437  ;;  %v10443_v19 = vpop.permute.xlu0 %10442  ;;  %v7592_v2 = vpack.c.bf16 %v6578_v26, %v6563_v58  ;;  %v6577_v25 = vsel %vm16579_vm5, %v10434_v39, %v10429_v23  ;;  %v7643_v10 = vpack.c.bf16 %v6579_v60, %v6564_v11  ;;  %vm16595_vm5 = vmmov %vm16594_vm10 }
0x21bf   : > { %v10440_v32 = vunpack.i.h.bf16 %v10438_v1  ;;  %v10439_v47 = vunpack.i.l.bf16 %v10438_v1  ;;  %v10445_v4 = vunpack.i.h.bf16 %v10443_v19  ;;  %v10444_v36 = vunpack.i.l.bf16 %v10443_v19  ;;  %7589 = vmatprep.subr.bf16.mxu0 %v7588_v61 }
0x21c0   : > { %6825 = vperm.xlu1 %8185, %v6822_v42   ;;  %v7594_v12 = vpack.c.bf16 %v6577_v25, %v6562_v56 }
0x21c1   : > { %7640 = vmatpush1.bf16.msra.mxu1 %v7639_v7  ;;  %7591 = vmatpush1.bf16.msra.mxu0 %v7590_v34  ;;  %v6593_v37 = vsel %vm16580_vm0, %v10439_v47, %v10440_v32  ;;  %v6608_v44 = vsel %vm16581_vm1, %v10444_v36, %v10445_v4  ;;  %vm16596_vm0 = vmmov %vm16593_vm9 }
0x21c2   : > { %7642 = vmatprep.subr.bf16.mxu1 %v7641_v22  ;;  %v10448_v50 = vpop.permute.xlu1 %10447  ;;  %v10453_v45 = vpop.permute.xlu0 %10452  ;;  %7593 = vmatprep.subr.bf16.mxu0 %v7592_v2  ;;  %v7596_v40 = vpack.c.bf16 %v6608_v44, %v6593_v37  ;;  %vm16597_vm1 = vmmov %vm16596_vm0 }
0x21c3   : > { %v10450_v31 = vunpack.i.h.bf16 %v10448_v50  ;;  %v10449_v18 = vunpack.i.l.bf16 %v10448_v50  ;;  %v10455_v14 = vunpack.i.h.bf16 %v10453_v45  ;;  %v10454_v20 = vunpack.i.l.bf16 %v10453_v45 }
0x21c5   : > { %v6592_v28 = vsel %vm16582_vm7, %v10449_v18, %v10439_v47  ;;  %v6594_v9 = vsel %vm16583_vm15, %v10440_v32, %v10450_v31  ;;  %v7645_v5 = vpack.c.bf16 %v10455_v14, %v10450_v31  ;;  %v6607_v46 = vsel %vm16584_vm3, %v10454_v20, %v10444_v36  ;;  %7644 = vmatpush1.bf16.msra.mxu1 %v7643_v10 }
0x21c6   : > { %v6609_v30 = vsel %vm16585_vm12, %v10445_v4, %v10455_v14  ;;  %v7598_v13 = vpack.c.bf16 %v6607_v46, %v6592_v28  ;;  %7595 = vmatpush1.bf16.msra.mxu0 %v7594_v12  ;;  %v10458_v41 = vpop.permute.xlu1 %10457  ;;  %v10463_v17 = vpop.permute.xlu0 %10462  ;;  %vm16598_vm7 = vcmask 547840  }
0x21c7   : > { %v7647_v57 = vpack.c.bf16 %v6609_v30, %v6594_v9  ;;  %v10460_v62 = vunpack.i.h.bf16 %v10458_v41  ;;  %v10459_v6 = vunpack.i.l.bf16 %v10458_v41  ;;  %v10465_v43 = vunpack.i.h.bf16 %v10463_v17  ;;  %7597 = vmatprep.subr.bf16.mxu0 %v7596_v40  ;;  %7646 = vmatprep.subr.bf16.mxu1 %v7645_v5  ;;  %vm16599_vm15 = vmmov %vm16598_vm7 }
0x21c8   : > { %v10464_v8 = vunpack.i.l.bf16 %v10463_v17  ;;  %vm16600_vm3 = vmmov %vm16598_vm7 }
0x21c9   : > { %7648 = vmatpush1.bf16.msra.mxu1 %v7647_v57  ;;  %v6623_v33 = vsel %vm16586_vm11, %v10459_v6, %v10460_v62  ;;  %vm16601_vm12 = vmmov %vm16600_vm3 }
0x21ca   : > { %7599 = vmatpush1.bf16.msra.mxu0 %v7598_v13  ;;  %v10468_v53 = vpop.permute.xlu1 %10467  ;;  %v10473_v58 = vpop.permute.xlu0 %10472  ;;  %v6638_v55 = vsel %vm16587_vm4, %v10464_v8, %v10465_v43  ;;  %vm16602_vm11 = vmmov %vm16600_vm3 }
0x21cb   : > { %v10470_v3 = vunpack.i.h.bf16 %v10468_v53  ;;  %v10469_v52 = vunpack.i.l.bf16 %v10468_v53  ;;  %v10475_v38 = vunpack.i.h.bf16 %v10473_v58  ;;  %v10474_v59 = vunpack.i.l.bf16 %v10473_v58  ;;  %vm16603_vm4 = vmmov %vm16600_vm3 }
0x21cc   : > { %v7600_v16 = vpack.c.bf16 %v6638_v55, %v6623_v33 }
0x21cd   : > { %v6622_v11 = vsel %vm16588_vm2, %v10469_v52, %v10459_v6  ;;  %v6624_v51 = vsel %vm16589_vm6, %v10460_v62, %v10470_v3  ;;  %v7649_v63 = vpack.c.bf16 %v10475_v38, %v10470_v3  ;;  %v6637_v24 = vsel %vm16590_vm8, %v10474_v59, %v10464_v8  ;;  %vm16604_vm2 = vmmov %vm16600_vm3 }
0x21ce   : > { %v6639_v21 = vsel %vm16591_vm13, %v10465_v43, %v10475_v38  ;;  %v7602_v15 = vpack.c.bf16 %v6637_v24, %v6622_v11  ;;  %7601 = vmatprep.subr.bf16.mxu0 %v7600_v16  ;;  %v10478_v35 = vpop.permute.xlu1 %10477  ;;  %v10483_v54 = vpop.permute.xlu0 %10482  ;;  %vm16605_vm6 = vmmov %vm16604_vm2 }
0x21cf   : > { %v7651_v29 = vpack.c.bf16 %v6639_v21, %v6624_v51  ;;  %v10480_v0 = vunpack.i.h.bf16 %v10478_v35  ;;  %v10479_v56 = vunpack.i.l.bf16 %v10478_v35  ;;  %v10485_v48 = vunpack.i.h.bf16 %v10483_v54  ;;  %7650 = vmatprep.subr.bf16.mxu1 %v7649_v63  ;;  %vm16606_vm8 = vmmov %vm16604_vm2 }
0x21d0   : > { %v10484_v23 = vunpack.i.l.bf16 %v10483_v54  ;;  %7603 = vmatpush1.bf16.msra.mxu0 %v7602_v15  ;;  %vm16607_vm13 = vmmov %vm16604_vm2 }
0x21d1   : > { %7652 = vmatpush1.bf16.msra.mxu1 %v7651_v29  ;;  %v6653_v49 = vsel %vm16592_vm14, %v10479_v56, %v10480_v0  ;;  %vm16608_vm14 = vmmov %vm16604_vm2 }
0x21d2   : > { %v10488_v27 = vpop.permute.xlu1 %10487  ;;  %v10493_v34 = vpop.permute.xlu0 %10492  ;;  %v6668_v39 = vsel %vm16593_vm9, %v10484_v23, %v10485_v48  ;;  %vm16609_vm9 = vmmov %vm16604_vm2 }
0x21d3   : > { %v10490_v61 = vunpack.i.h.bf16 %v10488_v27  ;;  %v10489_v42 = vunpack.i.l.bf16 %v10488_v27  ;;  %v10495_v7 = vunpack.i.h.bf16 %v10493_v34  ;;  %v10494_v60 = vunpack.i.l.bf16 %v10493_v34 }
0x21d4   : > { %v7604_v1 = vpack.c.bf16 %v6668_v39, %v6653_v49 }
0x21d5   : > { %v6652_v19 = vsel %vm16594_vm10, %v10489_v42, %v10479_v56  ;;  %v6654_v26 = vsel %vm16595_vm5, %v10480_v0, %v10490_v61  ;;  %v7653_v32 = vpack.c.bf16 %v10495_v7, %v10490_v61  ;;  %v6667_v47 = vsel %vm16596_vm0, %v10494_v60, %v10484_v23  ;;  %vm16610_vm10 = vmmov %vm16604_vm2 }
0x21d6   : > { %v6669_v4 = vsel %vm16597_vm1, %v10485_v48, %v10495_v7  ;;  %v7606_v36 = vpack.c.bf16 %v6667_v47, %v6652_v19  ;;  %7605 = vmatprep.subr.bf16.mxu0 %v7604_v1  ;;  %v10498_v2 = vpop.permute.xlu1 %10497  ;;  %vm16611_vm5 = vmmov %vm16604_vm2 }
0x21d7   : > { %v7655_v22 = vpack.c.bf16 %v6669_v4, %v6654_v26  ;;  %7654 = vmatprep.subr.bf16.mxu1 %v7653_v32  ;;  %v10500_v37 = vunpack.i.h.bf16 %v10498_v2  ;;  %v10499_v44 = vunpack.i.l.bf16 %v10498_v2  ;;  %vm16612_vm0 = vmmov %vm16604_vm2 }
0x21d8   : > { %7607 = vmatpush1.bf16.msra.mxu0 %v7606_v36  ;;  %vm16613_vm1 = vmmov %vm16612_vm0 }
0x21d9   : > { %7656 = vmatpush1.bf16.msra.mxu1 %v7655_v22  ;;  %v6758_v20 = vsel %vm16598_vm7, %v10499_v44, %v10500_v37  ;;  %vm16614_vm7 = vmmov %vm16612_vm0 }
0x21da   : > { %v10503_v25 = vpop.permute.xlu1 %10502 }
0x21db   : > { %v10505_v31 = vunpack.i.h.bf16 %v10503_v25  ;;  %v10504_v18 = vunpack.i.l.bf16 %v10503_v25 }
0x21dd   : > { %v6757_v46 = vsel %vm16600_vm3, %v10504_v18, %v10499_v44  ;;  %v6759_v30 = vsel %vm16601_vm12, %v10500_v37, %v10505_v31  ;;  %vm16616_vm3 = vmmov %vm16612_vm0 }
0x21de   : > { %vm16617_vm12 = vmmov %vm16612_vm0 }
0x220b   : > { %v10508_v10 = vpop.permute.xlu0 %10507 }
0x220c   : > { %v10510_v50 = vunpack.i.h.bf16 %v10508_v10  ;;  %v10509_v45 = vunpack.i.l.bf16 %v10508_v10 }
0x220e   : > { %v10518_v14 = vpop.permute.xlu1 %10517  ;;  %v6761_v12 = vsel %vm16599_vm15, %v10509_v45, %v10510_v50  ;;  %vm16615_vm15 = vmmov %vm16612_vm0 }
0x220f   : > { %v10513_v40 = vpop.permute.xlu0 %10512  ;;  %v7608_v28 = vpack.c.bf16 %v6761_v12, %v6758_v20  ;;  %v10520_v13 = vunpack.i.h.bf16 %v10518_v14  ;;  %v10519_v41 = vunpack.i.l.bf16 %v10518_v14 }
0x2210   : > { %v10515_v9 = vunpack.i.h.bf16 %v10513_v40  ;;  %v10514_v5 = vunpack.i.l.bf16 %v10513_v40 }
0x2211   : > { %7609 = vmatprep.subr.bf16.mxu0 %v7608_v28  ;;  %v6764_v52 = vsel %vm16604_vm2, %v10519_v41, %v10520_v13  ;;  %vm16620_vm2 = vmmov %vm16612_vm0 }
0x2212   : > { %v6762_v17 = vsel %vm16602_vm11, %v10510_v50, %v10515_v9  ;;  %v7657_v57 = vpack.c.bf16 %v10515_v9, %v10505_v31  ;;  %v6760_v62 = vsel %vm16603_vm4, %v10514_v5, %v10509_v45  ;;  %v10528_v6 = vpop.permute.xlu1 %10527  ;;  %vm16618_vm11 = vmmov %vm16612_vm0 }
0x2213   : > { %v7659_v43 = vpack.c.bf16 %v6762_v17, %v6759_v30  ;;  %v7610_v8 = vpack.c.bf16 %v6760_v62, %v6757_v46  ;;  %v10530_v55 = vunpack.i.h.bf16 %v10528_v6  ;;  %v10529_v3 = vunpack.i.l.bf16 %v10528_v6  ;;  %vm16619_vm4 = vmmov %vm16612_vm0 }
0x2214   : > { %v10523_v33 = vpop.permute.xlu0 %10522  ;;  %7658 = vmatprep.subr.bf16.mxu1 %v7657_v57 }
0x2215   : > { %v10525_v53 = vunpack.i.h.bf16 %v10523_v33  ;;  %v10524_v58 = vunpack.i.l.bf16 %v10523_v33  ;;  %7611 = vmatpush1.bf16.msra.mxu0 %v7610_v8  ;;  %7660 = vmatpush1.bf16.msra.mxu1 %v7659_v43  ;;  %v6765_v63 = vsel %vm16606_vm8, %v10520_v13, %v10530_v55  ;;  %v6763_v24 = vsel %vm16607_vm13, %v10529_v3, %v10519_v41  ;;  %vm16622_vm8 = vmmov %vm16612_vm0  ;;  %v6820_v3 = vld [vmem:[#allocation10] sm:$0xff] }
0x2216   : > { %vm16623_vm13 = vmmov %vm16612_vm0 }
0x2217   : > { %v6767_v38 = vsel %vm16605_vm6, %v10524_v58, %v10525_v53  ;;  %vm16621_vm6 = vmmov %vm16612_vm0 }
0x2218   : > { %v10533_v59 = vpop.permute.xlu0 %10532  ;;  %v7612_v16 = vpack.c.bf16 %v6767_v38, %v6764_v52 }
0x2219   : > { %v10535_v11 = vunpack.i.h.bf16 %v10533_v59  ;;  %v10534_v51 = vunpack.i.l.bf16 %v10533_v59 }
0x221a   : > { %7613 = vmatprep.subr.bf16.mxu0 %v7612_v16  ;;  %v10538_v21 = vpop.permute.xlu1 %10537 }
0x221b   : > { %v7661_v15 = vpack.c.bf16 %v10535_v11, %v10530_v55  ;;  %v6766_v35 = vsel %vm16608_vm14, %v10534_v51, %v10524_v58  ;;  %v6768_v54 = vsel %vm16609_vm9, %v10525_v53, %v10535_v11  ;;  %v10540_v29 = vunpack.i.h.bf16 %v10538_v21  ;;  %vm16624_vm14 = vmmov %vm16612_vm0 }
0x221c   : > { %v7614_v0 = vpack.c.bf16 %v6766_v35, %v6763_v24  ;;  %v7663_v56 = vpack.c.bf16 %v6768_v54, %v6765_v63  ;;  %v10539_v48 = vunpack.i.l.bf16 %v10538_v21  ;;  %v10543_v23 = vpop.permute.xlu0 %10542  ;;  %vm6982_vm9 = vcmask 1043456  }
0x221d   : > { %v10545_v49 = vunpack.i.h.bf16 %v10543_v23  ;;  %v10544_v27 = vunpack.i.l.bf16 %v10543_v23  ;;  %7662 = vmatprep.subr.bf16.mxu1 %v7661_v15 }
0x221e   : > { %7615 = vmatpush1.bf16.msra.mxu0 %v7614_v0  ;;  %7664 = vmatpush1.bf16.msra.mxu1 %v7663_v56  ;;  %v10548_v34 = vpop.permute.xlu1 %10547  ;;  %v6770_v39 = vsel %vm16610_vm10, %v10539_v48, %v10540_v29  ;;  %vm6983_vm10 = vcmask 130052  }
0x221f   : > { %v10550_v61 = vunpack.i.h.bf16 %v10548_v34  ;;  %v10549_v42 = vunpack.i.l.bf16 %v10548_v34  ;;  %v6773_v7 = vsel %vm16611_vm5, %v10544_v27, %v10545_v49  ;;  %vm6984_vm5 = vmor %vm6983_vm10, %vm6982_vm9 }
0x2220   : > { %v10553_v60 = vpop.permute.xlu0 %10552  ;;  %v7616_v1 = vpack.c.bf16 %v6773_v7, %v6770_v39 }
0x2221   : > { %v6769_v19 = vsel %vm16612_vm0, %v10549_v42, %v10539_v48  ;;  %v6771_v26 = vsel %vm16613_vm1, %v10540_v29, %v10550_v61  ;;  %v10555_v32 = vunpack.i.h.bf16 %v10553_v60  ;;  %v10554_v47 = vunpack.i.l.bf16 %v10553_v60 }
0x2222   : > { %7617 = vmatprep.subr.bf16.mxu0 %v7616_v1  ;;  %v10558_v4 = vpop.permute.xlu1 %10557 }
0x2223   : > { %v7665_v36 = vpack.c.bf16 %v10555_v32, %v10550_v61  ;;  %v6772_v22 = vsel %vm16614_vm7, %v10554_v47, %v10544_v27  ;;  %v6774_v2 = vsel %vm16615_vm15, %v10545_v49, %v10555_v32  ;;  %v10560_v25 = vunpack.i.h.bf16 %v10558_v4 }
0x2224   : > { %v7618_v37 = vpack.c.bf16 %v6772_v22, %v6769_v19  ;;  %v7667_v44 = vpack.c.bf16 %v6774_v2, %v6771_v26  ;;  %v10559_v10 = vunpack.i.l.bf16 %v10558_v4  ;;  %v10563_v50 = vpop.permute.xlu0 %10562 }
0x2225   : > { %v10565_v45 = vunpack.i.h.bf16 %v10563_v50  ;;  %v10564_v31 = vunpack.i.l.bf16 %v10563_v50  ;;  %7666 = vmatprep.subr.bf16.mxu1 %v7665_v36 }
0x2226   : > { %7619 = vmatpush1.bf16.msra.mxu0 %v7618_v37  ;;  %7668 = vmatpush1.bf16.msra.mxu1 %v7667_v44  ;;  %v10568_v18 = vpop.permute.xlu1 %10567  ;;  %v6776_v14 = vsel %vm16616_vm3, %v10559_v10, %v10560_v25 }
0x2227   : > { %v10570_v20 = vunpack.i.h.bf16 %v10568_v18  ;;  %v10569_v12 = vunpack.i.l.bf16 %v10568_v18  ;;  %v6779_v40 = vsel %vm16617_vm12, %v10564_v31, %v10565_v45 }
0x2228   : > { %v10573_v28 = vpop.permute.xlu0 %10572  ;;  %v7620_v9 = vpack.c.bf16 %v6779_v40, %v6776_v14 }
0x2229   : > { %v6775_v5 = vsel %vm16618_vm11, %v10569_v12, %v10559_v10  ;;  %v6777_v46 = vsel %vm16619_vm4, %v10560_v25, %v10570_v20  ;;  %v10575_v30 = vunpack.i.h.bf16 %v10573_v28  ;;  %v10574_v13 = vunpack.i.l.bf16 %v10573_v28 }
0x222a   : > { %7621 = vmatprep.subr.bf16.mxu0 %v7620_v9  ;;  %v6752_v41 = vpop.permute.xlu1 %6751 }
0x222b   : > { %v7669_v17 = vpack.c.bf16 %v10575_v30, %v10570_v20  ;;  %v6778_v57 = vsel %vm16620_vm2, %v10574_v13, %v10564_v31  ;;  %v6780_v62 = vsel %vm16621_vm6, %v10565_v45, %v10575_v30 }
0x222c   : > { %v7622_v6 = vpack.c.bf16 %v6778_v57, %v6775_v5  ;;  %v7671_v43 = vpack.c.bf16 %v6780_v62, %v6777_v46  ;;  %v6754_v8 = vpop.permute.xlu0 %6753 }
0x222d   : > { %7670 = vmatprep.subr.bf16.mxu1 %v7669_v17  ;;  %v6782_v33 = vsel %vm16622_vm8, %v6752_v41, %v6754_v8 }
0x222e   : > { %7623 = vmatpush1.bf16.msra.mxu0 %v7622_v6  ;;  %7672 = vmatpush1.bf16.msra.mxu1 %v7671_v43  ;;  %v6750_v53 = vpop.permute.xlu1 %6749 }
0x222f   : > { %6879 = vmatprep.subr.mxu0 %v6782_v33  ;;  %v6781_v58 = vsel %vm16623_vm13, %v6750_v53, %v6752_v41 }
0x2230   : > { %v6756_v55 = vpop.permute.xlu0 %6755 }
0x2231   : > { %v6783_v52 = vsel %vm16624_vm14, %v6754_v8, %v6756_v55  ;;  %6950 = vmatprep.subr.mxu1 %v6756_v55 }
0x2232   : > { %6880 = vmatpush1.msra.mxu0 %v6781_v58  ;;  %6951 = vmatpush1.msra.mxu1 %v6783_v52 }
0x2233   : > { %6896 = vmatmul.mubr.f32.vlgmr.msra.gmra.mrb[20].mxu0 %v6820_v3  ;;  %6967 = vmatmul.mubr.f32.vlgmr.msra.gmra.mrb[20].mxu1 %v6820_v3 }
0x223f   : > { %v6826_v38 = vpop.permute.xlu1 %6825 }
0x2306   : > { %v6897_v59 = vpop.f32.mrb[20].mxu0  ;;  %v6968_v16 = vpop.f32.mrb[20].mxu1 }
0x2307   : > { %v6898_v11 = vadd.f32 %v6897_v59, %v6826_v38  ;;  %v6969_v51 = vadd.f32 %v6968_v16, %v6826_v38  ;;  %v6899_v63 = vpop.f32.mrb[21].mxu0  ;;  %v6970_v24 = vpop.f32.mrb[21].mxu1 }
0x2308   : > { %v6900_v21 = vadd.f32 %v6899_v63, %v6826_v38  ;;  %v6971_v15 = vadd.f32 %v6970_v24, %v6826_v38 }
0x230a   : > { %v6977_v35 = vcombine.low %v6898_v11, %v6900_v21  ;;  %v6978_v54 = vcombine.low %v6969_v51, %v6971_v15 }
0x230c   : > { %6981 = vst [vmem:[%s527_s1] sm:$0xff] %v6977_v35  ;;  %6985 = vst.msk [vmem:[%s527_s1 + $0x8] sm:$0xff] %vm6984_vm5, %v6978_v54 }
0x230d   : > { %10729 = shalt.err (!%p10726_p1)
}
0x230e   : > { %s10730_s2 = scalar_lea.hbm %s15167_s5, 256  ;;  %s10734_s3 = scalar_lea.hbm %s16626_s14, 512 }
0x230f   : > { %p10731_p0 = scmp.ne.s32.totalorder %s15167_s5, %s10730_s2  ;;  %p10735_p9 = scmp.lt.u32.totalorder %s15167_s5, %s16626_s14 }
0x2310   : > { %p10736_p12 = scmp.lt.u32.totalorder %s10734_s3, %s10730_s2  ;;  %p10738_p2 = scmp.lt.u32.totalorder %s10730_s2, %s15167_s5 }
0x2311   : > { %p10732_p6 = pnand %p10731_p0, %p16627_p3 }
0x2312   : > { %p10737_p10 = por %p10736_p12, %p10735_p9 }
0x2313   : > { %p10733_p5 = pneg %p10732_p6 }
0x2314   : > { %p10739_p4 = por %p10738_p2, %p10737_p10 }
0x2316   : > { %p10740_p7 = pnand %p10739_p4, %p10733_p5 }
0x2318   : > { %10743 = shalt.err (!%p10740_p7)
}
0x2319   : > { %7709 = dma.vmem_to_hbm [thread:$0]  (%p16627_p3), %s15169_s24, 256, %s15167_s5, %s6987_s17  }
0x231a PF: > { %s16628_s20 = sld [smem:[#allocation18_spill]]  ;;  %s16629_s26 = sld [smem:[#allocation16_spill]] }
0x231b   : > { %s16630_s27 = sld [smem:[#allocation22_spill]] }
0x2320   : > { %p7741_p8 = scmp.ge.s32.totalorder %s16628_s20, 2  ;;  %s7013_s28 = sand.u32 1, %s16629_s26  }
0x2321   : > { %p16631_p11 = scmp.ne.s32.totalorder %s16630_s27, 0  ;;  %s7014_s15 = scalar_lea.sflag [#allocation4], %s7013_s28 }
0x2323   : > { %p7728_p13 = pnand %p7741_p8, %p16631_p11 }
0x2325   : > { %10773 = dma.done.wait (!%p7728_p13), %s7014_s15, 256  }
0x2326   : > { %10775 = vsyncadd (!%p7728_p13), %s7014_s15, 4294967040  ;;  %s16632_s16 = sld [smem:[#allocation19_spill]]  ;;  %s16633_s18 = sld [smem:[#allocation17_spill]] }
0x2327   : > { %s16634_s15 = sld [smem:[#allocation20_spill]]  ;;  %s16635_s29 = smov %s10782_s30 }
0x232c   : > { %p27_p1 = scmp.ge.s32.totalorder %s16632_s16, 4   ;;  %s16636_s30 = smov %s16633_s18 }
0x232e   :  { %29 = sbr.rel (!%p27_p1) target bundleno = 16 (0x10), region = 132 }
0x2335   :  { %7019 = vsyncpa [#allocation3], 1 }
0x2336   :  { %7021 = vsyncpa [#allocation3 + $0x1], 1 }
0x2337   :  { %7022 = vsyncpa [#allocation6], 1 }
0x2338   :  { %7023 = vsyncpa [#allocation9], 1 }
0x2339   :  { %7024 = vsyncpa [#allocation4], 1 }
0x233a   :  { %7026 = vsyncpa [#allocation4 + $0x1], 1 }

</bundles_post_ra>
